<compile_context>
chip_gen: v7x
topology: tpu7x:2x2x1
jax: 0.10.0
libtpu: 0.0.40
codegen_flags: <defaults>
</compile_context>

<pallas_src>
import jax
import jax.numpy as jnp
from jax.experimental import pallas as pl
from jax.experimental.pallas import tpu as pltpu


# ------------------------------------------------------------------ tiling helpers
def _round_up(x, m):
    return ((x + m - 1) // m) * m


def _row_tile(M):
    """Largest tile (<=256, multiple of 8) dividing M; None if M needs padding."""
    for t in (256, 128, 64, 32, 16, 8):
        if M % t == 0:
            return t
    return None


def _choose_tiles(M, N, K):
    """(tm, tn, tk) for the conv GEMM.

    tn = 128 keeps stores lane-dense and matches the v5e MXU width; tk is the largest
    multiple-of-128 divisor of K <= 512 (Mosaic block constraint for a non-full last
    dim) so large weight matrices are streamed across several pipeline steps; tm is
    capped at 256 and halved if the call would otherwise have < 2 parallel grid steps
    (v7x dual-TensorCore utilisation).
    """
    tn = 128 if N % 128 == 0 else N
    tk = K
    for t in (512, 384, 256, 128):
        if K % t == 0:
            tk = t
            break
    tm = _row_tile(M)
    if tm is not None and (M // tm) * (N // tn) < 2 and tm >= 16:
        tm //= 2
    return tm, tn, tk


# ----------------------------------- fused conv-GEMM + bias (+residual) (+ReLU) kernels
def _make_gemm_kernel(nk, relu, has_res):
    """GEMM kernel with fused epilogue. BN scale is pre-folded into the weights, so the
    epilogue is acc + bias (+ residual), optional ReLU."""

    def epilogue(acc, c_ref, r_ref, o_ref):
        y = acc + c_ref[...]
        if has_res:
            y = y + r_ref[...].astype(jnp.float32)
        if relu:
            y = jnp.maximum(y, 0.0)
        o_ref[...] = y.astype(o_ref.dtype)

    if nk == 1:
        # Single K block: no accumulator scratch, output written exactly once.
        def kernel(a_ref, b_ref, c_ref, *rest):
            if has_res:
                r_ref, o_ref = rest
            else:
                r_ref = None
                (o_ref,) = rest
            acc = jnp.dot(a_ref[...], b_ref[...], preferred_element_type=jnp.float32)
            epilogue(acc, c_ref, r_ref, o_ref)

        return kernel

    # Multiple K blocks: f32 VMEM accumulator, init on first / flush on last K step.
    def kernel(a_ref, b_ref, c_ref, *rest):
        if has_res:
            r_ref, o_ref, acc_ref = rest
        else:
            r_ref = None
            o_ref, acc_ref = rest

        @pl.when(pl.program_id(2) == 0)
        def _():
            acc_ref[...] = jnp.zeros_like(acc_ref)

        acc_ref[...] += jnp.dot(
            a_ref[...], b_ref[...], preferred_element_type=jnp.float32
        )

        @pl.when(pl.program_id(2) == nk - 1)
        def _():
            epilogue(acc_ref[...], c_ref, r_ref, o_ref)

    return kernel


def matmul_bias_act(a, b, bias, residual=None, relu=True, out_dtype=jnp.bfloat16):
    """out = act((a @ b) + bias [+ residual]).

    a: (M, K) bf16 im2col patches, b: (K, Cout) bf16 weights with BN scale folded in,
    bias: (Cout,) f32 folded BN bias. Grid = (M tiles, N tiles, K tiles); the K axis is
    'arbitrary' with an f32 accumulator so weight blocks pipeline behind MXU work.
    """
    M, K = a.shape
    Kb, N = b.shape
    if K < Kb:  # stem: patches padded up to the 8-aligned weight contraction dim
        a = jnp.pad(a, ((0, 0), (0, Kb - K)))
        K = Kb
    assert K == Kb

    Mp = M
    tm, tn, tk = _choose_tiles(M, N, K)
    if tm is None:  # generic fallback (never hit for the ResNet shapes used here)
        Mp = _round_up(M, 8)
        a = jnp.pad(a, ((0, Mp - M), (0, 0)))
        if residual is not None:
            residual = jnp.pad(residual, ((0, Mp - M), (0, 0)))
        tm, tn, tk = _choose_tiles(Mp, N, K)

    nk = K // tk
    bias2 = bias.reshape(1, N).astype(jnp.float32)

    a_spec = pl.BlockSpec((tm, tk), lambda i, j, k: (i, k))
    b_spec = pl.BlockSpec((tk, tn), lambda i, j, k: (k, j))
    c_spec = pl.BlockSpec((1, tn), lambda i, j, k: (0, j))
    o_spec = pl.BlockSpec((tm, tn), lambda i, j, k: (i, j))

    has_res = residual is not None
    in_specs = [a_spec, b_spec, c_spec] + ([o_spec] if has_res else [])
    args = (a, b, bias2) + ((residual,) if has_res else ())
    scratch = [pltpu.VMEM((tm, tn), jnp.float32)] if nk > 1 else []

    out = pl.pallas_call(
        _make_gemm_kernel(nk=nk, relu=relu, has_res=has_res),
        out_shape=jax.ShapeDtypeStruct((Mp, N), out_dtype),
        grid_spec=pltpu.PrefetchScalarGridSpec(
            num_scalar_prefetch=0,
            grid=(Mp // tm, N // tn, nk),
            in_specs=in_specs,
            out_specs=o_spec,
            scratch_shapes=scratch,
        ),
        compiler_params=pltpu.CompilerParams(
            dimension_semantics=("parallel", "parallel", "arbitrary"),
            vmem_limit_bytes=32 * 1024 * 1024,
        ),
    )(*args)
    return out[:M] if Mp != M else out


# --------------------------------------------------------------------------- conv
def _im2col(x, kh, kw, stride, pad):
    """x: NHWC (bf16) -> (N*Ho*Wo, kh*kw*C) patches.

    TODO(synk): the patch gather is still done as XLA slices/stack (kh*kw-x HBM blow-up
    for 3x3/7x7); an in-kernel shifted-window gather of the A tile would remove it.
    """
    N, H, W, C = x.shape
    Ho = (H + 2 * pad - kh) // stride + 1
    Wo = (W + 2 * pad - kw) // stride + 1
    if pad:
        x = jnp.pad(x, ((0, 0), (pad, pad), (pad, pad), (0, 0)))
    if kh == 1 and kw == 1:
        a = x[:, : stride * Ho : stride, : stride * Wo : stride, :].reshape(
            N * Ho * Wo, C
        )
    else:
        cols = [
            x[:, dy : dy + stride * Ho : stride, dx : dx + stride * Wo : stride, :]
            for dy in range(kh)
            for dx in range(kw)
        ]
        a = jnp.stack(cols, axis=3).reshape(N * Ho * Wo, kh * kw * C)
    return a, (N, Ho, Wo)


def conv_bn(x, w_mat, kh, kw, stride, pad, bias, residual=None, relu=True):
    """Conv (im2col GEMM) with folded-BN scale/bias, optional residual add, ReLU."""
    a, (N, Ho, Wo) = _im2col(x, kh, kw, stride, pad)
    cout = w_mat.shape[1]
    out2d = matmul_bias_act(a, w_mat, bias, residual=residual, relu=relu)
    return out2d.reshape(N, Ho, Wo, cout)


# --------------------------------------------------------------------------- maxpool
def _max9_kernel(r0, r1, r2, r3, r4, r5, r6, r7, r8, o_ref):
    m = jnp.maximum(r0[...], r1[...])
    m = jnp.maximum(m, r2[...])
    m = jnp.maximum(m, r3[...])
    m = jnp.maximum(m, r4[...])
    m = jnp.maximum(m, r5[...])
    m = jnp.maximum(m, r6[...])
    m = jnp.maximum(m, r7[...])
    m = jnp.maximum(m, r8[...])
    o_ref[...] = m


def maxpool_3x3_s2(x):
    """3x3 max pool, stride 2, padding 1 (NHWC). Input is post-ReLU (>=0), so zero
    padding is equivalent to -inf padding.

    TODO(synk): the 9 shifted/strided views are still materialized in XLA; a single
    padded input with in-kernel strided gathers would remove ~9x the pooled traffic.
    """
    N, H, W, C = x.shape
    Ho, Wo = (H + 2 - 3) // 2 + 1, (W + 2 - 3) // 2 + 1
    xp = jnp.pad(x, ((0, 0), (1, 1), (1, 1), (0, 0)))
    M = N * Ho * Wo
    views = [
        xp[:, dy : dy + 2 * Ho : 2, dx : dx + 2 * Wo : 2, :].reshape(M, C)
        for dy in range(3)
        for dx in range(3)
    ]
    tm = _row_tile(M) or M
    spec = pl.BlockSpec((tm, C), lambda i: (i, 0))
    out = pl.pallas_call(
        _max9_kernel,
        out_shape=jax.ShapeDtypeStruct((M, C), x.dtype),
        grid_spec=pltpu.PrefetchScalarGridSpec(
            num_scalar_prefetch=0,
            grid=(M // tm,),
            in_specs=[spec] * 9,
            out_specs=spec,
        ),
        compiler_params=pltpu.CompilerParams(
            dimension_semantics=("parallel",),
            vmem_limit_bytes=32 * 1024 * 1024,
        ),
    )(*views)
    return out.reshape(N, Ho, Wo, C)


# --------------------------------------------------- fused global-avgpool + fc head
def _head_kernel(x_ref, w1_ref, b1_ref, w2_ref, b2_ref, o_ref):
    # AdaptiveAvgPool2d((1,1)) over the HW axis, then Linear -> ReLU -> Dropout(id) ->
    # Linear. Matmuls run in bf16 on the MXU with f32 accumulation.
    pooled = jnp.mean(x_ref[...].astype(jnp.float32), axis=1)
    h = (
        jnp.dot(
            pooled.astype(jnp.bfloat16), w1_ref[...], preferred_element_type=jnp.float32
        )
        + b1_ref[...]
    )
    h = jnp.maximum(h, 0.0)
    # TODO(synk): nn.Dropout(0.3) is treated as identity (eval-mode forward semantics).
    o_ref[...] = (
        jnp.dot(h.astype(jnp.bfloat16), w2_ref[...], preferred_element_type=jnp.float32)
        + b2_ref[...]
    )


def head(feats, fcp):
    N, HW, Cf = feats.shape
    nc = fcp["w2"].shape[1]
    return pl.pallas_call(
        _head_kernel,
        out_shape=jax.ShapeDtypeStruct((N, nc), jnp.float32),
        grid_spec=pltpu.PrefetchScalarGridSpec(
            num_scalar_prefetch=0,
            grid=(1,),
            in_specs=[
                pl.BlockSpec((N, HW, Cf), lambda i: (0, 0, 0)),
                pl.BlockSpec((Cf, 128), lambda i: (0, 0)),
                pl.BlockSpec((1, 128), lambda i: (0, 0)),
                pl.BlockSpec((128, nc), lambda i: (0, 0)),
                pl.BlockSpec((1, nc), lambda i: (0, 0)),
            ],
            out_specs=pl.BlockSpec((N, nc), lambda i: (0, 0)),
        ),
        compiler_params=pltpu.CompilerParams(
            dimension_semantics=("arbitrary",),
            vmem_limit_bytes=32 * 1024 * 1024,
        ),
    )(feats, fcp["w1"], fcp["b1"].reshape(1, 128), fcp["w2"], fcp["b2"].reshape(1, nc))


# ------------------------------------------------------------------------ parameters
def _conv_bn_params(w_key, bn_key, kh, kw, cin, cout, k_pad_to=None):
    """He-init conv weight with the folded BN scale baked in (bf16 GEMM matrix) plus the
    folded BN bias (f32)."""
    fan_in = kh * kw * cin
    w = jax.random.normal(w_key, (kh, kw, cin, cout), jnp.float32) * jnp.sqrt(
        2.0 / fan_in
    )
    k1, k2, k3, k4 = jax.random.split(bn_key, 4)
    gamma = 1.0 + 0.1 * jax.random.normal(k1, (cout,), jnp.float32)
    beta = 0.1 * jax.random.normal(k2, (cout,), jnp.float32)
    mean = 0.1 * jax.random.normal(k3, (cout,), jnp.float32)
    var = 1.0 + 0.1 * jnp.abs(jax.random.normal(k4, (cout,), jnp.float32))
    scale = gamma / jnp.sqrt(var + 1e-5)
    bias = beta - mean * scale
    w_mat = w.reshape(fan_in, cout) * scale[None, :]  # fold BN scale (f32) into weights
    if k_pad_to is not None and k_pad_to > fan_in:
        w_mat = jnp.pad(w_mat, ((0, k_pad_to - fan_in), (0, 0)))
    return w_mat.astype(jnp.bfloat16), bias


def _block_params(key, cin, cout, downsample):
    ks = jax.random.split(key, 6)
    p = {}
    p["conv1_w"], p["bn1_b"] = _conv_bn_params(ks[0], ks[1], 3, 3, cin, cout)
    p["conv2_w"], p["bn2_b"] = _conv_bn_params(ks[2], ks[3], 3, 3, cout, cout)
    if downsample:
        p["down_w"], p["down_b"] = _conv_bn_params(ks[4], ks[5], 1, 1, cin, cout)
    return p


def init_params(key, num_classes):
    # TODO(synk): torchvision pretrained weights / requires_grad freezing are training
    # plumbing, not forward compute; parameters are initialized deterministically here.
    ks = jax.random.split(key, 16)
    params = {}
    # Stem contraction dim (147) padded to a multiple of 8 at init (zeros).
    params["conv1_w"], params["bn1_b"] = _conv_bn_params(
        ks[0], ks[1], 7, 7, 3, 64, k_pad_to=_round_up(7 * 7 * 3, 8)
    )
    stages = [(64, 64, False), (64, 128, True), (128, 256, True), (256, 512, True)]
    i = 2
    for li, (cin, cout, down) in enumerate(stages, start=1):
        blk0 = _block_params(ks[i], cin, cout, down)
        i += 1
        blk1 = _block_params(ks[i], cout, cout, False)
        i += 1
        params[f"layer{li}"] = (blk0, blk1)
    kfc = jax.random.split(ks[i], 2)
    params["fc"] = {
        "w1": (
            jax.random.normal(kfc[0], (512, 128), jnp.float32) * jnp.sqrt(2.0 / 512)
        ).astype(jnp.bfloat16),
        "b1": jnp.zeros((128,), jnp.float32),
        "w2": (
            jax.random.normal(kfc[1], (128, num_classes), jnp.float32)
            * jnp.sqrt(1.0 / 128)
        ).astype(jnp.bfloat16),
        "b2": jnp.zeros((num_classes,), jnp.float32),
    }
    return params


# --------------------------------------------------------------------------- forward
def basic_block(x, p, stride):
    N, H, W, Cin = x.shape
    # conv1 -> bn1 -> relu (fused)
    y = conv_bn(x, p["conv1_w"], 3, 3, stride, 1, p["bn1_b"], relu=True)
    # identity path
    if "down_w" in p:
        idn = conv_bn(x, p["down_w"], 1, 1, stride, 0, p["down_b"], relu=False)
        id2d = idn.reshape(-1, idn.shape[-1])
    else:
        id2d = x.reshape(N * H * W, Cin)
    # conv2 -> bn2 -> (+identity) -> relu, all fused in the GEMM epilogue
    out = conv_bn(
        y, p["conv2_w"], 3, 3, 1, 1, p["bn2_b"], residual=id2d, relu=True
    )
    return out


def my_resnet_forward(x_nchw, params):
    # MyResNet.forward: grayscale -> repeat to 3 channels
    if x_nchw.shape[1] == 1:
        x_nchw = jnp.repeat(x_nchw, 3, axis=1)
    x = jnp.transpose(x_nchw, (0, 2, 3, 1)).astype(jnp.bfloat16)  # NCHW -> NHWC (bf16)

    # stem: conv7x7/s2 + bn + relu (fused) + maxpool3x3/s2
    y = conv_bn(x, params["conv1_w"], 7, 7, 2, 3, params["bn1_b"], relu=True)
    y = maxpool_3x3_s2(y)

    # layer1..layer4 (two BasicBlocks each)
    for name, stride in (("layer1", 1), ("layer2", 2), ("layer3", 2), ("layer4", 2)):
        blk0, blk1 = params[name]
        y = basic_block(y, blk0, stride)
        y = basic_block(y, blk1, 1)

    # global avgpool + fc head (Linear 512->128, ReLU, Dropout(id), Linear 128->nc)
    N, Hf, Wf, Cf = y.shape
    feats = y.reshape(N, Hf * Wf, Cf)
    return head(feats, params["fc"])


# ------------------------------------------------------------------------------ main
if __name__ == "__main__":
    NUM_CLASSES = 10
    key = jax.random.PRNGKey(0)
    kx, kp = jax.random.split(key)

    params = init_params(kp, NUM_CLASSES)
    x = jax.random.normal(kx, (2, 3, 64, 64), jnp.float32)  # NCHW, like PyTorch input

    fwd = jax.jit(my_resnet_forward)
    logits = fwd(x, params)
    jax.block_until_ready(logits)

    assert logits.shape == (2, NUM_CLASSES)
    assert logits.dtype == jnp.float32
    assert bool(jnp.all(jnp.isfinite(logits)))
    print("KERNEL_OK")
</pallas_src>

<mosaic_0001>
module attributes {stable_mosaic.version = 11 : i64} {
  func.func @kernel(%arg0: i32, %arg1: i32, %arg2: i32, %arg3: memref<256x152xbf16, #tpu.memory_space<vmem>>, %arg4: memref<152x64xbf16, #tpu.memory_space<vmem>>, %arg5: memref<1x64xf32, #tpu.memory_space<vmem>>, %arg6: memref<256x64xbf16, #tpu.memory_space<vmem>>) attributes {dimension_semantics = [#tpu.dimension_semantics<parallel>, #tpu.dimension_semantics<parallel>, #tpu.dimension_semantics<arbitrary>], iteration_bounds = array<i64: 8, 1, 1>, scalar_prefetch = 0 : i64, scratch_operands = 0 : i64, tpu.core_type = #tpu.core_type<tc>, window_params = [{transform_indices = @transform_0, window_bounds = array<i64: 256, 152>}, {transform_indices = @transform_1, window_bounds = array<i64: 152, 64>}, {transform_indices = @transform_2, window_bounds = array<i64: 1, 64>}, {transform_indices = @transform_3, window_bounds = array<i64: 256, 64>}]} {
    %c0 = arith.constant 0 : index
    %c0_0 = arith.constant 0 : index
    %0 = vector.load %arg3[%c0, %c0_0] : memref<256x152xbf16, #tpu.memory_space<vmem>>, vector<256x152xbf16>
    %c0_1 = arith.constant 0 : index
    %c0_2 = arith.constant 0 : index
    %1 = vector.load %arg4[%c0_1, %c0_2] : memref<152x64xbf16, #tpu.memory_space<vmem>>, vector<152x64xbf16>
    %cst = arith.constant dense<0.000000e+00> : vector<256x64xf32>
    %2 = tpu.matmul %0, %1, %cst {dimension_numbers = #tpu.dot_dimension_numbers<[1], [0], [0], [1], [0, 0, 1, 1], [], []>} : vector<256x152xbf16>, vector<152x64xbf16>, vector<256x64xf32> -> vector<256x64xf32>
    %c0_3 = arith.constant 0 : index
    %c0_4 = arith.constant 0 : index
    %3 = vector.load %arg5[%c0_3, %c0_4] : memref<1x64xf32, #tpu.memory_space<vmem>>, vector<1x64xf32>
    %4 = vector.broadcast %3 : vector<1x64xf32> to vector<256x64xf32>
    %5 = arith.addf %2, %4 : vector<256x64xf32>
    %cst_5 = arith.constant 0.000000e+00 : f32
    %6 = vector.broadcast %cst_5 : f32 to vector<256x64xf32>
    %7 = arith.maximumf %5, %6 : vector<256x64xf32>
    %8 = arith.truncf %7 : vector<256x64xf32> to vector<256x64xbf16>
    %c0_6 = arith.constant 0 : index
    %c0_7 = arith.constant 0 : index
    %9 = vector.load %arg6[%c0_6, %c0_7] : memref<256x64xbf16, #tpu.memory_space<vmem>>, vector<256x64xbf16>
    tpu.vector_store %arg6[%c0_6, %c0_7], %8 {strides = array<i32>} : memref<256x64xbf16, #tpu.memory_space<vmem>>, vector<256x64xbf16>,
    return
  }
  func.func @transform_0(%arg0: i32, %arg1: i32, %arg2: i32) -> (i32, i32) {
    %c0_i32 = arith.constant 0 : i32
    return %arg0, %arg2 : i32, i32
  }
  func.func @transform_1(%arg0: i32, %arg1: i32, %arg2: i32) -> (i32, i32) {
    %c0_i32 = arith.constant 0 : i32
    return %arg2, %arg1 : i32, i32
  }
  func.func @transform_2(%arg0: i32, %arg1: i32, %arg2: i32) -> (i32, i32) {
    %c0_i32 = arith.constant 0 : i32
    %c0_i32_0 = arith.constant 0 : i32
    return %c0_i32, %arg1 : i32, i32
  }
  func.func @transform_3(%arg0: i32, %arg1: i32, %arg2: i32) -> (i32, i32) {
    %c0_i32 = arith.constant 0 : i32
    return %arg0, %arg1 : i32, i32
  }
}

module attributes {stable_mosaic.version = 11 : i64} {
  func.func @_max9_kernel(%arg0: i32, %arg1: memref<256x64xbf16, #tpu.memory_space<vmem>>, %arg2: memref<256x64xbf16, #tpu.memory_space<vmem>>, %arg3: memref<256x64xbf16, #tpu.memory_space<vmem>>, %arg4: memref<256x64xbf16, #tpu.memory_space<vmem>>, %arg5: memref<256x64xbf16, #tpu.memory_space<vmem>>, %arg6: memref<256x64xbf16, #tpu.memory_space<vmem>>, %arg7: memref<256x64xbf16, #tpu.memory_space<vmem>>, %arg8: memref<256x64xbf16, #tpu.memory_space<vmem>>, %arg9: memref<256x64xbf16, #tpu.memory_space<vmem>>, %arg10: memref<256x64xbf16, #tpu.memory_space<vmem>>) attributes {dimension_semantics = [#tpu.dimension_semantics<parallel>], iteration_bounds = array<i64: 2>, scalar_prefetch = 0 : i64, scratch_operands = 0 : i64, tpu.core_type = #tpu.core_type<tc>, window_params = [{transform_indices = @transform_0, window_bounds = array<i64: 256, 64>}, {transform_indices = @transform_1, window_bounds = array<i64: 256, 64>}, {transform_indices = @transform_2, window_bounds = array<i64: 256, 64>}, {transform_indices = @transform_3, window_bounds = array<i64: 256, 64>}, {transform_indices = @transform_4, window_bounds = array<i64: 256, 64>}, {transform_indices = @transform_5, window_bounds = array<i64: 256, 64>}, {transform_indices = @transform_6, window_bounds = array<i64: 256, 64>}, {transform_indices = @transform_7, window_bounds = array<i64: 256, 64>}, {transform_indices = @transform_8, window_bounds = array<i64: 256, 64>}, {transform_indices = @transform_9, window_bounds = array<i64: 256, 64>}]} {
    %c0 = arith.constant 0 : index
    %c0_0 = arith.constant 0 : index
    %0 = vector.load %arg1[%c0, %c0_0] : memref<256x64xbf16, #tpu.memory_space<vmem>>, vector<256x64xbf16>
    %c0_1 = arith.constant 0 : index
    %c0_2 = arith.constant 0 : index
    %1 = vector.load %arg2[%c0_1, %c0_2] : memref<256x64xbf16, #tpu.memory_space<vmem>>, vector<256x64xbf16>
    %2 = arith.maximumf %0, %1 : vector<256x64xbf16>
    %c0_3 = arith.constant 0 : index
    %c0_4 = arith.constant 0 : index
    %3 = vector.load %arg3[%c0_3, %c0_4] : memref<256x64xbf16, #tpu.memory_space<vmem>>, vector<256x64xbf16>
    %4 = arith.maximumf %2, %3 : vector<256x64xbf16>
    %c0_5 = arith.constant 0 : index
    %c0_6 = arith.constant 0 : index
    %5 = vector.load %arg4[%c0_5, %c0_6] : memref<256x64xbf16, #tpu.memory_space<vmem>>, vector<256x64xbf16>
    %6 = arith.maximumf %4, %5 : vector<256x64xbf16>
    %c0_7 = arith.constant 0 : index
    %c0_8 = arith.constant 0 : index
    %7 = vector.load %arg5[%c0_7, %c0_8] : memref<256x64xbf16, #tpu.memory_space<vmem>>, vector<256x64xbf16>
    %8 = arith.maximumf %6, %7 : vector<256x64xbf16>
    %c0_9 = arith.constant 0 : index
    %c0_10 = arith.constant 0 : index
    %9 = vector.load %arg6[%c0_9, %c0_10] : memref<256x64xbf16, #tpu.memory_space<vmem>>, vector<256x64xbf16>
    %10 = arith.maximumf %8, %9 : vector<256x64xbf16>
    %c0_11 = arith.constant 0 : index
    %c0_12 = arith.constant 0 : index
    %11 = vector.load %arg7[%c0_11, %c0_12] : memref<256x64xbf16, #tpu.memory_space<vmem>>, vector<256x64xbf16>
    %12 = arith.maximumf %10, %11 : vector<256x64xbf16>
    %c0_13 = arith.constant 0 : index
    %c0_14 = arith.constant 0 : index
    %13 = vector.load %arg8[%c0_13, %c0_14] : memref<256x64xbf16, #tpu.memory_space<vmem>>, vector<256x64xbf16>
    %14 = arith.maximumf %12, %13 : vector<256x64xbf16>
    %c0_15 = arith.constant 0 : index
    %c0_16 = arith.constant 0 : index
    %15 = vector.load %arg9[%c0_15, %c0_16] : memref<256x64xbf16, #tpu.memory_space<vmem>>, vector<256x64xbf16>
    %16 = arith.maximumf %14, %15 : vector<256x64xbf16>
    %c0_17 = arith.constant 0 : index
    %c0_18 = arith.constant 0 : index
    %17 = vector.load %arg10[%c0_17, %c0_18] : memref<256x64xbf16, #tpu.memory_space<vmem>>, vector<256x64xbf16>
    tpu.vector_store %arg10[%c0_17, %c0_18], %16 {strides = array<i32>} : memref<256x64xbf16, #tpu.memory_space<vmem>>, vector<256x64xbf16>,
    return
  }
  func.func @transform_0(%arg0: i32) -> (i32, i32) {
    %c0_i32 = arith.constant 0 : i32
    %c0_i32_0 = arith.constant 0 : i32
    return %arg0, %c0_i32 : i32, i32
  }
  func.func @transform_1(%arg0: i32) -> (i32, i32) {
    %c0_i32 = arith.constant 0 : i32
    %c0_i32_0 = arith.constant 0 : i32
    return %arg0, %c0_i32 : i32, i32
  }
  func.func @transform_2(%arg0: i32) -> (i32, i32) {
    %c0_i32 = arith.constant 0 : i32
    %c0_i32_0 = arith.constant 0 : i32
    return %arg0, %c0_i32 : i32, i32
  }
  func.func @transform_3(%arg0: i32) -> (i32, i32) {
    %c0_i32 = arith.constant 0 : i32
    %c0_i32_0 = arith.constant 0 : i32
    return %arg0, %c0_i32 : i32, i32
  }
  func.func @transform_4(%arg0: i32) -> (i32, i32) {
    %c0_i32 = arith.constant 0 : i32
    %c0_i32_0 = arith.constant 0 : i32
    return %arg0, %c0_i32 : i32, i32
  }
  func.func @transform_5(%arg0: i32) -> (i32, i32) {
    %c0_i32 = arith.constant 0 : i32
    %c0_i32_0 = arith.constant 0 : i32
    return %arg0, %c0_i32 : i32, i32
  }
  func.func @transform_6(%arg0: i32) -> (i32, i32) {
    %c0_i32 = arith.constant 0 : i32
    %c0_i32_0 = arith.constant 0 : i32
    return %arg0, %c0_i32 : i32, i32
  }
  func.func @transform_7(%arg0: i32) -> (i32, i32) {
    %c0_i32 = arith.constant 0 : i32
    %c0_i32_0 = arith.constant 0 : i32
    return %arg0, %c0_i32 : i32, i32
  }
  func.func @transform_8(%arg0: i32) -> (i32, i32) {
    %c0_i32 = arith.constant 0 : i32
    %c0_i32_0 = arith.constant 0 : i32
    return %arg0, %c0_i32 : i32, i32
  }
  func.func @transform_9(%arg0: i32) -> (i32, i32) {
    %c0_i32 = arith.constant 0 : i32
    %c0_i32_0 = arith.constant 0 : i32
    return %arg0, %c0_i32 : i32, i32
  }
}

module attributes {stable_mosaic.version = 11 : i64} {
  func.func @kernel(%arg0: i32, %arg1: i32, %arg2: i32, %arg3: memref<256x576xbf16, #tpu.memory_space<vmem>>, %arg4: memref<576x64xbf16, #tpu.memory_space<vmem>>, %arg5: memref<1x64xf32, #tpu.memory_space<vmem>>, %arg6: memref<256x64xbf16, #tpu.memory_space<vmem>>) attributes {dimension_semantics = [#tpu.dimension_semantics<parallel>, #tpu.dimension_semantics<parallel>, #tpu.dimension_semantics<arbitrary>], iteration_bounds = array<i64: 2, 1, 1>, scalar_prefetch = 0 : i64, scratch_operands = 0 : i64, tpu.core_type = #tpu.core_type<tc>, window_params = [{transform_indices = @transform_0, window_bounds = array<i64: 256, 576>}, {transform_indices = @transform_1, window_bounds = array<i64: 576, 64>}, {transform_indices = @transform_2, window_bounds = array<i64: 1, 64>}, {transform_indices = @transform_3, window_bounds = array<i64: 256, 64>}]} {
    %c0 = arith.constant 0 : index
    %c0_0 = arith.constant 0 : index
    %0 = vector.load %arg3[%c0, %c0_0] : memref<256x576xbf16, #tpu.memory_space<vmem>>, vector<256x576xbf16>
    %c0_1 = arith.constant 0 : index
    %c0_2 = arith.constant 0 : index
    %1 = vector.load %arg4[%c0_1, %c0_2] : memref<576x64xbf16, #tpu.memory_space<vmem>>, vector<576x64xbf16>
    %cst = arith.constant dense<0.000000e+00> : vector<256x64xf32>
    %2 = tpu.matmul %0, %1, %cst {dimension_numbers = #tpu.dot_dimension_numbers<[1], [0], [0], [1], [0, 0, 1, 1], [], []>} : vector<256x576xbf16>, vector<576x64xbf16>, vector<256x64xf32> -> vector<256x64xf32>
    %c0_3 = arith.constant 0 : index
    %c0_4 = arith.constant 0 : index
    %3 = vector.load %arg5[%c0_3, %c0_4] : memref<1x64xf32, #tpu.memory_space<vmem>>, vector<1x64xf32>
    %4 = vector.broadcast %3 : vector<1x64xf32> to vector<256x64xf32>
    %5 = arith.addf %2, %4 : vector<256x64xf32>
    %cst_5 = arith.constant 0.000000e+00 : f32
    %6 = vector.broadcast %cst_5 : f32 to vector<256x64xf32>
    %7 = arith.maximumf %5, %6 : vector<256x64xf32>
    %8 = arith.truncf %7 : vector<256x64xf32> to vector<256x64xbf16>
    %c0_6 = arith.constant 0 : index
    %c0_7 = arith.constant 0 : index
    %9 = vector.load %arg6[%c0_6, %c0_7] : memref<256x64xbf16, #tpu.memory_space<vmem>>, vector<256x64xbf16>
    tpu.vector_store %arg6[%c0_6, %c0_7], %8 {strides = array<i32>} : memref<256x64xbf16, #tpu.memory_space<vmem>>, vector<256x64xbf16>,
    return
  }
  func.func @transform_0(%arg0: i32, %arg1: i32, %arg2: i32) -> (i32, i32) {
    %c0_i32 = arith.constant 0 : i32
    return %arg0, %arg2 : i32, i32
  }
  func.func @transform_1(%arg0: i32, %arg1: i32, %arg2: i32) -> (i32, i32) {
    %c0_i32 = arith.constant 0 : i32
    return %arg2, %arg1 : i32, i32
  }
  func.func @transform_2(%arg0: i32, %arg1: i32, %arg2: i32) -> (i32, i32) {
    %c0_i32 = arith.constant 0 : i32
    %c0_i32_0 = arith.constant 0 : i32
    return %c0_i32, %arg1 : i32, i32
  }
  func.func @transform_3(%arg0: i32, %arg1: i32, %arg2: i32) -> (i32, i32) {
    %c0_i32 = arith.constant 0 : i32
    return %arg0, %arg1 : i32, i32
  }
}

module attributes {stable_mosaic.version = 11 : i64} {
  func.func @kernel(%arg0: i32, %arg1: i32, %arg2: i32, %arg3: memref<256x576xbf16, #tpu.memory_space<vmem>>, %arg4: memref<576x64xbf16, #tpu.memory_space<vmem>>, %arg5: memref<1x64xf32, #tpu.memory_space<vmem>>, %arg6: memref<256x64xbf16, #tpu.memory_space<vmem>>, %arg7: memref<256x64xbf16, #tpu.memory_space<vmem>>) attributes {dimension_semantics = [#tpu.dimension_semantics<parallel>, #tpu.dimension_semantics<parallel>, #tpu.dimension_semantics<arbitrary>], iteration_bounds = array<i64: 2, 1, 1>, scalar_prefetch = 0 : i64, scratch_operands = 0 : i64, tpu.core_type = #tpu.core_type<tc>, window_params = [{transform_indices = @transform_0, window_bounds = array<i64: 256, 576>}, {transform_indices = @transform_1, window_bounds = array<i64: 576, 64>}, {transform_indices = @transform_2, window_bounds = array<i64: 1, 64>}, {transform_indices = @transform_3, window_bounds = array<i64: 256, 64>}, {transform_indices = @transform_4, window_bounds = array<i64: 256, 64>}]} {
    %c0 = arith.constant 0 : index
    %c0_0 = arith.constant 0 : index
    %0 = vector.load %arg3[%c0, %c0_0] : memref<256x576xbf16, #tpu.memory_space<vmem>>, vector<256x576xbf16>
    %c0_1 = arith.constant 0 : index
    %c0_2 = arith.constant 0 : index
    %1 = vector.load %arg4[%c0_1, %c0_2] : memref<576x64xbf16, #tpu.memory_space<vmem>>, vector<576x64xbf16>
    %cst = arith.constant dense<0.000000e+00> : vector<256x64xf32>
    %2 = tpu.matmul %0, %1, %cst {dimension_numbers = #tpu.dot_dimension_numbers<[1], [0], [0], [1], [0, 0, 1, 1], [], []>} : vector<256x576xbf16>, vector<576x64xbf16>, vector<256x64xf32> -> vector<256x64xf32>
    %c0_3 = arith.constant 0 : index
    %c0_4 = arith.constant 0 : index
    %3 = vector.load %arg5[%c0_3, %c0_4] : memref<1x64xf32, #tpu.memory_space<vmem>>, vector<1x64xf32>
    %4 = vector.broadcast %3 : vector<1x64xf32> to vector<256x64xf32>
    %5 = arith.addf %2, %4 : vector<256x64xf32>
    %c0_5 = arith.constant 0 : index
    %c0_6 = arith.constant 0 : index
    %6 = vector.load %arg6[%c0_5, %c0_6] : memref<256x64xbf16, #tpu.memory_space<vmem>>, vector<256x64xbf16>
    %7 = arith.extf %6 : vector<256x64xbf16> to vector<256x64xf32>
    %8 = arith.addf %5, %7 : vector<256x64xf32>
    %cst_7 = arith.constant 0.000000e+00 : f32
    %9 = vector.broadcast %cst_7 : f32 to vector<256x64xf32>
    %10 = arith.maximumf %8, %9 : vector<256x64xf32>
    %11 = arith.truncf %10 : vector<256x64xf32> to vector<256x64xbf16>
    %c0_8 = arith.constant 0 : index
    %c0_9 = arith.constant 0 : index
    %12 = vector.load %arg7[%c0_8, %c0_9] : memref<256x64xbf16, #tpu.memory_space<vmem>>, vector<256x64xbf16>
    tpu.vector_store %arg7[%c0_8, %c0_9], %11 {strides = array<i32>} : memref<256x64xbf16, #tpu.memory_space<vmem>>, vector<256x64xbf16>,
    return
  }
  func.func @transform_0(%arg0: i32, %arg1: i32, %arg2: i32) -> (i32, i32) {
    %c0_i32 = arith.constant 0 : i32
    return %arg0, %arg2 : i32, i32
  }
  func.func @transform_1(%arg0: i32, %arg1: i32, %arg2: i32) -> (i32, i32) {
    %c0_i32 = arith.constant 0 : i32
    return %arg2, %arg1 : i32, i32
  }
  func.func @transform_2(%arg0: i32, %arg1: i32, %arg2: i32) -> (i32, i32) {
    %c0_i32 = arith.constant 0 : i32
    %c0_i32_0 = arith.constant 0 : i32
    return %c0_i32, %arg1 : i32, i32
  }
  func.func @transform_3(%arg0: i32, %arg1: i32, %arg2: i32) -> (i32, i32) {
    %c0_i32 = arith.constant 0 : i32
    return %arg0, %arg1 : i32, i32
  }
  func.func @transform_4(%arg0: i32, %arg1: i32, %arg2: i32) -> (i32, i32) {
    %c0_i32 = arith.constant 0 : i32
    return %arg0, %arg1 : i32, i32
  }
}

module attributes {stable_mosaic.version = 11 : i64} {
  func.func @kernel(%arg0: i32, %arg1: i32, %arg2: i32, %arg3: memref<64x576xbf16, #tpu.memory_space<vmem>>, %arg4: memref<576x128xbf16, #tpu.memory_space<vmem>>, %arg5: memref<1x128xf32, #tpu.memory_space<vmem>>, %arg6: memref<64x128xbf16, #tpu.memory_space<vmem>>) attributes {dimension_semantics = [#tpu.dimension_semantics<parallel>, #tpu.dimension_semantics<parallel>, #tpu.dimension_semantics<arbitrary>], iteration_bounds = array<i64: 2, 1, 1>, scalar_prefetch = 0 : i64, scratch_operands = 0 : i64, tpu.core_type = #tpu.core_type<tc>, window_params = [{transform_indices = @transform_0, window_bounds = array<i64: 64, 576>}, {transform_indices = @transform_1, window_bounds = array<i64: 576, 128>}, {transform_indices = @transform_2, window_bounds = array<i64: 1, 128>}, {transform_indices = @transform_3, window_bounds = array<i64: 64, 128>}]} {
    %c0 = arith.constant 0 : index
    %c0_0 = arith.constant 0 : index
    %0 = vector.load %arg3[%c0, %c0_0] : memref<64x576xbf16, #tpu.memory_space<vmem>>, vector<64x576xbf16>
    %c0_1 = arith.constant 0 : index
    %c0_2 = arith.constant 0 : index
    %1 = vector.load %arg4[%c0_1, %c0_2] : memref<576x128xbf16, #tpu.memory_space<vmem>>, vector<576x128xbf16>
    %cst = arith.constant dense<0.000000e+00> : vector<64x128xf32>
    %2 = tpu.matmul %0, %1, %cst {dimension_numbers = #tpu.dot_dimension_numbers<[1], [0], [0], [1], [0, 0, 1, 1], [], []>} : vector<64x576xbf16>, vector<576x128xbf16>, vector<64x128xf32> -> vector<64x128xf32>
    %c0_3 = arith.constant 0 : index
    %c0_4 = arith.constant 0 : index
    %3 = vector.load %arg5[%c0_3, %c0_4] : memref<1x128xf32, #tpu.memory_space<vmem>>, vector<1x128xf32>
    %4 = vector.broadcast %3 : vector<1x128xf32> to vector<64x128xf32>
    %5 = arith.addf %2, %4 : vector<64x128xf32>
    %cst_5 = arith.constant 0.000000e+00 : f32
    %6 = vector.broadcast %cst_5 : f32 to vector<64x128xf32>
    %7 = arith.maximumf %5, %6 : vector<64x128xf32>
    %8 = arith.truncf %7 : vector<64x128xf32> to vector<64x128xbf16>
    %c0_6 = arith.constant 0 : index
    %c0_7 = arith.constant 0 : index
    %9 = vector.load %arg6[%c0_6, %c0_7] : memref<64x128xbf16, #tpu.memory_space<vmem>>, vector<64x128xbf16>
    tpu.vector_store %arg6[%c0_6, %c0_7], %8 {strides = array<i32>} : memref<64x128xbf16, #tpu.memory_space<vmem>>, vector<64x128xbf16>,
    return
  }
  func.func @transform_0(%arg0: i32, %arg1: i32, %arg2: i32) -> (i32, i32) {
    %c0_i32 = arith.constant 0 : i32
    return %arg0, %arg2 : i32, i32
  }
  func.func @transform_1(%arg0: i32, %arg1: i32, %arg2: i32) -> (i32, i32) {
    %c0_i32 = arith.constant 0 : i32
    return %arg2, %arg1 : i32, i32
  }
  func.func @transform_2(%arg0: i32, %arg1: i32, %arg2: i32) -> (i32, i32) {
    %c0_i32 = arith.constant 0 : i32
    %c0_i32_0 = arith.constant 0 : i32
    return %c0_i32, %arg1 : i32, i32
  }
  func.func @transform_3(%arg0: i32, %arg1: i32, %arg2: i32) -> (i32, i32) {
    %c0_i32 = arith.constant 0 : i32
    return %arg0, %arg1 : i32, i32
  }
}

module attributes {stable_mosaic.version = 11 : i64} {
  func.func @kernel(%arg0: i32, %arg1: i32, %arg2: i32, %arg3: memref<64x384xbf16, #tpu.memory_space<vmem>>, %arg4: memref<384x128xbf16, #tpu.memory_space<vmem>>, %arg5: memref<1x128xf32, #tpu.memory_space<vmem>>, %arg6: memref<64x128xbf16, #tpu.memory_space<vmem>>, %arg7: memref<64x128xbf16, #tpu.memory_space<vmem>>, %arg8: memref<64x128xf32, #tpu.memory_space<vmem>>) attributes {dimension_semantics = [#tpu.dimension_semantics<parallel>, #tpu.dimension_semantics<parallel>, #tpu.dimension_semantics<arbitrary>], iteration_bounds = array<i64: 2, 1, 3>, scalar_prefetch = 0 : i64, scratch_operands = 1 : i64, tpu.core_type = #tpu.core_type<tc>, window_params = [{transform_indices = @transform_0, window_bounds = array<i64: 64, 384>}, {transform_indices = @transform_1, window_bounds = array<i64: 384, 128>}, {transform_indices = @transform_2, window_bounds = array<i64: 1, 128>}, {transform_indices = @transform_3, window_bounds = array<i64: 64, 128>}, {transform_indices = @transform_4, window_bounds = array<i64: 64, 128>}]} {
    %c0_i32 = arith.constant 0 : i32
    %0 = arith.cmpi eq, %arg2, %c0_i32 : i32
    %1 = arith.extui %0 : i1 to i32
    %c0_i32_0 = arith.constant 0 : i32
    %2 = arith.cmpi ne, %1, %c0_i32_0 : i32
    scf.if %2 {
      %cst_9 = arith.constant 0.000000e+00 : f32
      %12 = vector.broadcast %cst_9 : f32 to vector<64x128xf32>
      %c0_10 = arith.constant 0 : index
      %c0_11 = arith.constant 0 : index
      %13 = vector.load %arg8[%c0_10, %c0_11] : memref<64x128xf32, #tpu.memory_space<vmem>>, vector<64x128xf32>
      tpu.vector_store %arg8[%c0_10, %c0_11], %12 {strides = array<i32>} : memref<64x128xf32, #tpu.memory_space<vmem>>, vector<64x128xf32>,
    } else {
    }
    %c0 = arith.constant 0 : index
    %c0_1 = arith.constant 0 : index
    %3 = vector.load %arg8[%c0, %c0_1] : memref<64x128xf32, #tpu.memory_space<vmem>>, vector<64x128xf32>
    %c0_2 = arith.constant 0 : index
    %c0_3 = arith.constant 0 : index
    %4 = vector.load %arg3[%c0_2, %c0_3] : memref<64x384xbf16, #tpu.memory_space<vmem>>, vector<64x384xbf16>
    %c0_4 = arith.constant 0 : index
    %c0_5 = arith.constant 0 : index
    %5 = vector.load %arg4[%c0_4, %c0_5] : memref<384x128xbf16, #tpu.memory_space<vmem>>, vector<384x128xbf16>
    %cst = arith.constant dense<0.000000e+00> : vector<64x128xf32>
    %6 = tpu.matmul %4, %5, %cst {dimension_numbers = #tpu.dot_dimension_numbers<[1], [0], [0], [1], [0, 0, 1, 1], [], []>} : vector<64x384xbf16>, vector<384x128xbf16>, vector<64x128xf32> -> vector<64x128xf32>
    %7 = arith.addf %3, %6 : vector<64x128xf32>
    %c0_6 = arith.constant 0 : index
    %c0_7 = arith.constant 0 : index
    %8 = vector.load %arg8[%c0_6, %c0_7] : memref<64x128xf32, #tpu.memory_space<vmem>>, vector<64x128xf32>
    tpu.vector_store %arg8[%c0_6, %c0_7], %7 {strides = array<i32>} : memref<64x128xf32, #tpu.memory_space<vmem>>, vector<64x128xf32>,
    %c2_i32 = arith.constant 2 : i32
    %9 = arith.cmpi eq, %arg2, %c2_i32 : i32
    %10 = arith.extui %9 : i1 to i32
    %c0_i32_8 = arith.constant 0 : i32
    %11 = arith.cmpi ne, %10, %c0_i32_8 : i32
    scf.if %11 {
      %c0_9 = arith.constant 0 : index
      %c0_10 = arith.constant 0 : index
      %12 = vector.load %arg8[%c0_9, %c0_10] : memref<64x128xf32, #tpu.memory_space<vmem>>, vector<64x128xf32>
      %c0_11 = arith.constant 0 : index
      %c0_12 = arith.constant 0 : index
      %13 = vector.load %arg5[%c0_11, %c0_12] : memref<1x128xf32, #tpu.memory_space<vmem>>, vector<1x128xf32>
      %14 = vector.broadcast %13 : vector<1x128xf32> to vector<64x128xf32>
      %15 = arith.addf %12, %14 : vector<64x128xf32>
      %c0_13 = arith.constant 0 : index
      %c0_14 = arith.constant 0 : index
      %16 = vector.load %arg6[%c0_13, %c0_14] : memref<64x128xbf16, #tpu.memory_space<vmem>>, vector<64x128xbf16>
      %17 = arith.extf %16 : vector<64x128xbf16> to vector<64x128xf32>
      %18 = arith.addf %15, %17 : vector<64x128xf32>
      %cst_15 = arith.constant 0.000000e+00 : f32
      %19 = vector.broadcast %cst_15 : f32 to vector<64x128xf32>
      %20 = arith.maximumf %18, %19 : vector<64x128xf32>
      %21 = arith.truncf %20 : vector<64x128xf32> to vector<64x128xbf16>
      %c0_16 = arith.constant 0 : index
      %c0_17 = arith.constant 0 : index
      %22 = vector.load %arg7[%c0_16, %c0_17] : memref<64x128xbf16, #tpu.memory_space<vmem>>, vector<64x128xbf16>
      tpu.vector_store %arg7[%c0_16, %c0_17], %21 {strides = array<i32>} : memref<64x128xbf16, #tpu.memory_space<vmem>>, vector<64x128xbf16>,
    } else {
    }
    return
  }
  func.func @transform_0(%arg0: i32, %arg1: i32, %arg2: i32) -> (i32, i32) {
    %c0_i32 = arith.constant 0 : i32
    return %arg0, %arg2 : i32, i32
  }
  func.func @transform_1(%arg0: i32, %arg1: i32, %arg2: i32) -> (i32, i32) {
    %c0_i32 = arith.constant 0 : i32
    return %arg2, %arg1 : i32, i32
  }
  func.func @transform_2(%arg0: i32, %arg1: i32, %arg2: i32) -> (i32, i32) {
    %c0_i32 = arith.constant 0 : i32
    %c0_i32_0 = arith.constant 0 : i32
    return %c0_i32, %arg1 : i32, i32
  }
  func.func @transform_3(%arg0: i32, %arg1: i32, %arg2: i32) -> (i32, i32) {
    %c0_i32 = arith.constant 0 : i32
    return %arg0, %arg1 : i32, i32
  }
  func.func @transform_4(%arg0: i32, %arg1: i32, %arg2: i32) -> (i32, i32) {
    %c0_i32 = arith.constant 0 : i32
    return %arg0, %arg1 : i32, i32
  }
}

module attributes {stable_mosaic.version = 11 : i64} {
  func.func @kernel(%arg0: i32, %arg1: i32, %arg2: i32, %arg3: memref<64x64xbf16, #tpu.memory_space<vmem>>, %arg4: memref<64x128xbf16, #tpu.memory_space<vmem>>, %arg5: memref<1x128xf32, #tpu.memory_space<vmem>>, %arg6: memref<64x128xbf16, #tpu.memory_space<vmem>>) attributes {dimension_semantics = [#tpu.dimension_semantics<parallel>, #tpu.dimension_semantics<parallel>, #tpu.dimension_semantics<arbitrary>], iteration_bounds = array<i64: 2, 1, 1>, scalar_prefetch = 0 : i64, scratch_operands = 0 : i64, tpu.core_type = #tpu.core_type<tc>, window_params = [{transform_indices = @transform_0, window_bounds = array<i64: 64, 64>}, {transform_indices = @transform_1, window_bounds = array<i64: 64, 128>}, {transform_indices = @transform_2, window_bounds = array<i64: 1, 128>}, {transform_indices = @transform_3, window_bounds = array<i64: 64, 128>}]} {
    %c0 = arith.constant 0 : index
    %c0_0 = arith.constant 0 : index
    %0 = vector.load %arg3[%c0, %c0_0] : memref<64x64xbf16, #tpu.memory_space<vmem>>, vector<64x64xbf16>
    %c0_1 = arith.constant 0 : index
    %c0_2 = arith.constant 0 : index
    %1 = vector.load %arg4[%c0_1, %c0_2] : memref<64x128xbf16, #tpu.memory_space<vmem>>, vector<64x128xbf16>
    %cst = arith.constant dense<0.000000e+00> : vector<64x128xf32>
    %2 = tpu.matmul %0, %1, %cst {dimension_numbers = #tpu.dot_dimension_numbers<[1], [0], [0], [1], [0, 0, 1, 1], [], []>} : vector<64x64xbf16>, vector<64x128xbf16>, vector<64x128xf32> -> vector<64x128xf32>
    %c0_3 = arith.constant 0 : index
    %c0_4 = arith.constant 0 : index
    %3 = vector.load %arg5[%c0_3, %c0_4] : memref<1x128xf32, #tpu.memory_space<vmem>>, vector<1x128xf32>
    %4 = vector.broadcast %3 : vector<1x128xf32> to vector<64x128xf32>
    %5 = arith.addf %2, %4 : vector<64x128xf32>
    %6 = arith.truncf %5 : vector<64x128xf32> to vector<64x128xbf16>
    %c0_5 = arith.constant 0 : index
    %c0_6 = arith.constant 0 : index
    %7 = vector.load %arg6[%c0_5, %c0_6] : memref<64x128xbf16, #tpu.memory_space<vmem>>, vector<64x128xbf16>
    tpu.vector_store %arg6[%c0_5, %c0_6], %6 {strides = array<i32>} : memref<64x128xbf16, #tpu.memory_space<vmem>>, vector<64x128xbf16>,
    return
  }
  func.func @transform_0(%arg0: i32, %arg1: i32, %arg2: i32) -> (i32, i32) {
    %c0_i32 = arith.constant 0 : i32
    return %arg0, %arg2 : i32, i32
  }
  func.func @transform_1(%arg0: i32, %arg1: i32, %arg2: i32) -> (i32, i32) {
    %c0_i32 = arith.constant 0 : i32
    return %arg2, %arg1 : i32, i32
  }
  func.func @transform_2(%arg0: i32, %arg1: i32, %arg2: i32) -> (i32, i32) {
    %c0_i32 = arith.constant 0 : i32
    %c0_i32_0 = arith.constant 0 : i32
    return %c0_i32, %arg1 : i32, i32
  }
  func.func @transform_3(%arg0: i32, %arg1: i32, %arg2: i32) -> (i32, i32) {
    %c0_i32 = arith.constant 0 : i32
    return %arg0, %arg1 : i32, i32
  }
}

module attributes {stable_mosaic.version = 11 : i64} {
  func.func @kernel(%arg0: i32, %arg1: i32, %arg2: i32, %arg3: memref<64x384xbf16, #tpu.memory_space<vmem>>, %arg4: memref<384x128xbf16, #tpu.memory_space<vmem>>, %arg5: memref<1x128xf32, #tpu.memory_space<vmem>>, %arg6: memref<64x128xbf16, #tpu.memory_space<vmem>>, %arg7: memref<64x128xf32, #tpu.memory_space<vmem>>) attributes {dimension_semantics = [#tpu.dimension_semantics<parallel>, #tpu.dimension_semantics<parallel>, #tpu.dimension_semantics<arbitrary>], iteration_bounds = array<i64: 2, 1, 3>, scalar_prefetch = 0 : i64, scratch_operands = 1 : i64, tpu.core_type = #tpu.core_type<tc>, window_params = [{transform_indices = @transform_0, window_bounds = array<i64: 64, 384>}, {transform_indices = @transform_1, window_bounds = array<i64: 384, 128>}, {transform_indices = @transform_2, window_bounds = array<i64: 1, 128>}, {transform_indices = @transform_3, window_bounds = array<i64: 64, 128>}]} {
    %c0_i32 = arith.constant 0 : i32
    %0 = arith.cmpi eq, %arg2, %c0_i32 : i32
    %1 = arith.extui %0 : i1 to i32
    %c0_i32_0 = arith.constant 0 : i32
    %2 = arith.cmpi ne, %1, %c0_i32_0 : i32
    scf.if %2 {
      %cst_9 = arith.constant 0.000000e+00 : f32
      %12 = vector.broadcast %cst_9 : f32 to vector<64x128xf32>
      %c0_10 = arith.constant 0 : index
      %c0_11 = arith.constant 0 : index
      %13 = vector.load %arg7[%c0_10, %c0_11] : memref<64x128xf32, #tpu.memory_space<vmem>>, vector<64x128xf32>
      tpu.vector_store %arg7[%c0_10, %c0_11], %12 {strides = array<i32>} : memref<64x128xf32, #tpu.memory_space<vmem>>, vector<64x128xf32>,
    } else {
    }
    %c0 = arith.constant 0 : index
    %c0_1 = arith.constant 0 : index
    %3 = vector.load %arg7[%c0, %c0_1] : memref<64x128xf32, #tpu.memory_space<vmem>>, vector<64x128xf32>
    %c0_2 = arith.constant 0 : index
    %c0_3 = arith.constant 0 : index
    %4 = vector.load %arg3[%c0_2, %c0_3] : memref<64x384xbf16, #tpu.memory_space<vmem>>, vector<64x384xbf16>
    %c0_4 = arith.constant 0 : index
    %c0_5 = arith.constant 0 : index
    %5 = vector.load %arg4[%c0_4, %c0_5] : memref<384x128xbf16, #tpu.memory_space<vmem>>, vector<384x128xbf16>
    %cst = arith.constant dense<0.000000e+00> : vector<64x128xf32>
    %6 = tpu.matmul %4, %5, %cst {dimension_numbers = #tpu.dot_dimension_numbers<[1], [0], [0], [1], [0, 0, 1, 1], [], []>} : vector<64x384xbf16>, vector<384x128xbf16>, vector<64x128xf32> -> vector<64x128xf32>
    %7 = arith.addf %3, %6 : vector<64x128xf32>
    %c0_6 = arith.constant 0 : index
    %c0_7 = arith.constant 0 : index
    %8 = vector.load %arg7[%c0_6, %c0_7] : memref<64x128xf32, #tpu.memory_space<vmem>>, vector<64x128xf32>
    tpu.vector_store %arg7[%c0_6, %c0_7], %7 {strides = array<i32>} : memref<64x128xf32, #tpu.memory_space<vmem>>, vector<64x128xf32>,
    %c2_i32 = arith.constant 2 : i32
    %9 = arith.cmpi eq, %arg2, %c2_i32 : i32
    %10 = arith.extui %9 : i1 to i32
    %c0_i32_8 = arith.constant 0 : i32
    %11 = arith.cmpi ne, %10, %c0_i32_8 : i32
    scf.if %11 {
      %c0_9 = arith.constant 0 : index
      %c0_10 = arith.constant 0 : index
      %12 = vector.load %arg7[%c0_9, %c0_10] : memref<64x128xf32, #tpu.memory_space<vmem>>, vector<64x128xf32>
      %c0_11 = arith.constant 0 : index
      %c0_12 = arith.constant 0 : index
      %13 = vector.load %arg5[%c0_11, %c0_12] : memref<1x128xf32, #tpu.memory_space<vmem>>, vector<1x128xf32>
      %14 = vector.broadcast %13 : vector<1x128xf32> to vector<64x128xf32>
      %15 = arith.addf %12, %14 : vector<64x128xf32>
      %cst_13 = arith.constant 0.000000e+00 : f32
      %16 = vector.broadcast %cst_13 : f32 to vector<64x128xf32>
      %17 = arith.maximumf %15, %16 : vector<64x128xf32>
      %18 = arith.truncf %17 : vector<64x128xf32> to vector<64x128xbf16>
      %c0_14 = arith.constant 0 : index
      %c0_15 = arith.constant 0 : index
      %19 = vector.load %arg6[%c0_14, %c0_15] : memref<64x128xbf16, #tpu.memory_space<vmem>>, vector<64x128xbf16>
      tpu.vector_store %arg6[%c0_14, %c0_15], %18 {strides = array<i32>} : memref<64x128xbf16, #tpu.memory_space<vmem>>, vector<64x128xbf16>,
    } else {
    }
    return
  }
  func.func @transform_0(%arg0: i32, %arg1: i32, %arg2: i32) -> (i32, i32) {
    %c0_i32 = arith.constant 0 : i32
    return %arg0, %arg2 : i32, i32
  }
  func.func @transform_1(%arg0: i32, %arg1: i32, %arg2: i32) -> (i32, i32) {
    %c0_i32 = arith.constant 0 : i32
    return %arg2, %arg1 : i32, i32
  }
  func.func @transform_2(%arg0: i32, %arg1: i32, %arg2: i32) -> (i32, i32) {
    %c0_i32 = arith.constant 0 : i32
    %c0_i32_0 = arith.constant 0 : i32
    return %c0_i32, %arg1 : i32, i32
  }
  func.func @transform_3(%arg0: i32, %arg1: i32, %arg2: i32) -> (i32, i32) {
    %c0_i32 = arith.constant 0 : i32
    return %arg0, %arg1 : i32, i32
  }
}

module attributes {stable_mosaic.version = 11 : i64} {
  func.func @kernel(%arg0: i32, %arg1: i32, %arg2: i32, %arg3: memref<32x384xbf16, #tpu.memory_space<vmem>>, %arg4: memref<384x128xbf16, #tpu.memory_space<vmem>>, %arg5: memref<1x128xf32, #tpu.memory_space<vmem>>, %arg6: memref<32x128xbf16, #tpu.memory_space<vmem>>, %arg7: memref<32x128xf32, #tpu.memory_space<vmem>>) attributes {dimension_semantics = [#tpu.dimension_semantics<parallel>, #tpu.dimension_semantics<parallel>, #tpu.dimension_semantics<arbitrary>], iteration_bounds = array<i64: 1, 2, 3>, scalar_prefetch = 0 : i64, scratch_operands = 1 : i64, tpu.core_type = #tpu.core_type<tc>, window_params = [{transform_indices = @transform_0, window_bounds = array<i64: 32, 384>}, {transform_indices = @transform_1, window_bounds = array<i64: 384, 128>}, {transform_indices = @transform_2, window_bounds = array<i64: 1, 128>}, {transform_indices = @transform_3, window_bounds = array<i64: 32, 128>}]} {
    %c0_i32 = arith.constant 0 : i32
    %0 = arith.cmpi eq, %arg2, %c0_i32 : i32
    %1 = arith.extui %0 : i1 to i32
    %c0_i32_0 = arith.constant 0 : i32
    %2 = arith.cmpi ne, %1, %c0_i32_0 : i32
    scf.if %2 {
      %cst_9 = arith.constant 0.000000e+00 : f32
      %12 = vector.broadcast %cst_9 : f32 to vector<32x128xf32>
      %c0_10 = arith.constant 0 : index
      %c0_11 = arith.constant 0 : index
      %13 = vector.load %arg7[%c0_10, %c0_11] : memref<32x128xf32, #tpu.memory_space<vmem>>, vector<32x128xf32>
      tpu.vector_store %arg7[%c0_10, %c0_11], %12 {strides = array<i32>} : memref<32x128xf32, #tpu.memory_space<vmem>>, vector<32x128xf32>,
    } else {
    }
    %c0 = arith.constant 0 : index
    %c0_1 = arith.constant 0 : index
    %3 = vector.load %arg7[%c0, %c0_1] : memref<32x128xf32, #tpu.memory_space<vmem>>, vector<32x128xf32>
    %c0_2 = arith.constant 0 : index
    %c0_3 = arith.constant 0 : index
    %4 = vector.load %arg3[%c0_2, %c0_3] : memref<32x384xbf16, #tpu.memory_space<vmem>>, vector<32x384xbf16>
    %c0_4 = arith.constant 0 : index
    %c0_5 = arith.constant 0 : index
    %5 = vector.load %arg4[%c0_4, %c0_5] : memref<384x128xbf16, #tpu.memory_space<vmem>>, vector<384x128xbf16>
    %cst = arith.constant dense<0.000000e+00> : vector<32x128xf32>
    %6 = tpu.matmul %4, %5, %cst {dimension_numbers = #tpu.dot_dimension_numbers<[1], [0], [0], [1], [0, 0, 1, 1], [], []>} : vector<32x384xbf16>, vector<384x128xbf16>, vector<32x128xf32> -> vector<32x128xf32>
    %7 = arith.addf %3, %6 : vector<32x128xf32>
    %c0_6 = arith.constant 0 : index
    %c0_7 = arith.constant 0 : index
    %8 = vector.load %arg7[%c0_6, %c0_7] : memref<32x128xf32, #tpu.memory_space<vmem>>, vector<32x128xf32>
    tpu.vector_store %arg7[%c0_6, %c0_7], %7 {strides = array<i32>} : memref<32x128xf32, #tpu.memory_space<vmem>>, vector<32x128xf32>,
    %c2_i32 = arith.constant 2 : i32
    %9 = arith.cmpi eq, %arg2, %c2_i32 : i32
    %10 = arith.extui %9 : i1 to i32
    %c0_i32_8 = arith.constant 0 : i32
    %11 = arith.cmpi ne, %10, %c0_i32_8 : i32
    scf.if %11 {
      %c0_9 = arith.constant 0 : index
      %c0_10 = arith.constant 0 : index
      %12 = vector.load %arg7[%c0_9, %c0_10] : memref<32x128xf32, #tpu.memory_space<vmem>>, vector<32x128xf32>
      %c0_11 = arith.constant 0 : index
      %c0_12 = arith.constant 0 : index
      %13 = vector.load %arg5[%c0_11, %c0_12] : memref<1x128xf32, #tpu.memory_space<vmem>>, vector<1x128xf32>
      %14 = vector.broadcast %13 : vector<1x128xf32> to vector<32x128xf32>
      %15 = arith.addf %12, %14 : vector<32x128xf32>
      %cst_13 = arith.constant 0.000000e+00 : f32
      %16 = vector.broadcast %cst_13 : f32 to vector<32x128xf32>
      %17 = arith.maximumf %15, %16 : vector<32x128xf32>
      %18 = arith.truncf %17 : vector<32x128xf32> to vector<32x128xbf16>
      %c0_14 = arith.constant 0 : index
      %c0_15 = arith.constant 0 : index
      %19 = vector.load %arg6[%c0_14, %c0_15] : memref<32x128xbf16, #tpu.memory_space<vmem>>, vector<32x128xbf16>
      tpu.vector_store %arg6[%c0_14, %c0_15], %18 {strides = array<i32>} : memref<32x128xbf16, #tpu.memory_space<vmem>>, vector<32x128xbf16>,
    } else {
    }
    return
  }
  func.func @transform_0(%arg0: i32, %arg1: i32, %arg2: i32) -> (i32, i32) {
    %c0_i32 = arith.constant 0 : i32
    return %arg0, %arg2 : i32, i32
  }
  func.func @transform_1(%arg0: i32, %arg1: i32, %arg2: i32) -> (i32, i32) {
    %c0_i32 = arith.constant 0 : i32
    return %arg2, %arg1 : i32, i32
  }
  func.func @transform_2(%arg0: i32, %arg1: i32, %arg2: i32) -> (i32, i32) {
    %c0_i32 = arith.constant 0 : i32
    %c0_i32_0 = arith.constant 0 : i32
    return %c0_i32, %arg1 : i32, i32
  }
  func.func @transform_3(%arg0: i32, %arg1: i32, %arg2: i32) -> (i32, i32) {
    %c0_i32 = arith.constant 0 : i32
    return %arg0, %arg1 : i32, i32
  }
}

module attributes {stable_mosaic.version = 11 : i64} {
  func.func @kernel(%arg0: i32, %arg1: i32, %arg2: i32, %arg3: memref<32x128xbf16, #tpu.memory_space<vmem>>, %arg4: memref<128x128xbf16, #tpu.memory_space<vmem>>, %arg5: memref<1x128xf32, #tpu.memory_space<vmem>>, %arg6: memref<32x128xbf16, #tpu.memory_space<vmem>>) attributes {dimension_semantics = [#tpu.dimension_semantics<parallel>, #tpu.dimension_semantics<parallel>, #tpu.dimension_semantics<arbitrary>], iteration_bounds = array<i64: 1, 2, 1>, scalar_prefetch = 0 : i64, scratch_operands = 0 : i64, tpu.core_type = #tpu.core_type<tc>, window_params = [{transform_indices = @transform_0, window_bounds = array<i64: 32, 128>}, {transform_indices = @transform_1, window_bounds = array<i64: 128, 128>}, {transform_indices = @transform_2, window_bounds = array<i64: 1, 128>}, {transform_indices = @transform_3, window_bounds = array<i64: 32, 128>}]} {
    %c0 = arith.constant 0 : index
    %c0_0 = arith.constant 0 : index
    %0 = vector.load %arg3[%c0, %c0_0] : memref<32x128xbf16, #tpu.memory_space<vmem>>, vector<32x128xbf16>
    %c0_1 = arith.constant 0 : index
    %c0_2 = arith.constant 0 : index
    %1 = vector.load %arg4[%c0_1, %c0_2] : memref<128x128xbf16, #tpu.memory_space<vmem>>, vector<128x128xbf16>
    %cst = arith.constant dense<0.000000e+00> : vector<32x128xf32>
    %2 = tpu.matmul %0, %1, %cst {dimension_numbers = #tpu.dot_dimension_numbers<[1], [0], [0], [1], [0, 0, 1, 1], [], []>} : vector<32x128xbf16>, vector<128x128xbf16>, vector<32x128xf32> -> vector<32x128xf32>
    %c0_3 = arith.constant 0 : index
    %c0_4 = arith.constant 0 : index
    %3 = vector.load %arg5[%c0_3, %c0_4] : memref<1x128xf32, #tpu.memory_space<vmem>>, vector<1x128xf32>
    %4 = vector.broadcast %3 : vector<1x128xf32> to vector<32x128xf32>
    %5 = arith.addf %2, %4 : vector<32x128xf32>
    %6 = arith.truncf %5 : vector<32x128xf32> to vector<32x128xbf16>
    %c0_5 = arith.constant 0 : index
    %c0_6 = arith.constant 0 : index
    %7 = vector.load %arg6[%c0_5, %c0_6] : memref<32x128xbf16, #tpu.memory_space<vmem>>, vector<32x128xbf16>
    tpu.vector_store %arg6[%c0_5, %c0_6], %6 {strides = array<i32>} : memref<32x128xbf16, #tpu.memory_space<vmem>>, vector<32x128xbf16>,
    return
  }
  func.func @transform_0(%arg0: i32, %arg1: i32, %arg2: i32) -> (i32, i32) {
    %c0_i32 = arith.constant 0 : i32
    return %arg0, %arg2 : i32, i32
  }
  func.func @transform_1(%arg0: i32, %arg1: i32, %arg2: i32) -> (i32, i32) {
    %c0_i32 = arith.constant 0 : i32
    return %arg2, %arg1 : i32, i32
  }
  func.func @transform_2(%arg0: i32, %arg1: i32, %arg2: i32) -> (i32, i32) {
    %c0_i32 = arith.constant 0 : i32
    %c0_i32_0 = arith.constant 0 : i32
    return %c0_i32, %arg1 : i32, i32
  }
  func.func @transform_3(%arg0: i32, %arg1: i32, %arg2: i32) -> (i32, i32) {
    %c0_i32 = arith.constant 0 : i32
    return %arg0, %arg1 : i32, i32
  }
}

module attributes {stable_mosaic.version = 11 : i64} {
  func.func @kernel(%arg0: i32, %arg1: i32, %arg2: i32, %arg3: memref<32x384xbf16, #tpu.memory_space<vmem>>, %arg4: memref<384x128xbf16, #tpu.memory_space<vmem>>, %arg5: memref<1x128xf32, #tpu.memory_space<vmem>>, %arg6: memref<32x128xbf16, #tpu.memory_space<vmem>>, %arg7: memref<32x128xbf16, #tpu.memory_space<vmem>>, %arg8: memref<32x128xf32, #tpu.memory_space<vmem>>) attributes {dimension_semantics = [#tpu.dimension_semantics<parallel>, #tpu.dimension_semantics<parallel>, #tpu.dimension_semantics<arbitrary>], iteration_bounds = array<i64: 1, 2, 6>, scalar_prefetch = 0 : i64, scratch_operands = 1 : i64, tpu.core_type = #tpu.core_type<tc>, window_params = [{transform_indices = @transform_0, window_bounds = array<i64: 32, 384>}, {transform_indices = @transform_1, window_bounds = array<i64: 384, 128>}, {transform_indices = @transform_2, window_bounds = array<i64: 1, 128>}, {transform_indices = @transform_3, window_bounds = array<i64: 32, 128>}, {transform_indices = @transform_4, window_bounds = array<i64: 32, 128>}]} {
    %c0_i32 = arith.constant 0 : i32
    %0 = arith.cmpi eq, %arg2, %c0_i32 : i32
    %1 = arith.extui %0 : i1 to i32
    %c0_i32_0 = arith.constant 0 : i32
    %2 = arith.cmpi ne, %1, %c0_i32_0 : i32
    scf.if %2 {
      %cst_9 = arith.constant 0.000000e+00 : f32
      %12 = vector.broadcast %cst_9 : f32 to vector<32x128xf32>
      %c0_10 = arith.constant 0 : index
      %c0_11 = arith.constant 0 : index
      %13 = vector.load %arg8[%c0_10, %c0_11] : memref<32x128xf32, #tpu.memory_space<vmem>>, vector<32x128xf32>
      tpu.vector_store %arg8[%c0_10, %c0_11], %12 {strides = array<i32>} : memref<32x128xf32, #tpu.memory_space<vmem>>, vector<32x128xf32>,
    } else {
    }
    %c0 = arith.constant 0 : index
    %c0_1 = arith.constant 0 : index
    %3 = vector.load %arg8[%c0, %c0_1] : memref<32x128xf32, #tpu.memory_space<vmem>>, vector<32x128xf32>
    %c0_2 = arith.constant 0 : index
    %c0_3 = arith.constant 0 : index
    %4 = vector.load %arg3[%c0_2, %c0_3] : memref<32x384xbf16, #tpu.memory_space<vmem>>, vector<32x384xbf16>
    %c0_4 = arith.constant 0 : index
    %c0_5 = arith.constant 0 : index
    %5 = vector.load %arg4[%c0_4, %c0_5] : memref<384x128xbf16, #tpu.memory_space<vmem>>, vector<384x128xbf16>
    %cst = arith.constant dense<0.000000e+00> : vector<32x128xf32>
    %6 = tpu.matmul %4, %5, %cst {dimension_numbers = #tpu.dot_dimension_numbers<[1], [0], [0], [1], [0, 0, 1, 1], [], []>} : vector<32x384xbf16>, vector<384x128xbf16>, vector<32x128xf32> -> vector<32x128xf32>
    %7 = arith.addf %3, %6 : vector<32x128xf32>
    %c0_6 = arith.constant 0 : index
    %c0_7 = arith.constant 0 : index
    %8 = vector.load %arg8[%c0_6, %c0_7] : memref<32x128xf32, #tpu.memory_space<vmem>>, vector<32x128xf32>
    tpu.vector_store %arg8[%c0_6, %c0_7], %7 {strides = array<i32>} : memref<32x128xf32, #tpu.memory_space<vmem>>, vector<32x128xf32>,
    %c5_i32 = arith.constant 5 : i32
    %9 = arith.cmpi eq, %arg2, %c5_i32 : i32
    %10 = arith.extui %9 : i1 to i32
    %c0_i32_8 = arith.constant 0 : i32
    %11 = arith.cmpi ne, %10, %c0_i32_8 : i32
    scf.if %11 {
      %c0_9 = arith.constant 0 : index
      %c0_10 = arith.constant 0 : index
      %12 = vector.load %arg8[%c0_9, %c0_10] : memref<32x128xf32, #tpu.memory_space<vmem>>, vector<32x128xf32>
      %c0_11 = arith.constant 0 : index
      %c0_12 = arith.constant 0 : index
      %13 = vector.load %arg5[%c0_11, %c0_12] : memref<1x128xf32, #tpu.memory_space<vmem>>, vector<1x128xf32>
      %14 = vector.broadcast %13 : vector<1x128xf32> to vector<32x128xf32>
      %15 = arith.addf %12, %14 : vector<32x128xf32>
      %c0_13 = arith.constant 0 : index
      %c0_14 = arith.constant 0 : index
      %16 = vector.load %arg6[%c0_13, %c0_14] : memref<32x128xbf16, #tpu.memory_space<vmem>>, vector<32x128xbf16>
      %17 = arith.extf %16 : vector<32x128xbf16> to vector<32x128xf32>
      %18 = arith.addf %15, %17 : vector<32x128xf32>
      %cst_15 = arith.constant 0.000000e+00 : f32
      %19 = vector.broadcast %cst_15 : f32 to vector<32x128xf32>
      %20 = arith.maximumf %18, %19 : vector<32x128xf32>
      %21 = arith.truncf %20 : vector<32x128xf32> to vector<32x128xbf16>
      %c0_16 = arith.constant 0 : index
      %c0_17 = arith.constant 0 : index
      %22 = vector.load %arg7[%c0_16, %c0_17] : memref<32x128xbf16, #tpu.memory_space<vmem>>, vector<32x128xbf16>
      tpu.vector_store %arg7[%c0_16, %c0_17], %21 {strides = array<i32>} : memref<32x128xbf16, #tpu.memory_space<vmem>>, vector<32x128xbf16>,
    } else {
    }
    return
  }
  func.func @transform_0(%arg0: i32, %arg1: i32, %arg2: i32) -> (i32, i32) {
    %c0_i32 = arith.constant 0 : i32
    return %arg0, %arg2 : i32, i32
  }
  func.func @transform_1(%arg0: i32, %arg1: i32, %arg2: i32) -> (i32, i32) {
    %c0_i32 = arith.constant 0 : i32
    return %arg2, %arg1 : i32, i32
  }
  func.func @transform_2(%arg0: i32, %arg1: i32, %arg2: i32) -> (i32, i32) {
    %c0_i32 = arith.constant 0 : i32
    %c0_i32_0 = arith.constant 0 : i32
    return %c0_i32, %arg1 : i32, i32
  }
  func.func @transform_3(%arg0: i32, %arg1: i32, %arg2: i32) -> (i32, i32) {
    %c0_i32 = arith.constant 0 : i32
    return %arg0, %arg1 : i32, i32
  }
  func.func @transform_4(%arg0: i32, %arg1: i32, %arg2: i32) -> (i32, i32) {
    %c0_i32 = arith.constant 0 : i32
    return %arg0, %arg1 : i32, i32
  }
}

module attributes {stable_mosaic.version = 11 : i64} {
  func.func @kernel(%arg0: i32, %arg1: i32, %arg2: i32, %arg3: memref<32x384xbf16, #tpu.memory_space<vmem>>, %arg4: memref<384x128xbf16, #tpu.memory_space<vmem>>, %arg5: memref<1x128xf32, #tpu.memory_space<vmem>>, %arg6: memref<32x128xbf16, #tpu.memory_space<vmem>>, %arg7: memref<32x128xf32, #tpu.memory_space<vmem>>) attributes {dimension_semantics = [#tpu.dimension_semantics<parallel>, #tpu.dimension_semantics<parallel>, #tpu.dimension_semantics<arbitrary>], iteration_bounds = array<i64: 1, 2, 6>, scalar_prefetch = 0 : i64, scratch_operands = 1 : i64, tpu.core_type = #tpu.core_type<tc>, window_params = [{transform_indices = @transform_0, window_bounds = array<i64: 32, 384>}, {transform_indices = @transform_1, window_bounds = array<i64: 384, 128>}, {transform_indices = @transform_2, window_bounds = array<i64: 1, 128>}, {transform_indices = @transform_3, window_bounds = array<i64: 32, 128>}]} {
    %c0_i32 = arith.constant 0 : i32
    %0 = arith.cmpi eq, %arg2, %c0_i32 : i32
    %1 = arith.extui %0 : i1 to i32
    %c0_i32_0 = arith.constant 0 : i32
    %2 = arith.cmpi ne, %1, %c0_i32_0 : i32
    scf.if %2 {
      %cst_9 = arith.constant 0.000000e+00 : f32
      %12 = vector.broadcast %cst_9 : f32 to vector<32x128xf32>
      %c0_10 = arith.constant 0 : index
      %c0_11 = arith.constant 0 : index
      %13 = vector.load %arg7[%c0_10, %c0_11] : memref<32x128xf32, #tpu.memory_space<vmem>>, vector<32x128xf32>
      tpu.vector_store %arg7[%c0_10, %c0_11], %12 {strides = array<i32>} : memref<32x128xf32, #tpu.memory_space<vmem>>, vector<32x128xf32>,
    } else {
    }
    %c0 = arith.constant 0 : index
    %c0_1 = arith.constant 0 : index
    %3 = vector.load %arg7[%c0, %c0_1] : memref<32x128xf32, #tpu.memory_space<vmem>>, vector<32x128xf32>
    %c0_2 = arith.constant 0 : index
    %c0_3 = arith.constant 0 : index
    %4 = vector.load %arg3[%c0_2, %c0_3] : memref<32x384xbf16, #tpu.memory_space<vmem>>, vector<32x384xbf16>
    %c0_4 = arith.constant 0 : index
    %c0_5 = arith.constant 0 : index
    %5 = vector.load %arg4[%c0_4, %c0_5] : memref<384x128xbf16, #tpu.memory_space<vmem>>, vector<384x128xbf16>
    %cst = arith.constant dense<0.000000e+00> : vector<32x128xf32>
    %6 = tpu.matmul %4, %5, %cst {dimension_numbers = #tpu.dot_dimension_numbers<[1], [0], [0], [1], [0, 0, 1, 1], [], []>} : vector<32x384xbf16>, vector<384x128xbf16>, vector<32x128xf32> -> vector<32x128xf32>
    %7 = arith.addf %3, %6 : vector<32x128xf32>
    %c0_6 = arith.constant 0 : index
    %c0_7 = arith.constant 0 : index
    %8 = vector.load %arg7[%c0_6, %c0_7] : memref<32x128xf32, #tpu.memory_space<vmem>>, vector<32x128xf32>
    tpu.vector_store %arg7[%c0_6, %c0_7], %7 {strides = array<i32>} : memref<32x128xf32, #tpu.memory_space<vmem>>, vector<32x128xf32>,
    %c5_i32 = arith.constant 5 : i32
    %9 = arith.cmpi eq, %arg2, %c5_i32 : i32
    %10 = arith.extui %9 : i1 to i32
    %c0_i32_8 = arith.constant 0 : i32
    %11 = arith.cmpi ne, %10, %c0_i32_8 : i32
    scf.if %11 {
      %c0_9 = arith.constant 0 : index
      %c0_10 = arith.constant 0 : index
      %12 = vector.load %arg7[%c0_9, %c0_10] : memref<32x128xf32, #tpu.memory_space<vmem>>, vector<32x128xf32>
      %c0_11 = arith.constant 0 : index
      %c0_12 = arith.constant 0 : index
      %13 = vector.load %arg5[%c0_11, %c0_12] : memref<1x128xf32, #tpu.memory_space<vmem>>, vector<1x128xf32>
      %14 = vector.broadcast %13 : vector<1x128xf32> to vector<32x128xf32>
      %15 = arith.addf %12, %14 : vector<32x128xf32>
      %cst_13 = arith.constant 0.000000e+00 : f32
      %16 = vector.broadcast %cst_13 : f32 to vector<32x128xf32>
      %17 = arith.maximumf %15, %16 : vector<32x128xf32>
      %18 = arith.truncf %17 : vector<32x128xf32> to vector<32x128xbf16>
      %c0_14 = arith.constant 0 : index
      %c0_15 = arith.constant 0 : index
      %19 = vector.load %arg6[%c0_14, %c0_15] : memref<32x128xbf16, #tpu.memory_space<vmem>>, vector<32x128xbf16>
      tpu.vector_store %arg6[%c0_14, %c0_15], %18 {strides = array<i32>} : memref<32x128xbf16, #tpu.memory_space<vmem>>, vector<32x128xbf16>,
    } else {
    }
    return
  }
  func.func @transform_0(%arg0: i32, %arg1: i32, %arg2: i32) -> (i32, i32) {
    %c0_i32 = arith.constant 0 : i32
    return %arg0, %arg2 : i32, i32
  }
  func.func @transform_1(%arg0: i32, %arg1: i32, %arg2: i32) -> (i32, i32) {
    %c0_i32 = arith.constant 0 : i32
    return %arg2, %arg1 : i32, i32
  }
  func.func @transform_2(%arg0: i32, %arg1: i32, %arg2: i32) -> (i32, i32) {
    %c0_i32 = arith.constant 0 : i32
    %c0_i32_0 = arith.constant 0 : i32
    return %c0_i32, %arg1 : i32, i32
  }
  func.func @transform_3(%arg0: i32, %arg1: i32, %arg2: i32) -> (i32, i32) {
    %c0_i32 = arith.constant 0 : i32
    return %arg0, %arg1 : i32, i32
  }
}

module attributes {stable_mosaic.version = 11 : i64} {
  func.func @kernel(%arg0: i32, %arg1: i32, %arg2: i32, %arg3: memref<8x384xbf16, #tpu.memory_space<vmem>>, %arg4: memref<384x128xbf16, #tpu.memory_space<vmem>>, %arg5: memref<1x128xf32, #tpu.memory_space<vmem>>, %arg6: memref<8x128xbf16, #tpu.memory_space<vmem>>, %arg7: memref<8x128xf32, #tpu.memory_space<vmem>>) attributes {dimension_semantics = [#tpu.dimension_semantics<parallel>, #tpu.dimension_semantics<parallel>, #tpu.dimension_semantics<arbitrary>], iteration_bounds = array<i64: 1, 4, 6>, scalar_prefetch = 0 : i64, scratch_operands = 1 : i64, tpu.core_type = #tpu.core_type<tc>, window_params = [{transform_indices = @transform_0, window_bounds = array<i64: 8, 384>}, {transform_indices = @transform_1, window_bounds = array<i64: 384, 128>}, {transform_indices = @transform_2, window_bounds = array<i64: 1, 128>}, {transform_indices = @transform_3, window_bounds = array<i64: 8, 128>}]} {
    %c0_i32 = arith.constant 0 : i32
    %0 = arith.cmpi eq, %arg2, %c0_i32 : i32
    %1 = arith.extui %0 : i1 to i32
    %c0_i32_0 = arith.constant 0 : i32
    %2 = arith.cmpi ne, %1, %c0_i32_0 : i32
    scf.if %2 {
      %cst_9 = arith.constant 0.000000e+00 : f32
      %12 = vector.broadcast %cst_9 : f32 to vector<8x128xf32>
      %c0_10 = arith.constant 0 : index
      %c0_11 = arith.constant 0 : index
      %13 = vector.load %arg7[%c0_10, %c0_11] : memref<8x128xf32, #tpu.memory_space<vmem>>, vector<8x128xf32>
      tpu.vector_store %arg7[%c0_10, %c0_11], %12 {strides = array<i32>} : memref<8x128xf32, #tpu.memory_space<vmem>>, vector<8x128xf32>,
    } else {
    }
    %c0 = arith.constant 0 : index
    %c0_1 = arith.constant 0 : index
    %3 = vector.load %arg7[%c0, %c0_1] : memref<8x128xf32, #tpu.memory_space<vmem>>, vector<8x128xf32>
    %c0_2 = arith.constant 0 : index
    %c0_3 = arith.constant 0 : index
    %4 = vector.load %arg3[%c0_2, %c0_3] : memref<8x384xbf16, #tpu.memory_space<vmem>>, vector<8x384xbf16>
    %c0_4 = arith.constant 0 : index
    %c0_5 = arith.constant 0 : index
    %5 = vector.load %arg4[%c0_4, %c0_5] : memref<384x128xbf16, #tpu.memory_space<vmem>>, vector<384x128xbf16>
    %cst = arith.constant dense<0.000000e+00> : vector<8x128xf32>
    %6 = tpu.matmul %4, %5, %cst {dimension_numbers = #tpu.dot_dimension_numbers<[1], [0], [0], [1], [0, 0, 1, 1], [], []>} : vector<8x384xbf16>, vector<384x128xbf16>, vector<8x128xf32> -> vector<8x128xf32>
    %7 = arith.addf %3, %6 : vector<8x128xf32>
    %c0_6 = arith.constant 0 : index
    %c0_7 = arith.constant 0 : index
    %8 = vector.load %arg7[%c0_6, %c0_7] : memref<8x128xf32, #tpu.memory_space<vmem>>, vector<8x128xf32>
    tpu.vector_store %arg7[%c0_6, %c0_7], %7 {strides = array<i32>} : memref<8x128xf32, #tpu.memory_space<vmem>>, vector<8x128xf32>,
    %c5_i32 = arith.constant 5 : i32
    %9 = arith.cmpi eq, %arg2, %c5_i32 : i32
    %10 = arith.extui %9 : i1 to i32
    %c0_i32_8 = arith.constant 0 : i32
    %11 = arith.cmpi ne, %10, %c0_i32_8 : i32
    scf.if %11 {
      %c0_9 = arith.constant 0 : index
      %c0_10 = arith.constant 0 : index
      %12 = vector.load %arg7[%c0_9, %c0_10] : memref<8x128xf32, #tpu.memory_space<vmem>>, vector<8x128xf32>
      %c0_11 = arith.constant 0 : index
      %c0_12 = arith.constant 0 : index
      %13 = vector.load %arg5[%c0_11, %c0_12] : memref<1x128xf32, #tpu.memory_space<vmem>>, vector<1x128xf32>
      %14 = vector.broadcast %13 : vector<1x128xf32> to vector<8x128xf32>
      %15 = arith.addf %12, %14 : vector<8x128xf32>
      %cst_13 = arith.constant 0.000000e+00 : f32
      %16 = vector.broadcast %cst_13 : f32 to vector<8x128xf32>
      %17 = arith.maximumf %15, %16 : vector<8x128xf32>
      %18 = arith.truncf %17 : vector<8x128xf32> to vector<8x128xbf16>
      %c0_14 = arith.constant 0 : index
      %c0_15 = arith.constant 0 : index
      %19 = vector.load %arg6[%c0_14, %c0_15] : memref<8x128xbf16, #tpu.memory_space<vmem>>, vector<8x128xbf16>
      tpu.vector_store %arg6[%c0_14, %c0_15], %18 {strides = array<i32>} : memref<8x128xbf16, #tpu.memory_space<vmem>>, vector<8x128xbf16>,
    } else {
    }
    return
  }
  func.func @transform_0(%arg0: i32, %arg1: i32, %arg2: i32) -> (i32, i32) {
    %c0_i32 = arith.constant 0 : i32
    return %arg0, %arg2 : i32, i32
  }
  func.func @transform_1(%arg0: i32, %arg1: i32, %arg2: i32) -> (i32, i32) {
    %c0_i32 = arith.constant 0 : i32
    return %arg2, %arg1 : i32, i32
  }
  func.func @transform_2(%arg0: i32, %arg1: i32, %arg2: i32) -> (i32, i32) {
    %c0_i32 = arith.constant 0 : i32
    %c0_i32_0 = arith.constant 0 : i32
    return %c0_i32, %arg1 : i32, i32
  }
  func.func @transform_3(%arg0: i32, %arg1: i32, %arg2: i32) -> (i32, i32) {
    %c0_i32 = arith.constant 0 : i32
    return %arg0, %arg1 : i32, i32
  }
}

module attributes {stable_mosaic.version = 11 : i64} {
  func.func @kernel(%arg0: i32, %arg1: i32, %arg2: i32, %arg3: memref<8x256xbf16, #tpu.memory_space<vmem>>, %arg4: memref<256x128xbf16, #tpu.memory_space<vmem>>, %arg5: memref<1x128xf32, #tpu.memory_space<vmem>>, %arg6: memref<8x128xbf16, #tpu.memory_space<vmem>>) attributes {dimension_semantics = [#tpu.dimension_semantics<parallel>, #tpu.dimension_semantics<parallel>, #tpu.dimension_semantics<arbitrary>], iteration_bounds = array<i64: 1, 4, 1>, scalar_prefetch = 0 : i64, scratch_operands = 0 : i64, tpu.core_type = #tpu.core_type<tc>, window_params = [{transform_indices = @transform_0, window_bounds = array<i64: 8, 256>}, {transform_indices = @transform_1, window_bounds = array<i64: 256, 128>}, {transform_indices = @transform_2, window_bounds = array<i64: 1, 128>}, {transform_indices = @transform_3, window_bounds = array<i64: 8, 128>}]} {
    %c0 = arith.constant 0 : index
    %c0_0 = arith.constant 0 : index
    %0 = vector.load %arg3[%c0, %c0_0] : memref<8x256xbf16, #tpu.memory_space<vmem>>, vector<8x256xbf16>
    %c0_1 = arith.constant 0 : index
    %c0_2 = arith.constant 0 : index
    %1 = vector.load %arg4[%c0_1, %c0_2] : memref<256x128xbf16, #tpu.memory_space<vmem>>, vector<256x128xbf16>
    %cst = arith.constant dense<0.000000e+00> : vector<8x128xf32>
    %2 = tpu.matmul %0, %1, %cst {dimension_numbers = #tpu.dot_dimension_numbers<[1], [0], [0], [1], [0, 0, 1, 1], [], []>} : vector<8x256xbf16>, vector<256x128xbf16>, vector<8x128xf32> -> vector<8x128xf32>
    %c0_3 = arith.constant 0 : index
    %c0_4 = arith.constant 0 : index
    %3 = vector.load %arg5[%c0_3, %c0_4] : memref<1x128xf32, #tpu.memory_space<vmem>>, vector<1x128xf32>
    %4 = vector.broadcast %3 : vector<1x128xf32> to vector<8x128xf32>
    %5 = arith.addf %2, %4 : vector<8x128xf32>
    %6 = arith.truncf %5 : vector<8x128xf32> to vector<8x128xbf16>
    %c0_5 = arith.constant 0 : index
    %c0_6 = arith.constant 0 : index
    %7 = vector.load %arg6[%c0_5, %c0_6] : memref<8x128xbf16, #tpu.memory_space<vmem>>, vector<8x128xbf16>
    tpu.vector_store %arg6[%c0_5, %c0_6], %6 {strides = array<i32>} : memref<8x128xbf16, #tpu.memory_space<vmem>>, vector<8x128xbf16>,
    return
  }
  func.func @transform_0(%arg0: i32, %arg1: i32, %arg2: i32) -> (i32, i32) {
    %c0_i32 = arith.constant 0 : i32
    return %arg0, %arg2 : i32, i32
  }
  func.func @transform_1(%arg0: i32, %arg1: i32, %arg2: i32) -> (i32, i32) {
    %c0_i32 = arith.constant 0 : i32
    return %arg2, %arg1 : i32, i32
  }
  func.func @transform_2(%arg0: i32, %arg1: i32, %arg2: i32) -> (i32, i32) {
    %c0_i32 = arith.constant 0 : i32
    %c0_i32_0 = arith.constant 0 : i32
    return %c0_i32, %arg1 : i32, i32
  }
  func.func @transform_3(%arg0: i32, %arg1: i32, %arg2: i32) -> (i32, i32) {
    %c0_i32 = arith.constant 0 : i32
    return %arg0, %arg1 : i32, i32
  }
}

module attributes {stable_mosaic.version = 11 : i64} {
  func.func @kernel(%arg0: i32, %arg1: i32, %arg2: i32, %arg3: memref<8x512xbf16, #tpu.memory_space<vmem>>, %arg4: memref<512x128xbf16, #tpu.memory_space<vmem>>, %arg5: memref<1x128xf32, #tpu.memory_space<vmem>>, %arg6: memref<8x128xbf16, #tpu.memory_space<vmem>>, %arg7: memref<8x128xbf16, #tpu.memory_space<vmem>>, %arg8: memref<8x128xf32, #tpu.memory_space<vmem>>) attributes {dimension_semantics = [#tpu.dimension_semantics<parallel>, #tpu.dimension_semantics<parallel>, #tpu.dimension_semantics<arbitrary>], iteration_bounds = array<i64: 1, 4, 9>, scalar_prefetch = 0 : i64, scratch_operands = 1 : i64, tpu.core_type = #tpu.core_type<tc>, window_params = [{transform_indices = @transform_0, window_bounds = array<i64: 8, 512>}, {transform_indices = @transform_1, window_bounds = array<i64: 512, 128>}, {transform_indices = @transform_2, window_bounds = array<i64: 1, 128>}, {transform_indices = @transform_3, window_bounds = array<i64: 8, 128>}, {transform_indices = @transform_4, window_bounds = array<i64: 8, 128>}]} {
    %c0_i32 = arith.constant 0 : i32
    %0 = arith.cmpi eq, %arg2, %c0_i32 : i32
    %1 = arith.extui %0 : i1 to i32
    %c0_i32_0 = arith.constant 0 : i32
    %2 = arith.cmpi ne, %1, %c0_i32_0 : i32
    scf.if %2 {
      %cst_9 = arith.constant 0.000000e+00 : f32
      %12 = vector.broadcast %cst_9 : f32 to vector<8x128xf32>
      %c0_10 = arith.constant 0 : index
      %c0_11 = arith.constant 0 : index
      %13 = vector.load %arg8[%c0_10, %c0_11] : memref<8x128xf32, #tpu.memory_space<vmem>>, vector<8x128xf32>
      tpu.vector_store %arg8[%c0_10, %c0_11], %12 {strides = array<i32>} : memref<8x128xf32, #tpu.memory_space<vmem>>, vector<8x128xf32>,
    } else {
    }
    %c0 = arith.constant 0 : index
    %c0_1 = arith.constant 0 : index
    %3 = vector.load %arg8[%c0, %c0_1] : memref<8x128xf32, #tpu.memory_space<vmem>>, vector<8x128xf32>
    %c0_2 = arith.constant 0 : index
    %c0_3 = arith.constant 0 : index
    %4 = vector.load %arg3[%c0_2, %c0_3] : memref<8x512xbf16, #tpu.memory_space<vmem>>, vector<8x512xbf16>
    %c0_4 = arith.constant 0 : index
    %c0_5 = arith.constant 0 : index
    %5 = vector.load %arg4[%c0_4, %c0_5] : memref<512x128xbf16, #tpu.memory_space<vmem>>, vector<512x128xbf16>
    %cst = arith.constant dense<0.000000e+00> : vector<8x128xf32>
    %6 = tpu.matmul %4, %5, %cst {dimension_numbers = #tpu.dot_dimension_numbers<[1], [0], [0], [1], [0, 0, 1, 1], [], []>} : vector<8x512xbf16>, vector<512x128xbf16>, vector<8x128xf32> -> vector<8x128xf32>
    %7 = arith.addf %3, %6 : vector<8x128xf32>
    %c0_6 = arith.constant 0 : index
    %c0_7 = arith.constant 0 : index
    %8 = vector.load %arg8[%c0_6, %c0_7] : memref<8x128xf32, #tpu.memory_space<vmem>>, vector<8x128xf32>
    tpu.vector_store %arg8[%c0_6, %c0_7], %7 {strides = array<i32>} : memref<8x128xf32, #tpu.memory_space<vmem>>, vector<8x128xf32>,
    %c8_i32 = arith.constant 8 : i32
    %9 = arith.cmpi eq, %arg2, %c8_i32 : i32
    %10 = arith.extui %9 : i1 to i32
    %c0_i32_8 = arith.constant 0 : i32
    %11 = arith.cmpi ne, %10, %c0_i32_8 : i32
    scf.if %11 {
      %c0_9 = arith.constant 0 : index
      %c0_10 = arith.constant 0 : index
      %12 = vector.load %arg8[%c0_9, %c0_10] : memref<8x128xf32, #tpu.memory_space<vmem>>, vector<8x128xf32>
      %c0_11 = arith.constant 0 : index
      %c0_12 = arith.constant 0 : index
      %13 = vector.load %arg5[%c0_11, %c0_12] : memref<1x128xf32, #tpu.memory_space<vmem>>, vector<1x128xf32>
      %14 = vector.broadcast %13 : vector<1x128xf32> to vector<8x128xf32>
      %15 = arith.addf %12, %14 : vector<8x128xf32>
      %c0_13 = arith.constant 0 : index
      %c0_14 = arith.constant 0 : index
      %16 = vector.load %arg6[%c0_13, %c0_14] : memref<8x128xbf16, #tpu.memory_space<vmem>>, vector<8x128xbf16>
      %17 = arith.extf %16 : vector<8x128xbf16> to vector<8x128xf32>
      %18 = arith.addf %15, %17 : vector<8x128xf32>
      %cst_15 = arith.constant 0.000000e+00 : f32
      %19 = vector.broadcast %cst_15 : f32 to vector<8x128xf32>
      %20 = arith.maximumf %18, %19 : vector<8x128xf32>
      %21 = arith.truncf %20 : vector<8x128xf32> to vector<8x128xbf16>
      %c0_16 = arith.constant 0 : index
      %c0_17 = arith.constant 0 : index
      %22 = vector.load %arg7[%c0_16, %c0_17] : memref<8x128xbf16, #tpu.memory_space<vmem>>, vector<8x128xbf16>
      tpu.vector_store %arg7[%c0_16, %c0_17], %21 {strides = array<i32>} : memref<8x128xbf16, #tpu.memory_space<vmem>>, vector<8x128xbf16>,
    } else {
    }
    return
  }
  func.func @transform_0(%arg0: i32, %arg1: i32, %arg2: i32) -> (i32, i32) {
    %c0_i32 = arith.constant 0 : i32
    return %arg0, %arg2 : i32, i32
  }
  func.func @transform_1(%arg0: i32, %arg1: i32, %arg2: i32) -> (i32, i32) {
    %c0_i32 = arith.constant 0 : i32
    return %arg2, %arg1 : i32, i32
  }
  func.func @transform_2(%arg0: i32, %arg1: i32, %arg2: i32) -> (i32, i32) {
    %c0_i32 = arith.constant 0 : i32
    %c0_i32_0 = arith.constant 0 : i32
    return %c0_i32, %arg1 : i32, i32
  }
  func.func @transform_3(%arg0: i32, %arg1: i32, %arg2: i32) -> (i32, i32) {
    %c0_i32 = arith.constant 0 : i32
    return %arg0, %arg1 : i32, i32
  }
  func.func @transform_4(%arg0: i32, %arg1: i32, %arg2: i32) -> (i32, i32) {
    %c0_i32 = arith.constant 0 : i32
    return %arg0, %arg1 : i32, i32
  }
}

module attributes {stable_mosaic.version = 11 : i64} {
  func.func @kernel(%arg0: i32, %arg1: i32, %arg2: i32, %arg3: memref<8x512xbf16, #tpu.memory_space<vmem>>, %arg4: memref<512x128xbf16, #tpu.memory_space<vmem>>, %arg5: memref<1x128xf32, #tpu.memory_space<vmem>>, %arg6: memref<8x128xbf16, #tpu.memory_space<vmem>>, %arg7: memref<8x128xf32, #tpu.memory_space<vmem>>) attributes {dimension_semantics = [#tpu.dimension_semantics<parallel>, #tpu.dimension_semantics<parallel>, #tpu.dimension_semantics<arbitrary>], iteration_bounds = array<i64: 1, 4, 9>, scalar_prefetch = 0 : i64, scratch_operands = 1 : i64, tpu.core_type = #tpu.core_type<tc>, window_params = [{transform_indices = @transform_0, window_bounds = array<i64: 8, 512>}, {transform_indices = @transform_1, window_bounds = array<i64: 512, 128>}, {transform_indices = @transform_2, window_bounds = array<i64: 1, 128>}, {transform_indices = @transform_3, window_bounds = array<i64: 8, 128>}]} {
    %c0_i32 = arith.constant 0 : i32
    %0 = arith.cmpi eq, %arg2, %c0_i32 : i32
    %1 = arith.extui %0 : i1 to i32
    %c0_i32_0 = arith.constant 0 : i32
    %2 = arith.cmpi ne, %1, %c0_i32_0 : i32
    scf.if %2 {
      %cst_9 = arith.constant 0.000000e+00 : f32
      %12 = vector.broadcast %cst_9 : f32 to vector<8x128xf32>
      %c0_10 = arith.constant 0 : index
      %c0_11 = arith.constant 0 : index
      %13 = vector.load %arg7[%c0_10, %c0_11] : memref<8x128xf32, #tpu.memory_space<vmem>>, vector<8x128xf32>
      tpu.vector_store %arg7[%c0_10, %c0_11], %12 {strides = array<i32>} : memref<8x128xf32, #tpu.memory_space<vmem>>, vector<8x128xf32>,
    } else {
    }
    %c0 = arith.constant 0 : index
    %c0_1 = arith.constant 0 : index
    %3 = vector.load %arg7[%c0, %c0_1] : memref<8x128xf32, #tpu.memory_space<vmem>>, vector<8x128xf32>
    %c0_2 = arith.constant 0 : index
    %c0_3 = arith.constant 0 : index
    %4 = vector.load %arg3[%c0_2, %c0_3] : memref<8x512xbf16, #tpu.memory_space<vmem>>, vector<8x512xbf16>
    %c0_4 = arith.constant 0 : index
    %c0_5 = arith.constant 0 : index
    %5 = vector.load %arg4[%c0_4, %c0_5] : memref<512x128xbf16, #tpu.memory_space<vmem>>, vector<512x128xbf16>
    %cst = arith.constant dense<0.000000e+00> : vector<8x128xf32>
    %6 = tpu.matmul %4, %5, %cst {dimension_numbers = #tpu.dot_dimension_numbers<[1], [0], [0], [1], [0, 0, 1, 1], [], []>} : vector<8x512xbf16>, vector<512x128xbf16>, vector<8x128xf32> -> vector<8x128xf32>
    %7 = arith.addf %3, %6 : vector<8x128xf32>
    %c0_6 = arith.constant 0 : index
    %c0_7 = arith.constant 0 : index
    %8 = vector.load %arg7[%c0_6, %c0_7] : memref<8x128xf32, #tpu.memory_space<vmem>>, vector<8x128xf32>
    tpu.vector_store %arg7[%c0_6, %c0_7], %7 {strides = array<i32>} : memref<8x128xf32, #tpu.memory_space<vmem>>, vector<8x128xf32>,
    %c8_i32 = arith.constant 8 : i32
    %9 = arith.cmpi eq, %arg2, %c8_i32 : i32
    %10 = arith.extui %9 : i1 to i32
    %c0_i32_8 = arith.constant 0 : i32
    %11 = arith.cmpi ne, %10, %c0_i32_8 : i32
    scf.if %11 {
      %c0_9 = arith.constant 0 : index
      %c0_10 = arith.constant 0 : index
      %12 = vector.load %arg7[%c0_9, %c0_10] : memref<8x128xf32, #tpu.memory_space<vmem>>, vector<8x128xf32>
      %c0_11 = arith.constant 0 : index
      %c0_12 = arith.constant 0 : index
      %13 = vector.load %arg5[%c0_11, %c0_12] : memref<1x128xf32, #tpu.memory_space<vmem>>, vector<1x128xf32>
      %14 = vector.broadcast %13 : vector<1x128xf32> to vector<8x128xf32>
      %15 = arith.addf %12, %14 : vector<8x128xf32>
      %cst_13 = arith.constant 0.000000e+00 : f32
      %16 = vector.broadcast %cst_13 : f32 to vector<8x128xf32>
      %17 = arith.maximumf %15, %16 : vector<8x128xf32>
      %18 = arith.truncf %17 : vector<8x128xf32> to vector<8x128xbf16>
      %c0_14 = arith.constant 0 : index
      %c0_15 = arith.constant 0 : index
      %19 = vector.load %arg6[%c0_14, %c0_15] : memref<8x128xbf16, #tpu.memory_space<vmem>>, vector<8x128xbf16>
      tpu.vector_store %arg6[%c0_14, %c0_15], %18 {strides = array<i32>} : memref<8x128xbf16, #tpu.memory_space<vmem>>, vector<8x128xbf16>,
    } else {
    }
    return
  }
  func.func @transform_0(%arg0: i32, %arg1: i32, %arg2: i32) -> (i32, i32) {
    %c0_i32 = arith.constant 0 : i32
    return %arg0, %arg2 : i32, i32
  }
  func.func @transform_1(%arg0: i32, %arg1: i32, %arg2: i32) -> (i32, i32) {
    %c0_i32 = arith.constant 0 : i32
    return %arg2, %arg1 : i32, i32
  }
  func.func @transform_2(%arg0: i32, %arg1: i32, %arg2: i32) -> (i32, i32) {
    %c0_i32 = arith.constant 0 : i32
    %c0_i32_0 = arith.constant 0 : i32
    return %c0_i32, %arg1 : i32, i32
  }
  func.func @transform_3(%arg0: i32, %arg1: i32, %arg2: i32) -> (i32, i32) {
    %c0_i32 = arith.constant 0 : i32
    return %arg0, %arg1 : i32, i32
  }
}

module attributes {stable_mosaic.version = 11 : i64} {
  func.func @_head_kernel(%arg0: i32, %arg1: memref<2x4x512xbf16, #tpu.memory_space<vmem>>, %arg2: memref<512x128xbf16, #tpu.memory_space<vmem>>, %arg3: memref<1x128xf32, #tpu.memory_space<vmem>>, %arg4: memref<128x10xbf16, #tpu.memory_space<vmem>>, %arg5: memref<1x10xf32, #tpu.memory_space<vmem>>, %arg6: memref<2x10xf32, #tpu.memory_space<vmem>>) attributes {dimension_semantics = [#tpu.dimension_semantics<arbitrary>], iteration_bounds = array<i64: 1>, scalar_prefetch = 0 : i64, scratch_operands = 0 : i64, tpu.core_type = #tpu.core_type<tc>, window_params = [{pipeline_mode = #tpu.pipeline_mode<synchronous>, transform_indices = @transform_0, window_bounds = array<i64: 2, 4, 512>}, {pipeline_mode = #tpu.pipeline_mode<synchronous>, transform_indices = @transform_1, window_bounds = array<i64: 512, 128>}, {pipeline_mode = #tpu.pipeline_mode<synchronous>, transform_indices = @transform_2, window_bounds = array<i64: 1, 128>}, {pipeline_mode = #tpu.pipeline_mode<synchronous>, transform_indices = @transform_3, window_bounds = array<i64: 128, 10>}, {pipeline_mode = #tpu.pipeline_mode<synchronous>, transform_indices = @transform_4, window_bounds = array<i64: 1, 10>}, {pipeline_mode = #tpu.pipeline_mode<synchronous>, transform_indices = @transform_5, window_bounds = array<i64: 2, 10>}]} {
    %c0 = arith.constant 0 : index
    %c0_0 = arith.constant 0 : index
    %c0_1 = arith.constant 0 : index
    %0 = vector.load %arg1[%c0, %c0_0, %c0_1] : memref<2x4x512xbf16, #tpu.memory_space<vmem>>, vector<2x4x512xbf16>
    %1 = arith.extf %0 : vector<2x4x512xbf16> to vector<2x4x512xf32>
    %cst = arith.constant dense<0.000000e+00> : vector<2x512xf32>
    %2 = vector.multi_reduction <add>, %1, %cst [1] : vector<2x4x512xf32> to vector<2x512xf32>
    %cst_2 = arith.constant 4.000000e+00 : f32
    %3 = vector.broadcast %cst_2 : f32 to vector<2x512xf32>
    %4 = arith.divf %2, %3 : vector<2x512xf32>
    %5 = arith.truncf %4 : vector<2x512xf32> to vector<2x512xbf16>
    %c0_3 = arith.constant 0 : index
    %c0_4 = arith.constant 0 : index
    %6 = vector.load %arg2[%c0_3, %c0_4] : memref<512x128xbf16, #tpu.memory_space<vmem>>, vector<512x128xbf16>
    %cst_5 = arith.constant dense<0.000000e+00> : vector<2x128xf32>
    %7 = tpu.matmul %5, %6, %cst_5 {dimension_numbers = #tpu.dot_dimension_numbers<[1], [0], [0], [1], [0, 0, 1, 1], [], []>} : vector<2x512xbf16>, vector<512x128xbf16>, vector<2x128xf32> -> vector<2x128xf32>
    %c0_6 = arith.constant 0 : index
    %c0_7 = arith.constant 0 : index
    %8 = vector.load %arg3[%c0_6, %c0_7] : memref<1x128xf32, #tpu.memory_space<vmem>>, vector<1x128xf32>
    %9 = vector.broadcast %8 : vector<1x128xf32> to vector<2x128xf32>
    %10 = arith.addf %7, %9 : vector<2x128xf32>
    %cst_8 = arith.constant 0.000000e+00 : f32
    %11 = vector.broadcast %cst_8 : f32 to vector<2x128xf32>
    %12 = arith.maximumf %10, %11 : vector<2x128xf32>
    %13 = arith.truncf %12 : vector<2x128xf32> to vector<2x128xbf16>
    %c0_9 = arith.constant 0 : index
    %c0_10 = arith.constant 0 : index
    %14 = vector.load %arg4[%c0_9, %c0_10] : memref<128x10xbf16, #tpu.memory_space<vmem>>, vector<128x10xbf16>
    %cst_11 = arith.constant dense<0.000000e+00> : vector<2x10xf32>
    %15 = tpu.matmul %13, %14, %cst_11 {dimension_numbers = #tpu.dot_dimension_numbers<[1], [0], [0], [1], [0, 0, 1, 1], [], []>} : vector<2x128xbf16>, vector<128x10xbf16>, vector<2x10xf32> -> vector<2x10xf32>
    %c0_12 = arith.constant 0 : index
    %c0_13 = arith.constant 0 : index
    %16 = vector.load %arg5[%c0_12, %c0_13] : memref<1x10xf32, #tpu.memory_space<vmem>>, vector<1x10xf32>
    %17 = vector.broadcast %16 : vector<1x10xf32> to vector<2x10xf32>
    %18 = arith.addf %15, %17 : vector<2x10xf32>
    %c0_14 = arith.constant 0 : index
    %c0_15 = arith.constant 0 : index
    %19 = vector.load %arg6[%c0_14, %c0_15] : memref<2x10xf32, #tpu.memory_space<vmem>>, vector<2x10xf32>
    tpu.vector_store %arg6[%c0_14, %c0_15], %18 {strides = array<i32>} : memref<2x10xf32, #tpu.memory_space<vmem>>, vector<2x10xf32>,
    return
  }
  func.func @transform_0(%arg0: i32) -> (i32, i32, i32) {
    %c0_i32 = arith.constant 0 : i32
    %c0_i32_0 = arith.constant 0 : i32
    %c0_i32_1 = arith.constant 0 : i32
    %c0_i32_2 = arith.constant 0 : i32
    return %c0_i32, %c0_i32_0, %c0_i32_1 : i32, i32, i32
  }
  func.func @transform_1(%arg0: i32) -> (i32, i32) {
    %c0_i32 = arith.constant 0 : i32
    %c0_i32_0 = arith.constant 0 : i32
    %c0_i32_1 = arith.constant 0 : i32
    return %c0_i32, %c0_i32_0 : i32, i32
  }
  func.func @transform_2(%arg0: i32) -> (i32, i32) {
    %c0_i32 = arith.constant 0 : i32
    %c0_i32_0 = arith.constant 0 : i32
    %c0_i32_1 = arith.constant 0 : i32
    return %c0_i32, %c0_i32_0 : i32, i32
  }
  func.func @transform_3(%arg0: i32) -> (i32, i32) {
    %c0_i32 = arith.constant 0 : i32
    %c0_i32_0 = arith.constant 0 : i32
    %c0_i32_1 = arith.constant 0 : i32
    return %c0_i32, %c0_i32_0 : i32, i32
  }
  func.func @transform_4(%arg0: i32) -> (i32, i32) {
    %c0_i32 = arith.constant 0 : i32
    %c0_i32_0 = arith.constant 0 : i32
    %c0_i32_1 = arith.constant 0 : i32
    return %c0_i32, %c0_i32_0 : i32, i32
  }
  func.func @transform_5(%arg0: i32) -> (i32, i32) {
    %c0_i32 = arith.constant 0 : i32
    %c0_i32_0 = arith.constant 0 : i32
    %c0_i32_1 = arith.constant 0 : i32
    return %c0_i32, %c0_i32_0 : i32, i32
  }
}

</mosaic_0001>

<bundles_post_ra>
// kernel: my_resnet_forward.22
= control target key start
LH: loop header
LB: loop body
LE: loop exit
PB: predicated region body
PF: predicated region fallthrough
CT: control target
= control target key end

     0   :  { %s1334_s12 = smov 0   ;;  %s1336_s13 = smov 0   ;;  %s1554_s0 = inlined_call_operand.vmem [shape: bf16[2048,152], index: 0, kind: input, shape index: {}]   ;;  %s1555_s1 = inlined_call_operand.vmem [shape: bf16[152,64], index: 1, kind: input, shape index: {}]   ;;  %s1556_s2 = inlined_call_operand.vmem [shape: f32[1,64], index: 2, kind: input, shape index: {}]   ;;  %s1557_s3 = inlined_call_operand.vmem [shape: bf16[2048,64], index: 3, kind: output, shape index: {}]  }
   0x1   :  { %s1338_s14 = smov 0  }
   0x2 LB: > { %s32_s15 = sadd.s32 1, %s1307_s13  ;;  %p1054_p0 = scmp.ge.s32.totalorder %s1311_s14, 1  ;;  %s1311_s14 = sphi %s1338_s14, %s13_s14   ;;  %s1307_s13 = sphi %s1336_s13, %s1559_s13   ;;  %s1303_s12 = sphi %s1334_s12, %s1558_s12  }
   0x3   : > { %p34_p1 = scmp.ge.s32.totalorder %s32_s15, 8  ;;  %p191_p2 = scmp.lt.s32.totalorder %s1311_s14, 9 }
   0x5   : > { %s1561_s15 = smov (%p34_p1, %s32_s15), 0  ;;  %p192_p3 = pnand %p1054_p0, %p191_p2 }
   0x6   : > { %v1231_v0 = vld [vmem:[%s1555_s1] sm:$0xff] (!%p192_p3)   ;;  %v1313_v1 = vmov (!%p192_p3), 0   ;;  %v1232_v2 = vld [vmem:[%s1555_s1 + $0x8] sm:$0xff] (!%p192_p3)   ;;  %s1055_s20 = sshll.u32 (!%p192_p3), %s1303_s12, 5  ;;  %v1233_v3 = vld [vmem:[%s1555_s1 + $0x10] sm:$0xff] (!%p192_p3)   ;;  %vm527_vm0 = vcmask (!%p192_p3), 195584  }
   0x7   : > { %195 = sbr.rel (%p192_p3) target bundleno = 324 (0x144), region = 32  ;;  %580 = vmatprep.subr.bf16.mxu0 (!%p192_p3), %v1313_v1  ;;  %1186 = vmatprep.subr.bf16.mxu1 (!%p192_p3), %v1313_v1  ;;  %p236_p4 = scmp.lt.s32.totalorder (!%p192_p3), %s1055_s20, 255  ;;  %v1234_v4 = vld [vmem:[%s1555_s1 + $0x18] sm:$0xff] (!%p192_p3)   ;;  %v1235_v7 = vld [vmem:[%s1555_s1 + $0x20] sm:$0xff] (!%p192_p3)   ;;  %v1236_v8 = vld [vmem:[%s1555_s1 + $0x28] sm:$0xff] (!%p192_p3)   ;;  %vm576_vm1 = vcmask (!%p192_p3), 1043456  }
   0x8   : > { %581 = vmatpush1.bf16.msra.mxu0 (!%p192_p3), %v1231_v0  ;;  %1196 = vmatpush1.bf16.msra.mxu1 (!%p192_p3), %v1231_v0  ;;  %v1237_v9 = vld [vmem:[%s1555_s1 + $0x30] sm:$0xff] (!%p192_p3)   ;;  %v1238_v10 = vld [vmem:[%s1555_s1 + $0x38] sm:$0xff] (!%p192_p3)   ;;  %v1239_v11 = vld [vmem:[%s1555_s1 + $0x40] sm:$0xff] (!%p192_p3)   ;;  %vm901_vm2 = vcmask (!%p192_p3), 519168  }
   0x9   : > { %582 = vmatprep.subr.bf16.mxu0 (!%p192_p3), %v1313_v1  ;;  %1187 = vmatprep.subr.bf16.mxu1 (!%p192_p3), %v1313_v1  ;;  %v1240_v12 = vld [vmem:[%s1555_s1 + $0x48] ss:$0 sps:$4 sm:$0xff] (!%p192_p3)   ;;  %v1441_v44 = vld [vmem:[%s1556_s2] ss:$0 sm:$0xff] (!%p192_p3) }
   0xa   : > { %v578_v13 = vsel (!%p192_p3), %vm576_vm1, %v1240_v12, 0 }
   0xc   : > { %583 = vmatpush1.bf16.msra.mxu0 (!%p192_p3), %v1232_v2  ;;  %1197 = vmatpush1.bf16.msra.mxu1 (!%p192_p3), %v1232_v2 }
   0xd   : > { %584 = vmatprep.subr.bf16.mxu0 (!%p192_p3), %v1313_v1  ;;  %1188 = vmatprep.subr.bf16.mxu1 (!%p192_p3), %v1313_v1 }
   0xe   : > { %s1563_s20 = smov (!%p236_p4, %s1055_s20), 255 }
   0xf   : > { %s1153_s23 = sshll.u32 %s1563_s20, 3  ;;  %s1059_s19 = sshll.u32 %s1563_s20, 2 }
  0x10   : > { %s1367_s26 = scalar_lea.vmem %s1554_s0, %s1153_s23  ;;  %585 = vmatpush1.bf16.msra.mxu0 %v1233_v3  ;;  %1198 = vmatpush1.bf16.msra.mxu1 %v1233_v3  ;;  %s1451_s20 = scalar_lea.vmem %s1557_s3, %s1059_s19 }
  0x11   : > { %v1243_v5 = vld [vmem:[%s1367_s26 + $0x4] ss:$8 sps:$4 sm:$0xff]   ;;  %586 = vmatprep.subr.bf16.mxu0 %v1313_v1  ;;  %1189 = vmatprep.subr.bf16.mxu1 %v1313_v1  ;;  %v1241_v14 = vld [vmem:[%s1367_s26] ss:$8 sps:$4 sm:$0xff]   ;;  %v1247_v16 = vld [vmem:[%s1367_s26 + $0x14] ss:$8 sps:$4 sm:$0xff]  }
  0x12   : > { %1103 = vmatprep.mubr.msk.bf16.mxu0 %vm527_vm0, %v1243_v5  ;;  %v1246_v6 = vld [vmem:[%s1367_s26 + $0x84] ss:$8 sps:$4 sm:$0xff]   ;;  %v1244_v15 = vld [vmem:[%s1367_s26 + $0x80] ss:$8 sps:$4 sm:$0xff]   ;;  %v1249_v17 = vld [vmem:[%s1367_s26 + $0x94] ss:$8 sps:$4 sm:$0xff]  }
  0x13   : > { %1111 = vmatprep.mubr.msk.bf16.mxu1 %vm527_vm0, %v1246_v6  ;;  %v1251_v18 = vld [vmem:[%s1367_s26 + $0x10] ss:$8 sps:$4 sm:$0xff]   ;;  %v1253_v20 = vld [vmem:[%s1367_s26 + $0x24] ss:$8 sps:$4 sm:$0xff]   ;;  %v1257_v22 = vld [vmem:[%s1367_s26 + $0x20] ss:$8 sps:$4 sm:$0xff]  }
  0x14   : > { %587 = vmatpush1.bf16.msra.mxu0 %v1234_v4  ;;  %1199 = vmatpush1.bf16.msra.mxu1 %v1234_v4  ;;  %v1252_v19 = vld [vmem:[%s1367_s26 + $0x90] ss:$8 sps:$4 sm:$0xff]   ;;  %v1255_v21 = vld [vmem:[%s1367_s26 + $0xa4] ss:$8 sps:$4 sm:$0xff]   ;;  %v1258_v23 = vld [vmem:[%s1367_s26 + $0xa0] ss:$8 sps:$4 sm:$0xff]  }
  0x15   : > { %588 = vmatprep.subr.bf16.mxu0 %v1313_v1  ;;  %1190 = vmatprep.subr.bf16.mxu1 %v1313_v1  ;;  %v1259_v24 = vld [vmem:[%s1367_s26 + $0x34] ss:$8 sps:$4 sm:$0xff]   ;;  %v1263_v26 = vld [vmem:[%s1367_s26 + $0x30] ss:$8 sps:$4 sm:$0xff]   ;;  %v1265_v28 = vld [vmem:[%s1367_s26 + $0x44] ss:$8 sps:$4 sm:$0xff]  }
  0x16   : > { %v1261_v25 = vld [vmem:[%s1367_s26 + $0xb4] ss:$8 sps:$4 sm:$0xff]   ;;  %v1264_v27 = vld [vmem:[%s1367_s26 + $0xb0] ss:$8 sps:$4 sm:$0xff]   ;;  %v1267_v29 = vld [vmem:[%s1367_s26 + $0xc4] ss:$8 sps:$4 sm:$0xff]  }
  0x17   : > { %v1269_v30 = vld [vmem:[%s1367_s26 + $0x40] ss:$8 sps:$4 sm:$0xff]   ;;  %v1271_v32 = vld [vmem:[%s1367_s26 + $0x54] ss:$8 sps:$4 sm:$0xff]   ;;  %v1275_v34 = vld [vmem:[%s1367_s26 + $0x50] ss:$8 sps:$4 sm:$0xff]  }
  0x18   : > { %589 = vmatpush1.bf16.msra.mxu0 %v1235_v7  ;;  %1200 = vmatpush1.bf16.msra.mxu1 %v1235_v7  ;;  %v1270_v31 = vld [vmem:[%s1367_s26 + $0xc0] ss:$8 sps:$4 sm:$0xff]   ;;  %v1273_v33 = vld [vmem:[%s1367_s26 + $0xd4] ss:$8 sps:$4 sm:$0xff]   ;;  %v1276_v35 = vld [vmem:[%s1367_s26 + $0xd0] ss:$8 sps:$4 sm:$0xff]  }
  0x19   : > { %590 = vmatprep.subr.bf16.mxu0 %v1313_v1  ;;  %1191 = vmatprep.subr.bf16.mxu1 %v1313_v1  ;;  %v1277_v36 = vld [vmem:[%s1367_s26 + $0x64] ss:$8 sps:$4 sm:$0xff]   ;;  %v1281_v38 = vld [vmem:[%s1367_s26 + $0x60] ss:$8 sps:$4 sm:$0xff]   ;;  %v1283_v40 = vld [vmem:[%s1367_s26 + $0x74] ss:$8 sps:$4 sm:$0xff]  }
  0x1a   : > { %v1279_v37 = vld [vmem:[%s1367_s26 + $0xe4] ss:$8 sps:$4 sm:$0xff]   ;;  %v1282_v39 = vld [vmem:[%s1367_s26 + $0xe0] ss:$8 sps:$4 sm:$0xff]   ;;  %v1285_v41 = vld [vmem:[%s1367_s26 + $0xf4] ss:$8 sps:$4 sm:$0xff]  }
  0x1b   : > { %v1287_v42 = vld [vmem:[%s1367_s26 + $0x70] ss:$8 sps:$4 sm:$0xff]  }
  0x1c   : > { %591 = vmatpush1.bf16.msra.mxu0 %v1236_v8  ;;  %1201 = vmatpush1.bf16.msra.mxu1 %v1236_v8  ;;  %v1288_v43 = vld [vmem:[%s1367_s26 + $0xf0] ss:$8 sps:$4 sm:$0xff]  }
  0x1d   : > { %592 = vmatprep.subr.bf16.mxu0 %v1313_v1  ;;  %1192 = vmatprep.subr.bf16.mxu1 %v1313_v1 }
  0x20   : > { %593 = vmatpush1.bf16.msra.mxu0 %v1237_v9  ;;  %1202 = vmatpush1.bf16.msra.mxu1 %v1237_v9 }
  0x21   : > { %594 = vmatprep.subr.bf16.mxu0 %v1313_v1  ;;  %1193 = vmatprep.subr.bf16.mxu1 %v1313_v1 }
  0x24   : > { %595 = vmatpush1.bf16.msra.mxu0 %v1238_v10  ;;  %1203 = vmatpush1.bf16.msra.mxu1 %v1238_v10 }
  0x25   : > { %596 = vmatprep.subr.bf16.mxu0 %v1313_v1  ;;  %1194 = vmatprep.subr.bf16.mxu1 %v1313_v1 }
  0x28   : > { %597 = vmatpush1.bf16.msra.mxu0 %v1239_v11  ;;  %1204 = vmatpush1.bf16.msra.mxu1 %v1239_v11 }
  0x29   : > { %598 = vmatprep.subr.bf16.mxu0 %v1313_v1  ;;  %1195 = vmatprep.subr.bf16.mxu1 %v1313_v1 }
  0x2c   : > { %599 = vmatpush1.bf16.msra.mxu0 %v578_v13  ;;  %1205 = vmatpush1.bf16.msra.mxu1 %v578_v13 }
  0x2f   : > { %613 = vmatmul.mubr.bf16.vlgmr.msra.gmra.mrb[0].mxu0 %v1241_v14  ;;  %677 = vmatmul.mubr.bf16.vlgmr.msra.gmra.mrb[0].mxu1 %v1244_v15 }
  0x30   : > { %1104 = vmatprep.mubr.msk.bf16.mxu0 %vm527_vm0, %v1247_v16  ;;  %1112 = vmatprep.mubr.msk.bf16.mxu1 %vm527_vm0, %v1249_v17 }
  0x37   : > { %621 = vmatmul.mubr.bf16.gmra.mrb[4].mxu0 %v1251_v18  ;;  %685 = vmatmul.mubr.bf16.gmra.mrb[4].mxu1 %v1252_v19 }
  0x38   : > { %1105 = vmatprep.mubr.msk.bf16.mxu0 %vm527_vm0, %v1253_v20  ;;  %1113 = vmatprep.mubr.msk.bf16.mxu1 %vm527_vm0, %v1255_v21 }
  0x3f   : > { %629 = vmatmul.mubr.bf16.gmra.mrb[8].mxu0 %v1257_v22  ;;  %693 = vmatmul.mubr.bf16.gmra.mrb[8].mxu1 %v1258_v23 }
  0x40   : > { %1106 = vmatprep.mubr.msk.bf16.mxu0 %vm527_vm0, %v1259_v24  ;;  %1114 = vmatprep.mubr.msk.bf16.mxu1 %vm527_vm0, %v1261_v25 }
  0x47   : > { %637 = vmatmul.mubr.bf16.gmra.mrb[12].mxu0 %v1263_v26  ;;  %701 = vmatmul.mubr.bf16.gmra.mrb[12].mxu1 %v1264_v27 }
  0x48   : > { %1107 = vmatprep.mubr.msk.bf16.mxu0 %vm527_vm0, %v1265_v28  ;;  %1115 = vmatprep.mubr.msk.bf16.mxu1 %vm527_vm0, %v1267_v29 }
  0x4f   : > { %645 = vmatmul.mubr.bf16.gmra.mrb[16].mxu0 %v1269_v30  ;;  %709 = vmatmul.mubr.bf16.gmra.mrb[16].mxu1 %v1270_v31 }
  0x50   : > { %1108 = vmatprep.mubr.msk.bf16.mxu0 %vm527_vm0, %v1271_v32  ;;  %1116 = vmatprep.mubr.msk.bf16.mxu1 %vm527_vm0, %v1273_v33 }
  0x57   : > { %653 = vmatmul.mubr.bf16.gmra.mrb[20].mxu0 %v1275_v34  ;;  %717 = vmatmul.mubr.bf16.gmra.mrb[20].mxu1 %v1276_v35 }
  0x58   : > { %1109 = vmatprep.mubr.msk.bf16.mxu0 %vm527_vm0, %v1277_v36  ;;  %1117 = vmatprep.mubr.msk.bf16.mxu1 %vm527_vm0, %v1279_v37 }
  0x5f   : > { %661 = vmatmul.mubr.bf16.gmra.mrb[24].mxu0 %v1281_v38  ;;  %725 = vmatmul.mubr.bf16.gmra.mrb[24].mxu1 %v1282_v39 }
  0x60   : > { %1110 = vmatprep.mubr.msk.bf16.mxu0 %vm527_vm0, %v1283_v40  ;;  %1118 = vmatprep.mubr.msk.bf16.mxu1 %vm527_vm0, %v1285_v41 }
  0x67   : > { %669 = vmatmul.mubr.bf16.gmra.mrb[28].mxu0 %v1287_v42  ;;  %733 = vmatmul.mubr.bf16.gmra.mrb[28].mxu1 %v1288_v43 }
 0x102   : > { %v614_v45 = vpop.f32.mrb[0].mxu0  ;;  %v678_v46 = vpop.f32.mrb[0].mxu1 }
 0x103   : > { %v615_v47 = vadd.f32 %v1441_v44, %v614_v45  ;;  %v679_v48 = vadd.f32 %v1441_v44, %v678_v46  ;;  %v616_v49 = vpop.f32.mrb[1].mxu0  ;;  %v680_v50 = vpop.f32.mrb[1].mxu1 }
 0x104   : > { %v617_v51 = vpop.f32.mrb[2].mxu0  ;;  %v681_v52 = vpop.f32.mrb[2].mxu1 }
 0x105   : > { %v741_v53 = vmax.f32 %v615_v47, 0.0  ;;  %v757_v54 = vmax.f32 %v679_v48, 0.0  ;;  %v618_v55 = vadd.f32 %v1441_v44, %v617_v51  ;;  %v682_v56 = vadd.f32 %v1441_v44, %v681_v52  ;;  %v619_v57 = vpop.f32.mrb[3].mxu0  ;;  %v683_v58 = vpop.f32.mrb[3].mxu1 }
 0x107   : > { %v1154_v59 = vpack.c.bf16 %v741_v53, %v741_v53  ;;  %v1170_v60 = vpack.c.bf16 %v757_v54, %v757_v54  ;;  %v742_v61 = vmax.f32 %v618_v55, 0.0  ;;  %v758_v62 = vmax.f32 %v682_v56, 0.0 }
 0x109   : > { %902 = vst.msk [vmem:[%s1451_s20] sm:$0xf] %vm901_vm2, %v1154_v59  ;;  %918 = vst.msk [vmem:[%s1451_s20 + $0x40] sm:$0xf] %vm901_vm2, %v1170_v60  ;;  %v1155_v63 = vpack.c.bf16 %v742_v61, %v742_v61  ;;  %v1171_v0 = vpack.c.bf16 %v758_v62, %v758_v62 }
 0x10a   : > { %v622_v1 = vpop.f32.mrb[4].mxu0  ;;  %v686_v2 = vpop.f32.mrb[4].mxu1 }
 0x10b   : > { %903 = vst.msk [vmem:[%s1451_s20 + $0x4] sm:$0xf] %vm901_vm2, %v1155_v63  ;;  %919 = vst.msk [vmem:[%s1451_s20 + $0x44] sm:$0xf] %vm901_vm2, %v1171_v0  ;;  %v623_v3 = vadd.f32 %v1441_v44, %v622_v1  ;;  %v687_v4 = vadd.f32 %v1441_v44, %v686_v2  ;;  %v624_v5 = vpop.f32.mrb[5].mxu0  ;;  %v688_v6 = vpop.f32.mrb[5].mxu1 }
 0x10c   : > { %v625_v7 = vpop.f32.mrb[6].mxu0  ;;  %v689_v8 = vpop.f32.mrb[6].mxu1 }
 0x10d   : > { %v743_v9 = vmax.f32 %v623_v3, 0.0  ;;  %v759_v10 = vmax.f32 %v687_v4, 0.0  ;;  %v626_v11 = vadd.f32 %v1441_v44, %v625_v7  ;;  %v690_v12 = vadd.f32 %v1441_v44, %v689_v8  ;;  %v627_v13 = vpop.f32.mrb[7].mxu0  ;;  %v691_v14 = vpop.f32.mrb[7].mxu1 }
 0x10f   : > { %v1156_v15 = vpack.c.bf16 %v743_v9, %v743_v9  ;;  %v1172_v16 = vpack.c.bf16 %v759_v10, %v759_v10  ;;  %v744_v17 = vmax.f32 %v626_v11, 0.0  ;;  %v760_v18 = vmax.f32 %v690_v12, 0.0 }
 0x111   : > { %904 = vst.msk [vmem:[%s1451_s20 + $0x8] sm:$0xf] %vm901_vm2, %v1156_v15  ;;  %920 = vst.msk [vmem:[%s1451_s20 + $0x48] sm:$0xf] %vm901_vm2, %v1172_v16  ;;  %v1157_v19 = vpack.c.bf16 %v744_v17, %v744_v17  ;;  %v1173_v20 = vpack.c.bf16 %v760_v18, %v760_v18 }
 0x112   : > { %v630_v21 = vpop.f32.mrb[8].mxu0  ;;  %v694_v22 = vpop.f32.mrb[8].mxu1 }
 0x113   : > { %905 = vst.msk [vmem:[%s1451_s20 + $0xc] sm:$0xf] %vm901_vm2, %v1157_v19  ;;  %921 = vst.msk [vmem:[%s1451_s20 + $0x4c] sm:$0xf] %vm901_vm2, %v1173_v20  ;;  %v631_v23 = vadd.f32 %v1441_v44, %v630_v21  ;;  %v695_v24 = vadd.f32 %v1441_v44, %v694_v22  ;;  %v632_v25 = vpop.f32.mrb[9].mxu0  ;;  %v696_v26 = vpop.f32.mrb[9].mxu1 }
 0x114   : > { %v633_v27 = vpop.f32.mrb[10].mxu0  ;;  %v697_v28 = vpop.f32.mrb[10].mxu1 }
 0x115   : > { %v745_v29 = vmax.f32 %v631_v23, 0.0  ;;  %v761_v30 = vmax.f32 %v695_v24, 0.0  ;;  %v634_v31 = vadd.f32 %v1441_v44, %v633_v27  ;;  %v698_v32 = vadd.f32 %v1441_v44, %v697_v28  ;;  %v635_v33 = vpop.f32.mrb[11].mxu0  ;;  %v699_v34 = vpop.f32.mrb[11].mxu1 }
 0x117   : > { %v1158_v35 = vpack.c.bf16 %v745_v29, %v745_v29  ;;  %v1174_v36 = vpack.c.bf16 %v761_v30, %v761_v30  ;;  %v746_v37 = vmax.f32 %v634_v31, 0.0  ;;  %v762_v38 = vmax.f32 %v698_v32, 0.0 }
 0x119   : > { %906 = vst.msk [vmem:[%s1451_s20 + $0x10] sm:$0xf] %vm901_vm2, %v1158_v35  ;;  %922 = vst.msk [vmem:[%s1451_s20 + $0x50] sm:$0xf] %vm901_vm2, %v1174_v36  ;;  %v1159_v39 = vpack.c.bf16 %v746_v37, %v746_v37  ;;  %v1175_v40 = vpack.c.bf16 %v762_v38, %v762_v38 }
 0x11a   : > { %v638_v41 = vpop.f32.mrb[12].mxu0  ;;  %v702_v42 = vpop.f32.mrb[12].mxu1 }
 0x11b   : > { %907 = vst.msk [vmem:[%s1451_s20 + $0x14] sm:$0xf] %vm901_vm2, %v1159_v39  ;;  %923 = vst.msk [vmem:[%s1451_s20 + $0x54] sm:$0xf] %vm901_vm2, %v1175_v40  ;;  %v639_v43 = vadd.f32 %v1441_v44, %v638_v41  ;;  %v703_v45 = vadd.f32 %v1441_v44, %v702_v42  ;;  %v640_v46 = vpop.f32.mrb[13].mxu0  ;;  %v704_v47 = vpop.f32.mrb[13].mxu1 }
 0x11c   : > { %v641_v48 = vpop.f32.mrb[14].mxu0  ;;  %v705_v49 = vpop.f32.mrb[14].mxu1 }
 0x11d   : > { %v747_v50 = vmax.f32 %v639_v43, 0.0  ;;  %v763_v51 = vmax.f32 %v703_v45, 0.0  ;;  %v642_v52 = vadd.f32 %v1441_v44, %v641_v48  ;;  %v706_v53 = vadd.f32 %v1441_v44, %v705_v49  ;;  %v643_v54 = vpop.f32.mrb[15].mxu0  ;;  %v707_v55 = vpop.f32.mrb[15].mxu1 }
 0x11f   : > { %v1160_v56 = vpack.c.bf16 %v747_v50, %v747_v50  ;;  %v1176_v57 = vpack.c.bf16 %v763_v51, %v763_v51  ;;  %v748_v58 = vmax.f32 %v642_v52, 0.0  ;;  %v764_v59 = vmax.f32 %v706_v53, 0.0 }
 0x121   : > { %908 = vst.msk [vmem:[%s1451_s20 + $0x18] sm:$0xf] %vm901_vm2, %v1160_v56  ;;  %924 = vst.msk [vmem:[%s1451_s20 + $0x58] sm:$0xf] %vm901_vm2, %v1176_v57  ;;  %v1161_v60 = vpack.c.bf16 %v748_v58, %v748_v58  ;;  %v1177_v61 = vpack.c.bf16 %v764_v59, %v764_v59 }
 0x122   : > { %v646_v62 = vpop.f32.mrb[16].mxu0  ;;  %v710_v63 = vpop.f32.mrb[16].mxu1 }
 0x123   : > { %909 = vst.msk [vmem:[%s1451_s20 + $0x1c] sm:$0xf] %vm901_vm2, %v1161_v60  ;;  %925 = vst.msk [vmem:[%s1451_s20 + $0x5c] sm:$0xf] %vm901_vm2, %v1177_v61  ;;  %v647_v0 = vadd.f32 %v1441_v44, %v646_v62  ;;  %v711_v1 = vadd.f32 %v1441_v44, %v710_v63  ;;  %v648_v2 = vpop.f32.mrb[17].mxu0  ;;  %v712_v3 = vpop.f32.mrb[17].mxu1 }
 0x124   : > { %v649_v4 = vpop.f32.mrb[18].mxu0  ;;  %v713_v5 = vpop.f32.mrb[18].mxu1 }
 0x125   : > { %v749_v6 = vmax.f32 %v647_v0, 0.0  ;;  %v765_v7 = vmax.f32 %v711_v1, 0.0  ;;  %v650_v8 = vadd.f32 %v1441_v44, %v649_v4  ;;  %v714_v9 = vadd.f32 %v1441_v44, %v713_v5  ;;  %v651_v10 = vpop.f32.mrb[19].mxu0  ;;  %v715_v11 = vpop.f32.mrb[19].mxu1 }
 0x127   : > { %v1162_v12 = vpack.c.bf16 %v749_v6, %v749_v6  ;;  %v1178_v13 = vpack.c.bf16 %v765_v7, %v765_v7  ;;  %v750_v14 = vmax.f32 %v650_v8, 0.0  ;;  %v766_v15 = vmax.f32 %v714_v9, 0.0 }
 0x129   : > { %910 = vst.msk [vmem:[%s1451_s20 + $0x20] sm:$0xf] %vm901_vm2, %v1162_v12  ;;  %926 = vst.msk [vmem:[%s1451_s20 + $0x60] sm:$0xf] %vm901_vm2, %v1178_v13  ;;  %v1163_v16 = vpack.c.bf16 %v750_v14, %v750_v14  ;;  %v1179_v17 = vpack.c.bf16 %v766_v15, %v766_v15 }
 0x12a   : > { %v654_v18 = vpop.f32.mrb[20].mxu0  ;;  %v718_v19 = vpop.f32.mrb[20].mxu1 }
 0x12b   : > { %911 = vst.msk [vmem:[%s1451_s20 + $0x24] sm:$0xf] %vm901_vm2, %v1163_v16  ;;  %927 = vst.msk [vmem:[%s1451_s20 + $0x64] sm:$0xf] %vm901_vm2, %v1179_v17  ;;  %v655_v20 = vadd.f32 %v1441_v44, %v654_v18  ;;  %v719_v21 = vadd.f32 %v1441_v44, %v718_v19  ;;  %v656_v22 = vpop.f32.mrb[21].mxu0  ;;  %v720_v23 = vpop.f32.mrb[21].mxu1 }
 0x12c   : > { %v657_v24 = vpop.f32.mrb[22].mxu0  ;;  %v721_v25 = vpop.f32.mrb[22].mxu1 }
 0x12d   : > { %v751_v26 = vmax.f32 %v655_v20, 0.0  ;;  %v767_v27 = vmax.f32 %v719_v21, 0.0  ;;  %v658_v28 = vadd.f32 %v1441_v44, %v657_v24  ;;  %v722_v29 = vadd.f32 %v1441_v44, %v721_v25  ;;  %v659_v30 = vpop.f32.mrb[23].mxu0  ;;  %v723_v31 = vpop.f32.mrb[23].mxu1 }
 0x12f   : > { %v1164_v32 = vpack.c.bf16 %v751_v26, %v751_v26  ;;  %v1180_v33 = vpack.c.bf16 %v767_v27, %v767_v27  ;;  %v752_v34 = vmax.f32 %v658_v28, 0.0  ;;  %v768_v35 = vmax.f32 %v722_v29, 0.0 }
 0x131   : > { %912 = vst.msk [vmem:[%s1451_s20 + $0x28] sm:$0xf] %vm901_vm2, %v1164_v32  ;;  %928 = vst.msk [vmem:[%s1451_s20 + $0x68] sm:$0xf] %vm901_vm2, %v1180_v33  ;;  %v1165_v36 = vpack.c.bf16 %v752_v34, %v752_v34  ;;  %v1181_v37 = vpack.c.bf16 %v768_v35, %v768_v35 }
 0x132   : > { %v662_v38 = vpop.f32.mrb[24].mxu0  ;;  %v726_v39 = vpop.f32.mrb[24].mxu1 }
 0x133   : > { %913 = vst.msk [vmem:[%s1451_s20 + $0x2c] sm:$0xf] %vm901_vm2, %v1165_v36  ;;  %929 = vst.msk [vmem:[%s1451_s20 + $0x6c] sm:$0xf] %vm901_vm2, %v1181_v37  ;;  %v663_v40 = vadd.f32 %v1441_v44, %v662_v38  ;;  %v727_v41 = vadd.f32 %v1441_v44, %v726_v39  ;;  %v664_v42 = vpop.f32.mrb[25].mxu0  ;;  %v728_v43 = vpop.f32.mrb[25].mxu1 }
 0x134   : > { %v665_v45 = vpop.f32.mrb[26].mxu0  ;;  %v729_v46 = vpop.f32.mrb[26].mxu1 }
 0x135   : > { %v753_v47 = vmax.f32 %v663_v40, 0.0  ;;  %v769_v48 = vmax.f32 %v727_v41, 0.0  ;;  %v666_v49 = vadd.f32 %v1441_v44, %v665_v45  ;;  %v730_v50 = vadd.f32 %v1441_v44, %v729_v46  ;;  %v667_v51 = vpop.f32.mrb[27].mxu0  ;;  %v731_v52 = vpop.f32.mrb[27].mxu1 }
 0x137   : > { %v1166_v53 = vpack.c.bf16 %v753_v47, %v753_v47  ;;  %v1182_v54 = vpack.c.bf16 %v769_v48, %v769_v48  ;;  %v754_v55 = vmax.f32 %v666_v49, 0.0  ;;  %v770_v56 = vmax.f32 %v730_v50, 0.0 }
 0x139   : > { %914 = vst.msk [vmem:[%s1451_s20 + $0x30] sm:$0xf] %vm901_vm2, %v1166_v53  ;;  %930 = vst.msk [vmem:[%s1451_s20 + $0x70] sm:$0xf] %vm901_vm2, %v1182_v54  ;;  %v1167_v57 = vpack.c.bf16 %v754_v55, %v754_v55  ;;  %v1183_v58 = vpack.c.bf16 %v770_v56, %v770_v56 }
 0x13a   : > { %v670_v59 = vpop.f32.mrb[28].mxu0  ;;  %v734_v60 = vpop.f32.mrb[28].mxu1 }
 0x13b   : > { %915 = vst.msk [vmem:[%s1451_s20 + $0x34] sm:$0xf] %vm901_vm2, %v1167_v57  ;;  %931 = vst.msk [vmem:[%s1451_s20 + $0x74] sm:$0xf] %vm901_vm2, %v1183_v58  ;;  %v671_v61 = vadd.f32 %v1441_v44, %v670_v59  ;;  %v735_v62 = vadd.f32 %v1441_v44, %v734_v60  ;;  %v672_v63 = vpop.f32.mrb[29].mxu0  ;;  %v736_v0 = vpop.f32.mrb[29].mxu1 }
 0x13c   : > { %v673_v1 = vpop.f32.mrb[30].mxu0  ;;  %v737_v2 = vpop.f32.mrb[30].mxu1 }
 0x13d   : > { %v755_v3 = vmax.f32 %v671_v61, 0.0  ;;  %v771_v4 = vmax.f32 %v735_v62, 0.0  ;;  %v674_v5 = vadd.f32 %v1441_v44, %v673_v1  ;;  %v738_v6 = vadd.f32 %v1441_v44, %v737_v2  ;;  %v675_v7 = vpop.f32.mrb[31].mxu0  ;;  %v739_v8 = vpop.f32.mrb[31].mxu1 }
 0x13f   : > { %v1168_v9 = vpack.c.bf16 %v755_v3, %v755_v3  ;;  %v1184_v10 = vpack.c.bf16 %v771_v4, %v771_v4  ;;  %v756_v11 = vmax.f32 %v674_v5, 0.0  ;;  %v772_v12 = vmax.f32 %v738_v6, 0.0 }
 0x141   : > { %916 = vst.msk [vmem:[%s1451_s20 + $0x38] sm:$0xf] %vm901_vm2, %v1168_v9  ;;  %932 = vst.msk [vmem:[%s1451_s20 + $0x78] sm:$0xf] %vm901_vm2, %v1184_v10  ;;  %v1169_v13 = vpack.c.bf16 %v756_v11, %v756_v11  ;;  %v1185_v14 = vpack.c.bf16 %v772_v12, %v772_v12 }
 0x143   : > { %917 = vst.msk [vmem:[%s1451_s20 + $0x3c] sm:$0xf] %vm901_vm2, %v1169_v13  ;;  %933 = vst.msk [vmem:[%s1451_s20 + $0x7c] sm:$0xf] %vm901_vm2, %v1185_v14 }
 0x144 PF: > { %s13_s14 = sadd.s32 1, %s1311_s14   ;;  %s1558_s12 = smov %s1307_s13 }
 0x145   : > { %p10_p5 = scmp.ge.s32.totalorder %s13_s14, 10   ;;  %s1559_s13 = smov %s1561_s15 }
 0x147   :  { %12 = sbr.rel (!%p10_p5) target bundleno = 2 (0x2), region = 68 }

// kernel: my_resnet_forward.23
= control target key start
LH: loop header
LB: loop body
LE: loop exit
PB: predicated region body
PF: predicated region fallthrough
CT: control target
= control target key end

     0   :  { %s1334_s30 = smov 0   ;;  %s1759_s0 = inlined_call_operand.vmem [shape: bf16[512,64], index: 0, kind: input, shape index: {}]   ;;  %s1760_s1 = inlined_call_operand.vmem [shape: bf16[512,64], index: 1, kind: input, shape index: {}]   ;;  %s1761_s2 = inlined_call_operand.vmem [shape: bf16[512,64], index: 2, kind: input, shape index: {}]   ;;  %s1762_s3 = inlined_call_operand.vmem [shape: bf16[512,64], index: 3, kind: input, shape index: {}]   ;;  %s1763_s4 = inlined_call_operand.vmem [shape: bf16[512,64], index: 4, kind: input, shape index: {}]   ;;  %s1764_s5 = inlined_call_operand.vmem [shape: bf16[512,64], index: 5, kind: input, shape index: {}]   ;;  %s1765_s6 = inlined_call_operand.vmem [shape: bf16[512,64], index: 6, kind: input, shape index: {}]   ;;  %s1766_s7 = inlined_call_operand.vmem [shape: bf16[512,64], index: 7, kind: input, shape index: {}]   ;;  %s1767_s8 = inlined_call_operand.vmem [shape: bf16[512,64], index: 8, kind: input, shape index: {}]   ;;  %s1768_s9 = inlined_call_operand.vmem [shape: bf16[512,64], index: 9, kind: output, shape index: {}]  }
   0x1 LB: > { %s1241_s10 = sadd.s32 4294967295, %s1282_s30   ;;  %p1245_p0 = scmp.ge.s32.totalorder %s1282_s30, 1  ;;  %s1282_s30 = sphi %s1334_s30, %s19_s30  }
   0x2   : > { %p376_p1 = scmp.lt.s32.totalorder %s1282_s30, 3 }
   0x4   : > { %p377_p2 = pnand %p1245_p0, %p376_p1 }
   0x5   : > { %s1246_s11 = sshll.u32 (!%p377_p2), %s1241_s10, 5  ;;  %vm1056_vm0 = vcmask (!%p377_p2), 519168  }
   0x6   : > { %380 = sbr.rel (%p377_p2) target bundleno = 133 (0x85), region = 56  ;;  %p453_p3 = scmp.lt.s32.totalorder (!%p377_p2), %s1246_s11, 63 }
   0xd   : > { %s1770_s11 = smov (!%p453_p3, %s1246_s11), 63 }
   0xe   : > { %s1342_s12 = sshll.u32 %s1770_s11, 2 }
   0xf   : > { %s1348_s15 = scalar_lea.vmem %s1759_s0, %s1342_s12  ;;  %s1354_s18 = scalar_lea.vmem %s1760_s1, %s1342_s12 }
  0x10   : > { %s1360_s21 = scalar_lea.vmem %s1761_s2, %s1342_s12  ;;  %s1366_s24 = scalar_lea.vmem %s1762_s3, %s1342_s12  ;;  %v512_v0 = vld [vmem:[%s1348_s15] sm:$0xf]  ;;  %v513_v2 = vld [vmem:[%s1348_s15 + $0x4] sm:$0xf]  ;;  %v514_v17 = vld [vmem:[%s1348_s15 + $0x8] sm:$0xf] }
  0x11   : > { %v544_v1 = vld [vmem:[%s1354_s18] sm:$0xf]  ;;  %s1375_s27 = scalar_lea.vmem %s1763_s4, %s1342_s12  ;;  %v545_v5 = vld [vmem:[%s1354_s18 + $0x4] sm:$0xf]  ;;  %s1383_s10 = scalar_lea.vmem %s1764_s5, %s1342_s12  ;;  %v546_v18 = vld [vmem:[%s1354_s18 + $0x8] sm:$0xf] }
  0x12   : > { %v576_v3 = vmax.bf16 %v544_v1, %v512_v0  ;;  %v608_v4 = vld [vmem:[%s1360_s21] sm:$0xf]  ;;  %v577_v7 = vmax.bf16 %v545_v5, %v513_v2  ;;  %v609_v8 = vld [vmem:[%s1360_s21 + $0x4] sm:$0xf]  ;;  %s1393_s14 = scalar_lea.vmem %s1765_s6, %s1342_s12  ;;  %v610_v19 = vld [vmem:[%s1360_s21 + $0x8] sm:$0xf]  ;;  %s1404_s19 = scalar_lea.vmem %s1766_s7, %s1342_s12  ;;  %v578_v22 = vmax.bf16 %v546_v18, %v514_v17 }
  0x13   : > { %v672_v6 = vld [vmem:[%s1366_s24] sm:$0xf]  ;;  %v673_v10 = vld [vmem:[%s1366_s24 + $0x4] sm:$0xf]  ;;  %s1410_s23 = scalar_lea.vmem %s1767_s8, %s1342_s12  ;;  %v674_v26 = vld [vmem:[%s1366_s24 + $0x8] sm:$0xf]  ;;  %s1434_s28 = scalar_lea.vmem %s1768_s9, %s1342_s12 }
  0x14   : > { %v640_v9 = vmax.bf16 %v608_v4, %v576_v3  ;;  %v736_v11 = vld [vmem:[%s1375_s27] sm:$0xf]  ;;  %v641_v12 = vmax.bf16 %v609_v8, %v577_v7  ;;  %v737_v15 = vld [vmem:[%s1375_s27 + $0x4] sm:$0xf]  ;;  %v642_v28 = vmax.bf16 %v610_v19, %v578_v22  ;;  %v515_v29 = vld [vmem:[%s1348_s15 + $0xc] sm:$0xf] }
  0x15   : > { %v800_v14 = vld [vmem:[%s1383_s10] sm:$0xf]  ;;  %v801_v21 = vld [vmem:[%s1383_s10 + $0x4] sm:$0xf]  ;;  %v547_v30 = vld [vmem:[%s1354_s18 + $0xc] sm:$0xf] }
  0x16   : > { %v704_v13 = vmax.bf16 %v672_v6, %v640_v9  ;;  %v705_v16 = vmax.bf16 %v673_v10, %v641_v12  ;;  %v864_v23 = vld [vmem:[%s1393_s14] sm:$0xf]  ;;  %v865_v25 = vld [vmem:[%s1393_s14 + $0x4] sm:$0xf]  ;;  %v611_v31 = vld [vmem:[%s1360_s21 + $0xc] sm:$0xf]  ;;  %v579_v36 = vmax.bf16 %v547_v30, %v515_v29  ;;  %v706_v39 = vmax.bf16 %v674_v26, %v642_v28 }
  0x17   : > { %v928_v32 = vld [vmem:[%s1404_s19] sm:$0xf]  ;;  %v738_v35 = vld [vmem:[%s1375_s27 + $0x8] sm:$0xf]  ;;  %v929_v38 = vld [vmem:[%s1404_s19 + $0x4] sm:$0xf] }
  0x18   : > { %v768_v20 = vmax.bf16 %v736_v11, %v704_v13  ;;  %v769_v24 = vmax.bf16 %v737_v15, %v705_v16  ;;  %v992_v33 = vld [vmem:[%s1410_s23] sm:$0xf]  ;;  %v802_v40 = vld [vmem:[%s1383_s10 + $0x8] sm:$0xf]  ;;  %v675_v41 = vld [vmem:[%s1366_s24 + $0xc] sm:$0xf]  ;;  %v643_v43 = vmax.bf16 %v611_v31, %v579_v36  ;;  %v770_v49 = vmax.bf16 %v738_v35, %v706_v39 }
  0x19   : > { %v516_v44 = vld [vmem:[%s1348_s15 + $0x10] sm:$0xf]  ;;  %v993_v48 = vld [vmem:[%s1410_s23 + $0x4] sm:$0xf]  ;;  %v739_v50 = vld [vmem:[%s1375_s27 + $0xc] sm:$0xf] }
  0x1a   : > { %v832_v27 = vmax.bf16 %v800_v14, %v768_v20  ;;  %v833_v34 = vmax.bf16 %v801_v21, %v769_v24  ;;  %v548_v45 = vld [vmem:[%s1354_s18 + $0x10] sm:$0xf]  ;;  %v866_v53 = vld [vmem:[%s1393_s14 + $0x8] sm:$0xf]  ;;  %v707_v54 = vmax.bf16 %v675_v41, %v643_v43  ;;  %v803_v55 = vld [vmem:[%s1383_s10 + $0xc] sm:$0xf]  ;;  %v834_v58 = vmax.bf16 %v802_v40, %v770_v49 }
  0x1b   : > { %v612_v46 = vld [vmem:[%s1360_s21 + $0x10] sm:$0xf]  ;;  %v580_v51 = vmax.bf16 %v548_v45, %v516_v44  ;;  %v517_v60 = vld [vmem:[%s1348_s15 + $0x14] sm:$0xf]  ;;  %v930_v0 = vld [vmem:[%s1404_s19 + $0x8] sm:$0xf] }
  0x1c   : > { %v896_v37 = vmax.bf16 %v864_v23, %v832_v27  ;;  %v897_v42 = vmax.bf16 %v865_v25, %v833_v34  ;;  %v676_v56 = vld [vmem:[%s1366_s24 + $0x10] sm:$0xf]  ;;  %v549_v61 = vld [vmem:[%s1354_s18 + $0x14] sm:$0xf]  ;;  %v994_v1 = vld [vmem:[%s1410_s23 + $0x8] sm:$0xf]  ;;  %v771_v2 = vmax.bf16 %v739_v50, %v707_v54  ;;  %v898_v5 = vmax.bf16 %v866_v53, %v834_v58 }
  0x1d   : > { %v644_v59 = vmax.bf16 %v612_v46, %v580_v51  ;;  %v613_v62 = vld [vmem:[%s1360_s21 + $0x14] sm:$0xf]  ;;  %v740_v3 = vld [vmem:[%s1375_s27 + $0x10] sm:$0xf]  ;;  %v581_v4 = vmax.bf16 %v549_v61, %v517_v60  ;;  %v867_v6 = vld [vmem:[%s1393_s14 + $0xc] sm:$0xf] }
  0x1e   : > { %v960_v47 = vmax.bf16 %v928_v32, %v896_v37  ;;  %v961_v52 = vmax.bf16 %v929_v38, %v897_v42  ;;  %v804_v8 = vld [vmem:[%s1383_s10 + $0x10] sm:$0xf]  ;;  %v677_v9 = vld [vmem:[%s1366_s24 + $0x14] sm:$0xf]  ;;  %v835_v10 = vmax.bf16 %v803_v55, %v771_v2  ;;  %v518_v12 = vld [vmem:[%s1348_s15 + $0x18] sm:$0xf]  ;;  %v962_v15 = vmax.bf16 %v930_v0, %v898_v5 }
  0x1f   : > { %v708_v7 = vmax.bf16 %v676_v56, %v644_v59  ;;  %v645_v11 = vmax.bf16 %v613_v62, %v581_v4  ;;  %v550_v13 = vld [vmem:[%s1354_s18 + $0x18] sm:$0xf]  ;;  %v931_v16 = vld [vmem:[%s1404_s19 + $0xc] sm:$0xf]  ;;  %v741_v19 = vld [vmem:[%s1375_s27 + $0x14] sm:$0xf] }
  0x20   : > { %v1024_v57 = vmax.bf16 %v992_v33, %v960_v47  ;;  %v1025_v63 = vmax.bf16 %v993_v48, %v961_v52  ;;  %v614_v14 = vld [vmem:[%s1360_s21 + $0x18] sm:$0xf]  ;;  %v995_v17 = vld [vmem:[%s1410_s23 + $0xc] sm:$0xf]  ;;  %v582_v20 = vmax.bf16 %v550_v13, %v518_v12  ;;  %v899_v21 = vmax.bf16 %v867_v6, %v835_v10  ;;  %v868_v22 = vld [vmem:[%s1393_s14 + $0x10] sm:$0xf] }
  0x21   : > { %v772_v18 = vmax.bf16 %v740_v3, %v708_v7  ;;  %v709_v23 = vmax.bf16 %v677_v9, %v645_v11  ;;  %v805_v24 = vld [vmem:[%s1383_s10 + $0x14] sm:$0xf]  ;;  %v678_v25 = vld [vmem:[%s1366_s24 + $0x18] sm:$0xf]  ;;  %v1026_v26 = vmax.bf16 %v994_v1, %v962_v15  ;;  %v519_v29 = vld [vmem:[%s1348_s15 + $0x1c] sm:$0xf] }
  0x22   : > { %1057 = vst.msk [vmem:[%s1434_s28] sm:$0xf] %vm1056_vm0, %v1024_v57  ;;  %1058 = vst.msk [vmem:[%s1434_s28 + $0x4] sm:$0xf] %vm1056_vm0, %v1025_v63  ;;  %v646_v28 = vmax.bf16 %v614_v14, %v582_v20  ;;  %v551_v30 = vld [vmem:[%s1354_s18 + $0x1c] sm:$0xf]  ;;  %v963_v32 = vmax.bf16 %v931_v16, %v899_v21 }
  0x23   : > { %v836_v27 = vmax.bf16 %v804_v8, %v772_v18  ;;  %v615_v31 = vld [vmem:[%s1360_s21 + $0x1c] sm:$0xf]  ;;  %v932_v33 = vld [vmem:[%s1404_s19 + $0x10] sm:$0xf]  ;;  %v773_v35 = vmax.bf16 %v741_v19, %v709_v23  ;;  %v742_v36 = vld [vmem:[%s1375_s27 + $0x18] sm:$0xf]  ;;  %v583_v37 = vmax.bf16 %v551_v30, %v519_v29 }
  0x24   : > { %v996_v34 = vld [vmem:[%s1410_s23 + $0x10] sm:$0xf]  ;;  %1059 = vst.msk [vmem:[%s1434_s28 + $0x8] sm:$0xf] %vm1056_vm0, %v1026_v26  ;;  %v869_v39 = vld [vmem:[%s1393_s14 + $0x14] sm:$0xf]  ;;  %v710_v40 = vmax.bf16 %v678_v25, %v646_v28  ;;  %v1027_v43 = vmax.bf16 %v995_v17, %v963_v32 }
  0x25   : > { %v900_v38 = vmax.bf16 %v868_v22, %v836_v27  ;;  %v806_v41 = vld [vmem:[%s1383_s10 + $0x18] sm:$0xf]  ;;  %v679_v42 = vld [vmem:[%s1366_s24 + $0x1c] sm:$0xf]  ;;  %v837_v44 = vmax.bf16 %v805_v24, %v773_v35  ;;  %v647_v45 = vmax.bf16 %v615_v31, %v583_v37  ;;  %v520_v46 = vld [vmem:[%s1348_s15 + $0x20] sm:$0xf] }
  0x26   : > { %v552_v47 = vld [vmem:[%s1354_s18 + $0x20] sm:$0xf]  ;;  %v933_v50 = vld [vmem:[%s1404_s19 + $0x14] sm:$0xf]  ;;  %v774_v52 = vmax.bf16 %v742_v36, %v710_v40  ;;  %v743_v53 = vld [vmem:[%s1375_s27 + $0x1c] sm:$0xf] }
  0x27   : > { %v616_v48 = vld [vmem:[%s1360_s21 + $0x20] sm:$0xf]  ;;  %v964_v49 = vmax.bf16 %v932_v33, %v900_v38  ;;  %v997_v51 = vld [vmem:[%s1410_s23 + $0x14] sm:$0xf]  ;;  %v584_v54 = vmax.bf16 %v552_v47, %v520_v46  ;;  %1060 = vst.msk [vmem:[%s1434_s28 + $0xc] sm:$0xf] %vm1056_vm0, %v1027_v43  ;;  %v901_v55 = vmax.bf16 %v869_v39, %v837_v44  ;;  %v711_v57 = vmax.bf16 %v679_v42, %v647_v45 }
  0x28   : > { %v870_v56 = vld [vmem:[%s1393_s14 + $0x18] sm:$0xf]  ;;  %v807_v58 = vld [vmem:[%s1383_s10 + $0x1c] sm:$0xf]  ;;  %v680_v59 = vld [vmem:[%s1366_s24 + $0x20] sm:$0xf]  ;;  %v838_v61 = vmax.bf16 %v806_v41, %v774_v52 }
  0x29   : > { %v1028_v60 = vmax.bf16 %v996_v34, %v964_v49  ;;  %v648_v62 = vmax.bf16 %v616_v48, %v584_v54  ;;  %v521_v63 = vld [vmem:[%s1348_s15 + $0x24] sm:$0xf]  ;;  %v965_v2 = vmax.bf16 %v933_v50, %v901_v55  ;;  %v934_v3 = vld [vmem:[%s1404_s19 + $0x18] sm:$0xf]  ;;  %v775_v5 = vmax.bf16 %v743_v53, %v711_v57  ;;  %v744_v6 = vld [vmem:[%s1375_s27 + $0x20] sm:$0xf] }
  0x2a   : > { %v553_v0 = vld [vmem:[%s1354_s18 + $0x24] sm:$0xf]  ;;  %v998_v4 = vld [vmem:[%s1410_s23 + $0x18] sm:$0xf]  ;;  %v902_v8 = vmax.bf16 %v870_v56, %v838_v61  ;;  %v871_v9 = vld [vmem:[%s1393_s14 + $0x1c] sm:$0xf] }
  0x2b   : > { %v617_v1 = vld [vmem:[%s1360_s21 + $0x24] sm:$0xf]  ;;  %v585_v7 = vmax.bf16 %v553_v0, %v521_v63  ;;  %1061 = vst.msk [vmem:[%s1434_s28 + $0x10] sm:$0xf] %vm1056_vm0, %v1028_v60  ;;  %v712_v10 = vmax.bf16 %v680_v59, %v648_v62  ;;  %v808_v11 = vld [vmem:[%s1383_s10 + $0x20] sm:$0xf]  ;;  %v1029_v13 = vmax.bf16 %v997_v51, %v965_v2  ;;  %v839_v14 = vmax.bf16 %v807_v58, %v775_v5 }
  0x2c   : > { %v681_v12 = vld [vmem:[%s1366_s24 + $0x24] sm:$0xf]  ;;  %v522_v16 = vld [vmem:[%s1348_s15 + $0x28] sm:$0xf]  ;;  %v966_v19 = vmax.bf16 %v934_v3, %v902_v8  ;;  %v935_v20 = vld [vmem:[%s1404_s19 + $0x1c] sm:$0xf] }
  0x2d   : > { %v649_v15 = vmax.bf16 %v617_v1, %v585_v7  ;;  %v554_v17 = vld [vmem:[%s1354_s18 + $0x28] sm:$0xf]  ;;  %v999_v21 = vld [vmem:[%s1410_s23 + $0x1c] sm:$0xf]  ;;  %v776_v22 = vmax.bf16 %v744_v6, %v712_v10  ;;  %v745_v23 = vld [vmem:[%s1375_s27 + $0x24] sm:$0xf]  ;;  %v903_v25 = vmax.bf16 %v871_v9, %v839_v14 }
  0x2e   : > { %v618_v18 = vld [vmem:[%s1360_s21 + $0x28] sm:$0xf]  ;;  %v586_v24 = vmax.bf16 %v554_v17, %v522_v16  ;;  %1062 = vst.msk [vmem:[%s1434_s28 + $0x14] sm:$0xf] %vm1056_vm0, %v1029_v13  ;;  %v872_v26 = vld [vmem:[%s1393_s14 + $0x20] sm:$0xf]  ;;  %v1030_v30 = vmax.bf16 %v998_v4, %v966_v19 }
  0x2f   : > { %v713_v27 = vmax.bf16 %v681_v12, %v649_v15  ;;  %v809_v28 = vld [vmem:[%s1383_s10 + $0x24] sm:$0xf]  ;;  %v682_v29 = vld [vmem:[%s1366_s24 + $0x28] sm:$0xf]  ;;  %v840_v31 = vmax.bf16 %v808_v11, %v776_v22  ;;  %v523_v33 = vld [vmem:[%s1348_s15 + $0x2c] sm:$0xf]  ;;  %v967_v36 = vmax.bf16 %v935_v20, %v903_v25 }
  0x30   : > { %v650_v32 = vmax.bf16 %v618_v18, %v586_v24  ;;  %v555_v34 = vld [vmem:[%s1354_s18 + $0x2c] sm:$0xf]  ;;  %v936_v37 = vld [vmem:[%s1404_s19 + $0x20] sm:$0xf]  ;;  %v746_v40 = vld [vmem:[%s1375_s27 + $0x28] sm:$0xf] }
  0x31   : > { %v619_v35 = vld [vmem:[%s1360_s21 + $0x2c] sm:$0xf]  ;;  %v1000_v38 = vld [vmem:[%s1410_s23 + $0x20] sm:$0xf]  ;;  %v777_v39 = vmax.bf16 %v745_v23, %v713_v27  ;;  %v587_v41 = vmax.bf16 %v555_v34, %v523_v33  ;;  %1063 = vst.msk [vmem:[%s1434_s28 + $0x18] sm:$0xf] %vm1056_vm0, %v1030_v30  ;;  %v904_v42 = vmax.bf16 %v872_v26, %v840_v31  ;;  %v1031_v47 = vmax.bf16 %v999_v21, %v967_v36 }
  0x32   : > { %v873_v43 = vld [vmem:[%s1393_s14 + $0x24] sm:$0xf]  ;;  %v714_v44 = vmax.bf16 %v682_v29, %v650_v32  ;;  %v810_v45 = vld [vmem:[%s1383_s10 + $0x28] sm:$0xf]  ;;  %v683_v46 = vld [vmem:[%s1366_s24 + $0x2c] sm:$0xf] }
  0x33   : > { %v841_v48 = vmax.bf16 %v809_v28, %v777_v39  ;;  %v651_v49 = vmax.bf16 %v619_v35, %v587_v41  ;;  %v524_v50 = vld [vmem:[%s1348_s15 + $0x30] sm:$0xf]  ;;  %v968_v53 = vmax.bf16 %v936_v37, %v904_v42  ;;  %v937_v54 = vld [vmem:[%s1404_s19 + $0x24] sm:$0xf]  ;;  %v747_v57 = vld [vmem:[%s1375_s27 + $0x2c] sm:$0xf] }
  0x34   : > { %v556_v51 = vld [vmem:[%s1354_s18 + $0x30] sm:$0xf]  ;;  %v1001_v55 = vld [vmem:[%s1410_s23 + $0x24] sm:$0xf]  ;;  %v778_v56 = vmax.bf16 %v746_v40, %v714_v44  ;;  %1064 = vst.msk [vmem:[%s1434_s28 + $0x1c] sm:$0xf] %vm1056_vm0, %v1031_v47 }
  0x35   : > { %v620_v52 = vld [vmem:[%s1360_s21 + $0x30] sm:$0xf]  ;;  %v588_v58 = vmax.bf16 %v556_v51, %v524_v50  ;;  %v905_v59 = vmax.bf16 %v873_v43, %v841_v48  ;;  %v874_v60 = vld [vmem:[%s1393_s14 + $0x28] sm:$0xf]  ;;  %v715_v61 = vmax.bf16 %v683_v46, %v651_v49  ;;  %v811_v62 = vld [vmem:[%s1383_s10 + $0x2c] sm:$0xf]  ;;  %v1032_v0 = vmax.bf16 %v1000_v38, %v968_v53 }
  0x36   : > { %v684_v63 = vld [vmem:[%s1366_s24 + $0x30] sm:$0xf]  ;;  %v842_v1 = vmax.bf16 %v810_v45, %v778_v56  ;;  %v525_v3 = vld [vmem:[%s1348_s15 + $0x34] sm:$0xf]  ;;  %v938_v7 = vld [vmem:[%s1404_s19 + $0x28] sm:$0xf] }
  0x37   : > { %v652_v2 = vmax.bf16 %v620_v52, %v588_v58  ;;  %v557_v4 = vld [vmem:[%s1354_s18 + $0x34] sm:$0xf]  ;;  %v969_v6 = vmax.bf16 %v937_v54, %v905_v59  ;;  %v1002_v8 = vld [vmem:[%s1410_s23 + $0x28] sm:$0xf]  ;;  %v779_v9 = vmax.bf16 %v747_v57, %v715_v61  ;;  %v748_v10 = vld [vmem:[%s1375_s27 + $0x30] sm:$0xf] }
  0x38   : > { %v621_v5 = vld [vmem:[%s1360_s21 + $0x34] sm:$0xf]  ;;  %v589_v11 = vmax.bf16 %v557_v4, %v525_v3  ;;  %1065 = vst.msk [vmem:[%s1434_s28 + $0x20] sm:$0xf] %vm1056_vm0, %v1032_v0  ;;  %v906_v12 = vmax.bf16 %v874_v60, %v842_v1  ;;  %v875_v13 = vld [vmem:[%s1393_s14 + $0x2c] sm:$0xf] }
  0x39   : > { %v716_v14 = vmax.bf16 %v684_v63, %v652_v2  ;;  %v812_v15 = vld [vmem:[%s1383_s10 + $0x30] sm:$0xf]  ;;  %v685_v16 = vld [vmem:[%s1366_s24 + $0x34] sm:$0xf]  ;;  %v1033_v17 = vmax.bf16 %v1001_v55, %v969_v6  ;;  %v843_v18 = vmax.bf16 %v811_v62, %v779_v9  ;;  %v526_v20 = vld [vmem:[%s1348_s15 + $0x38] sm:$0xf] }
  0x3a   : > { %v653_v19 = vmax.bf16 %v621_v5, %v589_v11  ;;  %v558_v21 = vld [vmem:[%s1354_s18 + $0x38] sm:$0xf]  ;;  %v970_v23 = vmax.bf16 %v938_v7, %v906_v12  ;;  %v939_v24 = vld [vmem:[%s1404_s19 + $0x2c] sm:$0xf]  ;;  %v749_v27 = vld [vmem:[%s1375_s27 + $0x34] sm:$0xf] }
  0x3b   : > { %v622_v22 = vld [vmem:[%s1360_s21 + $0x38] sm:$0xf]  ;;  %v1003_v25 = vld [vmem:[%s1410_s23 + $0x2c] sm:$0xf]  ;;  %v780_v26 = vmax.bf16 %v748_v10, %v716_v14  ;;  %v590_v28 = vmax.bf16 %v558_v21, %v526_v20  ;;  %1066 = vst.msk [vmem:[%s1434_s28 + $0x24] sm:$0xf] %vm1056_vm0, %v1033_v17  ;;  %v907_v29 = vmax.bf16 %v875_v13, %v843_v18 }
  0x3c   : > { %v876_v30 = vld [vmem:[%s1393_s14 + $0x30] sm:$0xf]  ;;  %v717_v31 = vmax.bf16 %v685_v16, %v653_v19  ;;  %v813_v32 = vld [vmem:[%s1383_s10 + $0x34] sm:$0xf]  ;;  %v686_v33 = vld [vmem:[%s1366_s24 + $0x38] sm:$0xf]  ;;  %v1034_v34 = vmax.bf16 %v1002_v8, %v970_v23 }
  0x3d   : > { %v844_v35 = vmax.bf16 %v812_v15, %v780_v26  ;;  %v654_v36 = vmax.bf16 %v622_v22, %v590_v28  ;;  %v527_v37 = vld [vmem:[%s1348_s15 + $0x3c] sm:$0xf]  ;;  %v971_v40 = vmax.bf16 %v939_v24, %v907_v29  ;;  %v940_v41 = vld [vmem:[%s1404_s19 + $0x30] sm:$0xf]  ;;  %v750_v44 = vld [vmem:[%s1375_s27 + $0x38] sm:$0xf] }
  0x3e   : > { %v559_v38 = vld [vmem:[%s1354_s18 + $0x3c] sm:$0xf]  ;;  %v1004_v42 = vld [vmem:[%s1410_s23 + $0x30] sm:$0xf]  ;;  %v781_v43 = vmax.bf16 %v749_v27, %v717_v31  ;;  %1067 = vst.msk [vmem:[%s1434_s28 + $0x28] sm:$0xf] %vm1056_vm0, %v1034_v34 }
  0x3f   : > { %v623_v39 = vld [vmem:[%s1360_s21 + $0x3c] sm:$0xf]  ;;  %v591_v45 = vmax.bf16 %v559_v38, %v527_v37  ;;  %v908_v46 = vmax.bf16 %v876_v30, %v844_v35  ;;  %v877_v47 = vld [vmem:[%s1393_s14 + $0x34] sm:$0xf]  ;;  %v718_v48 = vmax.bf16 %v686_v33, %v654_v36  ;;  %v814_v49 = vld [vmem:[%s1383_s10 + $0x38] sm:$0xf]  ;;  %v1035_v51 = vmax.bf16 %v1003_v25, %v971_v40 }
  0x40   : > { %v687_v50 = vld [vmem:[%s1366_s24 + $0x3c] sm:$0xf]  ;;  %v845_v52 = vmax.bf16 %v813_v32, %v781_v43  ;;  %v528_v54 = vld [vmem:[%s1348_s15 + $0x40] sm:$0xf]  ;;  %v941_v58 = vld [vmem:[%s1404_s19 + $0x34] sm:$0xf] }
  0x41   : > { %v655_v53 = vmax.bf16 %v623_v39, %v591_v45  ;;  %v560_v55 = vld [vmem:[%s1354_s18 + $0x40] sm:$0xf]  ;;  %v972_v57 = vmax.bf16 %v940_v41, %v908_v46  ;;  %v1005_v59 = vld [vmem:[%s1410_s23 + $0x34] sm:$0xf]  ;;  %v782_v60 = vmax.bf16 %v750_v44, %v718_v48  ;;  %v751_v61 = vld [vmem:[%s1375_s27 + $0x3c] sm:$0xf] }
  0x42   : > { %v624_v56 = vld [vmem:[%s1360_s21 + $0x40] sm:$0xf]  ;;  %v592_v62 = vmax.bf16 %v560_v55, %v528_v54  ;;  %1068 = vst.msk [vmem:[%s1434_s28 + $0x2c] sm:$0xf] %vm1056_vm0, %v1035_v51  ;;  %v909_v63 = vmax.bf16 %v877_v47, %v845_v52  ;;  %v878_v0 = vld [vmem:[%s1393_s14 + $0x38] sm:$0xf] }
  0x43   : > { %v719_v1 = vmax.bf16 %v687_v50, %v655_v53  ;;  %v815_v2 = vld [vmem:[%s1383_s10 + $0x3c] sm:$0xf]  ;;  %v688_v3 = vld [vmem:[%s1366_s24 + $0x40] sm:$0xf]  ;;  %v1036_v4 = vmax.bf16 %v1004_v42, %v972_v57  ;;  %v846_v5 = vmax.bf16 %v814_v49, %v782_v60  ;;  %v529_v7 = vld [vmem:[%s1348_s15 + $0x44] sm:$0xf] }
  0x44   : > { %v656_v6 = vmax.bf16 %v624_v56, %v592_v62  ;;  %v561_v8 = vld [vmem:[%s1354_s18 + $0x44] sm:$0xf]  ;;  %v973_v10 = vmax.bf16 %v941_v58, %v909_v63  ;;  %v942_v11 = vld [vmem:[%s1404_s19 + $0x38] sm:$0xf]  ;;  %v752_v14 = vld [vmem:[%s1375_s27 + $0x40] sm:$0xf] }
  0x45   : > { %v625_v9 = vld [vmem:[%s1360_s21 + $0x44] sm:$0xf]  ;;  %v1006_v12 = vld [vmem:[%s1410_s23 + $0x38] sm:$0xf]  ;;  %v783_v13 = vmax.bf16 %v751_v61, %v719_v1  ;;  %v593_v15 = vmax.bf16 %v561_v8, %v529_v7  ;;  %1069 = vst.msk [vmem:[%s1434_s28 + $0x30] sm:$0xf] %vm1056_vm0, %v1036_v4  ;;  %v910_v16 = vmax.bf16 %v878_v0, %v846_v5 }
  0x46   : > { %v879_v17 = vld [vmem:[%s1393_s14 + $0x3c] sm:$0xf]  ;;  %v720_v18 = vmax.bf16 %v688_v3, %v656_v6  ;;  %v816_v19 = vld [vmem:[%s1383_s10 + $0x40] sm:$0xf]  ;;  %v689_v20 = vld [vmem:[%s1366_s24 + $0x44] sm:$0xf]  ;;  %v1037_v21 = vmax.bf16 %v1005_v59, %v973_v10 }
  0x47   : > { %v847_v22 = vmax.bf16 %v815_v2, %v783_v13  ;;  %v657_v23 = vmax.bf16 %v625_v9, %v593_v15  ;;  %v530_v24 = vld [vmem:[%s1348_s15 + $0x48] sm:$0xf]  ;;  %v974_v27 = vmax.bf16 %v942_v11, %v910_v16  ;;  %v943_v28 = vld [vmem:[%s1404_s19 + $0x3c] sm:$0xf]  ;;  %v753_v31 = vld [vmem:[%s1375_s27 + $0x44] sm:$0xf] }
  0x48   : > { %v562_v25 = vld [vmem:[%s1354_s18 + $0x48] sm:$0xf]  ;;  %v1007_v29 = vld [vmem:[%s1410_s23 + $0x3c] sm:$0xf]  ;;  %v784_v30 = vmax.bf16 %v752_v14, %v720_v18  ;;  %1070 = vst.msk [vmem:[%s1434_s28 + $0x34] sm:$0xf] %vm1056_vm0, %v1037_v21 }
  0x49   : > { %v626_v26 = vld [vmem:[%s1360_s21 + $0x48] sm:$0xf]  ;;  %v594_v32 = vmax.bf16 %v562_v25, %v530_v24  ;;  %v911_v33 = vmax.bf16 %v879_v17, %v847_v22  ;;  %v880_v34 = vld [vmem:[%s1393_s14 + $0x40] sm:$0xf]  ;;  %v721_v35 = vmax.bf16 %v689_v20, %v657_v23  ;;  %v817_v36 = vld [vmem:[%s1383_s10 + $0x44] sm:$0xf]  ;;  %v1038_v38 = vmax.bf16 %v1006_v12, %v974_v27 }
  0x4a   : > { %v690_v37 = vld [vmem:[%s1366_s24 + $0x48] sm:$0xf]  ;;  %v848_v39 = vmax.bf16 %v816_v19, %v784_v30  ;;  %v531_v41 = vld [vmem:[%s1348_s15 + $0x4c] sm:$0xf]  ;;  %v944_v45 = vld [vmem:[%s1404_s19 + $0x40] sm:$0xf] }
  0x4b   : > { %v658_v40 = vmax.bf16 %v626_v26, %v594_v32  ;;  %v563_v42 = vld [vmem:[%s1354_s18 + $0x4c] sm:$0xf]  ;;  %v975_v44 = vmax.bf16 %v943_v28, %v911_v33  ;;  %v1008_v46 = vld [vmem:[%s1410_s23 + $0x40] sm:$0xf]  ;;  %v785_v47 = vmax.bf16 %v753_v31, %v721_v35  ;;  %v754_v48 = vld [vmem:[%s1375_s27 + $0x48] sm:$0xf] }
  0x4c   : > { %v627_v43 = vld [vmem:[%s1360_s21 + $0x4c] sm:$0xf]  ;;  %v595_v49 = vmax.bf16 %v563_v42, %v531_v41  ;;  %1071 = vst.msk [vmem:[%s1434_s28 + $0x38] sm:$0xf] %vm1056_vm0, %v1038_v38  ;;  %v912_v50 = vmax.bf16 %v880_v34, %v848_v39  ;;  %v881_v51 = vld [vmem:[%s1393_s14 + $0x44] sm:$0xf] }
  0x4d   : > { %v722_v52 = vmax.bf16 %v690_v37, %v658_v40  ;;  %v818_v53 = vld [vmem:[%s1383_s10 + $0x48] sm:$0xf]  ;;  %v691_v54 = vld [vmem:[%s1366_s24 + $0x4c] sm:$0xf]  ;;  %v1039_v55 = vmax.bf16 %v1007_v29, %v975_v44  ;;  %v849_v56 = vmax.bf16 %v817_v36, %v785_v47  ;;  %v532_v58 = vld [vmem:[%s1348_s15 + $0x50] sm:$0xf] }
  0x4e   : > { %v659_v57 = vmax.bf16 %v627_v43, %v595_v49  ;;  %v564_v59 = vld [vmem:[%s1354_s18 + $0x50] sm:$0xf]  ;;  %v976_v61 = vmax.bf16 %v944_v45, %v912_v50  ;;  %v945_v62 = vld [vmem:[%s1404_s19 + $0x44] sm:$0xf]  ;;  %v755_v1 = vld [vmem:[%s1375_s27 + $0x4c] sm:$0xf] }
  0x4f   : > { %v628_v60 = vld [vmem:[%s1360_s21 + $0x50] sm:$0xf]  ;;  %v1009_v63 = vld [vmem:[%s1410_s23 + $0x44] sm:$0xf]  ;;  %v786_v0 = vmax.bf16 %v754_v48, %v722_v52  ;;  %v596_v2 = vmax.bf16 %v564_v59, %v532_v58  ;;  %1072 = vst.msk [vmem:[%s1434_s28 + $0x3c] sm:$0xf] %vm1056_vm0, %v1039_v55  ;;  %v913_v3 = vmax.bf16 %v881_v51, %v849_v56 }
  0x50   : > { %v882_v4 = vld [vmem:[%s1393_s14 + $0x48] sm:$0xf]  ;;  %v723_v5 = vmax.bf16 %v691_v54, %v659_v57  ;;  %v819_v6 = vld [vmem:[%s1383_s10 + $0x4c] sm:$0xf]  ;;  %v692_v7 = vld [vmem:[%s1366_s24 + $0x50] sm:$0xf]  ;;  %v1040_v8 = vmax.bf16 %v1008_v46, %v976_v61 }
  0x51   : > { %v850_v9 = vmax.bf16 %v818_v53, %v786_v0  ;;  %v660_v10 = vmax.bf16 %v628_v60, %v596_v2  ;;  %v533_v11 = vld [vmem:[%s1348_s15 + $0x54] sm:$0xf]  ;;  %v977_v14 = vmax.bf16 %v945_v62, %v913_v3  ;;  %v946_v15 = vld [vmem:[%s1404_s19 + $0x48] sm:$0xf]  ;;  %v756_v18 = vld [vmem:[%s1375_s27 + $0x50] sm:$0xf] }
  0x52   : > { %v565_v12 = vld [vmem:[%s1354_s18 + $0x54] sm:$0xf]  ;;  %v1010_v16 = vld [vmem:[%s1410_s23 + $0x48] sm:$0xf]  ;;  %v787_v17 = vmax.bf16 %v755_v1, %v723_v5  ;;  %1073 = vst.msk [vmem:[%s1434_s28 + $0x40] sm:$0xf] %vm1056_vm0, %v1040_v8 }
  0x53   : > { %v629_v13 = vld [vmem:[%s1360_s21 + $0x54] sm:$0xf]  ;;  %v597_v19 = vmax.bf16 %v565_v12, %v533_v11  ;;  %v914_v20 = vmax.bf16 %v882_v4, %v850_v9  ;;  %v883_v21 = vld [vmem:[%s1393_s14 + $0x4c] sm:$0xf]  ;;  %v724_v22 = vmax.bf16 %v692_v7, %v660_v10  ;;  %v820_v23 = vld [vmem:[%s1383_s10 + $0x50] sm:$0xf]  ;;  %v1041_v25 = vmax.bf16 %v1009_v63, %v977_v14 }
  0x54   : > { %v693_v24 = vld [vmem:[%s1366_s24 + $0x54] sm:$0xf]  ;;  %v851_v26 = vmax.bf16 %v819_v6, %v787_v17  ;;  %v534_v28 = vld [vmem:[%s1348_s15 + $0x58] sm:$0xf]  ;;  %v947_v32 = vld [vmem:[%s1404_s19 + $0x4c] sm:$0xf] }
  0x55   : > { %v661_v27 = vmax.bf16 %v629_v13, %v597_v19  ;;  %v566_v29 = vld [vmem:[%s1354_s18 + $0x58] sm:$0xf]  ;;  %v978_v31 = vmax.bf16 %v946_v15, %v914_v20  ;;  %v1011_v33 = vld [vmem:[%s1410_s23 + $0x4c] sm:$0xf]  ;;  %v788_v34 = vmax.bf16 %v756_v18, %v724_v22  ;;  %v757_v35 = vld [vmem:[%s1375_s27 + $0x54] sm:$0xf] }
  0x56   : > { %v630_v30 = vld [vmem:[%s1360_s21 + $0x58] sm:$0xf]  ;;  %v598_v36 = vmax.bf16 %v566_v29, %v534_v28  ;;  %1074 = vst.msk [vmem:[%s1434_s28 + $0x44] sm:$0xf] %vm1056_vm0, %v1041_v25  ;;  %v915_v37 = vmax.bf16 %v883_v21, %v851_v26  ;;  %v884_v38 = vld [vmem:[%s1393_s14 + $0x50] sm:$0xf] }
  0x57   : > { %v725_v39 = vmax.bf16 %v693_v24, %v661_v27  ;;  %v821_v40 = vld [vmem:[%s1383_s10 + $0x54] sm:$0xf]  ;;  %v694_v41 = vld [vmem:[%s1366_s24 + $0x58] sm:$0xf]  ;;  %v1042_v42 = vmax.bf16 %v1010_v16, %v978_v31  ;;  %v852_v43 = vmax.bf16 %v820_v23, %v788_v34  ;;  %v535_v45 = vld [vmem:[%s1348_s15 + $0x5c] sm:$0xf] }
  0x58   : > { %v662_v44 = vmax.bf16 %v630_v30, %v598_v36  ;;  %v567_v46 = vld [vmem:[%s1354_s18 + $0x5c] sm:$0xf]  ;;  %v979_v48 = vmax.bf16 %v947_v32, %v915_v37  ;;  %v948_v49 = vld [vmem:[%s1404_s19 + $0x50] sm:$0xf]  ;;  %v758_v52 = vld [vmem:[%s1375_s27 + $0x58] sm:$0xf] }
  0x59   : > { %v631_v47 = vld [vmem:[%s1360_s21 + $0x5c] sm:$0xf]  ;;  %v1012_v50 = vld [vmem:[%s1410_s23 + $0x50] sm:$0xf]  ;;  %v789_v51 = vmax.bf16 %v757_v35, %v725_v39  ;;  %v599_v53 = vmax.bf16 %v567_v46, %v535_v45  ;;  %1075 = vst.msk [vmem:[%s1434_s28 + $0x48] sm:$0xf] %vm1056_vm0, %v1042_v42  ;;  %v916_v54 = vmax.bf16 %v884_v38, %v852_v43 }
  0x5a   : > { %v885_v55 = vld [vmem:[%s1393_s14 + $0x54] sm:$0xf]  ;;  %v726_v56 = vmax.bf16 %v694_v41, %v662_v44  ;;  %v822_v57 = vld [vmem:[%s1383_s10 + $0x58] sm:$0xf]  ;;  %v695_v58 = vld [vmem:[%s1366_s24 + $0x5c] sm:$0xf]  ;;  %v1043_v59 = vmax.bf16 %v1011_v33, %v979_v48 }
  0x5b   : > { %v853_v60 = vmax.bf16 %v821_v40, %v789_v51  ;;  %v663_v61 = vmax.bf16 %v631_v47, %v599_v53  ;;  %v536_v62 = vld [vmem:[%s1348_s15 + $0x60] sm:$0xf]  ;;  %v980_v1 = vmax.bf16 %v948_v49, %v916_v54  ;;  %v949_v2 = vld [vmem:[%s1404_s19 + $0x54] sm:$0xf]  ;;  %v759_v5 = vld [vmem:[%s1375_s27 + $0x5c] sm:$0xf] }
  0x5c   : > { %v568_v63 = vld [vmem:[%s1354_s18 + $0x60] sm:$0xf]  ;;  %v1013_v3 = vld [vmem:[%s1410_s23 + $0x54] sm:$0xf]  ;;  %v790_v4 = vmax.bf16 %v758_v52, %v726_v56  ;;  %1076 = vst.msk [vmem:[%s1434_s28 + $0x4c] sm:$0xf] %vm1056_vm0, %v1043_v59 }
  0x5d   : > { %v632_v0 = vld [vmem:[%s1360_s21 + $0x60] sm:$0xf]  ;;  %v600_v6 = vmax.bf16 %v568_v63, %v536_v62  ;;  %v917_v7 = vmax.bf16 %v885_v55, %v853_v60  ;;  %v886_v8 = vld [vmem:[%s1393_s14 + $0x58] sm:$0xf]  ;;  %v727_v9 = vmax.bf16 %v695_v58, %v663_v61  ;;  %v823_v10 = vld [vmem:[%s1383_s10 + $0x5c] sm:$0xf]  ;;  %v1044_v12 = vmax.bf16 %v1012_v50, %v980_v1 }
  0x5e   : > { %v696_v11 = vld [vmem:[%s1366_s24 + $0x60] sm:$0xf]  ;;  %v854_v13 = vmax.bf16 %v822_v57, %v790_v4  ;;  %v537_v15 = vld [vmem:[%s1348_s15 + $0x64] sm:$0xf]  ;;  %v950_v19 = vld [vmem:[%s1404_s19 + $0x58] sm:$0xf] }
  0x5f   : > { %v664_v14 = vmax.bf16 %v632_v0, %v600_v6  ;;  %v569_v16 = vld [vmem:[%s1354_s18 + $0x64] sm:$0xf]  ;;  %v981_v18 = vmax.bf16 %v949_v2, %v917_v7  ;;  %v1014_v20 = vld [vmem:[%s1410_s23 + $0x58] sm:$0xf]  ;;  %v791_v21 = vmax.bf16 %v759_v5, %v727_v9  ;;  %v760_v22 = vld [vmem:[%s1375_s27 + $0x60] sm:$0xf] }
  0x60   : > { %v633_v17 = vld [vmem:[%s1360_s21 + $0x64] sm:$0xf]  ;;  %v601_v23 = vmax.bf16 %v569_v16, %v537_v15  ;;  %1077 = vst.msk [vmem:[%s1434_s28 + $0x50] sm:$0xf] %vm1056_vm0, %v1044_v12  ;;  %v918_v24 = vmax.bf16 %v886_v8, %v854_v13  ;;  %v887_v25 = vld [vmem:[%s1393_s14 + $0x5c] sm:$0xf] }
  0x61   : > { %v728_v26 = vmax.bf16 %v696_v11, %v664_v14  ;;  %v824_v27 = vld [vmem:[%s1383_s10 + $0x60] sm:$0xf]  ;;  %v697_v28 = vld [vmem:[%s1366_s24 + $0x64] sm:$0xf]  ;;  %v1045_v29 = vmax.bf16 %v1013_v3, %v981_v18  ;;  %v855_v30 = vmax.bf16 %v823_v10, %v791_v21  ;;  %v538_v32 = vld [vmem:[%s1348_s15 + $0x68] sm:$0xf] }
  0x62   : > { %v665_v31 = vmax.bf16 %v633_v17, %v601_v23  ;;  %v570_v33 = vld [vmem:[%s1354_s18 + $0x68] sm:$0xf]  ;;  %v982_v35 = vmax.bf16 %v950_v19, %v918_v24  ;;  %v951_v36 = vld [vmem:[%s1404_s19 + $0x5c] sm:$0xf]  ;;  %v761_v39 = vld [vmem:[%s1375_s27 + $0x64] sm:$0xf] }
  0x63   : > { %v634_v34 = vld [vmem:[%s1360_s21 + $0x68] sm:$0xf]  ;;  %v1015_v37 = vld [vmem:[%s1410_s23 + $0x5c] sm:$0xf]  ;;  %v792_v38 = vmax.bf16 %v760_v22, %v728_v26  ;;  %v602_v40 = vmax.bf16 %v570_v33, %v538_v32  ;;  %1078 = vst.msk [vmem:[%s1434_s28 + $0x54] sm:$0xf] %vm1056_vm0, %v1045_v29  ;;  %v919_v41 = vmax.bf16 %v887_v25, %v855_v30 }
  0x64   : > { %v888_v42 = vld [vmem:[%s1393_s14 + $0x60] sm:$0xf]  ;;  %v729_v43 = vmax.bf16 %v697_v28, %v665_v31  ;;  %v825_v44 = vld [vmem:[%s1383_s10 + $0x64] sm:$0xf]  ;;  %v698_v45 = vld [vmem:[%s1366_s24 + $0x68] sm:$0xf]  ;;  %v1046_v46 = vmax.bf16 %v1014_v20, %v982_v35 }
  0x65   : > { %v856_v47 = vmax.bf16 %v824_v27, %v792_v38  ;;  %v666_v48 = vmax.bf16 %v634_v34, %v602_v40  ;;  %v539_v49 = vld [vmem:[%s1348_s15 + $0x6c] sm:$0xf]  ;;  %v983_v52 = vmax.bf16 %v951_v36, %v919_v41  ;;  %v952_v53 = vld [vmem:[%s1404_s19 + $0x60] sm:$0xf]  ;;  %v762_v56 = vld [vmem:[%s1375_s27 + $0x68] sm:$0xf] }
  0x66   : > { %v571_v50 = vld [vmem:[%s1354_s18 + $0x6c] sm:$0xf]  ;;  %v1016_v54 = vld [vmem:[%s1410_s23 + $0x60] sm:$0xf]  ;;  %v793_v55 = vmax.bf16 %v761_v39, %v729_v43  ;;  %1079 = vst.msk [vmem:[%s1434_s28 + $0x58] sm:$0xf] %vm1056_vm0, %v1046_v46 }
  0x67   : > { %v635_v51 = vld [vmem:[%s1360_s21 + $0x6c] sm:$0xf]  ;;  %v603_v57 = vmax.bf16 %v571_v50, %v539_v49  ;;  %v920_v58 = vmax.bf16 %v888_v42, %v856_v47  ;;  %v889_v59 = vld [vmem:[%s1393_s14 + $0x64] sm:$0xf]  ;;  %v730_v60 = vmax.bf16 %v698_v45, %v666_v48  ;;  %v826_v61 = vld [vmem:[%s1383_s10 + $0x68] sm:$0xf]  ;;  %v1047_v63 = vmax.bf16 %v1015_v37, %v983_v52 }
  0x68   : > { %v699_v62 = vld [vmem:[%s1366_s24 + $0x6c] sm:$0xf]  ;;  %v857_v0 = vmax.bf16 %v825_v44, %v793_v55  ;;  %v540_v2 = vld [vmem:[%s1348_s15 + $0x70] sm:$0xf]  ;;  %v953_v6 = vld [vmem:[%s1404_s19 + $0x64] sm:$0xf] }
  0x69   : > { %v667_v1 = vmax.bf16 %v635_v51, %v603_v57  ;;  %v572_v3 = vld [vmem:[%s1354_s18 + $0x70] sm:$0xf]  ;;  %v984_v5 = vmax.bf16 %v952_v53, %v920_v58  ;;  %v1017_v7 = vld [vmem:[%s1410_s23 + $0x64] sm:$0xf]  ;;  %v794_v8 = vmax.bf16 %v762_v56, %v730_v60  ;;  %v763_v9 = vld [vmem:[%s1375_s27 + $0x6c] sm:$0xf] }
  0x6a   : > { %v636_v4 = vld [vmem:[%s1360_s21 + $0x70] sm:$0xf]  ;;  %v604_v10 = vmax.bf16 %v572_v3, %v540_v2  ;;  %1080 = vst.msk [vmem:[%s1434_s28 + $0x5c] sm:$0xf] %vm1056_vm0, %v1047_v63  ;;  %v921_v11 = vmax.bf16 %v889_v59, %v857_v0  ;;  %v890_v12 = vld [vmem:[%s1393_s14 + $0x68] sm:$0xf] }
  0x6b   : > { %v731_v13 = vmax.bf16 %v699_v62, %v667_v1  ;;  %v827_v14 = vld [vmem:[%s1383_s10 + $0x6c] sm:$0xf]  ;;  %v700_v15 = vld [vmem:[%s1366_s24 + $0x70] sm:$0xf]  ;;  %v1048_v16 = vmax.bf16 %v1016_v54, %v984_v5  ;;  %v858_v17 = vmax.bf16 %v826_v61, %v794_v8  ;;  %v541_v19 = vld [vmem:[%s1348_s15 + $0x74] sm:$0xf] }
  0x6c   : > { %v668_v18 = vmax.bf16 %v636_v4, %v604_v10  ;;  %v573_v20 = vld [vmem:[%s1354_s18 + $0x74] sm:$0xf]  ;;  %v985_v22 = vmax.bf16 %v953_v6, %v921_v11  ;;  %v954_v23 = vld [vmem:[%s1404_s19 + $0x68] sm:$0xf]  ;;  %v764_v26 = vld [vmem:[%s1375_s27 + $0x70] sm:$0xf] }
  0x6d   : > { %v637_v21 = vld [vmem:[%s1360_s21 + $0x74] sm:$0xf]  ;;  %v1018_v24 = vld [vmem:[%s1410_s23 + $0x68] sm:$0xf]  ;;  %v795_v25 = vmax.bf16 %v763_v9, %v731_v13  ;;  %v605_v27 = vmax.bf16 %v573_v20, %v541_v19  ;;  %1081 = vst.msk [vmem:[%s1434_s28 + $0x60] sm:$0xf] %vm1056_vm0, %v1048_v16  ;;  %v922_v28 = vmax.bf16 %v890_v12, %v858_v17 }
  0x6e   : > { %v891_v29 = vld [vmem:[%s1393_s14 + $0x6c] sm:$0xf]  ;;  %v732_v30 = vmax.bf16 %v700_v15, %v668_v18  ;;  %v828_v31 = vld [vmem:[%s1383_s10 + $0x70] sm:$0xf]  ;;  %v701_v32 = vld [vmem:[%s1366_s24 + $0x74] sm:$0xf]  ;;  %v1049_v33 = vmax.bf16 %v1017_v7, %v985_v22 }
  0x6f   : > { %v859_v34 = vmax.bf16 %v827_v14, %v795_v25  ;;  %v669_v35 = vmax.bf16 %v637_v21, %v605_v27  ;;  %v542_v36 = vld [vmem:[%s1348_s15 + $0x78] sm:$0xf]  ;;  %v986_v39 = vmax.bf16 %v954_v23, %v922_v28  ;;  %v955_v40 = vld [vmem:[%s1404_s19 + $0x6c] sm:$0xf]  ;;  %v765_v43 = vld [vmem:[%s1375_s27 + $0x74] sm:$0xf] }
  0x70   : > { %v574_v37 = vld [vmem:[%s1354_s18 + $0x78] sm:$0xf]  ;;  %v1019_v41 = vld [vmem:[%s1410_s23 + $0x6c] sm:$0xf]  ;;  %v796_v42 = vmax.bf16 %v764_v26, %v732_v30  ;;  %1082 = vst.msk [vmem:[%s1434_s28 + $0x64] sm:$0xf] %vm1056_vm0, %v1049_v33 }
  0x71   : > { %v638_v38 = vld [vmem:[%s1360_s21 + $0x78] sm:$0xf]  ;;  %v606_v44 = vmax.bf16 %v574_v37, %v542_v36  ;;  %v923_v45 = vmax.bf16 %v891_v29, %v859_v34  ;;  %v892_v46 = vld [vmem:[%s1393_s14 + $0x70] sm:$0xf]  ;;  %v733_v47 = vmax.bf16 %v701_v32, %v669_v35  ;;  %v829_v48 = vld [vmem:[%s1383_s10 + $0x74] sm:$0xf]  ;;  %v1050_v50 = vmax.bf16 %v1018_v24, %v986_v39 }
  0x72   : > { %v702_v49 = vld [vmem:[%s1366_s24 + $0x78] sm:$0xf]  ;;  %v860_v51 = vmax.bf16 %v828_v31, %v796_v42  ;;  %v543_v53 = vld [vmem:[%s1348_s15 + $0x7c] sm:$0xf]  ;;  %v956_v57 = vld [vmem:[%s1404_s19 + $0x70] sm:$0xf] }
  0x73   : > { %v670_v52 = vmax.bf16 %v638_v38, %v606_v44  ;;  %v575_v54 = vld [vmem:[%s1354_s18 + $0x7c] sm:$0xf]  ;;  %v987_v56 = vmax.bf16 %v955_v40, %v923_v45  ;;  %v797_v58 = vmax.bf16 %v765_v43, %v733_v47  ;;  %v766_v59 = vld [vmem:[%s1375_s27 + $0x78] sm:$0xf]  ;;  %1083 = vst.msk [vmem:[%s1434_s28 + $0x68] sm:$0xf] %vm1056_vm0, %v1050_v50 }
  0x74   : > { %v639_v55 = vld [vmem:[%s1360_s21 + $0x7c] sm:$0xf]  ;;  %v607_v60 = vmax.bf16 %v575_v54, %v543_v53  ;;  %v924_v61 = vmax.bf16 %v892_v46, %v860_v51  ;;  %v893_v62 = vld [vmem:[%s1393_s14 + $0x74] sm:$0xf]  ;;  %v1020_v2 = vld [vmem:[%s1410_s23 + $0x70] sm:$0xf] }
  0x75   : > { %v734_v63 = vmax.bf16 %v702_v49, %v670_v52  ;;  %v703_v0 = vld [vmem:[%s1366_s24 + $0x7c] sm:$0xf]  ;;  %v1051_v1 = vmax.bf16 %v1019_v41, %v987_v56  ;;  %v861_v3 = vmax.bf16 %v829_v48, %v797_v58  ;;  %v830_v4 = vld [vmem:[%s1383_s10 + $0x78] sm:$0xf]  ;;  %v957_v7 = vld [vmem:[%s1404_s19 + $0x74] sm:$0xf] }
  0x76   : > { %v671_v5 = vmax.bf16 %v639_v55, %v607_v60  ;;  %v988_v6 = vmax.bf16 %v956_v57, %v924_v61  ;;  %v767_v9 = vld [vmem:[%s1375_s27 + $0x7c] sm:$0xf]  ;;  %v894_v11 = vld [vmem:[%s1393_s14 + $0x78] sm:$0xf]  ;;  %v1021_v14 = vld [vmem:[%s1410_s23 + $0x74] sm:$0xf] }
  0x77   : > { %v798_v8 = vmax.bf16 %v766_v59, %v734_v63  ;;  %1084 = vst.msk [vmem:[%s1434_s28 + $0x6c] sm:$0xf] %vm1056_vm0, %v1051_v1  ;;  %v925_v10 = vmax.bf16 %v893_v62, %v861_v3  ;;  %v831_v16 = vld [vmem:[%s1383_s10 + $0x7c] sm:$0xf]  ;;  %v958_v18 = vld [vmem:[%s1404_s19 + $0x78] sm:$0xf] }
  0x78   : > { %v735_v12 = vmax.bf16 %v703_v0, %v671_v5  ;;  %v1052_v13 = vmax.bf16 %v1020_v2, %v988_v6  ;;  %v895_v21 = vld [vmem:[%s1393_s14 + $0x7c] sm:$0xf]  ;;  %v1022_v23 = vld [vmem:[%s1410_s23 + $0x78] sm:$0xf] }
  0x79   : > { %v862_v15 = vmax.bf16 %v830_v4, %v798_v8  ;;  %v989_v17 = vmax.bf16 %v957_v7, %v925_v10  ;;  %v959_v26 = vld [vmem:[%s1404_s19 + $0x7c] sm:$0xf] }
  0x7a   : > { %v799_v19 = vmax.bf16 %v767_v9, %v735_v12  ;;  %1085 = vst.msk [vmem:[%s1434_s28 + $0x70] sm:$0xf] %vm1056_vm0, %v1052_v13  ;;  %v1023_v29 = vld [vmem:[%s1410_s23 + $0x7c] sm:$0xf] }
  0x7b   : > { %v926_v20 = vmax.bf16 %v894_v11, %v862_v15  ;;  %v1053_v22 = vmax.bf16 %v1021_v14, %v989_v17 }
  0x7c   : > { %v863_v24 = vmax.bf16 %v831_v16, %v799_v19 }
  0x7d   : > { %v990_v25 = vmax.bf16 %v958_v18, %v926_v20  ;;  %1086 = vst.msk [vmem:[%s1434_s28 + $0x74] sm:$0xf] %vm1056_vm0, %v1053_v22 }
  0x7e   : > { %v927_v27 = vmax.bf16 %v895_v21, %v863_v24 }
  0x7f   : > { %v1054_v28 = vmax.bf16 %v1022_v23, %v990_v25 }
  0x80   : > { %v991_v30 = vmax.bf16 %v959_v26, %v927_v27 }
  0x81   : > { %1087 = vst.msk [vmem:[%s1434_s28 + $0x78] sm:$0xf] %vm1056_vm0, %v1054_v28 }
  0x82   : > { %v1055_v31 = vmax.bf16 %v1023_v29, %v991_v30 }
  0x84   : > { %1088 = vst.msk [vmem:[%s1434_s28 + $0x7c] sm:$0xf] %vm1056_vm0, %v1055_v31 }
  0x85 PF: > { %s19_s30 = sadd.s32 1, %s1282_s30  }
  0x86   : > { %p16_p4 = scmp.ge.s32.totalorder %s19_s30, 4  }
  0x88   :  { %18 = sbr.rel (!%p16_p4) target bundleno = 1 (0x1), region = 110 }

// kernel: my_resnet_forward.24
= control target key start
LH: loop header
LB: loop body
LE: loop exit
PB: predicated region body
PF: predicated region fallthrough
CT: control target
= control target key end

     0   :  { %s2625_s12 = smov 0   ;;  %s2627_s13 = smov 0   ;;  %s3082_s0 = inlined_call_operand.vmem [shape: bf16[512,576], index: 0, kind: input, shape index: {}]   ;;  %s3083_s1 = inlined_call_operand.vmem [shape: bf16[576,64], index: 1, kind: input, shape index: {}]   ;;  %s3084_s2 = inlined_call_operand.vmem [shape: f32[1,64], index: 2, kind: input, shape index: {}]   ;;  %s3085_s3 = inlined_call_operand.vmem [shape: bf16[512,64], index: 3, kind: output, shape index: {}]  }
   0x1   :  { %s2629_s14 = smov 0  }
   0x2 LB: > { %s32_s15 = sadd.s32 1, %s2599_s13  ;;  %p1904_p0 = scmp.ge.s32.totalorder %s2603_s14, 1  ;;  %s2603_s14 = sphi %s2629_s14, %s13_s14   ;;  %s2599_s13 = sphi %s2627_s13, %s3087_s13   ;;  %s2595_s12 = sphi %s2625_s12, %s3086_s12  }
   0x3   : > { %p34_p1 = scmp.ge.s32.totalorder %s32_s15, 2  ;;  %p191_p2 = scmp.lt.s32.totalorder %s2603_s14, 3 }
   0x5   : > { %s3089_s15 = smov (%p34_p1, %s32_s15), 0  ;;  %p192_p3 = pnand %p1904_p0, %p191_p2 }
   0x6   : > { %v2433_v0 = vld [vmem:[%s3083_s1 + $0x40] sm:$0xff] (!%p192_p3)   ;;  %s1905_s18 = sshll.u32 (!%p192_p3), %s2595_s12, 5  ;;  %v2435_v2 = vld [vmem:[%s3083_s1 + $0x48] sm:$0xff] (!%p192_p3)   ;;  %v2437_v4 = vld [vmem:[%s3083_s1 + $0x50] sm:$0xff] (!%p192_p3)   ;;  %vm1059_vm0 = vcmask (!%p192_p3), 523264   ;;  %vm1751_vm1 = vcmask (!%p192_p3), 519168  }
   0x7   : > { %195 = sbr.rel (%p192_p3) target bundleno = 417 (0x1a1), region = 32  ;;  %v2434_v1 = vld [vmem:[%s3083_s1] sm:$0xff] (!%p192_p3)   ;;  %2108 = vmatprep.subr.bf16.mxu0 (!%p192_p3), %v2433_v0  ;;  %2392 = vmatprep.subr.bf16.mxu1 (!%p192_p3), %v2433_v0  ;;  %p236_p4 = scmp.lt.s32.totalorder (!%p192_p3), %s1905_s18, 63  ;;  %v2436_v3 = vld [vmem:[%s3083_s1 + $0x8] sm:$0xff] (!%p192_p3)   ;;  %v2438_v5 = vld [vmem:[%s3083_s1 + $0x10] sm:$0xff] (!%p192_p3)  }
   0x8   : > { %2109 = vmatpush3.bf16.msra.mxu0 (!%p192_p3), %v2434_v1  ;;  %2400 = vmatpush3.bf16.msra.mxu1 (!%p192_p3), %v2434_v1  ;;  %v2439_v6 = vld [vmem:[%s3083_s1 + $0x58] sm:$0xff] (!%p192_p3)   ;;  %v2441_v8 = vld [vmem:[%s3083_s1 + $0x60] sm:$0xff] (!%p192_p3)   ;;  %v2443_v10 = vld [vmem:[%s3083_s1 + $0x68] sm:$0xff] (!%p192_p3)  }
   0x9   : > { %2110 = vmatprep.subr.bf16.mxu0 (!%p192_p3), %v2435_v2  ;;  %2393 = vmatprep.subr.bf16.mxu1 (!%p192_p3), %v2435_v2  ;;  %v2440_v7 = vld [vmem:[%s3083_s1 + $0x18] sm:$0xff] (!%p192_p3)   ;;  %v2442_v9 = vld [vmem:[%s3083_s1 + $0x20] sm:$0xff] (!%p192_p3)   ;;  %v2444_v13 = vld [vmem:[%s3083_s1 + $0x28] sm:$0xff] (!%p192_p3)  }
   0xa   : > { %v2445_v14 = vld [vmem:[%s3083_s1 + $0x70] sm:$0xff] (!%p192_p3)   ;;  %v2447_v16 = vld [vmem:[%s3083_s1 + $0x78] sm:$0xff] (!%p192_p3)   ;;  %v2455_v18 = vld [vmem:[%s3083_s1 + $0xc0] sm:$0xff] (!%p192_p3)  }
   0xb   : > { %v2446_v15 = vld [vmem:[%s3083_s1 + $0x30] sm:$0xff] (!%p192_p3)   ;;  %v2448_v17 = vld [vmem:[%s3083_s1 + $0x38] sm:$0xff] (!%p192_p3)   ;;  %v2458_v19 = vld [vmem:[%s3083_s1 + $0x100] sm:$0xff] (!%p192_p3)  }
   0xc   : > { %2111 = vmatpush3.bf16.msra.mxu0 (!%p192_p3), %v2436_v3  ;;  %2401 = vmatpush3.bf16.msra.mxu1 (!%p192_p3), %v2436_v3  ;;  %v2456_v22 = vld [vmem:[%s3083_s1 + $0x80] sm:$0xff] (!%p192_p3)   ;;  %v2457_v23 = vld [vmem:[%s3083_s1 + $0xc8] sm:$0xff] (!%p192_p3)   ;;  %v2466_v28 = vld [vmem:[%s3083_s1 + $0xd0] sm:$0xff] (!%p192_p3)  }
   0xd   : > { %2112 = vmatprep.subr.bf16.mxu0 (!%p192_p3), %v2437_v4  ;;  %2394 = vmatprep.subr.bf16.mxu1 (!%p192_p3), %v2437_v4  ;;  %v2459_v26 = vld [vmem:[%s3083_s1 + $0x88] sm:$0xff] (!%p192_p3)   ;;  %v2467_v30 = vld [vmem:[%s3083_s1 + $0x90] sm:$0xff] (!%p192_p3)   ;;  %v2468_v31 = vld [vmem:[%s3083_s1 + $0xd8] sm:$0xff] (!%p192_p3)  }
   0xe   : > { %s3091_s18 = smov (!%p236_p4, %s1905_s18), 63  ;;  %v2469_v34 = vld [vmem:[%s3083_s1 + $0x98] sm:$0xff]   ;;  %v2489_v35 = vld [vmem:[%s3083_s1 + $0x108] sm:$0xff]   ;;  %v2476_v37 = vld [vmem:[%s3083_s1 + $0xe0] sm:$0xff]  }
   0xf   : > { %s2408_s4 = smul.u32 20, %s3091_s18  ;;  %v2477_v39 = vld [vmem:[%s3083_s1 + $0xa0] sm:$0xff]   ;;  %v2478_v40 = vld [vmem:[%s3083_s1 + $0xe8] sm:$0xff]   ;;  %v2486_v46 = vld [vmem:[%s3083_s1 + $0xf0] sm:$0xff]   ;;  %s1908_s27 = sshll.u32 %s3091_s18, 2 }
  0x10   : > { %2113 = vmatpush3.bf16.msra.mxu0 %v2438_v5  ;;  %2402 = vmatpush3.bf16.msra.mxu1 %v2438_v5  ;;  %v2479_v43 = vld [vmem:[%s3083_s1 + $0xa8] sm:$0xff]   ;;  %v2509_v47 = vld [vmem:[%s3083_s1 + $0x110] sm:$0xff]   ;;  %v2488_v49 = vld [vmem:[%s3083_s1 + $0xf8] sm:$0xff]   ;;  %s2948_s29 = scalar_lea.vmem %s3085_s3, %s1908_s27 }
  0x11   : > { %2114 = vmatprep.subr.bf16.mxu0 %v2439_v6  ;;  %2395 = vmatprep.subr.bf16.mxu1 %v2439_v6  ;;  %s2676_s11 = scalar_lea.vmem %s3082_s0, %s2408_s4  ;;  %v2487_v48 = vld [vmem:[%s3083_s1 + $0xb0] sm:$0xff]   ;;  %v2490_v52 = vld [vmem:[%s3083_s1 + $0xb8] sm:$0xff]  }
  0x12   : > { %v2451_v11 = vld [vmem:[%s2676_s11 + $0x4] ss:$20 sps:$4 sm:$0xff]   ;;  %v2449_v20 = vld [vmem:[%s2676_s11] ss:$20 sps:$4 sm:$0xff]   ;;  %v2464_v27 = vld [vmem:[%s2676_s11 + $0x28] ss:$20 sps:$4 sm:$0xff]  }
  0x13   : > { %v2454_v12 = vld [vmem:[%s2676_s11 + $0x1e4] ss:$20 sps:$4 sm:$0xff]   ;;  %1140 = vmatprep.mubr.bf16.mxu0 %v2451_v11  ;;  %v2452_v21 = vld [vmem:[%s2676_s11 + $0x1e0] ss:$20 sps:$4 sm:$0xff]   ;;  %v2465_v29 = vld [vmem:[%s2676_s11 + $0x208] ss:$20 sps:$4 sm:$0xff]  }
  0x14   : > { %2115 = vmatpush3.bf16.msra.mxu0 %v2440_v7  ;;  %2403 = vmatpush3.bf16.msra.mxu1 %v2440_v7  ;;  %v2460_v24 = vld [vmem:[%s2676_s11 + $0x2c] ss:$20 sps:$4 sm:$0xff]   ;;  %v2470_v32 = vld [vmem:[%s2676_s11 + $0x54] ss:$20 sps:$4 sm:$0xff]   ;;  %v2474_v36 = vld [vmem:[%s2676_s11 + $0x50] ss:$20 sps:$4 sm:$0xff]  }
  0x15   : > { %2116 = vmatprep.subr.bf16.mxu0 %v2441_v8  ;;  %2396 = vmatprep.subr.bf16.mxu1 %v2441_v8  ;;  %v2462_v25 = vld [vmem:[%s2676_s11 + $0x20c] ss:$20 sps:$4 sm:$0xff]   ;;  %v2472_v33 = vld [vmem:[%s2676_s11 + $0x234] ss:$20 sps:$4 sm:$0xff]   ;;  %v2475_v38 = vld [vmem:[%s2676_s11 + $0x230] ss:$20 sps:$4 sm:$0xff]  }
  0x16   : > { %1236 = vmatprep.mubr.bf16.mxu1 %v2454_v12  ;;  %v2480_v41 = vld [vmem:[%s2676_s11 + $0x7c] ss:$20 sps:$4 sm:$0xff]   ;;  %v2484_v44 = vld [vmem:[%s2676_s11 + $0x78] ss:$20 sps:$4 sm:$0xff]   ;;  %v2496_v54 = vld [vmem:[%s2676_s11 + $0xa0] ss:$20 sps:$4 sm:$0xff]  }
  0x17   : > { %v2482_v42 = vld [vmem:[%s2676_s11 + $0x25c] ss:$20 sps:$4 sm:$0xff]   ;;  %v2485_v45 = vld [vmem:[%s2676_s11 + $0x258] ss:$20 sps:$4 sm:$0xff]   ;;  %v2499_v57 = vld [vmem:[%s2676_s11 + $0x34] ss:$20 sps:$4 sm:$0xff]  }
  0x18   : > { %2117 = vmatpush3.bf16.msra.mxu0 %v2442_v9  ;;  %2404 = vmatpush3.bf16.msra.mxu1 %v2442_v9  ;;  %v2491_v50 = vld [vmem:[%s2676_s11 + $0xa4] ss:$20 sps:$4 sm:$0xff]   ;;  %v2495_v51 = vld [vmem:[%s2676_s11 + $0xc] ss:$20 sps:$4 sm:$0xff]   ;;  %v2493_v53 = vld [vmem:[%s2676_s11 + $0x8] ss:$20 sps:$4 sm:$0xff]  }
  0x19   : > { %2118 = vmatprep.subr.bf16.mxu0 %v2443_v10  ;;  %2397 = vmatprep.subr.bf16.mxu1 %v2443_v10  ;;  %v2497_v55 = vld [vmem:[%s2676_s11 + $0xcc] ss:$20 sps:$4 sm:$0xff]   ;;  %v2528_v56 = vld [vmem:[%s3083_s1 + $0x118] sm:$0xff]   ;;  %v2502_v59 = vld [vmem:[%s2676_s11 + $0x30] ss:$20 sps:$4 sm:$0xff]  }
  0x1a   : > { %v2501_v58 = vld [vmem:[%s2676_s11 + $0xc8] ss:$20 sps:$4 sm:$0xff]   ;;  %v2507_v62 = vld [vmem:[%s2676_s11 + $0xf0] ss:$20 sps:$4 sm:$0xff]   ;;  %v2508_v63 = vld [vmem:[%s2676_s11 + $0x58] ss:$20 sps:$4 sm:$0xff]  }
  0x1b   : > { %v2503_v60 = vld [vmem:[%s2676_s11 + $0xf4] ss:$20 sps:$4 sm:$0xff]   ;;  %v2505_v61 = vld [vmem:[%s2676_s11 + $0x5c] ss:$20 sps:$4 sm:$0xff]   ;;  %v2512_v1 = vld [vmem:[%s2676_s11 + $0x84] ss:$20 sps:$4 sm:$0xff]  }
  0x1c   : > { %2119 = vmatpush3.bf16.msra.mxu0 %v2444_v13  ;;  %2405 = vmatpush3.bf16.msra.mxu1 %v2444_v13  ;;  %v2510_v0 = vld [vmem:[%s2676_s11 + $0x11c] ss:$20 sps:$4 sm:$0xff]   ;;  %v2514_v2 = vld [vmem:[%s2676_s11 + $0x118] ss:$20 sps:$4 sm:$0xff]   ;;  %v2515_v3 = vld [vmem:[%s2676_s11 + $0x80] ss:$20 sps:$4 sm:$0xff]  }
  0x1d   : > { %2120 = vmatprep.subr.bf16.mxu0 %v2445_v14  ;;  %2398 = vmatprep.subr.bf16.mxu1 %v2445_v14  ;;  %v2516_v4 = vld [vmem:[%s2676_s11 + $0x144] ss:$20 sps:$4 sm:$0xff]   ;;  %v2518_v5 = vld [vmem:[%s2676_s11 + $0xac] ss:$20 sps:$4 sm:$0xff]   ;;  %v2521_v7 = vld [vmem:[%s2676_s11 + $0xa8] ss:$20 sps:$4 sm:$0xff]  }
  0x1e   : > { %v2520_v6 = vld [vmem:[%s2676_s11 + $0x140] ss:$20 sps:$4 sm:$0xff]   ;;  %v2526_v10 = vld [vmem:[%s2676_s11 + $0x168] ss:$20 sps:$4 sm:$0xff]   ;;  %v2527_v11 = vld [vmem:[%s2676_s11 + $0xd0] ss:$20 sps:$4 sm:$0xff]  }
  0x1f   : > { %v2522_v8 = vld [vmem:[%s2676_s11 + $0x16c] ss:$20 sps:$4 sm:$0xff]   ;;  %v2524_v9 = vld [vmem:[%s2676_s11 + $0xd4] ss:$20 sps:$4 sm:$0xff]   ;;  %v2531_v13 = vld [vmem:[%s2676_s11 + $0xfc] ss:$20 sps:$4 sm:$0xff]  }
  0x20   : > { %2121 = vmatpush3.bf16.msra.mxu0 %v2446_v15  ;;  %2406 = vmatpush3.bf16.msra.mxu1 %v2446_v15  ;;  %v2529_v12 = vld [vmem:[%s2676_s11 + $0x194] ss:$20 sps:$4 sm:$0xff]   ;;  %v2533_v14 = vld [vmem:[%s2676_s11 + $0x190] ss:$20 sps:$4 sm:$0xff]   ;;  %v2534_v15 = vld [vmem:[%s2676_s11 + $0xf8] ss:$20 sps:$4 sm:$0xff]  }
  0x21   : > { %2122 = vmatprep.subr.bf16.mxu0 %v2447_v16  ;;  %2399 = vmatprep.subr.bf16.mxu1 %v2447_v16  ;;  %v2535_v16 = vld [vmem:[%s2676_s11 + $0x1bc] ss:$20 sps:$4 sm:$0xff]  }
  0x24   : > { %2123 = vmatpush3.bf16.msra.mxu0 %v2448_v17  ;;  %2407 = vmatpush3.bf16.msra.mxu1 %v2448_v17  ;;  %v2537_v17 = vld [vmem:[%s2676_s11 + $0x124] ss:$20 sps:$4 sm:$0xff]  }
  0x25   : > { %2220 = vmatprep.subr.bf16.mxu1 %v2455_v18  ;;  %2352 = vmatprep.subr.bf16.mxu0 %v2458_v19  ;;  %v2539_v18 = vld [vmem:[%s2676_s11 + $0x1b8] ss:$20 sps:$4 sm:$0xff]  }
  0x27   : > { %1141 = vmatmul.mubr.bf16.vlgmr.msra.gmra.mrb[0].mxu0 %v2449_v20  ;;  %1237 = vmatmul.mubr.bf16.vlgmr.msra.gmra.mrb[0].mxu1 %v2452_v21  ;;  %v2541_v20 = vld [vmem:[%s2676_s11 + $0x14c] ss:$20 sps:$4 sm:$0xff]   ;;  %v2543_v21 = vld [vmem:[%s2676_s11 + $0x10] ss:$20 sps:$4 sm:$0xff]  }
  0x28   : > { %2221 = vmatpush3.bf16.msra.mxu1 %v2456_v22  ;;  %2353 = vmatpush3.bf16.msra.mxu0 %v2458_v19  ;;  %v2540_v19 = vld [vmem:[%s2676_s11 + $0x120] ss:$20 sps:$4 sm:$0xff]   ;;  %v2544_v22 = vld [vmem:[%s2676_s11 + $0x148] ss:$20 sps:$4 sm:$0xff]  }
  0x29   : > { %2222 = vmatprep.subr.bf16.mxu1 %v2457_v23  ;;  %1148 = vmatprep.mubr.bf16.mxu0 %v2460_v24  ;;  %v2545_v23 = vld [vmem:[%s2676_s11 + $0x38] ss:$20 sps:$4 sm:$0xff]   ;;  %v2546_v24 = vld [vmem:[%s2676_s11 + $0x174] ss:$20 sps:$4 sm:$0xff]  }
  0x2a   : > { %1244 = vmatprep.mubr.bf16.mxu1 %v2462_v25  ;;  %2354 = vmatprep.subr.bf16.mxu0 %v2489_v35  ;;  %v2548_v25 = vld [vmem:[%s2676_s11 + $0x60] ss:$20 sps:$4 sm:$0xff]  }
  0x2c   : > { %2223 = vmatpush3.bf16.msra.mxu1 %v2459_v26  ;;  %2355 = vmatpush3.bf16.msra.mxu0 %v2489_v35  ;;  %v2549_v26 = vld [vmem:[%s2676_s11 + $0x170] ss:$20 sps:$4 sm:$0xff]   ;;  %v2560_v35 = vld [vmem:[%s2676_s11 + $0x128] ss:$20 sps:$4 sm:$0xff]  }
  0x2d   : > { %2224 = vmatprep.subr.bf16.mxu1 %v2466_v28  ;;  %2356 = vmatprep.subr.bf16.mxu0 %v2509_v47  ;;  %v2551_v28 = vld [vmem:[%s2676_s11 + $0x19c] ss:$20 sps:$4 sm:$0xff]  }
  0x2f   : > { %1149 = vmatmul.mubr.bf16.gmra.mrb[4].mxu0 %v2464_v27  ;;  %1245 = vmatmul.mubr.bf16.gmra.mrb[4].mxu1 %v2465_v29  ;;  %v2550_v27 = vld [vmem:[%s2676_s11 + $0x88] ss:$20 sps:$4 sm:$0xff]   ;;  %v2553_v29 = vld [vmem:[%s2676_s11 + $0xb0] ss:$20 sps:$4 sm:$0xff]  }
  0x30   : > { %2225 = vmatpush3.bf16.msra.mxu1 %v2467_v30  ;;  %1156 = vmatprep.mubr.bf16.mxu0 %v2470_v32  ;;  %v2554_v30 = vld [vmem:[%s2676_s11 + $0x198] ss:$20 sps:$4 sm:$0xff]  }
  0x31   : > { %2226 = vmatprep.subr.bf16.mxu1 %v2468_v31  ;;  %1252 = vmatprep.mubr.bf16.mxu1 %v2472_v33  ;;  %v2555_v31 = vld [vmem:[%s2676_s11 + $0xd8] ss:$20 sps:$4 sm:$0xff]   ;;  %v2558_v33 = vld [vmem:[%s2676_s11 + $0x100] ss:$20 sps:$4 sm:$0xff]  }
  0x32   : > { %2357 = vmatpush3.bf16.msra.mxu0 %v2509_v47  ;;  %v2556_v32 = vld [vmem:[%s2676_s11 + $0x1c4] ss:$20 sps:$4 sm:$0xff]  }
  0x33   : > { %2358 = vmatprep.subr.bf16.mxu0 %v2528_v56  ;;  %v2575_v47 = vld [vmem:[%s2676_s11 + $0x218] ss:$20 sps:$4 sm:$0xff]  }
  0x34   : > { %2227 = vmatpush3.bf16.msra.mxu1 %v2469_v34  ;;  %v2559_v34 = vld [vmem:[%s2676_s11 + $0x1c0] ss:$20 sps:$4 sm:$0xff]  }
  0x35   : > { %2228 = vmatprep.subr.bf16.mxu1 %v2476_v37  ;;  %v2563_v37 = vld [vmem:[%s2676_s11 + $0x150] ss:$20 sps:$4 sm:$0xff]  }
  0x36   : > { %2359 = vmatpush3.bf16.msra.mxu0 %v2528_v56 }
  0x37   : > { %1157 = vmatmul.mubr.bf16.gmra.mrb[8].mxu0 %v2474_v36  ;;  %1253 = vmatmul.mubr.bf16.gmra.mrb[8].mxu1 %v2475_v38  ;;  %v2561_v36 = vld [vmem:[%s2676_s11 + $0x1ec] ss:$20 sps:$4 sm:$0xff]   ;;  %v2564_v38 = vld [vmem:[%s2676_s11 + $0x1e8] ss:$20 sps:$4 sm:$0xff]  }
  0x38   : > { %2229 = vmatpush3.bf16.msra.mxu1 %v2477_v39  ;;  %1164 = vmatprep.mubr.bf16.mxu0 %v2480_v41  ;;  %v2565_v39 = vld [vmem:[%s2676_s11 + $0x178] ss:$20 sps:$4 sm:$0xff]   ;;  %v2568_v41 = vld [vmem:[%s2676_s11 + $0x1a0] ss:$20 sps:$4 sm:$0xff]  }
  0x39   : > { %2230 = vmatprep.subr.bf16.mxu1 %v2478_v40  ;;  %1260 = vmatprep.mubr.bf16.mxu1 %v2482_v42  ;;  %v2566_v40 = vld [vmem:[%s2676_s11 + $0x214] ss:$20 sps:$4 sm:$0xff]   ;;  %v2569_v42 = vld [vmem:[%s2676_s11 + $0x210] ss:$20 sps:$4 sm:$0xff]  }
  0x3c   : > { %2231 = vmatpush3.bf16.msra.mxu1 %v2479_v43  ;;  %v2570_v43 = vld [vmem:[%s2676_s11 + $0x1c8] ss:$20 sps:$4 sm:$0xff]  }
  0x3d   : > { %2232 = vmatprep.subr.bf16.mxu1 %v2486_v46  ;;  %v2574_v46 = vld [vmem:[%s2676_s11 + $0x238] ss:$20 sps:$4 sm:$0xff]  }
  0x3f   : > { %1165 = vmatmul.mubr.bf16.gmra.mrb[12].mxu0 %v2484_v44  ;;  %1261 = vmatmul.mubr.bf16.gmra.mrb[12].mxu1 %v2485_v45  ;;  %v2571_v44 = vld [vmem:[%s2676_s11 + $0x23c] ss:$20 sps:$4 sm:$0xff]  }
  0x40   : > { %2233 = vmatpush3.bf16.msra.mxu1 %v2487_v48  ;;  %1172 = vmatprep.mubr.bf16.mxu0 %v2491_v50  ;;  %v2573_v45 = vld [vmem:[%s2676_s11 + $0x1f0] ss:$20 sps:$4 sm:$0xff]   ;;  %v2579_v50 = vld [vmem:[%s2676_s11 + $0x260] ss:$20 sps:$4 sm:$0xff]  }
  0x41   : > { %2234 = vmatprep.subr.bf16.mxu1 %v2488_v49  ;;  %1301 = vmatprep.mubr.bf16.mxu1 %v2495_v51  ;;  %v2576_v48 = vld [vmem:[%s2676_s11 + $0x264] ss:$20 sps:$4 sm:$0xff]   ;;  %v2578_v49 = vld [vmem:[%s2676_s11 + $0x240] ss:$20 sps:$4 sm:$0xff]   ;;  %v2580_v51 = vld [vmem:[%s2676_s11 + $0x268] ss:$20 sps:$4 sm:$0xff]  }
  0x44   : > { %2235 = vmatpush3.bf16.msra.mxu1 %v2490_v52 }
  0x47   : > { %1173 = vmatmul.mubr.bf16.gmra.mrb[16].mxu0 %v2496_v54  ;;  %1302 = vmatmul.mubr.bf16.vlgmr.msra.gmra.mrb[16].mxu1 %v2493_v53 }
  0x48   : > { %1180 = vmatprep.mubr.bf16.mxu0 %v2497_v55  ;;  %1309 = vmatprep.mubr.bf16.mxu1 %v2499_v57 }
  0x4f   : > { %1181 = vmatmul.mubr.bf16.gmra.mrb[20].mxu0 %v2501_v58  ;;  %1310 = vmatmul.mubr.bf16.gmra.mrb[20].mxu1 %v2502_v59 }
  0x50   : > { %1188 = vmatprep.mubr.bf16.mxu0 %v2503_v60  ;;  %1317 = vmatprep.mubr.bf16.mxu1 %v2505_v61 }
  0x57   : > { %1189 = vmatmul.mubr.bf16.gmra.mrb[24].mxu0 %v2507_v62  ;;  %1318 = vmatmul.mubr.bf16.gmra.mrb[24].mxu1 %v2508_v63 }
  0x58   : > { %1196 = vmatprep.mubr.bf16.mxu0 %v2510_v0  ;;  %1325 = vmatprep.mubr.bf16.mxu1 %v2512_v1 }
  0x5f   : > { %1197 = vmatmul.mubr.bf16.gmra.mrb[28].mxu0 %v2514_v2  ;;  %1326 = vmatmul.mubr.bf16.gmra.mrb[28].mxu1 %v2515_v3 }
  0x60   : > { %1204 = vmatprep.mubr.bf16.mxu0 %v2516_v4  ;;  %1333 = vmatprep.mubr.bf16.mxu1 %v2518_v5 }
  0x67   : > { %1205 = vmatmul.mubr.bf16.gmra.mrb[32].mxu0 %v2520_v6  ;;  %1334 = vmatmul.mubr.bf16.gmra.mrb[32].mxu1 %v2521_v7 }
  0x68   : > { %1212 = vmatprep.mubr.bf16.mxu0 %v2522_v8  ;;  %1341 = vmatprep.mubr.bf16.mxu1 %v2524_v9 }
  0x6f   : > { %1213 = vmatmul.mubr.bf16.gmra.mrb[36].mxu0 %v2526_v10  ;;  %1342 = vmatmul.mubr.bf16.gmra.mrb[36].mxu1 %v2527_v11 }
  0x70   : > { %1220 = vmatprep.mubr.bf16.mxu0 %v2529_v12  ;;  %1349 = vmatprep.mubr.bf16.mxu1 %v2531_v13 }
  0x77   : > { %1221 = vmatmul.mubr.bf16.gmra.mrb[40].mxu0 %v2533_v14  ;;  %1350 = vmatmul.mubr.bf16.gmra.mrb[40].mxu1 %v2534_v15 }
  0x78   : > { %1228 = vmatprep.mubr.bf16.mxu0 %v2535_v16  ;;  %1357 = vmatprep.mubr.bf16.mxu1 %v2537_v17 }
  0x7f   : > { %1229 = vmatmul.mubr.bf16.gmra.mrb[44].mxu0 %v2539_v18  ;;  %1358 = vmatmul.mubr.bf16.gmra.mrb[44].mxu1 %v2540_v19 }
  0x80   : > { %1365 = vmatprep.mubr.bf16.mxu1 %v2541_v20  ;;  %2360 = vmatprep.mubr.msk.bf16.mxu0 %vm1059_vm0, %v2543_v21 }
  0x87   : > { %1366 = vmatmul.mubr.bf16.gmra.mrb[48].mxu1 %v2544_v22  ;;  %2361 = vmatmul.mubr.msk.bf16.vlgmr.msra.gmra.mrb[48].mxu0 %vm1059_vm0, %v2545_v23 }
  0x88   : > { %1373 = vmatprep.mubr.bf16.mxu1 %v2546_v24  ;;  %2364 = vmatprep.mubr.msk.bf16.mxu0 %vm1059_vm0, %v2548_v25 }
  0x8f   : > { %1374 = vmatmul.mubr.bf16.gmra.mrb[52].mxu1 %v2549_v26  ;;  %2365 = vmatmul.mubr.msk.bf16.gmra.mrb[52].mxu0 %vm1059_vm0, %v2550_v27 }
  0x90   : > { %1381 = vmatprep.mubr.bf16.mxu1 %v2551_v28  ;;  %2368 = vmatprep.mubr.msk.bf16.mxu0 %vm1059_vm0, %v2553_v29 }
  0x97   : > { %1382 = vmatmul.mubr.bf16.gmra.mrb[56].mxu1 %v2554_v30  ;;  %2369 = vmatmul.mubr.msk.bf16.gmra.mrb[56].mxu0 %vm1059_vm0, %v2555_v31 }
  0x98   : > { %1389 = vmatprep.mubr.bf16.mxu1 %v2556_v32  ;;  %2372 = vmatprep.mubr.msk.bf16.mxu0 %vm1059_vm0, %v2558_v33 }
  0x9f   : > { %1390 = vmatmul.mubr.bf16.gmra.mrb[60].mxu1 %v2559_v34  ;;  %2373 = vmatmul.mubr.msk.bf16.gmra.mrb[60].mxu0 %vm1059_vm0, %v2560_v35 }
  0xa0   : > { %1397 = vmatprep.mubr.bf16.mxu1 %v2561_v36  ;;  %2376 = vmatprep.mubr.msk.bf16.mxu0 %vm1059_vm0, %v2563_v37 }
  0xa7   : > { %1398 = vmatmul.mubr.bf16.gmra.mrb[64].mxu1 %v2564_v38  ;;  %2377 = vmatmul.mubr.msk.bf16.gmra.mrb[64].mxu0 %vm1059_vm0, %v2565_v39  ;;  %v2874_v38 = vld [vmem:[%s3084_s2] ss:$0 sm:$0xff] }
  0xa8   : > { %1405 = vmatprep.mubr.bf16.mxu1 %v2566_v40  ;;  %2380 = vmatprep.mubr.msk.bf16.mxu0 %vm1059_vm0, %v2568_v41 }
  0xaf   : > { %1406 = vmatmul.mubr.bf16.gmra.mrb[68].mxu1 %v2569_v42  ;;  %2381 = vmatmul.mubr.msk.bf16.gmra.mrb[68].mxu0 %vm1059_vm0, %v2570_v43 }
  0xb0   : > { %1413 = vmatprep.mubr.bf16.mxu1 %v2571_v44  ;;  %2384 = vmatprep.mubr.msk.bf16.mxu0 %vm1059_vm0, %v2573_v45 }
  0xb7   : > { %1414 = vmatmul.mubr.bf16.gmra.mrb[72].mxu1 %v2574_v46  ;;  %2385 = vmatmul.mubr.msk.bf16.gmra.mrb[72].mxu0 %vm1059_vm0, %v2575_v47 }
  0xb8   : > { %1421 = vmatprep.mubr.bf16.mxu1 %v2576_v48  ;;  %2388 = vmatprep.mubr.msk.bf16.mxu0 %vm1059_vm0, %v2578_v49 }
  0xbf   : > { %1422 = vmatmul.mubr.bf16.gmra.mrb[76].mxu1 %v2579_v50  ;;  %2389 = vmatmul.mubr.msk.bf16.gmra.mrb[76].mxu0 %vm1059_vm0, %v2580_v51 }
  0xfa   : > { %v2196_v52 = vpop.f32.mrb[0].mxu1  ;;  %v2124_v53 = vpop.f32.mrb[0].mxu0 }
  0xfb   : > { %v2197_v54 = vpop.f32.mrb[1].mxu1  ;;  %v2125_v55 = vpop.f32.mrb[1].mxu0 }
  0xfc   : > { %v2855_v56 = vadd.f32 %v2197_v54, %v2196_v52  ;;  %v2199_v57 = vpop.f32.mrb[2].mxu1  ;;  %v2126_v58 = vadd.f32 %v2125_v55, %v2124_v53  ;;  %v2127_v59 = vpop.f32.mrb[2].mxu0 }
  0xfd   : > { %v2200_v60 = vpop.f32.mrb[3].mxu1  ;;  %v2128_v61 = vpop.f32.mrb[3].mxu0 }
  0xfe   : > { %v2857_v62 = vadd.f32 %v2200_v60, %v2199_v57  ;;  %v2129_v63 = vadd.f32 %v2128_v61, %v2127_v59  ;;  %v1143_v41 = vadd.f32 %v2126_v58, %v2874_v38 }
 0x100   : > { %v1146_v48 = vadd.f32 %v2129_v63, %v2874_v38 }
 0x102   : > { %v2202_v0 = vpop.f32.mrb[4].mxu1  ;;  %v2130_v1 = vpop.f32.mrb[4].mxu0 }
 0x103   : > { %v2203_v2 = vpop.f32.mrb[5].mxu1  ;;  %v2131_v3 = vpop.f32.mrb[5].mxu0 }
 0x104   : > { %v2859_v4 = vadd.f32 %v2203_v2, %v2202_v0  ;;  %v2205_v5 = vpop.f32.mrb[6].mxu1  ;;  %v2132_v6 = vadd.f32 %v2131_v3, %v2130_v1  ;;  %v2133_v7 = vpop.f32.mrb[6].mxu0 }
 0x105   : > { %v2206_v8 = vpop.f32.mrb[7].mxu1  ;;  %v2134_v9 = vpop.f32.mrb[7].mxu0 }
 0x106   : > { %v2861_v10 = vadd.f32 %v2206_v8, %v2205_v5  ;;  %v2135_v11 = vadd.f32 %v2134_v9, %v2133_v7  ;;  %v1151_v58 = vadd.f32 %v2132_v6, %v2874_v38 }
 0x108   : > { %v1154_v63 = vadd.f32 %v2135_v11, %v2874_v38 }
 0x10a   : > { %v2208_v12 = vpop.f32.mrb[8].mxu1  ;;  %v2136_v13 = vpop.f32.mrb[8].mxu0 }
 0x10b   : > { %v2209_v14 = vpop.f32.mrb[9].mxu1  ;;  %v2137_v15 = vpop.f32.mrb[9].mxu0 }
 0x10c   : > { %v2863_v16 = vadd.f32 %v2209_v14, %v2208_v12  ;;  %v2211_v17 = vpop.f32.mrb[10].mxu1  ;;  %v2138_v18 = vadd.f32 %v2137_v15, %v2136_v13  ;;  %v2139_v19 = vpop.f32.mrb[10].mxu0 }
 0x10d   : > { %v2212_v20 = vpop.f32.mrb[11].mxu1  ;;  %v2140_v21 = vpop.f32.mrb[11].mxu0 }
 0x10e   : > { %v2865_v22 = vadd.f32 %v2212_v20, %v2211_v17  ;;  %v2141_v23 = vadd.f32 %v2140_v21, %v2139_v19  ;;  %v1159_v6 = vadd.f32 %v2138_v18, %v2874_v38 }
 0x110   : > { %v1162_v11 = vadd.f32 %v2141_v23, %v2874_v38 }
 0x112   : > { %v2214_v24 = vpop.f32.mrb[12].mxu1  ;;  %v2142_v25 = vpop.f32.mrb[12].mxu0 }
 0x113   : > { %v2215_v26 = vpop.f32.mrb[13].mxu1  ;;  %v2143_v27 = vpop.f32.mrb[13].mxu0 }
 0x114   : > { %v2867_v28 = vadd.f32 %v2215_v26, %v2214_v24  ;;  %v2217_v29 = vpop.f32.mrb[14].mxu1  ;;  %v2144_v30 = vadd.f32 %v2143_v27, %v2142_v25  ;;  %v2145_v31 = vpop.f32.mrb[14].mxu0 }
 0x115   : > { %v2218_v32 = vpop.f32.mrb[15].mxu1  ;;  %v2146_v33 = vpop.f32.mrb[15].mxu0 }
 0x116   : > { %v2869_v34 = vadd.f32 %v2218_v32, %v2217_v29  ;;  %v2147_v35 = vadd.f32 %v2146_v33, %v2145_v31  ;;  %v1167_v18 = vadd.f32 %v2144_v30, %v2874_v38 }
 0x118   : > { %v1170_v23 = vadd.f32 %v2147_v35, %v2874_v38 }
 0x11a   : > { %v2236_v36 = vpop.f32.mrb[16].mxu1  ;;  %v2148_v37 = vpop.f32.mrb[16].mxu0 }
 0x11b   : > { %v2237_v39 = vpop.f32.mrb[17].mxu1  ;;  %v2149_v40 = vpop.f32.mrb[17].mxu0 }
 0x11c   : > { %v2238_v42 = vadd.f32 %v2237_v39, %v2236_v36  ;;  %v2239_v43 = vpop.f32.mrb[18].mxu1  ;;  %v2150_v44 = vadd.f32 %v2149_v40, %v2148_v37  ;;  %v2151_v45 = vpop.f32.mrb[18].mxu0 }
 0x11d   : > { %v2240_v46 = vpop.f32.mrb[19].mxu1  ;;  %v2152_v47 = vpop.f32.mrb[19].mxu0 }
 0x11e   : > { %v2241_v49 = vadd.f32 %v2240_v46, %v2239_v43  ;;  %v2153_v50 = vadd.f32 %v2152_v47, %v2151_v45  ;;  %v2878_v51 = vadd.f32 %v2238_v42, %v1143_v41  ;;  %v1175_v30 = vadd.f32 %v2150_v44, %v2874_v38 }
 0x120   : > { %v2880_v52 = vadd.f32 %v2241_v49, %v1146_v48  ;;  %v1178_v35 = vadd.f32 %v2153_v50, %v2874_v38 }
 0x122   : > { %v2242_v53 = vpop.f32.mrb[20].mxu1  ;;  %v2154_v54 = vpop.f32.mrb[20].mxu0 }
 0x123   : > { %v2243_v55 = vpop.f32.mrb[21].mxu1  ;;  %v2155_v57 = vpop.f32.mrb[21].mxu0 }
 0x124   : > { %v2244_v59 = vadd.f32 %v2243_v55, %v2242_v53  ;;  %v2245_v60 = vpop.f32.mrb[22].mxu1  ;;  %v2156_v61 = vadd.f32 %v2155_v57, %v2154_v54  ;;  %v2157_v0 = vpop.f32.mrb[22].mxu0 }
 0x125   : > { %v2246_v1 = vpop.f32.mrb[23].mxu1  ;;  %v2158_v2 = vpop.f32.mrb[23].mxu0 }
 0x126   : > { %v2247_v3 = vadd.f32 %v2246_v1, %v2245_v60  ;;  %v2159_v5 = vadd.f32 %v2158_v2, %v2157_v0  ;;  %v2884_v7 = vadd.f32 %v2244_v59, %v1151_v58  ;;  %v1183_v44 = vadd.f32 %v2156_v61, %v2874_v38 }
 0x128   : > { %v2886_v8 = vadd.f32 %v2247_v3, %v1154_v63  ;;  %v1186_v50 = vadd.f32 %v2159_v5, %v2874_v38 }
 0x12a   : > { %v2248_v9 = vpop.f32.mrb[24].mxu1  ;;  %v2160_v12 = vpop.f32.mrb[24].mxu0 }
 0x12b   : > { %v2249_v13 = vpop.f32.mrb[25].mxu1  ;;  %v2161_v14 = vpop.f32.mrb[25].mxu0 }
 0x12c   : > { %v2250_v15 = vadd.f32 %v2249_v13, %v2248_v9  ;;  %v2251_v17 = vpop.f32.mrb[26].mxu1  ;;  %v2162_v19 = vadd.f32 %v2161_v14, %v2160_v12  ;;  %v2163_v20 = vpop.f32.mrb[26].mxu0 }
 0x12d   : > { %v2252_v21 = vpop.f32.mrb[27].mxu1  ;;  %v2164_v24 = vpop.f32.mrb[27].mxu0 }
 0x12e   : > { %v2253_v25 = vadd.f32 %v2252_v21, %v2251_v17  ;;  %v2165_v26 = vadd.f32 %v2164_v24, %v2163_v20  ;;  %v2890_v27 = vadd.f32 %v2250_v15, %v1159_v6 }
 0x130   : > { %v2892_v29 = vadd.f32 %v2253_v25, %v1162_v11 }
 0x132   : > { %v2254_v31 = vpop.f32.mrb[28].mxu1  ;;  %v2166_v32 = vpop.f32.mrb[28].mxu0 }
 0x133   : > { %v2255_v33 = vpop.f32.mrb[29].mxu1  ;;  %v2167_v36 = vpop.f32.mrb[29].mxu0 }
 0x134   : > { %v2256_v37 = vadd.f32 %v2255_v33, %v2254_v31  ;;  %v2257_v39 = vpop.f32.mrb[30].mxu1  ;;  %v2168_v40 = vadd.f32 %v2167_v36, %v2166_v32  ;;  %v2169_v41 = vpop.f32.mrb[30].mxu0 }
 0x135   : > { %v2258_v42 = vpop.f32.mrb[31].mxu1  ;;  %v2170_v43 = vpop.f32.mrb[31].mxu0 }
 0x136   : > { %v2259_v45 = vadd.f32 %v2258_v42, %v2257_v39  ;;  %v2171_v46 = vadd.f32 %v2170_v43, %v2169_v41  ;;  %v2896_v47 = vadd.f32 %v2256_v37, %v1167_v18  ;;  %v1191_v39 = vadd.f32 %v2162_v19, %v2874_v38 }
 0x138   : > { %v2898_v48 = vadd.f32 %v2259_v45, %v1170_v23 }
 0x13a   : > { %v2260_v49 = vpop.f32.mrb[32].mxu1  ;;  %v2172_v53 = vpop.f32.mrb[32].mxu0 }
 0x13b   : > { %v2261_v54 = vpop.f32.mrb[33].mxu1  ;;  %v2173_v55 = vpop.f32.mrb[33].mxu0 }
 0x13c   : > { %v2262_v57 = vadd.f32 %v2261_v54, %v2260_v49  ;;  %v2263_v58 = vpop.f32.mrb[34].mxu1  ;;  %v2901_v59 = vadd.f32 %v2173_v55, %v2172_v53  ;;  %v2175_v60 = vpop.f32.mrb[34].mxu0  ;;  %v1194_v49 = vadd.f32 %v2165_v26, %v2874_v38 }
 0x13d   : > { %v2264_v0 = vpop.f32.mrb[35].mxu1  ;;  %v2176_v1 = vpop.f32.mrb[35].mxu0 }
 0x13e   : > { %v2265_v2 = vadd.f32 %v2264_v0, %v2263_v58  ;;  %v2177_v63 = vadd.f32 %v2176_v1, %v2175_v60  ;;  %v2904_v3 = vadd.f32 %v2262_v57, %v1175_v30  ;;  %v1199_v0 = vadd.f32 %v2168_v40, %v2874_v38 }
 0x140   : > { %v2906_v9 = vadd.f32 %v2265_v2, %v1178_v35 }
 0x142   : > { %v2266_v12 = vpop.f32.mrb[36].mxu1  ;;  %v2178_v13 = vpop.f32.mrb[36].mxu0 }
 0x143   : > { %v2267_v14 = vpop.f32.mrb[37].mxu1  ;;  %v2179_v6 = vpop.f32.mrb[37].mxu0 }
 0x144   : > { %v2268_v15 = vadd.f32 %v2267_v14, %v2266_v12  ;;  %v2269_v17 = vpop.f32.mrb[38].mxu1  ;;  %v2909_v20 = vadd.f32 %v2179_v6, %v2178_v13  ;;  %v2181_v21 = vpop.f32.mrb[38].mxu0  ;;  %v1202_v14 = vadd.f32 %v2171_v46, %v2874_v38 }
 0x145   : > { %v2270_v24 = vpop.f32.mrb[39].mxu1  ;;  %v2182_v11 = vpop.f32.mrb[39].mxu0 }
 0x146   : > { %v2271_v25 = vadd.f32 %v2270_v24, %v2269_v17  ;;  %v2912_v31 = vadd.f32 %v2182_v11, %v2181_v21  ;;  %v2914_v32 = vadd.f32 %v2268_v15, %v1183_v44 }
 0x148   : > { %v2916_v33 = vadd.f32 %v2271_v25, %v1186_v50  ;;  %v1207_v25 = vadd.f32 %v2901_v59, %v2874_v38 }
 0x14a   : > { %v2272_v36 = vpop.f32.mrb[40].mxu1  ;;  %v2184_v18 = vpop.f32.mrb[40].mxu0 }
 0x14b   : > { %v2273_v37 = vpop.f32.mrb[41].mxu1  ;;  %v2185_v61 = vpop.f32.mrb[41].mxu0 }
 0x14c   : > { %v2274_v41 = vadd.f32 %v2273_v37, %v2272_v36  ;;  %v2275_v42 = vpop.f32.mrb[42].mxu1  ;;  %v2919_v43 = vadd.f32 %v2185_v61, %v2184_v18  ;;  %v2187_v23 = vpop.f32.mrb[42].mxu0  ;;  %v1210_v61 = vadd.f32 %v2177_v63, %v2874_v38 }
 0x14d   : > { %v2276_v45 = vpop.f32.mrb[43].mxu1  ;;  %v2188_v5 = vpop.f32.mrb[43].mxu0 }
 0x14e   : > { %v2277_v53 = vadd.f32 %v2276_v45, %v2275_v42  ;;  %v2922_v54 = vadd.f32 %v2188_v5, %v2187_v23  ;;  %v2924_v55 = vadd.f32 %v2274_v41, %v1191_v39 }
 0x150   : > { %v2926_v30 = vadd.f32 %v2277_v53, %v1194_v49 }
 0x152   : > { %v2278_v57 = vpop.f32.mrb[44].mxu1  ;;  %v2190_v58 = vpop.f32.mrb[44].mxu0 }
 0x153   : > { %v2279_v60 = vpop.f32.mrb[45].mxu1  ;;  %v2191_v19 = vpop.f32.mrb[45].mxu0 }
 0x154   : > { %v2280_v1 = vadd.f32 %v2279_v60, %v2278_v57  ;;  %v2281_v35 = vpop.f32.mrb[46].mxu1  ;;  %v2929_v2 = vadd.f32 %v2191_v19, %v2190_v58  ;;  %v2193_v12 = vpop.f32.mrb[46].mxu0 }
 0x155   : > { %v2282_v26 = vpop.f32.mrb[47].mxu1  ;;  %v2194_v13 = vpop.f32.mrb[47].mxu0 }
 0x156   : > { %v2283_v6 = vadd.f32 %v2282_v26, %v2281_v35  ;;  %v2932_v44 = vadd.f32 %v2194_v13, %v2193_v12  ;;  %v2934_v15 = vadd.f32 %v2280_v1, %v1199_v0  ;;  %v1215_v35 = vadd.f32 %v2909_v20, %v2874_v38 }
 0x158   : > { %v2936_v17 = vadd.f32 %v2283_v6, %v1202_v14  ;;  %v1218_v6 = vadd.f32 %v2912_v31, %v2874_v38 }
 0x15a   : > { %v2284_v21 = vpop.f32.mrb[48].mxu1  ;;  %v2362_v24 = vpop.f32.mrb[48].mxu0 }
 0x15b   : > { %v1473_v40 = vadd.f32 %v2362_v24, %v2884_v7  ;;  %v2285_v11 = vpop.f32.mrb[49].mxu1  ;;  %v1464_v50 = vpop.f32.mrb[49].mxu0 }
 0x15c   : > { %v2286_v36 = vadd.f32 %v2285_v11, %v2284_v21  ;;  %v1465_v46 = vadd.f32 %v1464_v50, %v2878_v51  ;;  %v2287_v18 = vpop.f32.mrb[50].mxu1  ;;  %v2363_v37 = vpop.f32.mrb[50].mxu0 }
 0x15d   : > { %v1593_v39 = vmax.f32 %v1473_v40, 0.0  ;;  %v1476_v41 = vadd.f32 %v2363_v37, %v2886_v8  ;;  %v2288_v42 = vpop.f32.mrb[51].mxu1  ;;  %v1467_v23 = vpop.f32.mrb[51].mxu0 }
 0x15e   : > { %v1591_v7 = vmax.f32 %v1465_v46, 0.0  ;;  %v2289_v51 = vadd.f32 %v2288_v42, %v2287_v18  ;;  %v1468_v59 = vadd.f32 %v1467_v23, %v2880_v52  ;;  %v2951_v45 = vadd.f32 %v2286_v36, %v1207_v25 }
 0x15f   : > { %v2078_v63 = vpack.c.bf16 %v1593_v39, %v1593_v39  ;;  %v1594_v5 = vmax.f32 %v1476_v41, 0.0  ;;  %v1223_v23 = vadd.f32 %v2919_v43, %v2874_v38 }
 0x160   : > { %v2076_v8 = vpack.c.bf16 %v1591_v7, %v1591_v7  ;;  %v1592_v49 = vmax.f32 %v1468_v59, 0.0  ;;  %v2953_v53 = vadd.f32 %v2289_v51, %v1210_v61 }
 0x161   : > { %1754 = vst.msk [vmem:[%s2948_s29 + $0x8] sm:$0xf] %vm1751_vm1, %v2078_v63  ;;  %v2079_v57 = vpack.c.bf16 %v1594_v5, %v1594_v5  ;;  %v1226_v5 = vadd.f32 %v2922_v54, %v2874_v38 }
 0x162   : > { %1752 = vst.msk [vmem:[%s2948_s29] sm:$0xf] %vm1751_vm1, %v2076_v8  ;;  %v2077_v58 = vpack.c.bf16 %v1592_v49, %v1592_v49  ;;  %v2290_v60 = vpop.f32.mrb[52].mxu1  ;;  %v2366_v19 = vpop.f32.mrb[52].mxu0 }
 0x163   : > { %1755 = vst.msk [vmem:[%s2948_s29 + $0xc] sm:$0xf] %vm1751_vm1, %v2079_v57  ;;  %v1489_v52 = vadd.f32 %v2366_v19, %v2896_v47  ;;  %v2291_v0 = vpop.f32.mrb[53].mxu1  ;;  %v1480_v1 = vpop.f32.mrb[53].mxu0 }
 0x164   : > { %1753 = vst.msk [vmem:[%s2948_s29 + $0x4] sm:$0xf] %vm1751_vm1, %v2077_v58  ;;  %v2292_v12 = vadd.f32 %v2291_v0, %v2290_v60  ;;  %v1481_v26 = vadd.f32 %v1480_v1, %v2890_v27  ;;  %v2293_v13 = vpop.f32.mrb[54].mxu1  ;;  %v2367_v14 = vpop.f32.mrb[54].mxu0 }
 0x165   : > { %v1597_v21 = vmax.f32 %v1489_v52, 0.0  ;;  %v1492_v47 = vadd.f32 %v2367_v14, %v2898_v48  ;;  %v2294_v24 = vpop.f32.mrb[55].mxu1  ;;  %v1483_v40 = vpop.f32.mrb[55].mxu0 }
 0x166   : > { %v1595_v11 = vmax.f32 %v1481_v26, 0.0  ;;  %v2295_v20 = vadd.f32 %v2294_v24, %v2293_v13  ;;  %v1484_v50 = vadd.f32 %v1483_v40, %v2892_v29  ;;  %v2971_v25 = vadd.f32 %v2292_v12, %v1215_v35 }
 0x167   : > { %v2082_v27 = vpack.c.bf16 %v1597_v21, %v1597_v21  ;;  %v1598_v36 = vmax.f32 %v1492_v47, 0.0 }
 0x168   : > { %v2080_v46 = vpack.c.bf16 %v1595_v11, %v1595_v11  ;;  %v1596_v18 = vmax.f32 %v1484_v50, 0.0  ;;  %v2973_v37 = vadd.f32 %v2295_v20, %v1218_v6  ;;  %v1231_v6 = vadd.f32 %v2929_v2, %v2874_v38 }
 0x169   : > { %1758 = vst.msk [vmem:[%s2948_s29 + $0x18] sm:$0xf] %vm1751_vm1, %v2082_v27  ;;  %v2083_v31 = vpack.c.bf16 %v1598_v36, %v1598_v36  ;;  %v1234_v11 = vadd.f32 %v2932_v44, %v2874_v38 }
 0x16a   : > { %1756 = vst.msk [vmem:[%s2948_s29 + $0x10] sm:$0xf] %vm1751_vm1, %v2080_v46  ;;  %v2081_v48 = vpack.c.bf16 %v1596_v18, %v1596_v18  ;;  %v2296_v61 = vpop.f32.mrb[56].mxu1  ;;  %v2370_v39 = vpop.f32.mrb[56].mxu0 }
 0x16b   : > { %1759 = vst.msk [vmem:[%s2948_s29 + $0x1c] sm:$0xf] %vm1751_vm1, %v2083_v31  ;;  %v1505_v29 = vadd.f32 %v2370_v39, %v2914_v32  ;;  %v2297_v41 = vpop.f32.mrb[57].mxu1  ;;  %v1496_v42 = vpop.f32.mrb[57].mxu0 }
 0x16c   : > { %1757 = vst.msk [vmem:[%s2948_s29 + $0x14] sm:$0xf] %vm1751_vm1, %v2081_v48  ;;  %v2298_v7 = vadd.f32 %v2297_v41, %v2296_v61  ;;  %v1497_v51 = vadd.f32 %v1496_v42, %v2904_v3  ;;  %v2299_v59 = vpop.f32.mrb[58].mxu1  ;;  %v2371_v63 = vpop.f32.mrb[58].mxu0 }
 0x16d   : > { %v1601_v8 = vmax.f32 %v1505_v29, 0.0  ;;  %v1508_v32 = vadd.f32 %v2371_v63, %v2916_v33  ;;  %v2300_v49 = vpop.f32.mrb[59].mxu1  ;;  %v1499_v57 = vpop.f32.mrb[59].mxu0 }
 0x16e   : > { %v1599_v58 = vmax.f32 %v1497_v51, 0.0  ;;  %v2301_v43 = vadd.f32 %v2300_v49, %v2299_v59  ;;  %v1500_v60 = vadd.f32 %v1499_v57, %v2906_v9  ;;  %v2991_v19 = vadd.f32 %v2298_v7, %v1223_v23 }
 0x16f   : > { %v2086_v3 = vpack.c.bf16 %v1601_v8, %v1601_v8  ;;  %v1602_v52 = vmax.f32 %v1508_v32, 0.0  ;;  %v1239_v7 = vadd.f32 %v2855_v56, %v2874_v38  ;;  %v1242_v8 = vadd.f32 %v2857_v62, %v2874_v38 }
 0x170   : > { %v2084_v0 = vpack.c.bf16 %v1599_v58, %v1599_v58  ;;  %v1600_v1 = vmax.f32 %v1500_v60, 0.0  ;;  %v2993_v35 = vadd.f32 %v2301_v43, %v1226_v5 }
 0x171   : > { %1762 = vst.msk [vmem:[%s2948_s29 + $0x28] sm:$0xf] %vm1751_vm1, %v2086_v3  ;;  %v2087_v54 = vpack.c.bf16 %v1602_v52, %v1602_v52 }
 0x172   : > { %1760 = vst.msk [vmem:[%s2948_s29 + $0x20] sm:$0xf] %vm1751_vm1, %v2084_v0  ;;  %v2085_v33 = vpack.c.bf16 %v1600_v1, %v1600_v1  ;;  %v2302_v12 = vpop.f32.mrb[60].mxu1  ;;  %v2374_v26 = vpop.f32.mrb[60].mxu0 }
 0x173   : > { %1763 = vst.msk [vmem:[%s2948_s29 + $0x2c] sm:$0xf] %vm1751_vm1, %v2087_v54  ;;  %v1521_v9 = vadd.f32 %v2374_v26, %v2934_v15  ;;  %v2303_v13 = vpop.f32.mrb[61].mxu1  ;;  %v1512_v14 = vpop.f32.mrb[61].mxu0 }
 0x174   : > { %1761 = vst.msk [vmem:[%s2948_s29 + $0x24] sm:$0xf] %vm1751_vm1, %v2085_v33  ;;  %v2304_v21 = vadd.f32 %v2303_v13, %v2302_v12  ;;  %v1513_v47 = vadd.f32 %v1512_v14, %v2924_v55  ;;  %v2305_v24 = vpop.f32.mrb[62].mxu1  ;;  %v2375_v40 = vpop.f32.mrb[62].mxu0 }
 0x175   : > { %v1605_v20 = vmax.f32 %v1521_v9, 0.0  ;;  %v1524_v15 = vadd.f32 %v2375_v40, %v2936_v17  ;;  %v2306_v50 = vpop.f32.mrb[63].mxu1  ;;  %v1515_v27 = vpop.f32.mrb[63].mxu0  ;;  %v1247_v9 = vadd.f32 %v2859_v4, %v2874_v38 }
 0x176   : > { %v1603_v36 = vmax.f32 %v1513_v47, 0.0  ;;  %v2307_v2 = vadd.f32 %v2306_v50, %v2305_v24  ;;  %v1516_v46 = vadd.f32 %v1515_v27, %v2926_v30  ;;  %v1392_v18 = vadd.f32 %v2304_v21, %v1231_v6 }
 0x177   : > { %v2090_v31 = vpack.c.bf16 %v1605_v20, %v1605_v20  ;;  %v1606_v55 = vmax.f32 %v1524_v15, 0.0  ;;  %v1250_v47 = vadd.f32 %v2861_v10, %v2874_v38 }
 0x178   : > { %v2088_v48 = vpack.c.bf16 %v1603_v36, %v1603_v36  ;;  %v1604_v61 = vmax.f32 %v1516_v46, 0.0  ;;  %v1395_v39 = vadd.f32 %v2307_v2, %v1234_v11 }
 0x179   : > { %1766 = vst.msk [vmem:[%s2948_s29 + $0x38] sm:$0xf] %vm1751_vm1, %v2090_v31  ;;  %v2091_v44 = vpack.c.bf16 %v1606_v55, %v1606_v55 }
 0x17a   : > { %1764 = vst.msk [vmem:[%s2948_s29 + $0x30] sm:$0xf] %vm1751_vm1, %v2088_v48  ;;  %v2089_v17 = vpack.c.bf16 %v1604_v61, %v1604_v61  ;;  %v2308_v29 = vpop.f32.mrb[64].mxu1  ;;  %v2378_v41 = vpop.f32.mrb[64].mxu0 }
 0x17b   : > { %1767 = vst.msk [vmem:[%s2948_s29 + $0x3c] sm:$0xf] %vm1751_vm1, %v2091_v44  ;;  %v1537_v42 = vadd.f32 %v2378_v41, %v2971_v25  ;;  %v2309_v30 = vpop.f32.mrb[65].mxu1  ;;  %v1528_v23 = vpop.f32.mrb[65].mxu0  ;;  %v1255_v44 = vadd.f32 %v2863_v16, %v2874_v38 }
 0x17c   : > { %1765 = vst.msk [vmem:[%s2948_s29 + $0x34] sm:$0xf] %vm1751_vm1, %v2089_v17  ;;  %v2310_v51 = vadd.f32 %v2309_v30, %v2308_v29  ;;  %v1529_v59 = vadd.f32 %v1528_v23, %v2951_v45  ;;  %v2311_v63 = vpop.f32.mrb[66].mxu1  ;;  %v2379_v5 = vpop.f32.mrb[66].mxu0  ;;  %v1258_v30 = vadd.f32 %v2865_v22, %v2874_v38 }
 0x17d   : > { %v1609_v32 = vmax.f32 %v1537_v42, 0.0  ;;  %v1540_v25 = vadd.f32 %v2379_v5, %v2973_v37  ;;  %v2312_v49 = vpop.f32.mrb[67].mxu1  ;;  %v1531_v57 = vpop.f32.mrb[67].mxu0 }
 0x17e   : > { %v1607_v58 = vmax.f32 %v1529_v59, 0.0  ;;  %v2313_v56 = vadd.f32 %v2312_v49, %v2311_v63  ;;  %v1532_v43 = vadd.f32 %v1531_v57, %v2953_v53  ;;  %v1400_v60 = vadd.f32 %v2310_v51, %v1239_v7 }
 0x17f   : > { %v2094_v3 = vpack.c.bf16 %v1609_v32, %v1609_v32  ;;  %v1610_v45 = vmax.f32 %v1540_v25, 0.0 }
 0x180   : > { %v2092_v52 = vpack.c.bf16 %v1607_v58, %v1607_v58  ;;  %v1608_v0 = vmax.f32 %v1532_v43, 0.0  ;;  %v1403_v1 = vadd.f32 %v2313_v56, %v1242_v8 }
 0x181   : > { %1770 = vst.msk [vmem:[%s2948_s29 + $0x48] sm:$0xf] %vm1751_vm1, %v2094_v3  ;;  %v2095_v62 = vpack.c.bf16 %v1610_v45, %v1610_v45 }
 0x182   : > { %1768 = vst.msk [vmem:[%s2948_s29 + $0x40] sm:$0xf] %vm1751_vm1, %v2092_v52  ;;  %v2093_v37 = vpack.c.bf16 %v1608_v0, %v1608_v0  ;;  %v2314_v54 = vpop.f32.mrb[68].mxu1  ;;  %v2382_v33 = vpop.f32.mrb[68].mxu0  ;;  %v1263_v52 = vadd.f32 %v2867_v28, %v2874_v38 }
 0x183   : > { %1771 = vst.msk [vmem:[%s2948_s29 + $0x4c] sm:$0xf] %vm1751_vm1, %v2095_v62  ;;  %v1553_v12 = vadd.f32 %v2382_v33, %v1392_v18  ;;  %v2315_v26 = vpop.f32.mrb[69].mxu1  ;;  %v1544_v53 = vpop.f32.mrb[69].mxu0 }
 0x184   : > { %1769 = vst.msk [vmem:[%s2948_s29 + $0x44] sm:$0xf] %vm1751_vm1, %v2093_v37  ;;  %v2316_v13 = vadd.f32 %v2315_v26, %v2314_v54  ;;  %v1545_v14 = vadd.f32 %v1544_v53, %v2991_v19  ;;  %v2317_v6 = vpop.f32.mrb[70].mxu1  ;;  %v2383_v21 = vpop.f32.mrb[70].mxu0  ;;  %v1266_v54 = vadd.f32 %v2869_v34, %v2874_v38 }
 0x185   : > { %v1613_v24 = vmax.f32 %v1553_v12, 0.0  ;;  %v1556_v40 = vadd.f32 %v2383_v21, %v1395_v39  ;;  %v2318_v11 = vpop.f32.mrb[71].mxu1  ;;  %v1547_v20 = vpop.f32.mrb[71].mxu0 }
 0x186   : > { %v1611_v15 = vmax.f32 %v1545_v14, 0.0  ;;  %v2319_v50 = vadd.f32 %v2318_v11, %v2317_v6  ;;  %v1548_v4 = vadd.f32 %v1547_v20, %v2993_v35  ;;  %v1408_v27 = vadd.f32 %v2316_v13, %v1247_v9 }
 0x187   : > { %v2098_v36 = vpack.c.bf16 %v1613_v24, %v1613_v24  ;;  %v1614_v19 = vmax.f32 %v1556_v40, 0.0 }
 0x188   : > { %v2096_v2 = vpack.c.bf16 %v1611_v15, %v1611_v15  ;;  %v1612_v46 = vmax.f32 %v1548_v4, 0.0  ;;  %v1411_v18 = vadd.f32 %v2319_v50, %v1250_v47 }
 0x189   : > { %1774 = vst.msk [vmem:[%s2948_s29 + $0x58] sm:$0xf] %vm1751_vm1, %v2098_v36  ;;  %v2099_v10 = vpack.c.bf16 %v1614_v19, %v1614_v19 }
 0x18a   : > { %1772 = vst.msk [vmem:[%s2948_s29 + $0x50] sm:$0xf] %vm1751_vm1, %v2096_v2  ;;  %v2097_v31 = vpack.c.bf16 %v1612_v46, %v1612_v46  ;;  %v2320_v55 = vpop.f32.mrb[72].mxu1  ;;  %v2386_v48 = vpop.f32.mrb[72].mxu0 }
 0x18b   : > { %1775 = vst.msk [vmem:[%s2948_s29 + $0x5c] sm:$0xf] %vm1751_vm1, %v2099_v10  ;;  %v1569_v61 = vadd.f32 %v2386_v48, %v1408_v27  ;;  %v2321_v39 = vpop.f32.mrb[73].mxu1  ;;  %v1560_v35 = vpop.f32.mrb[73].mxu0 }
 0x18c   : > { %1773 = vst.msk [vmem:[%s2948_s29 + $0x54] sm:$0xf] %vm1751_vm1, %v2097_v31  ;;  %v2322_v17 = vadd.f32 %v2321_v39, %v2320_v55  ;;  %v1561_v29 = vadd.f32 %v1560_v35, %v1400_v60  ;;  %v2323_v41 = vpop.f32.mrb[74].mxu1  ;;  %v2387_v42 = vpop.f32.mrb[74].mxu0 }
 0x18d   : > { %v1617_v23 = vmax.f32 %v1569_v61, 0.0  ;;  %v1572_v7 = vadd.f32 %v2387_v42, %v1411_v18  ;;  %v2324_v51 = vpop.f32.mrb[75].mxu1  ;;  %v1563_v59 = vpop.f32.mrb[75].mxu0 }
 0x18e   : > { %v1615_v63 = vmax.f32 %v1561_v29, 0.0  ;;  %v2325_v5 = vadd.f32 %v2324_v51, %v2323_v41  ;;  %v1564_v8 = vadd.f32 %v1563_v59, %v1403_v1  ;;  %v1416_v16 = vadd.f32 %v2322_v17, %v1255_v44 }
 0x18f   : > { %v2102_v32 = vpack.c.bf16 %v1617_v23, %v1617_v23  ;;  %v1618_v25 = vmax.f32 %v1572_v7, 0.0 }
 0x190   : > { %v2100_v49 = vpack.c.bf16 %v1615_v63, %v1615_v63  ;;  %v1616_v57 = vmax.f32 %v1564_v8, 0.0  ;;  %v1419_v58 = vadd.f32 %v2325_v5, %v1258_v30 }
 0x191   : > { %1778 = vst.msk [vmem:[%s2948_s29 + $0x68] sm:$0xf] %vm1751_vm1, %v2102_v32  ;;  %v2103_v56 = vpack.c.bf16 %v1618_v25, %v1618_v25 }
 0x192   : > { %1776 = vst.msk [vmem:[%s2948_s29 + $0x60] sm:$0xf] %vm1751_vm1, %v2100_v49  ;;  %v2101_v22 = vpack.c.bf16 %v1616_v57, %v1616_v57  ;;  %v2326_v43 = vpop.f32.mrb[76].mxu1  ;;  %v2390_v60 = vpop.f32.mrb[76].mxu0 }
 0x193   : > { %1779 = vst.msk [vmem:[%s2948_s29 + $0x6c] sm:$0xf] %vm1751_vm1, %v2103_v56  ;;  %v2327_v3 = vpop.f32.mrb[77].mxu1  ;;  %v1576_v45 = vpop.f32.mrb[77].mxu0 }
 0x194   : > { %1777 = vst.msk [vmem:[%s2948_s29 + $0x64] sm:$0xf] %vm1751_vm1, %v2101_v22  ;;  %v2328_v0 = vadd.f32 %v2327_v3, %v2326_v43  ;;  %v1577_v1 = vadd.f32 %v1576_v45, %v1416_v16  ;;  %v2329_v62 = vpop.f32.mrb[78].mxu1  ;;  %v2391_v37 = vpop.f32.mrb[78].mxu0 }
 0x195   : > { %v2330_v33 = vpop.f32.mrb[79].mxu1  ;;  %v1579_v12 = vpop.f32.mrb[79].mxu0 }
 0x196   : > { %v1424_v26 = vadd.f32 %v2328_v0, %v1263_v52  ;;  %v1619_v53 = vmax.f32 %v1577_v1, 0.0  ;;  %v2331_v9 = vadd.f32 %v2330_v33, %v2329_v62  ;;  %v1580_v13 = vadd.f32 %v1579_v12, %v1419_v58 }
 0x198   : > { %v1585_v28 = vadd.f32 %v2390_v60, %v1424_v26  ;;  %v2104_v14 = vpack.c.bf16 %v1619_v53, %v1619_v53  ;;  %v1427_v6 = vadd.f32 %v2331_v9, %v1266_v54  ;;  %v1620_v21 = vmax.f32 %v1580_v13, 0.0 }
 0x19a   : > { %v1621_v47 = vmax.f32 %v1585_v28, 0.0  ;;  %1780 = vst.msk [vmem:[%s2948_s29 + $0x70] sm:$0xf] %vm1751_vm1, %v2104_v14  ;;  %v1588_v24 = vadd.f32 %v2391_v37, %v1427_v6  ;;  %v2105_v40 = vpack.c.bf16 %v1620_v21, %v1620_v21 }
 0x19c   : > { %v2106_v11 = vpack.c.bf16 %v1621_v47, %v1621_v47  ;;  %v1622_v34 = vmax.f32 %v1588_v24, 0.0  ;;  %1781 = vst.msk [vmem:[%s2948_s29 + $0x74] sm:$0xf] %vm1751_vm1, %v2105_v40 }
 0x19e   : > { %1782 = vst.msk [vmem:[%s2948_s29 + $0x78] sm:$0xf] %vm1751_vm1, %v2106_v11  ;;  %v2107_v38 = vpack.c.bf16 %v1622_v34, %v1622_v34 }
 0x1a0   : > { %1783 = vst.msk [vmem:[%s2948_s29 + $0x7c] sm:$0xf] %vm1751_vm1, %v2107_v38 }
 0x1a1 PF: > { %s13_s14 = sadd.s32 1, %s2603_s14   ;;  %s3086_s12 = smov %s2599_s13 }
 0x1a2   : > { %p10_p5 = scmp.ge.s32.totalorder %s13_s14, 4   ;;  %s3087_s13 = smov %s3089_s15 }
 0x1a4   :  { %12 = sbr.rel (!%p10_p5) target bundleno = 2 (0x2), region = 68 }

// kernel: my_resnet_forward.25
= control target key start
LH: loop header
LB: loop body
LE: loop exit
PB: predicated region body
PF: predicated region fallthrough
CT: control target
= control target key end

     0   :  { %s2882_s15 = smov 0   ;;  %s2884_s16 = smov 0   ;;  %s3382_s0 = inlined_call_operand.vmem [shape: bf16[512,576], index: 0, kind: input, shape index: {}]   ;;  %s3383_s1 = inlined_call_operand.vmem [shape: bf16[576,64], index: 1, kind: input, shape index: {}]   ;;  %s3384_s2 = inlined_call_operand.vmem [shape: f32[1,64], index: 2, kind: input, shape index: {}]   ;;  %s3385_s3 = inlined_call_operand.vmem [shape: bf16[512,64], index: 3, kind: input, shape index: {}]   ;;  %s3386_s4 = inlined_call_operand.vmem [shape: bf16[512,64], index: 4, kind: output, shape index: {}]  }
   0x1   :  { %s2886_s17 = smov 0  }
   0x2 LB: > { %s33_s18 = sadd.s32 1, %s2851_s16  ;;  %p2075_p0 = scmp.ge.s32.totalorder %s2855_s17, 1  ;;  %s2855_s17 = sphi %s2886_s17, %s14_s17   ;;  %s2851_s16 = sphi %s2884_s16, %s3388_s16   ;;  %s2847_s15 = sphi %s2882_s15, %s3387_s15  }
   0x3   : > { %p35_p1 = scmp.ge.s32.totalorder %s33_s18, 2  ;;  %p232_p2 = scmp.lt.s32.totalorder %s2855_s17, 3 }
   0x5   : > { %s3390_s18 = smov (%p35_p1, %s33_s18), 0  ;;  %p233_p3 = pnand %p2075_p0, %p232_p2 }
   0x6   : > { %v2685_v0 = vld [vmem:[%s3383_s1 + $0x40] sm:$0xff] (!%p233_p3)   ;;  %s2076_s21 = sshll.u32 (!%p233_p3), %s2847_s15, 5  ;;  %v2687_v2 = vld [vmem:[%s3383_s1 + $0x48] sm:$0xff] (!%p233_p3)   ;;  %v2689_v4 = vld [vmem:[%s3383_s1 + $0x50] sm:$0xff] (!%p233_p3)   ;;  %vm1119_vm0 = vcmask (!%p233_p3), 523264   ;;  %vm1907_vm1 = vcmask (!%p233_p3), 519168  }
   0x7   : > { %236 = sbr.rel (%p233_p3) target bundleno = 419 (0x1a3), region = 36  ;;  %v2686_v1 = vld [vmem:[%s3383_s1] sm:$0xff] (!%p233_p3)   ;;  %2360 = vmatprep.subr.bf16.mxu0 (!%p233_p3), %v2685_v0  ;;  %2644 = vmatprep.subr.bf16.mxu1 (!%p233_p3), %v2685_v0  ;;  %p287_p4 = scmp.lt.s32.totalorder (!%p233_p3), %s2076_s21, 63  ;;  %v2688_v3 = vld [vmem:[%s3383_s1 + $0x8] sm:$0xff] (!%p233_p3)   ;;  %v2690_v5 = vld [vmem:[%s3383_s1 + $0x10] sm:$0xff] (!%p233_p3)  }
   0x8   : > { %2361 = vmatpush3.bf16.msra.mxu0 (!%p233_p3), %v2686_v1  ;;  %2652 = vmatpush3.bf16.msra.mxu1 (!%p233_p3), %v2686_v1  ;;  %v2691_v6 = vld [vmem:[%s3383_s1 + $0x58] sm:$0xff] (!%p233_p3)   ;;  %v2693_v8 = vld [vmem:[%s3383_s1 + $0x60] sm:$0xff] (!%p233_p3)   ;;  %v2695_v10 = vld [vmem:[%s3383_s1 + $0x68] sm:$0xff] (!%p233_p3)  }
   0x9   : > { %2362 = vmatprep.subr.bf16.mxu0 (!%p233_p3), %v2687_v2  ;;  %2645 = vmatprep.subr.bf16.mxu1 (!%p233_p3), %v2687_v2  ;;  %v2692_v7 = vld [vmem:[%s3383_s1 + $0x18] sm:$0xff] (!%p233_p3)   ;;  %v2694_v9 = vld [vmem:[%s3383_s1 + $0x20] sm:$0xff] (!%p233_p3)   ;;  %v2696_v13 = vld [vmem:[%s3383_s1 + $0x28] sm:$0xff] (!%p233_p3)  }
   0xa   : > { %v2697_v14 = vld [vmem:[%s3383_s1 + $0x70] sm:$0xff] (!%p233_p3)   ;;  %v2699_v16 = vld [vmem:[%s3383_s1 + $0x78] sm:$0xff] (!%p233_p3)   ;;  %v2707_v18 = vld [vmem:[%s3383_s1 + $0xc0] sm:$0xff] (!%p233_p3)  }
   0xb   : > { %v2698_v15 = vld [vmem:[%s3383_s1 + $0x30] sm:$0xff] (!%p233_p3)   ;;  %v2700_v17 = vld [vmem:[%s3383_s1 + $0x38] sm:$0xff] (!%p233_p3)   ;;  %v2710_v19 = vld [vmem:[%s3383_s1 + $0x100] sm:$0xff] (!%p233_p3)  }
   0xc   : > { %2363 = vmatpush3.bf16.msra.mxu0 (!%p233_p3), %v2688_v3  ;;  %2653 = vmatpush3.bf16.msra.mxu1 (!%p233_p3), %v2688_v3  ;;  %v2708_v22 = vld [vmem:[%s3383_s1 + $0x80] sm:$0xff] (!%p233_p3)   ;;  %v2709_v23 = vld [vmem:[%s3383_s1 + $0xc8] sm:$0xff] (!%p233_p3)   ;;  %v2718_v28 = vld [vmem:[%s3383_s1 + $0xd0] sm:$0xff] (!%p233_p3)  }
   0xd   : > { %2364 = vmatprep.subr.bf16.mxu0 (!%p233_p3), %v2689_v4  ;;  %2646 = vmatprep.subr.bf16.mxu1 (!%p233_p3), %v2689_v4  ;;  %v2711_v26 = vld [vmem:[%s3383_s1 + $0x88] sm:$0xff] (!%p233_p3)   ;;  %v2719_v30 = vld [vmem:[%s3383_s1 + $0x90] sm:$0xff] (!%p233_p3)   ;;  %v2720_v31 = vld [vmem:[%s3383_s1 + $0xd8] sm:$0xff] (!%p233_p3)  }
   0xe   : > { %s3392_s21 = smov (!%p287_p4, %s2076_s21), 63  ;;  %v2721_v34 = vld [vmem:[%s3383_s1 + $0x98] sm:$0xff]   ;;  %v2741_v35 = vld [vmem:[%s3383_s1 + $0x108] sm:$0xff]   ;;  %v2728_v37 = vld [vmem:[%s3383_s1 + $0xe0] sm:$0xff]  }
   0xf   : > { %s2660_s8 = smul.u32 20, %s3392_s21  ;;  %v2729_v39 = vld [vmem:[%s3383_s1 + $0xa0] sm:$0xff]   ;;  %v2730_v40 = vld [vmem:[%s3383_s1 + $0xe8] sm:$0xff]   ;;  %v2738_v46 = vld [vmem:[%s3383_s1 + $0xf0] sm:$0xff]   ;;  %s2079_s7 = sshll.u32 %s3392_s21, 2 }
  0x10   : > { %2365 = vmatpush3.bf16.msra.mxu0 %v2690_v5  ;;  %2654 = vmatpush3.bf16.msra.mxu1 %v2690_v5  ;;  %v2731_v43 = vld [vmem:[%s3383_s1 + $0xa8] sm:$0xff]   ;;  %v2761_v47 = vld [vmem:[%s3383_s1 + $0x110] sm:$0xff]   ;;  %v2740_v49 = vld [vmem:[%s3383_s1 + $0xf8] sm:$0xff]   ;;  %s3197_s10 = scalar_lea.vmem %s3385_s3, %s2079_s7  ;;  %s3230_s13 = scalar_lea.vmem %s3386_s4, %s2079_s7 }
  0x11   : > { %2366 = vmatprep.subr.bf16.mxu0 %v2691_v6  ;;  %2647 = vmatprep.subr.bf16.mxu1 %v2691_v6  ;;  %s2933_s15 = scalar_lea.vmem %s3382_s0, %s2660_s8  ;;  %v2739_v48 = vld [vmem:[%s3383_s1 + $0xb0] sm:$0xff]   ;;  %v2742_v52 = vld [vmem:[%s3383_s1 + $0xb8] sm:$0xff]  }
  0x12   : > { %v2703_v11 = vld [vmem:[%s2933_s15 + $0x4] ss:$20 sps:$4 sm:$0xff]   ;;  %v2701_v20 = vld [vmem:[%s2933_s15] ss:$20 sps:$4 sm:$0xff]   ;;  %v2716_v27 = vld [vmem:[%s2933_s15 + $0x28] ss:$20 sps:$4 sm:$0xff]  }
  0x13   : > { %v2706_v12 = vld [vmem:[%s2933_s15 + $0x1e4] ss:$20 sps:$4 sm:$0xff]   ;;  %1200 = vmatprep.mubr.bf16.mxu0 %v2703_v11  ;;  %v2704_v21 = vld [vmem:[%s2933_s15 + $0x1e0] ss:$20 sps:$4 sm:$0xff]   ;;  %v2717_v29 = vld [vmem:[%s2933_s15 + $0x208] ss:$20 sps:$4 sm:$0xff]  }
  0x14   : > { %2367 = vmatpush3.bf16.msra.mxu0 %v2692_v7  ;;  %2655 = vmatpush3.bf16.msra.mxu1 %v2692_v7  ;;  %v2712_v24 = vld [vmem:[%s2933_s15 + $0x2c] ss:$20 sps:$4 sm:$0xff]   ;;  %v2722_v32 = vld [vmem:[%s2933_s15 + $0x54] ss:$20 sps:$4 sm:$0xff]   ;;  %v2726_v36 = vld [vmem:[%s2933_s15 + $0x50] ss:$20 sps:$4 sm:$0xff]  }
  0x15   : > { %2368 = vmatprep.subr.bf16.mxu0 %v2693_v8  ;;  %2648 = vmatprep.subr.bf16.mxu1 %v2693_v8  ;;  %v2714_v25 = vld [vmem:[%s2933_s15 + $0x20c] ss:$20 sps:$4 sm:$0xff]   ;;  %v2724_v33 = vld [vmem:[%s2933_s15 + $0x234] ss:$20 sps:$4 sm:$0xff]   ;;  %v2727_v38 = vld [vmem:[%s2933_s15 + $0x230] ss:$20 sps:$4 sm:$0xff]  }
  0x16   : > { %1296 = vmatprep.mubr.bf16.mxu1 %v2706_v12  ;;  %v2732_v41 = vld [vmem:[%s2933_s15 + $0x7c] ss:$20 sps:$4 sm:$0xff]   ;;  %v2736_v44 = vld [vmem:[%s2933_s15 + $0x78] ss:$20 sps:$4 sm:$0xff]   ;;  %v2748_v54 = vld [vmem:[%s2933_s15 + $0xa0] ss:$20 sps:$4 sm:$0xff]  }
  0x17   : > { %v2734_v42 = vld [vmem:[%s2933_s15 + $0x25c] ss:$20 sps:$4 sm:$0xff]   ;;  %v2737_v45 = vld [vmem:[%s2933_s15 + $0x258] ss:$20 sps:$4 sm:$0xff]   ;;  %v2751_v57 = vld [vmem:[%s2933_s15 + $0x34] ss:$20 sps:$4 sm:$0xff]  }
  0x18   : > { %2369 = vmatpush3.bf16.msra.mxu0 %v2694_v9  ;;  %2656 = vmatpush3.bf16.msra.mxu1 %v2694_v9  ;;  %v2743_v50 = vld [vmem:[%s2933_s15 + $0xa4] ss:$20 sps:$4 sm:$0xff]   ;;  %v2747_v51 = vld [vmem:[%s2933_s15 + $0xc] ss:$20 sps:$4 sm:$0xff]   ;;  %v2745_v53 = vld [vmem:[%s2933_s15 + $0x8] ss:$20 sps:$4 sm:$0xff]  }
  0x19   : > { %2370 = vmatprep.subr.bf16.mxu0 %v2695_v10  ;;  %2649 = vmatprep.subr.bf16.mxu1 %v2695_v10  ;;  %v2749_v55 = vld [vmem:[%s2933_s15 + $0xcc] ss:$20 sps:$4 sm:$0xff]   ;;  %v2780_v56 = vld [vmem:[%s3383_s1 + $0x118] sm:$0xff]   ;;  %v2754_v59 = vld [vmem:[%s2933_s15 + $0x30] ss:$20 sps:$4 sm:$0xff]  }
  0x1a   : > { %v2753_v58 = vld [vmem:[%s2933_s15 + $0xc8] ss:$20 sps:$4 sm:$0xff]   ;;  %v2759_v62 = vld [vmem:[%s2933_s15 + $0xf0] ss:$20 sps:$4 sm:$0xff]   ;;  %v2760_v63 = vld [vmem:[%s2933_s15 + $0x58] ss:$20 sps:$4 sm:$0xff]  }
  0x1b   : > { %v2755_v60 = vld [vmem:[%s2933_s15 + $0xf4] ss:$20 sps:$4 sm:$0xff]   ;;  %v2757_v61 = vld [vmem:[%s2933_s15 + $0x5c] ss:$20 sps:$4 sm:$0xff]   ;;  %v2764_v1 = vld [vmem:[%s2933_s15 + $0x84] ss:$20 sps:$4 sm:$0xff]  }
  0x1c   : > { %2371 = vmatpush3.bf16.msra.mxu0 %v2696_v13  ;;  %2657 = vmatpush3.bf16.msra.mxu1 %v2696_v13  ;;  %v2762_v0 = vld [vmem:[%s2933_s15 + $0x11c] ss:$20 sps:$4 sm:$0xff]   ;;  %v2766_v2 = vld [vmem:[%s2933_s15 + $0x118] ss:$20 sps:$4 sm:$0xff]   ;;  %v2767_v3 = vld [vmem:[%s2933_s15 + $0x80] ss:$20 sps:$4 sm:$0xff]  }
  0x1d   : > { %2372 = vmatprep.subr.bf16.mxu0 %v2697_v14  ;;  %2650 = vmatprep.subr.bf16.mxu1 %v2697_v14  ;;  %v2768_v4 = vld [vmem:[%s2933_s15 + $0x144] ss:$20 sps:$4 sm:$0xff]   ;;  %v2770_v5 = vld [vmem:[%s2933_s15 + $0xac] ss:$20 sps:$4 sm:$0xff]   ;;  %v2773_v7 = vld [vmem:[%s2933_s15 + $0xa8] ss:$20 sps:$4 sm:$0xff]  }
  0x1e   : > { %v2772_v6 = vld [vmem:[%s2933_s15 + $0x140] ss:$20 sps:$4 sm:$0xff]   ;;  %v2778_v10 = vld [vmem:[%s2933_s15 + $0x168] ss:$20 sps:$4 sm:$0xff]   ;;  %v2779_v11 = vld [vmem:[%s2933_s15 + $0xd0] ss:$20 sps:$4 sm:$0xff]  }
  0x1f   : > { %v2774_v8 = vld [vmem:[%s2933_s15 + $0x16c] ss:$20 sps:$4 sm:$0xff]   ;;  %v2776_v9 = vld [vmem:[%s2933_s15 + $0xd4] ss:$20 sps:$4 sm:$0xff]   ;;  %v2783_v13 = vld [vmem:[%s2933_s15 + $0xfc] ss:$20 sps:$4 sm:$0xff]  }
  0x20   : > { %2373 = vmatpush3.bf16.msra.mxu0 %v2698_v15  ;;  %2658 = vmatpush3.bf16.msra.mxu1 %v2698_v15  ;;  %v2781_v12 = vld [vmem:[%s2933_s15 + $0x194] ss:$20 sps:$4 sm:$0xff]   ;;  %v2785_v14 = vld [vmem:[%s2933_s15 + $0x190] ss:$20 sps:$4 sm:$0xff]   ;;  %v2786_v15 = vld [vmem:[%s2933_s15 + $0xf8] ss:$20 sps:$4 sm:$0xff]  }
  0x21   : > { %2374 = vmatprep.subr.bf16.mxu0 %v2699_v16  ;;  %2651 = vmatprep.subr.bf16.mxu1 %v2699_v16  ;;  %v2787_v16 = vld [vmem:[%s2933_s15 + $0x1bc] ss:$20 sps:$4 sm:$0xff]  }
  0x24   : > { %2375 = vmatpush3.bf16.msra.mxu0 %v2700_v17  ;;  %2659 = vmatpush3.bf16.msra.mxu1 %v2700_v17  ;;  %v2789_v17 = vld [vmem:[%s2933_s15 + $0x124] ss:$20 sps:$4 sm:$0xff]  }
  0x25   : > { %2472 = vmatprep.subr.bf16.mxu1 %v2707_v18  ;;  %2604 = vmatprep.subr.bf16.mxu0 %v2710_v19  ;;  %v2791_v18 = vld [vmem:[%s2933_s15 + $0x1b8] ss:$20 sps:$4 sm:$0xff]  }
  0x27   : > { %1201 = vmatmul.mubr.bf16.vlgmr.msra.gmra.mrb[0].mxu0 %v2701_v20  ;;  %1297 = vmatmul.mubr.bf16.vlgmr.msra.gmra.mrb[0].mxu1 %v2704_v21  ;;  %v2793_v20 = vld [vmem:[%s2933_s15 + $0x14c] ss:$20 sps:$4 sm:$0xff]   ;;  %v2795_v21 = vld [vmem:[%s2933_s15 + $0x10] ss:$20 sps:$4 sm:$0xff]  }
  0x28   : > { %2473 = vmatpush3.bf16.msra.mxu1 %v2708_v22  ;;  %2605 = vmatpush3.bf16.msra.mxu0 %v2710_v19  ;;  %v2792_v19 = vld [vmem:[%s2933_s15 + $0x120] ss:$20 sps:$4 sm:$0xff]   ;;  %v2796_v22 = vld [vmem:[%s2933_s15 + $0x148] ss:$20 sps:$4 sm:$0xff]  }
  0x29   : > { %2474 = vmatprep.subr.bf16.mxu1 %v2709_v23  ;;  %1208 = vmatprep.mubr.bf16.mxu0 %v2712_v24  ;;  %v2797_v23 = vld [vmem:[%s2933_s15 + $0x38] ss:$20 sps:$4 sm:$0xff]   ;;  %v2798_v24 = vld [vmem:[%s2933_s15 + $0x174] ss:$20 sps:$4 sm:$0xff]  }
  0x2a   : > { %1304 = vmatprep.mubr.bf16.mxu1 %v2714_v25  ;;  %2606 = vmatprep.subr.bf16.mxu0 %v2741_v35  ;;  %v2800_v25 = vld [vmem:[%s2933_s15 + $0x60] ss:$20 sps:$4 sm:$0xff]  }
  0x2c   : > { %2475 = vmatpush3.bf16.msra.mxu1 %v2711_v26  ;;  %2607 = vmatpush3.bf16.msra.mxu0 %v2741_v35  ;;  %v2801_v26 = vld [vmem:[%s2933_s15 + $0x170] ss:$20 sps:$4 sm:$0xff]   ;;  %v2812_v35 = vld [vmem:[%s2933_s15 + $0x128] ss:$20 sps:$4 sm:$0xff]  }
  0x2d   : > { %2476 = vmatprep.subr.bf16.mxu1 %v2718_v28  ;;  %2608 = vmatprep.subr.bf16.mxu0 %v2761_v47  ;;  %v2803_v28 = vld [vmem:[%s2933_s15 + $0x19c] ss:$20 sps:$4 sm:$0xff]  }
  0x2f   : > { %1209 = vmatmul.mubr.bf16.gmra.mrb[4].mxu0 %v2716_v27  ;;  %1305 = vmatmul.mubr.bf16.gmra.mrb[4].mxu1 %v2717_v29  ;;  %v2802_v27 = vld [vmem:[%s2933_s15 + $0x88] ss:$20 sps:$4 sm:$0xff]   ;;  %v2805_v29 = vld [vmem:[%s2933_s15 + $0xb0] ss:$20 sps:$4 sm:$0xff]  }
  0x30   : > { %2477 = vmatpush3.bf16.msra.mxu1 %v2719_v30  ;;  %1216 = vmatprep.mubr.bf16.mxu0 %v2722_v32  ;;  %v2806_v30 = vld [vmem:[%s2933_s15 + $0x198] ss:$20 sps:$4 sm:$0xff]  }
  0x31   : > { %2478 = vmatprep.subr.bf16.mxu1 %v2720_v31  ;;  %1312 = vmatprep.mubr.bf16.mxu1 %v2724_v33  ;;  %v2807_v31 = vld [vmem:[%s2933_s15 + $0xd8] ss:$20 sps:$4 sm:$0xff]   ;;  %v2810_v33 = vld [vmem:[%s2933_s15 + $0x100] ss:$20 sps:$4 sm:$0xff]  }
  0x32   : > { %2609 = vmatpush3.bf16.msra.mxu0 %v2761_v47  ;;  %v2808_v32 = vld [vmem:[%s2933_s15 + $0x1c4] ss:$20 sps:$4 sm:$0xff]  }
  0x33   : > { %2610 = vmatprep.subr.bf16.mxu0 %v2780_v56  ;;  %v2827_v47 = vld [vmem:[%s2933_s15 + $0x218] ss:$20 sps:$4 sm:$0xff]  }
  0x34   : > { %2479 = vmatpush3.bf16.msra.mxu1 %v2721_v34  ;;  %v2811_v34 = vld [vmem:[%s2933_s15 + $0x1c0] ss:$20 sps:$4 sm:$0xff]  }
  0x35   : > { %2480 = vmatprep.subr.bf16.mxu1 %v2728_v37  ;;  %v2815_v37 = vld [vmem:[%s2933_s15 + $0x150] ss:$20 sps:$4 sm:$0xff]  }
  0x36   : > { %2611 = vmatpush3.bf16.msra.mxu0 %v2780_v56 }
  0x37   : > { %1217 = vmatmul.mubr.bf16.gmra.mrb[8].mxu0 %v2726_v36  ;;  %1313 = vmatmul.mubr.bf16.gmra.mrb[8].mxu1 %v2727_v38  ;;  %v2813_v36 = vld [vmem:[%s2933_s15 + $0x1ec] ss:$20 sps:$4 sm:$0xff]   ;;  %v2816_v38 = vld [vmem:[%s2933_s15 + $0x1e8] ss:$20 sps:$4 sm:$0xff]  }
  0x38   : > { %2481 = vmatpush3.bf16.msra.mxu1 %v2729_v39  ;;  %1224 = vmatprep.mubr.bf16.mxu0 %v2732_v41  ;;  %v2817_v39 = vld [vmem:[%s2933_s15 + $0x178] ss:$20 sps:$4 sm:$0xff]   ;;  %v2820_v41 = vld [vmem:[%s2933_s15 + $0x1a0] ss:$20 sps:$4 sm:$0xff]  }
  0x39   : > { %2482 = vmatprep.subr.bf16.mxu1 %v2730_v40  ;;  %1320 = vmatprep.mubr.bf16.mxu1 %v2734_v42  ;;  %v2818_v40 = vld [vmem:[%s2933_s15 + $0x214] ss:$20 sps:$4 sm:$0xff]   ;;  %v2821_v42 = vld [vmem:[%s2933_s15 + $0x210] ss:$20 sps:$4 sm:$0xff]  }
  0x3c   : > { %2483 = vmatpush3.bf16.msra.mxu1 %v2731_v43  ;;  %v2822_v43 = vld [vmem:[%s2933_s15 + $0x1c8] ss:$20 sps:$4 sm:$0xff]  }
  0x3d   : > { %2484 = vmatprep.subr.bf16.mxu1 %v2738_v46  ;;  %v2826_v46 = vld [vmem:[%s2933_s15 + $0x238] ss:$20 sps:$4 sm:$0xff]  }
  0x3f   : > { %1225 = vmatmul.mubr.bf16.gmra.mrb[12].mxu0 %v2736_v44  ;;  %1321 = vmatmul.mubr.bf16.gmra.mrb[12].mxu1 %v2737_v45  ;;  %v2823_v44 = vld [vmem:[%s2933_s15 + $0x23c] ss:$20 sps:$4 sm:$0xff]  }
  0x40   : > { %2485 = vmatpush3.bf16.msra.mxu1 %v2739_v48  ;;  %1232 = vmatprep.mubr.bf16.mxu0 %v2743_v50  ;;  %v2825_v45 = vld [vmem:[%s2933_s15 + $0x1f0] ss:$20 sps:$4 sm:$0xff]   ;;  %v2831_v50 = vld [vmem:[%s2933_s15 + $0x260] ss:$20 sps:$4 sm:$0xff]  }
  0x41   : > { %2486 = vmatprep.subr.bf16.mxu1 %v2740_v49  ;;  %1361 = vmatprep.mubr.bf16.mxu1 %v2747_v51  ;;  %v2828_v48 = vld [vmem:[%s2933_s15 + $0x264] ss:$20 sps:$4 sm:$0xff]   ;;  %v2830_v49 = vld [vmem:[%s2933_s15 + $0x240] ss:$20 sps:$4 sm:$0xff]   ;;  %v2832_v51 = vld [vmem:[%s2933_s15 + $0x268] ss:$20 sps:$4 sm:$0xff]  }
  0x44   : > { %2487 = vmatpush3.bf16.msra.mxu1 %v2742_v52 }
  0x47   : > { %1233 = vmatmul.mubr.bf16.gmra.mrb[16].mxu0 %v2748_v54  ;;  %1362 = vmatmul.mubr.bf16.vlgmr.msra.gmra.mrb[16].mxu1 %v2745_v53 }
  0x48   : > { %1240 = vmatprep.mubr.bf16.mxu0 %v2749_v55  ;;  %1369 = vmatprep.mubr.bf16.mxu1 %v2751_v57 }
  0x4f   : > { %1241 = vmatmul.mubr.bf16.gmra.mrb[20].mxu0 %v2753_v58  ;;  %1370 = vmatmul.mubr.bf16.gmra.mrb[20].mxu1 %v2754_v59 }
  0x50   : > { %1248 = vmatprep.mubr.bf16.mxu0 %v2755_v60  ;;  %1377 = vmatprep.mubr.bf16.mxu1 %v2757_v61 }
  0x57   : > { %1249 = vmatmul.mubr.bf16.gmra.mrb[24].mxu0 %v2759_v62  ;;  %1378 = vmatmul.mubr.bf16.gmra.mrb[24].mxu1 %v2760_v63 }
  0x58   : > { %1256 = vmatprep.mubr.bf16.mxu0 %v2762_v0  ;;  %1385 = vmatprep.mubr.bf16.mxu1 %v2764_v1 }
  0x5f   : > { %1257 = vmatmul.mubr.bf16.gmra.mrb[28].mxu0 %v2766_v2  ;;  %1386 = vmatmul.mubr.bf16.gmra.mrb[28].mxu1 %v2767_v3 }
  0x60   : > { %1264 = vmatprep.mubr.bf16.mxu0 %v2768_v4  ;;  %1393 = vmatprep.mubr.bf16.mxu1 %v2770_v5 }
  0x67   : > { %1265 = vmatmul.mubr.bf16.gmra.mrb[32].mxu0 %v2772_v6  ;;  %1394 = vmatmul.mubr.bf16.gmra.mrb[32].mxu1 %v2773_v7 }
  0x68   : > { %1272 = vmatprep.mubr.bf16.mxu0 %v2774_v8  ;;  %1401 = vmatprep.mubr.bf16.mxu1 %v2776_v9 }
  0x6f   : > { %1273 = vmatmul.mubr.bf16.gmra.mrb[36].mxu0 %v2778_v10  ;;  %1402 = vmatmul.mubr.bf16.gmra.mrb[36].mxu1 %v2779_v11 }
  0x70   : > { %1280 = vmatprep.mubr.bf16.mxu0 %v2781_v12  ;;  %1409 = vmatprep.mubr.bf16.mxu1 %v2783_v13 }
  0x77   : > { %1281 = vmatmul.mubr.bf16.gmra.mrb[40].mxu0 %v2785_v14  ;;  %1410 = vmatmul.mubr.bf16.gmra.mrb[40].mxu1 %v2786_v15 }
  0x78   : > { %1288 = vmatprep.mubr.bf16.mxu0 %v2787_v16  ;;  %1417 = vmatprep.mubr.bf16.mxu1 %v2789_v17 }
  0x7f   : > { %1289 = vmatmul.mubr.bf16.gmra.mrb[44].mxu0 %v2791_v18  ;;  %1418 = vmatmul.mubr.bf16.gmra.mrb[44].mxu1 %v2792_v19 }
  0x80   : > { %1425 = vmatprep.mubr.bf16.mxu1 %v2793_v20  ;;  %2612 = vmatprep.mubr.msk.bf16.mxu0 %vm1119_vm0, %v2795_v21 }
  0x87   : > { %1426 = vmatmul.mubr.bf16.gmra.mrb[48].mxu1 %v2796_v22  ;;  %2613 = vmatmul.mubr.msk.bf16.vlgmr.msra.gmra.mrb[48].mxu0 %vm1119_vm0, %v2797_v23 }
  0x88   : > { %1433 = vmatprep.mubr.bf16.mxu1 %v2798_v24  ;;  %2616 = vmatprep.mubr.msk.bf16.mxu0 %vm1119_vm0, %v2800_v25 }
  0x8f   : > { %1434 = vmatmul.mubr.bf16.gmra.mrb[52].mxu1 %v2801_v26  ;;  %2617 = vmatmul.mubr.msk.bf16.gmra.mrb[52].mxu0 %vm1119_vm0, %v2802_v27 }
  0x90   : > { %1441 = vmatprep.mubr.bf16.mxu1 %v2803_v28  ;;  %2620 = vmatprep.mubr.msk.bf16.mxu0 %vm1119_vm0, %v2805_v29 }
  0x97   : > { %1442 = vmatmul.mubr.bf16.gmra.mrb[56].mxu1 %v2806_v30  ;;  %2621 = vmatmul.mubr.msk.bf16.gmra.mrb[56].mxu0 %vm1119_vm0, %v2807_v31 }
  0x98   : > { %1449 = vmatprep.mubr.bf16.mxu1 %v2808_v32  ;;  %2624 = vmatprep.mubr.msk.bf16.mxu0 %vm1119_vm0, %v2810_v33 }
  0x9f   : > { %1450 = vmatmul.mubr.bf16.gmra.mrb[60].mxu1 %v2811_v34  ;;  %2625 = vmatmul.mubr.msk.bf16.gmra.mrb[60].mxu0 %vm1119_vm0, %v2812_v35 }
  0xa0   : > { %1457 = vmatprep.mubr.bf16.mxu1 %v2813_v36  ;;  %2628 = vmatprep.mubr.msk.bf16.mxu0 %vm1119_vm0, %v2815_v37 }
  0xa7   : > { %1458 = vmatmul.mubr.bf16.gmra.mrb[64].mxu1 %v2816_v38  ;;  %2629 = vmatmul.mubr.msk.bf16.gmra.mrb[64].mxu0 %vm1119_vm0, %v2817_v39  ;;  %v3131_v38 = vld [vmem:[%s3384_s2] ss:$0 sm:$0xff] }
  0xa8   : > { %1465 = vmatprep.mubr.bf16.mxu1 %v2818_v40  ;;  %2632 = vmatprep.mubr.msk.bf16.mxu0 %vm1119_vm0, %v2820_v41 }
  0xaf   : > { %1466 = vmatmul.mubr.bf16.gmra.mrb[68].mxu1 %v2821_v42  ;;  %2633 = vmatmul.mubr.msk.bf16.gmra.mrb[68].mxu0 %vm1119_vm0, %v2822_v43 }
  0xb0   : > { %1473 = vmatprep.mubr.bf16.mxu1 %v2823_v44  ;;  %2636 = vmatprep.mubr.msk.bf16.mxu0 %vm1119_vm0, %v2825_v45 }
  0xb7   : > { %1474 = vmatmul.mubr.bf16.gmra.mrb[72].mxu1 %v2826_v46  ;;  %2637 = vmatmul.mubr.msk.bf16.gmra.mrb[72].mxu0 %vm1119_vm0, %v2827_v47 }
  0xb8   : > { %1481 = vmatprep.mubr.bf16.mxu1 %v2828_v48  ;;  %2640 = vmatprep.mubr.msk.bf16.mxu0 %vm1119_vm0, %v2830_v49 }
  0xbf   : > { %1482 = vmatmul.mubr.bf16.gmra.mrb[76].mxu1 %v2831_v50  ;;  %2641 = vmatmul.mubr.msk.bf16.gmra.mrb[76].mxu0 %vm1119_vm0, %v2832_v51 }
  0xfa   : > { %v2448_v52 = vpop.f32.mrb[0].mxu1  ;;  %v2376_v53 = vpop.f32.mrb[0].mxu0 }
  0xfb   : > { %v2449_v54 = vpop.f32.mrb[1].mxu1  ;;  %v2377_v55 = vpop.f32.mrb[1].mxu0 }
  0xfc   : > { %v3112_v56 = vadd.f32 %v2449_v54, %v2448_v52  ;;  %v2451_v57 = vpop.f32.mrb[2].mxu1  ;;  %v2378_v58 = vadd.f32 %v2377_v55, %v2376_v53  ;;  %v2379_v59 = vpop.f32.mrb[2].mxu0 }
  0xfd   : > { %v2452_v60 = vpop.f32.mrb[3].mxu1  ;;  %v2380_v61 = vpop.f32.mrb[3].mxu0 }
  0xfe   : > { %v3114_v62 = vadd.f32 %v2452_v60, %v2451_v57  ;;  %v2381_v63 = vadd.f32 %v2380_v61, %v2379_v59  ;;  %v1203_v41 = vadd.f32 %v2378_v58, %v3131_v38 }
 0x100   : > { %v1206_v48 = vadd.f32 %v2381_v63, %v3131_v38 }
 0x102   : > { %v2454_v0 = vpop.f32.mrb[4].mxu1  ;;  %v2382_v1 = vpop.f32.mrb[4].mxu0 }
 0x103   : > { %v2455_v2 = vpop.f32.mrb[5].mxu1  ;;  %v2383_v3 = vpop.f32.mrb[5].mxu0 }
 0x104   : > { %v3116_v4 = vadd.f32 %v2455_v2, %v2454_v0  ;;  %v2457_v5 = vpop.f32.mrb[6].mxu1  ;;  %v2384_v6 = vadd.f32 %v2383_v3, %v2382_v1  ;;  %v2385_v7 = vpop.f32.mrb[6].mxu0 }
 0x105   : > { %v2458_v8 = vpop.f32.mrb[7].mxu1  ;;  %v2386_v9 = vpop.f32.mrb[7].mxu0 }
 0x106   : > { %v3118_v10 = vadd.f32 %v2458_v8, %v2457_v5  ;;  %v2387_v11 = vadd.f32 %v2386_v9, %v2385_v7  ;;  %v1211_v58 = vadd.f32 %v2384_v6, %v3131_v38 }
 0x108   : > { %v1214_v63 = vadd.f32 %v2387_v11, %v3131_v38 }
 0x10a   : > { %v2460_v12 = vpop.f32.mrb[8].mxu1  ;;  %v2388_v13 = vpop.f32.mrb[8].mxu0 }
 0x10b   : > { %v2461_v14 = vpop.f32.mrb[9].mxu1  ;;  %v2389_v15 = vpop.f32.mrb[9].mxu0 }
 0x10c   : > { %v3120_v16 = vadd.f32 %v2461_v14, %v2460_v12  ;;  %v2463_v17 = vpop.f32.mrb[10].mxu1  ;;  %v2390_v18 = vadd.f32 %v2389_v15, %v2388_v13  ;;  %v2391_v19 = vpop.f32.mrb[10].mxu0 }
 0x10d   : > { %v2464_v20 = vpop.f32.mrb[11].mxu1  ;;  %v2392_v21 = vpop.f32.mrb[11].mxu0 }
 0x10e   : > { %v3122_v22 = vadd.f32 %v2464_v20, %v2463_v17  ;;  %v2393_v23 = vadd.f32 %v2392_v21, %v2391_v19  ;;  %v1219_v6 = vadd.f32 %v2390_v18, %v3131_v38 }
 0x110   : > { %v1222_v11 = vadd.f32 %v2393_v23, %v3131_v38 }
 0x112   : > { %v2466_v24 = vpop.f32.mrb[12].mxu1  ;;  %v2394_v25 = vpop.f32.mrb[12].mxu0 }
 0x113   : > { %v2467_v26 = vpop.f32.mrb[13].mxu1  ;;  %v2395_v27 = vpop.f32.mrb[13].mxu0 }
 0x114   : > { %v3124_v28 = vadd.f32 %v2467_v26, %v2466_v24  ;;  %v2469_v29 = vpop.f32.mrb[14].mxu1  ;;  %v2396_v30 = vadd.f32 %v2395_v27, %v2394_v25  ;;  %v2397_v31 = vpop.f32.mrb[14].mxu0 }
 0x115   : > { %v2470_v32 = vpop.f32.mrb[15].mxu1  ;;  %v2398_v33 = vpop.f32.mrb[15].mxu0 }
 0x116   : > { %v3126_v34 = vadd.f32 %v2470_v32, %v2469_v29  ;;  %v2399_v35 = vadd.f32 %v2398_v33, %v2397_v31  ;;  %v1227_v18 = vadd.f32 %v2396_v30, %v3131_v38 }
 0x118   : > { %v1230_v23 = vadd.f32 %v2399_v35, %v3131_v38 }
 0x11a   : > { %v2488_v36 = vpop.f32.mrb[16].mxu1  ;;  %v2400_v37 = vpop.f32.mrb[16].mxu0 }
 0x11b   : > { %v2489_v39 = vpop.f32.mrb[17].mxu1  ;;  %v2401_v40 = vpop.f32.mrb[17].mxu0 }
 0x11c   : > { %v2490_v42 = vadd.f32 %v2489_v39, %v2488_v36  ;;  %v2491_v43 = vpop.f32.mrb[18].mxu1  ;;  %v2402_v44 = vadd.f32 %v2401_v40, %v2400_v37  ;;  %v2403_v45 = vpop.f32.mrb[18].mxu0 }
 0x11d   : > { %v2492_v46 = vpop.f32.mrb[19].mxu1  ;;  %v2404_v47 = vpop.f32.mrb[19].mxu0 }
 0x11e   : > { %v2493_v49 = vadd.f32 %v2492_v46, %v2491_v43  ;;  %v2405_v50 = vadd.f32 %v2404_v47, %v2403_v45  ;;  %v3135_v51 = vadd.f32 %v2490_v42, %v1203_v41 }
 0x120   : > { %v3137_v52 = vadd.f32 %v2493_v49, %v1206_v48 }
 0x122   : > { %v2494_v53 = vpop.f32.mrb[20].mxu1  ;;  %v2406_v54 = vpop.f32.mrb[20].mxu0 }
 0x123   : > { %v2495_v55 = vpop.f32.mrb[21].mxu1  ;;  %v2407_v57 = vpop.f32.mrb[21].mxu0 }
 0x124   : > { %v2496_v59 = vadd.f32 %v2495_v55, %v2494_v53  ;;  %v2497_v60 = vpop.f32.mrb[22].mxu1  ;;  %v2408_v61 = vadd.f32 %v2407_v57, %v2406_v54  ;;  %v2409_v0 = vpop.f32.mrb[22].mxu0  ;;  %v1235_v55 = vadd.f32 %v2402_v44, %v3131_v38 }
 0x125   : > { %v2498_v1 = vpop.f32.mrb[23].mxu1  ;;  %v2410_v2 = vpop.f32.mrb[23].mxu0 }
 0x126   : > { %v2499_v3 = vadd.f32 %v2498_v1, %v2497_v60  ;;  %v2411_v5 = vadd.f32 %v2410_v2, %v2409_v0  ;;  %v3141_v7 = vadd.f32 %v2496_v59, %v1211_v58  ;;  %v1238_v1 = vadd.f32 %v2405_v50, %v3131_v38 }
 0x128   : > { %v3143_v8 = vadd.f32 %v2499_v3, %v1214_v63 }
 0x12a   : > { %v2500_v9 = vpop.f32.mrb[24].mxu1  ;;  %v2412_v12 = vpop.f32.mrb[24].mxu0 }
 0x12b   : > { %v2501_v13 = vpop.f32.mrb[25].mxu1  ;;  %v2413_v14 = vpop.f32.mrb[25].mxu0 }
 0x12c   : > { %v2502_v15 = vadd.f32 %v2501_v13, %v2500_v9  ;;  %v2503_v17 = vpop.f32.mrb[26].mxu1  ;;  %v2414_v19 = vadd.f32 %v2413_v14, %v2412_v12  ;;  %v2415_v20 = vpop.f32.mrb[26].mxu0 }
 0x12d   : > { %v2504_v21 = vpop.f32.mrb[27].mxu1  ;;  %v2416_v24 = vpop.f32.mrb[27].mxu0 }
 0x12e   : > { %v2505_v25 = vadd.f32 %v2504_v21, %v2503_v17  ;;  %v2417_v26 = vadd.f32 %v2416_v24, %v2415_v20  ;;  %v3147_v27 = vadd.f32 %v2502_v15, %v1219_v6  ;;  %v1243_v6 = vadd.f32 %v2408_v61, %v3131_v38 }
 0x130   : > { %v3149_v29 = vadd.f32 %v2505_v25, %v1222_v11  ;;  %v1246_v11 = vadd.f32 %v2411_v5, %v3131_v38 }
 0x132   : > { %v2506_v31 = vpop.f32.mrb[28].mxu1  ;;  %v2418_v32 = vpop.f32.mrb[28].mxu0 }
 0x133   : > { %v2507_v33 = vpop.f32.mrb[29].mxu1  ;;  %v2419_v36 = vpop.f32.mrb[29].mxu0 }
 0x134   : > { %v2508_v37 = vadd.f32 %v2507_v33, %v2506_v31  ;;  %v2509_v39 = vpop.f32.mrb[30].mxu1  ;;  %v3152_v40 = vadd.f32 %v2419_v36, %v2418_v32  ;;  %v2421_v41 = vpop.f32.mrb[30].mxu0 }
 0x135   : > { %v2510_v42 = vpop.f32.mrb[31].mxu1  ;;  %v2422_v43 = vpop.f32.mrb[31].mxu0 }
 0x136   : > { %v2511_v45 = vadd.f32 %v2510_v42, %v2509_v39  ;;  %v3155_v46 = vadd.f32 %v2422_v43, %v2421_v41  ;;  %v3157_v47 = vadd.f32 %v2508_v37, %v1227_v18  ;;  %v1251_v39 = vadd.f32 %v2414_v19, %v3131_v38 }
 0x138   : > { %v3159_v48 = vadd.f32 %v2511_v45, %v1230_v23 }
 0x13a   : > { %v2512_v49 = vpop.f32.mrb[32].mxu1  ;;  %v2424_v53 = vpop.f32.mrb[32].mxu0 }
 0x13b   : > { %v2513_v54 = vpop.f32.mrb[33].mxu1  ;;  %v2425_v30 = vpop.f32.mrb[33].mxu0 }
 0x13c   : > { %v2514_v57 = vadd.f32 %v2513_v54, %v2512_v49  ;;  %v2515_v58 = vpop.f32.mrb[34].mxu1  ;;  %v3162_v59 = vadd.f32 %v2425_v30, %v2424_v53  ;;  %v2427_v60 = vpop.f32.mrb[34].mxu0  ;;  %v1254_v49 = vadd.f32 %v2417_v26, %v3131_v38  ;;  %v1259_v26 = vadd.f32 %v3152_v40, %v3131_v38 }
 0x13d   : > { %v2516_v0 = vpop.f32.mrb[35].mxu1  ;;  %v2428_v35 = vpop.f32.mrb[35].mxu0 }
 0x13e   : > { %v2517_v2 = vadd.f32 %v2516_v0, %v2515_v58  ;;  %v3165_v63 = vadd.f32 %v2428_v35, %v2427_v60  ;;  %v3167_v3 = vadd.f32 %v2514_v57, %v1235_v55 }
 0x140   : > { %v3169_v9 = vadd.f32 %v2517_v2, %v1238_v1 }
 0x142   : > { %v2518_v12 = vpop.f32.mrb[36].mxu1  ;;  %v2430_v13 = vpop.f32.mrb[36].mxu0 }
 0x143   : > { %v2519_v14 = vpop.f32.mrb[37].mxu1  ;;  %v2431_v44 = vpop.f32.mrb[37].mxu0 }
 0x144   : > { %v2520_v15 = vadd.f32 %v2519_v14, %v2518_v12  ;;  %v2521_v17 = vpop.f32.mrb[38].mxu1  ;;  %v3172_v20 = vadd.f32 %v2431_v44, %v2430_v13  ;;  %v2433_v21 = vpop.f32.mrb[38].mxu0  ;;  %v1262_v14 = vadd.f32 %v3155_v46, %v3131_v38  ;;  %v1267_v46 = vadd.f32 %v3162_v59, %v3131_v38 }
 0x145   : > { %v2522_v24 = vpop.f32.mrb[39].mxu1  ;;  %v2434_v50 = vpop.f32.mrb[39].mxu0 }
 0x146   : > { %v2523_v25 = vadd.f32 %v2522_v24, %v2521_v17  ;;  %v3175_v31 = vadd.f32 %v2434_v50, %v2433_v21  ;;  %v3177_v32 = vadd.f32 %v2520_v15, %v1243_v6  ;;  %v2345_v15 = vld [vmem:[%s3197_s10 + $0x8] sm:$0xff]   ;;  %v2282_v21 = vld [vmem:[%s3197_s10] sm:$0xff]  }
 0x147   : > { %v2287_v40 = vunpack.c.l.bf16 %v2345_v15 }
 0x148   : > { %v3179_v33 = vadd.f32 %v2523_v25, %v1246_v11  ;;  %v2283_v25 = vunpack.c.l.bf16 %v2282_v21 }
 0x14a   : > { %v2524_v36 = vpop.f32.mrb[40].mxu1  ;;  %v2436_v18 = vpop.f32.mrb[40].mxu0 }
 0x14b   : > { %v2525_v61 = vpop.f32.mrb[41].mxu1  ;;  %v2437_v37 = vpop.f32.mrb[41].mxu0 }
 0x14c   : > { %v2526_v41 = vadd.f32 %v2525_v61, %v2524_v36  ;;  %v2527_v42 = vpop.f32.mrb[42].mxu1  ;;  %v3182_v43 = vadd.f32 %v2437_v37, %v2436_v18  ;;  %v2439_v5 = vpop.f32.mrb[42].mxu0  ;;  %v2288_v37 = vunpack.c.h.bf16 %v2345_v15 }
 0x14d   : > { %v2528_v23 = vpop.f32.mrb[43].mxu1  ;;  %v2440_v45 = vpop.f32.mrb[43].mxu0 }
 0x14e   : > { %v2529_v53 = vadd.f32 %v2528_v23, %v2527_v42  ;;  %v3185_v54 = vadd.f32 %v2440_v45, %v2439_v5  ;;  %v3187_v30 = vadd.f32 %v2526_v41, %v1251_v39  ;;  %v2284_v23 = vunpack.c.h.bf16 %v2282_v21 }
 0x14f   : > { %v1270_v45 = vadd.f32 %v3165_v63, %v3131_v38 }
 0x150   : > { %v3190_v55 = vadd.f32 %v2529_v53, %v1254_v49 }
 0x152   : > { %v2530_v57 = vpop.f32.mrb[44].mxu1  ;;  %v2442_v19 = vpop.f32.mrb[44].mxu0 }
 0x153   : > { %v2531_v58 = vpop.f32.mrb[45].mxu1  ;;  %v2443_v60 = vpop.f32.mrb[45].mxu0 }
 0x154   : > { %v2532_v0 = vadd.f32 %v2531_v58, %v2530_v57  ;;  %v2533_v35 = vpop.f32.mrb[46].mxu1  ;;  %v3201_v1 = vadd.f32 %v2443_v60, %v2442_v19  ;;  %v2445_v2 = vpop.f32.mrb[46].mxu0  ;;  %v2347_v60 = vld [vmem:[%s3197_s10 + $0x18] sm:$0xff]  }
 0x155   : > { %v2534_v12 = vpop.f32.mrb[47].mxu1  ;;  %v2446_v13 = vpop.f32.mrb[47].mxu0 }
 0x156   : > { %v2535_v44 = vadd.f32 %v2534_v12, %v2533_v35  ;;  %v3205_v6 = vadd.f32 %v2446_v13, %v2445_v2  ;;  %v3208_v17 = vadd.f32 %v2532_v0, %v1259_v26  ;;  %v2346_v35 = vld [vmem:[%s3197_s10 + $0x10] sm:$0xff]   ;;  %v2295_v13 = vunpack.c.l.bf16 %v2347_v60 }
 0x158   : > { %v3211_v24 = vadd.f32 %v2535_v44, %v1262_v14 }
 0x15a   : > { %v2536_v50 = vpop.f32.mrb[48].mxu1  ;;  %v2614_v11 = vpop.f32.mrb[48].mxu0 }
 0x15b   : > { %v1533_v36 = vadd.f32 %v2614_v11, %v3141_v7  ;;  %v2537_v18 = vpop.f32.mrb[49].mxu1  ;;  %v1524_v61 = vpop.f32.mrb[49].mxu0 }
 0x15c   : > { %v2538_v39 = vadd.f32 %v2537_v18, %v2536_v50  ;;  %v1525_v41 = vadd.f32 %v1524_v61, %v3135_v51  ;;  %v2539_v42 = vpop.f32.mrb[50].mxu1  ;;  %v2615_v5 = vpop.f32.mrb[50].mxu0  ;;  %v2296_v18 = vunpack.c.h.bf16 %v2347_v60  ;;  %v2292_v61 = vunpack.c.h.bf16 %v2346_v35 }
 0x15d   : > { %v1717_v49 = vadd.f32 %v2287_v40, %v1533_v36  ;;  %v1536_v7 = vadd.f32 %v2615_v5, %v3143_v8  ;;  %v2540_v53 = vpop.f32.mrb[51].mxu1  ;;  %v1527_v57 = vpop.f32.mrb[51].mxu0  ;;  %v2291_v40 = vunpack.c.l.bf16 %v2346_v35 }
 0x15e   : > { %v1715_v19 = vadd.f32 %v2283_v25, %v1525_v41  ;;  %v2541_v58 = vadd.f32 %v2540_v53, %v2539_v42  ;;  %v1528_v59 = vadd.f32 %v1527_v57, %v3137_v52  ;;  %v3222_v26 = vadd.f32 %v2538_v39, %v1267_v46 }
 0x15f   : > { %v1749_v51 = vmax.f32 %v1717_v49, 0.0  ;;  %v1718_v0 = vadd.f32 %v2288_v37, %v1536_v7  ;;  %v1275_v37 = vadd.f32 %v3172_v20, %v3131_v38 }
 0x160   : > { %v1747_v8 = vmax.f32 %v1715_v19, 0.0  ;;  %v1716_v63 = vadd.f32 %v2284_v23, %v1528_v59  ;;  %v3232_v2 = vadd.f32 %v2541_v58, %v1270_v45 }
 0x161   : > { %v2251_v12 = vpack.c.bf16 %v1749_v51, %v1749_v51  ;;  %v1750_v52 = vmax.f32 %v1718_v0, 0.0 }
 0x162   : > { %v2249_v14 = vpack.c.bf16 %v1747_v8, %v1747_v8  ;;  %v1748_v44 = vmax.f32 %v1716_v63, 0.0  ;;  %v2542_v15 = vpop.f32.mrb[52].mxu1  ;;  %v2618_v21 = vpop.f32.mrb[52].mxu0 }
 0x163   : > { %1910 = vst.msk [vmem:[%s3230_s13 + $0x8] sm:$0xf] %vm1907_vm1, %v2251_v12  ;;  %v2252_v50 = vpack.c.bf16 %v1750_v52, %v1750_v52  ;;  %v1549_v11 = vadd.f32 %v2618_v21, %v3157_v47  ;;  %v2543_v25 = vpop.f32.mrb[53].mxu1  ;;  %v1540_v36 = vpop.f32.mrb[53].mxu0  ;;  %v1278_v47 = vadd.f32 %v3175_v31, %v3131_v38  ;;  %v2348_v31 = vld [vmem:[%s3197_s10 + $0x20] sm:$0xff]  }
 0x164   : > { %1908 = vst.msk [vmem:[%s3230_s13] sm:$0xf] %vm1907_vm1, %v2249_v14  ;;  %v2250_v46 = vpack.c.bf16 %v1748_v44, %v1748_v44  ;;  %v2544_v39 = vadd.f32 %v2543_v25, %v2542_v15  ;;  %v1541_v41 = vadd.f32 %v1540_v36, %v3147_v27  ;;  %v2545_v42 = vpop.f32.mrb[54].mxu1  ;;  %v2619_v5 = vpop.f32.mrb[54].mxu0  ;;  %v2349_v27 = vld [vmem:[%s3197_s10 + $0x28] sm:$0xff]  }
 0x165   : > { %1911 = vst.msk [vmem:[%s3230_s13 + $0xc] sm:$0xf] %vm1907_vm1, %v2252_v50  ;;  %v1721_v23 = vadd.f32 %v2295_v13, %v1549_v11  ;;  %v1552_v45 = vadd.f32 %v2619_v5, %v3159_v48  ;;  %v2546_v49 = vpop.f32.mrb[55].mxu1  ;;  %v1543_v20 = vpop.f32.mrb[55].mxu0  ;;  %v2303_v8 = vunpack.c.l.bf16 %v2349_v27  ;;  %v2300_v50 = vunpack.c.h.bf16 %v2348_v31 }
 0x166   : > { %1909 = vst.msk [vmem:[%s3230_s13 + $0x4] sm:$0xf] %vm1907_vm1, %v2250_v46  ;;  %v1719_v7 = vadd.f32 %v2291_v40, %v1541_v41  ;;  %v2547_v53 = vadd.f32 %v2546_v49, %v2545_v42  ;;  %v1544_v57 = vadd.f32 %v1543_v20, %v3149_v29  ;;  %v3251_v19 = vadd.f32 %v2544_v39, %v1275_v37 }
 0x167   : > { %v1753_v58 = vmax.f32 %v1721_v23, 0.0  ;;  %v1722_v59 = vadd.f32 %v2296_v18, %v1552_v45  ;;  %v2299_v29 = vunpack.c.l.bf16 %v2348_v31  ;;  %v2304_v40 = vunpack.c.h.bf16 %v2349_v27 }
 0x168   : > { %v1751_v60 = vmax.f32 %v1719_v7, 0.0  ;;  %v1720_v51 = vadd.f32 %v2292_v61, %v1544_v57  ;;  %v3254_v0 = vadd.f32 %v2547_v53, %v1278_v47  ;;  %v1283_v11 = vadd.f32 %v3182_v43, %v3131_v38 }
 0x169   : > { %v2255_v48 = vpack.c.bf16 %v1753_v58, %v1753_v58  ;;  %v1754_v35 = vmax.f32 %v1722_v59, 0.0 }
 0x16a   : > { %v2253_v63 = vpack.c.bf16 %v1751_v60, %v1751_v60  ;;  %v1752_v12 = vmax.f32 %v1720_v51, 0.0  ;;  %v2548_v52 = vpop.f32.mrb[56].mxu1  ;;  %v2622_v13 = vpop.f32.mrb[56].mxu0 }
 0x16b   : > { %1914 = vst.msk [vmem:[%s3230_s13 + $0x18] sm:$0xf] %vm1907_vm1, %v2255_v48  ;;  %v2256_v14 = vpack.c.bf16 %v1754_v35, %v1754_v35  ;;  %v1565_v44 = vadd.f32 %v2622_v13, %v3177_v32  ;;  %v2549_v15 = vpop.f32.mrb[57].mxu1  ;;  %v1556_v21 = vpop.f32.mrb[57].mxu0  ;;  %v1286_v32 = vadd.f32 %v3185_v54, %v3131_v38  ;;  %v2350_v54 = vld [vmem:[%s3197_s10 + $0x30] sm:$0xff]  }
 0x16c   : > { %1912 = vst.msk [vmem:[%s3230_s13 + $0x10] sm:$0xf] %vm1907_vm1, %v2253_v63  ;;  %v2254_v25 = vpack.c.bf16 %v1752_v12, %v1752_v12  ;;  %v2550_v36 = vadd.f32 %v2549_v15, %v2548_v52  ;;  %v1557_v18 = vadd.f32 %v1556_v21, %v3167_v3  ;;  %v2551_v61 = vpop.f32.mrb[58].mxu1  ;;  %v2623_v37 = vpop.f32.mrb[58].mxu0  ;;  %v2351_v3 = vld [vmem:[%s3197_s10 + $0x38] sm:$0xff]   ;;  %v2308_v12 = vunpack.c.h.bf16 %v2350_v54 }
 0x16d   : > { %1915 = vst.msk [vmem:[%s3230_s13 + $0x1c] sm:$0xf] %vm1907_vm1, %v2256_v14  ;;  %v1725_v46 = vadd.f32 %v2303_v8, %v1565_v44  ;;  %v1568_v39 = vadd.f32 %v2623_v37, %v3179_v33  ;;  %v2552_v41 = vpop.f32.mrb[59].mxu1  ;;  %v1559_v43 = vpop.f32.mrb[59].mxu0  ;;  %v2311_v27 = vunpack.c.l.bf16 %v2351_v3  ;;  %v2312_v63 = vunpack.c.h.bf16 %v2351_v3 }
 0x16e   : > { %1913 = vst.msk [vmem:[%s3230_s13 + $0x14] sm:$0xf] %vm1907_vm1, %v2254_v25  ;;  %v1723_v42 = vadd.f32 %v2299_v29, %v1557_v18  ;;  %v2553_v5 = vadd.f32 %v2552_v41, %v2551_v61  ;;  %v1560_v47 = vadd.f32 %v1559_v43, %v3169_v9  ;;  %v3273_v23 = vadd.f32 %v2550_v36, %v1283_v11 }
 0x16f   : > { %v1757_v45 = vmax.f32 %v1725_v46, 0.0  ;;  %v1726_v49 = vadd.f32 %v2304_v40, %v1568_v39  ;;  %v2307_v9 = vunpack.c.l.bf16 %v2350_v54  ;;  %v1291_v52 = vadd.f32 %v3201_v1, %v3131_v38 }
 0x170   : > { %v1755_v20 = vmax.f32 %v1723_v42, 0.0  ;;  %v1724_v7 = vadd.f32 %v2300_v50, %v1560_v47  ;;  %v3276_v53 = vadd.f32 %v2553_v5, %v1286_v32  ;;  %v2352_v32 = vld [vmem:[%s3197_s10 + $0x40] sm:$0xff]  }
 0x171   : > { %v2259_v33 = vpack.c.bf16 %v1757_v45, %v1757_v45  ;;  %v1758_v57 = vmax.f32 %v1726_v49, 0.0  ;;  %v2315_v45 = vunpack.c.l.bf16 %v2352_v32 }
 0x172   : > { %v2257_v58 = vpack.c.bf16 %v1755_v20, %v1755_v20  ;;  %v1756_v59 = vmax.f32 %v1724_v7, 0.0  ;;  %v2554_v31 = vpop.f32.mrb[60].mxu1  ;;  %v2626_v60 = vpop.f32.mrb[60].mxu0 }
 0x173   : > { %1918 = vst.msk [vmem:[%s3230_s13 + $0x28] sm:$0xf] %vm1907_vm1, %v2259_v33  ;;  %v2260_v51 = vpack.c.bf16 %v1758_v57, %v1758_v57  ;;  %v1581_v48 = vadd.f32 %v2626_v60, %v3208_v17  ;;  %v2555_v35 = vpop.f32.mrb[61].mxu1  ;;  %v1572_v8 = vpop.f32.mrb[61].mxu0  ;;  %v1294_v17 = vadd.f32 %v3205_v6, %v3131_v38  ;;  %v1302_v60 = vadd.f32 %v3114_v62, %v3131_v38  ;;  %v2354_v62 = vld [vmem:[%s3197_s10 + $0x50] sm:$0xff]  }
 0x174   : > { %1916 = vst.msk [vmem:[%s3230_s13 + $0x20] sm:$0xf] %vm1907_vm1, %v2257_v58  ;;  %v2258_v13 = vpack.c.bf16 %v1756_v59, %v1756_v59  ;;  %v2556_v29 = vadd.f32 %v2555_v35, %v2554_v31  ;;  %v1573_v14 = vadd.f32 %v1572_v8, %v3187_v30  ;;  %v2557_v44 = vpop.f32.mrb[62].mxu1  ;;  %v2627_v15 = vpop.f32.mrb[62].mxu0  ;;  %v2353_v30 = vld [vmem:[%s3197_s10 + $0x48] sm:$0xff]  }
 0x175   : > { %1919 = vst.msk [vmem:[%s3230_s13 + $0x2c] sm:$0xf] %vm1907_vm1, %v2260_v51  ;;  %v1729_v21 = vadd.f32 %v2311_v27, %v1581_v48  ;;  %v1584_v40 = vadd.f32 %v2627_v15, %v3211_v24  ;;  %v2558_v50 = vpop.f32.mrb[63].mxu1  ;;  %v1575_v1 = vpop.f32.mrb[63].mxu0  ;;  %v2319_v43 = vunpack.c.l.bf16 %v2353_v30  ;;  %v2320_v33 = vunpack.c.h.bf16 %v2353_v30 }
 0x176   : > { %1917 = vst.msk [vmem:[%s3230_s13 + $0x24] sm:$0xf] %vm1907_vm1, %v2258_v13  ;;  %v1727_v11 = vadd.f32 %v2307_v9, %v1573_v14  ;;  %v2559_v25 = vadd.f32 %v2558_v50, %v2557_v44  ;;  %v1576_v36 = vadd.f32 %v1575_v1, %v3190_v55  ;;  %v1452_v18 = vadd.f32 %v2556_v29, %v1291_v52 }
 0x177   : > { %v1761_v61 = vmax.f32 %v1729_v21, 0.0  ;;  %v1730_v37 = vadd.f32 %v2312_v63, %v1584_v40  ;;  %v1299_v55 = vadd.f32 %v3112_v56, %v3131_v38  ;;  %v2316_v56 = vunpack.c.h.bf16 %v2352_v32  ;;  %v2355_v63 = vld [vmem:[%s3197_s10 + $0x58] sm:$0xff]  }
 0x178   : > { %v1759_v6 = vmax.f32 %v1727_v11, 0.0  ;;  %v1728_v46 = vadd.f32 %v2308_v12, %v1576_v36  ;;  %v3296_v39 = vadd.f32 %v2559_v25, %v1294_v17  ;;  %v2327_v17 = vunpack.c.l.bf16 %v2355_v63 }
 0x179   : > { %v2263_v24 = vpack.c.bf16 %v1761_v61, %v1761_v61  ;;  %v1762_v41 = vmax.f32 %v1730_v37, 0.0  ;;  %v1307_v11 = vadd.f32 %v3116_v4, %v3131_v38  ;;  %v2328_v37 = vunpack.c.h.bf16 %v2355_v63 }
 0x17a   : > { %v2261_v42 = vpack.c.bf16 %v1759_v6, %v1759_v6  ;;  %v1760_v5 = vmax.f32 %v1728_v46, 0.0  ;;  %v2560_v47 = vpop.f32.mrb[64].mxu1  ;;  %v2630_v3 = vpop.f32.mrb[64].mxu0  ;;  %v1310_v4 = vadd.f32 %v3118_v10, %v3131_v38 }
 0x17b   : > { %1922 = vst.msk [vmem:[%s3230_s13 + $0x38] sm:$0xf] %vm1907_vm1, %v2263_v24  ;;  %v2264_v49 = vpack.c.bf16 %v1762_v41, %v1762_v41  ;;  %v1597_v54 = vadd.f32 %v2630_v3, %v3251_v19  ;;  %v2561_v20 = vpop.f32.mrb[65].mxu1  ;;  %v1588_v7 = vpop.f32.mrb[65].mxu0 }
 0x17c   : > { %1920 = vst.msk [vmem:[%s3230_s13 + $0x30] sm:$0xf] %vm1907_vm1, %v2261_v42  ;;  %v2262_v57 = vpack.c.bf16 %v1760_v5, %v1760_v5  ;;  %v2562_v27 = vadd.f32 %v2561_v20, %v2560_v47  ;;  %v1589_v58 = vadd.f32 %v1588_v7, %v3222_v26  ;;  %v2563_v59 = vpop.f32.mrb[66].mxu1  ;;  %v2631_v31 = vpop.f32.mrb[66].mxu0  ;;  %v2356_v7 = vld [vmem:[%s3197_s10 + $0x60] sm:$0xff]  }
 0x17d   : > { %1923 = vst.msk [vmem:[%s3230_s13 + $0x3c] sm:$0xf] %vm1907_vm1, %v2264_v49  ;;  %v1733_v19 = vadd.f32 %v2319_v43, %v1597_v54  ;;  %v1600_v9 = vadd.f32 %v2631_v31, %v3254_v0  ;;  %v2564_v51 = vpop.f32.mrb[67].mxu1  ;;  %v1591_v48 = vpop.f32.mrb[67].mxu0  ;;  %v2324_v43 = vunpack.c.h.bf16 %v2354_v62  ;;  %v2357_v49 = vld [vmem:[%s3197_s10 + $0x68] sm:$0xff]  }
 0x17e   : > { %1921 = vst.msk [vmem:[%s3230_s13 + $0x34] sm:$0xf] %vm1907_vm1, %v2262_v57  ;;  %v1731_v35 = vadd.f32 %v2315_v45, %v1589_v58  ;;  %v2565_v8 = vadd.f32 %v2564_v51, %v2563_v59  ;;  %v1592_v26 = vadd.f32 %v1591_v48, %v3232_v2  ;;  %v3315_v12 = vadd.f32 %v2562_v27, %v1299_v55 }
 0x17f   : > { %v1765_v52 = vmax.f32 %v1733_v19, 0.0  ;;  %v1734_v13 = vadd.f32 %v2320_v33, %v1600_v9  ;;  %v2323_v2 = vunpack.c.l.bf16 %v2354_v62  ;;  %v2335_v58 = vunpack.c.l.bf16 %v2357_v49 }
 0x180   : > { %v1763_v29 = vmax.f32 %v1731_v35, 0.0  ;;  %v1732_v14 = vadd.f32 %v2316_v56, %v1592_v26  ;;  %v3318_v44 = vadd.f32 %v2565_v8, %v1302_v60  ;;  %v2331_v19 = vunpack.c.l.bf16 %v2356_v7 }
 0x181   : > { %v2267_v0 = vpack.c.bf16 %v1765_v52, %v1765_v52  ;;  %v1766_v15 = vmax.f32 %v1734_v13, 0.0  ;;  %v2336_v8 = vunpack.c.h.bf16 %v2357_v49 }
 0x182   : > { %v2265_v21 = vpack.c.bf16 %v1763_v29, %v1763_v29  ;;  %v1764_v40 = vmax.f32 %v1732_v14, 0.0  ;;  %v2566_v50 = vpop.f32.mrb[68].mxu1  ;;  %v2634_v1 = vpop.f32.mrb[68].mxu0  ;;  %v2332_v29 = vunpack.c.h.bf16 %v2356_v7 }
 0x183   : > { %1926 = vst.msk [vmem:[%s3230_s13 + $0x48] sm:$0xf] %vm1907_vm1, %v2267_v0  ;;  %v2268_v25 = vpack.c.bf16 %v1766_v15, %v1766_v15  ;;  %v1613_v36 = vadd.f32 %v2634_v1, %v1452_v18  ;;  %v2567_v30 = vpop.f32.mrb[69].mxu1  ;;  %v1604_v61 = vpop.f32.mrb[69].mxu0 }
 0x184   : > { %1924 = vst.msk [vmem:[%s3230_s13 + $0x40] sm:$0xf] %vm1907_vm1, %v2265_v21  ;;  %v2266_v32 = vpack.c.bf16 %v1764_v40, %v1764_v40  ;;  %v2568_v6 = vadd.f32 %v2567_v30, %v2566_v50  ;;  %v1605_v46 = vadd.f32 %v1604_v61, %v3273_v23  ;;  %v2569_v24 = vpop.f32.mrb[70].mxu1  ;;  %v2635_v41 = vpop.f32.mrb[70].mxu0 }
 0x185   : > { %1927 = vst.msk [vmem:[%s3230_s13 + $0x4c] sm:$0xf] %vm1907_vm1, %v2268_v25  ;;  %v1737_v18 = vadd.f32 %v2327_v17, %v1613_v36  ;;  %v1616_v42 = vadd.f32 %v2635_v41, %v3296_v39  ;;  %v2570_v5 = vpop.f32.mrb[71].mxu1  ;;  %v1607_v47 = vpop.f32.mrb[71].mxu0 }
 0x186   : > { %1925 = vst.msk [vmem:[%s3230_s13 + $0x44] sm:$0xf] %vm1907_vm1, %v2266_v32  ;;  %v1735_v3 = vadd.f32 %v2323_v2, %v1605_v46  ;;  %v2571_v45 = vadd.f32 %v2570_v5, %v2569_v24  ;;  %v1608_v23 = vadd.f32 %v1607_v47, %v3276_v53  ;;  %v1468_v55 = vadd.f32 %v2568_v6, %v1307_v11  ;;  %v2358_v11 = vld [vmem:[%s3197_s10 + $0x70] sm:$0xff]   ;;  %v2359_v24 = vld [vmem:[%s3197_s10 + $0x78] sm:$0xff]  }
 0x187   : > { %v1769_v54 = vmax.f32 %v1737_v18, 0.0  ;;  %v1738_v20 = vadd.f32 %v2328_v37, %v1616_v42  ;;  %v1315_v53 = vadd.f32 %v3120_v16, %v3131_v38  ;;  %v1318_v16 = vadd.f32 %v3122_v22, %v3131_v38 }
 0x188   : > { %v1767_v10 = vmax.f32 %v1735_v3, 0.0  ;;  %v1736_v33 = vadd.f32 %v2324_v43, %v1608_v23  ;;  %v1471_v57 = vadd.f32 %v2571_v45, %v1310_v4  ;;  %v2339_v41 = vunpack.c.l.bf16 %v2358_v11 }
 0x189   : > { %v2271_v27 = vpack.c.bf16 %v1769_v54, %v1769_v54  ;;  %v1770_v39 = vmax.f32 %v1738_v20, 0.0  ;;  %v2340_v23 = vunpack.c.h.bf16 %v2358_v11 }
 0x18a   : > { %v2269_v59 = vpack.c.bf16 %v1767_v10, %v1767_v10  ;;  %v1768_v31 = vmax.f32 %v1736_v33, 0.0  ;;  %v2572_v56 = vpop.f32.mrb[72].mxu1  ;;  %v2638_v60 = vpop.f32.mrb[72].mxu0 }
 0x18b   : > { %1930 = vst.msk [vmem:[%s3230_s13 + $0x58] sm:$0xf] %vm1907_vm1, %v2271_v27  ;;  %v2272_v9 = vpack.c.bf16 %v1770_v39, %v1770_v39  ;;  %v1629_v51 = vadd.f32 %v2638_v60, %v1468_v55  ;;  %v2573_v48 = vpop.f32.mrb[73].mxu1  ;;  %v1620_v35 = vpop.f32.mrb[73].mxu0  ;;  %v1326_v55 = vadd.f32 %v3126_v34, %v3131_v38 }
 0x18c   : > { %1928 = vst.msk [vmem:[%s3230_s13 + $0x50] sm:$0xf] %vm1907_vm1, %v2269_v59  ;;  %v2270_v26 = vpack.c.bf16 %v1768_v31, %v1768_v31  ;;  %v2574_v63 = vadd.f32 %v2573_v48, %v2572_v56  ;;  %v1621_v52 = vadd.f32 %v1620_v35, %v3315_v12  ;;  %v2575_v13 = vpop.f32.mrb[74].mxu1  ;;  %v2639_v62 = vpop.f32.mrb[74].mxu0 }
 0x18d   : > { %1931 = vst.msk [vmem:[%s3230_s13 + $0x5c] sm:$0xf] %vm1907_vm1, %v2272_v9  ;;  %v1741_v14 = vadd.f32 %v2335_v58, %v1629_v51  ;;  %v1632_v0 = vadd.f32 %v2639_v62, %v1471_v57  ;;  %v2576_v15 = vpop.f32.mrb[75].mxu1  ;;  %v1623_v17 = vpop.f32.mrb[75].mxu0  ;;  %v2344_v57 = vunpack.c.h.bf16 %v2359_v24 }
 0x18e   : > { %1929 = vst.msk [vmem:[%s3230_s13 + $0x54] sm:$0xf] %vm1907_vm1, %v2270_v26  ;;  %v1739_v21 = vadd.f32 %v2331_v19, %v1621_v52  ;;  %v2577_v40 = vadd.f32 %v2576_v15, %v2575_v13  ;;  %v1624_v12 = vadd.f32 %v1623_v17, %v3318_v44  ;;  %v1476_v50 = vadd.f32 %v2574_v63, %v1315_v53 }
 0x18f   : > { %v1773_v1 = vmax.f32 %v1741_v14, 0.0  ;;  %v1742_v2 = vadd.f32 %v2336_v8, %v1632_v0  ;;  %v1323_v44 = vadd.f32 %v3124_v28, %v3131_v38  ;;  %v2343_v28 = vunpack.c.l.bf16 %v2359_v24 }
 0x190   : > { %v1771_v25 = vmax.f32 %v1739_v21, 0.0  ;;  %v1740_v22 = vadd.f32 %v2332_v29, %v1624_v12  ;;  %v1479_v36 = vadd.f32 %v2577_v40, %v1318_v16 }
 0x191   : > { %v2275_v30 = vpack.c.bf16 %v1773_v1, %v1773_v1  ;;  %v1774_v61 = vmax.f32 %v1742_v2, 0.0 }
 0x192   : > { %v2273_v37 = vpack.c.bf16 %v1771_v25, %v1771_v25  ;;  %v1772_v32 = vmax.f32 %v1740_v22, 0.0  ;;  %v2578_v6 = vpop.f32.mrb[76].mxu1  ;;  %v2642_v46 = vpop.f32.mrb[76].mxu0 }
 0x193   : > { %1934 = vst.msk [vmem:[%s3230_s13 + $0x68] sm:$0xf] %vm1907_vm1, %v2275_v30  ;;  %v2276_v43 = vpack.c.bf16 %v1774_v61, %v1774_v61  ;;  %v2579_v4 = vpop.f32.mrb[77].mxu1  ;;  %v1636_v18 = vpop.f32.mrb[77].mxu0 }
 0x194   : > { %1932 = vst.msk [vmem:[%s3230_s13 + $0x60] sm:$0xf] %vm1907_vm1, %v2273_v37  ;;  %v2274_v42 = vpack.c.bf16 %v1772_v32, %v1772_v32  ;;  %v2580_v5 = vadd.f32 %v2579_v4, %v2578_v6  ;;  %v1637_v47 = vadd.f32 %v1636_v18, %v1476_v50  ;;  %v2581_v3 = vpop.f32.mrb[78].mxu1  ;;  %v2643_v45 = vpop.f32.mrb[78].mxu0 }
 0x195   : > { %1935 = vst.msk [vmem:[%s3230_s13 + $0x6c] sm:$0xf] %vm1907_vm1, %v2276_v43  ;;  %v2582_v49 = vpop.f32.mrb[79].mxu1  ;;  %v1639_v54 = vpop.f32.mrb[79].mxu0 }
 0x196   : > { %1933 = vst.msk [vmem:[%s3230_s13 + $0x64] sm:$0xf] %vm1907_vm1, %v2274_v42  ;;  %v1484_v20 = vadd.f32 %v2580_v5, %v1323_v44  ;;  %v1743_v7 = vadd.f32 %v2339_v41, %v1637_v47  ;;  %v2583_v10 = vadd.f32 %v2582_v49, %v2581_v3  ;;  %v1640_v33 = vadd.f32 %v1639_v54, %v1479_v36 }
 0x198   : > { %v1645_v27 = vadd.f32 %v2642_v46, %v1484_v20  ;;  %v1775_v39 = vmax.f32 %v1743_v7, 0.0  ;;  %v1487_v58 = vadd.f32 %v2583_v10, %v1326_v55  ;;  %v1744_v34 = vadd.f32 %v2340_v23, %v1640_v33 }
 0x19a   : > { %v1745_v38 = vadd.f32 %v2343_v28, %v1645_v27  ;;  %v2277_v59 = vpack.c.bf16 %v1775_v39, %v1775_v39  ;;  %v1648_v31 = vadd.f32 %v2643_v45, %v1487_v58  ;;  %v1776_v56 = vmax.f32 %v1744_v34, 0.0 }
 0x19c   : > { %v1777_v60 = vmax.f32 %v1745_v38, 0.0  ;;  %1936 = vst.msk [vmem:[%s3230_s13 + $0x70] sm:$0xf] %vm1907_vm1, %v2277_v59  ;;  %v1746_v19 = vadd.f32 %v2344_v57, %v1648_v31  ;;  %v2278_v53 = vpack.c.bf16 %v1776_v56, %v1776_v56 }
 0x19e   : > { %v2279_v9 = vpack.c.bf16 %v1777_v60, %v1777_v60  ;;  %v1778_v51 = vmax.f32 %v1746_v19, 0.0  ;;  %1937 = vst.msk [vmem:[%s3230_s13 + $0x74] sm:$0xf] %vm1907_vm1, %v2278_v53 }
 0x1a0   : > { %1938 = vst.msk [vmem:[%s3230_s13 + $0x78] sm:$0xf] %vm1907_vm1, %v2279_v9  ;;  %v2280_v48 = vpack.c.bf16 %v1778_v51, %v1778_v51 }
 0x1a2   : > { %1939 = vst.msk [vmem:[%s3230_s13 + $0x7c] sm:$0xf] %vm1907_vm1, %v2280_v48 }
 0x1a3 PF: > { %s14_s17 = sadd.s32 1, %s2855_s17   ;;  %s3387_s15 = smov %s2851_s16 }
 0x1a4   : > { %p11_p5 = scmp.ge.s32.totalorder %s14_s17, 4   ;;  %s3388_s16 = smov %s3390_s18 }
 0x1a6   :  { %13 = sbr.rel (!%p11_p5) target bundleno = 2 (0x2), region = 75 }

// kernel: my_resnet_forward.28
= control target key start
LH: loop header
LB: loop body
LE: loop exit
PB: predicated region body
PF: predicated region fallthrough
CT: control target
= control target key end

     0   :  { %s1415_s12 = smov 0   ;;  %s1417_s13 = smov 0   ;;  %s1588_s0 = inlined_call_operand.vmem [shape: bf16[128,576], index: 0, kind: input, shape index: {}]   ;;  %s1589_s1 = inlined_call_operand.vmem [shape: bf16[576,128], index: 1, kind: input, shape index: {}]   ;;  %s1590_s2 = inlined_call_operand.vmem [shape: f32[1,128], index: 2, kind: input, shape index: {}]   ;;  %s1591_s3 = inlined_call_operand.vmem [shape: bf16[128,128], index: 3, kind: output, shape index: {}]  }
   0x1   :  { %s1419_s14 = smov 0  }
   0x2 LB: > { %s32_s15 = sadd.s32 1, %s1389_s13  ;;  %p1063_p0 = scmp.ge.s32.totalorder %s1393_s14, 1  ;;  %s1393_s14 = sphi %s1419_s14, %s13_s14   ;;  %s1389_s13 = sphi %s1417_s13, %s1593_s13   ;;  %s1385_s12 = sphi %s1415_s12, %s1592_s12  }
   0x3   : > { %p34_p1 = scmp.ge.s32.totalorder %s32_s15, 2  ;;  %p191_p2 = scmp.lt.s32.totalorder %s1393_s14, 3 }
   0x5   : > { %s1595_s15 = smov (%p34_p1, %s32_s15), 0  ;;  %p192_p3 = pnand %p1063_p0, %p191_p2 }
   0x6   : > { %v1307_v0 = vld [vmem:[%s1589_s1 + $0x40] sm:$0xff] (!%p192_p3)   ;;  %v1311_v4 = vld [vmem:[%s1589_s1 + $0x48] sm:$0xff] (!%p192_p3)   ;;  %v1315_v8 = vld [vmem:[%s1589_s1 + $0x50] sm:$0xff] (!%p192_p3)   ;;  %s1064_s23 = sshll.u32 (!%p192_p3), %s1385_s12, 3  ;;  %vm687_vm0 = vcmask (!%p192_p3), 523264  }
   0x7   : > { %195 = sbr.rel (%p192_p3) target bundleno = 295 (0x127), region = 32  ;;  %v1308_v1 = vld [vmem:[%s1589_s1 + $0xc0] sm:$0xff] (!%p192_p3)   ;;  %1170 = vmatprep.subr.bf16.mxu0 (!%p192_p3), %v1307_v0  ;;  %v1312_v5 = vld [vmem:[%s1589_s1 + $0xc8] sm:$0xff] (!%p192_p3)   ;;  %v1316_v9 = vld [vmem:[%s1589_s1 + $0xd0] sm:$0xff] (!%p192_p3)   ;;  %p236_p4 = scmp.lt.s32.totalorder (!%p192_p3), %s1064_s23, 15 }
   0x8   : > { %v1309_v2 = vld [vmem:[%s1589_s1] sm:$0xff] (!%p192_p3)   ;;  %1210 = vmatprep.subr.bf16.mxu1 (!%p192_p3), %v1308_v1  ;;  %v1313_v6 = vld [vmem:[%s1589_s1 + $0x8] sm:$0xff] (!%p192_p3)   ;;  %v1317_v10 = vld [vmem:[%s1589_s1 + $0x10] sm:$0xff] (!%p192_p3)  }
   0x9   : > { %v1310_v3 = vld [vmem:[%s1589_s1 + $0x80] sm:$0xff] (!%p192_p3)   ;;  %1171 = vmatpush3.bf16.msra.mxu0 (!%p192_p3), %v1309_v2  ;;  %v1314_v7 = vld [vmem:[%s1589_s1 + $0x88] sm:$0xff] (!%p192_p3)   ;;  %v1318_v11 = vld [vmem:[%s1589_s1 + $0x90] sm:$0xff] (!%p192_p3)  }
   0xa   : > { %1211 = vmatpush3.bf16.msra.mxu1 (!%p192_p3), %v1310_v3  ;;  %1172 = vmatprep.subr.bf16.mxu0 (!%p192_p3), %v1311_v4  ;;  %v1319_v12 = vld [vmem:[%s1589_s1 + $0x58] sm:$0xff] (!%p192_p3)   ;;  %v1323_v16 = vld [vmem:[%s1589_s1 + $0x60] sm:$0xff] (!%p192_p3)   ;;  %v1327_v20 = vld [vmem:[%s1589_s1 + $0x68] sm:$0xff] (!%p192_p3)  }
   0xb   : > { %1212 = vmatprep.subr.bf16.mxu1 (!%p192_p3), %v1312_v5  ;;  %v1320_v13 = vld [vmem:[%s1589_s1 + $0xd8] sm:$0xff] (!%p192_p3)   ;;  %v1324_v17 = vld [vmem:[%s1589_s1 + $0xe0] sm:$0xff] (!%p192_p3)   ;;  %v1328_v21 = vld [vmem:[%s1589_s1 + $0xe8] sm:$0xff] (!%p192_p3)  }
   0xc   : > { %v1321_v14 = vld [vmem:[%s1589_s1 + $0x18] sm:$0xff] (!%p192_p3)   ;;  %v1325_v18 = vld [vmem:[%s1589_s1 + $0x20] sm:$0xff] (!%p192_p3)   ;;  %v1329_v22 = vld [vmem:[%s1589_s1 + $0x28] sm:$0xff] (!%p192_p3)  }
   0xd   : > { %1173 = vmatpush3.bf16.msra.mxu0 (!%p192_p3), %v1313_v6  ;;  %v1322_v15 = vld [vmem:[%s1589_s1 + $0x98] sm:$0xff] (!%p192_p3)   ;;  %v1326_v19 = vld [vmem:[%s1589_s1 + $0xa0] sm:$0xff] (!%p192_p3)   ;;  %v1330_v23 = vld [vmem:[%s1589_s1 + $0xa8] sm:$0xff] (!%p192_p3)  }
   0xe   : > { %1213 = vmatpush3.bf16.msra.mxu1 %v1314_v7  ;;  %1174 = vmatprep.subr.bf16.mxu0 %v1315_v8  ;;  %s1597_s23 = smov (!%p236_p4, %s1064_s23), 15  ;;  %v1331_v24 = vld [vmem:[%s1589_s1 + $0x70] sm:$0xff]   ;;  %v1335_v28 = vld [vmem:[%s1589_s1 + $0x78] sm:$0xff]   ;;  %v1345_v36 = vld [vmem:[%s1589_s1 + $0x100] sm:$0xff]  }
   0xf   : > { %1214 = vmatprep.subr.bf16.mxu1 %v1316_v9  ;;  %v1332_v25 = vld [vmem:[%s1589_s1 + $0xf0] sm:$0xff]   ;;  %s1282_s22 = smul.u32 20, %s1597_s23  ;;  %v1336_v29 = vld [vmem:[%s1589_s1 + $0xf8] sm:$0xff]   ;;  %v1352_v39 = vld [vmem:[%s1589_s1 + $0x108] sm:$0xff]   ;;  %s1067_s26 = sshll.u32 %s1597_s23, 2 }
  0x10   : > { %v1333_v26 = vld [vmem:[%s1589_s1 + $0x30] sm:$0xff]   ;;  %v1337_v30 = vld [vmem:[%s1589_s1 + $0x38] sm:$0xff]   ;;  %v1068_v58 = vld [vmem:[%s1590_s2] ss:$0 sm:$0xff]  ;;  %s265_s29 = scalar_lea.vmem %s1591_s3, %s1067_s26 }
  0x11   : > { %1175 = vmatpush3.bf16.msra.mxu0 %v1317_v10  ;;  %v1334_v27 = vld [vmem:[%s1589_s1 + $0xb0] sm:$0xff]   ;;  %s1532_s6 = scalar_lea.vmem %s1588_s0, %s1282_s22  ;;  %v1338_v31 = vld [vmem:[%s1589_s1 + $0xb8] sm:$0xff]  }
  0x12   : > { %1215 = vmatpush3.bf16.msra.mxu1 %v1318_v11  ;;  %1176 = vmatprep.subr.bf16.mxu0 %v1319_v12  ;;  %v1339_v32 = vld [vmem:[%s1532_s6] ss:$20 sps:$4 sm:$0xff]   ;;  %v1341_v33 = vld [vmem:[%s1532_s6 + $0x4] ss:$20 sps:$4 sm:$0xff]   ;;  %v1342_v34 = vld [vmem:[%s1532_s6 + $0x8] ss:$20 sps:$4 sm:$0xff]  }
  0x13   : > { %1216 = vmatprep.subr.bf16.mxu1 %v1320_v13  ;;  %v1344_v35 = vld [vmem:[%s1532_s6 + $0xc] ss:$20 sps:$4 sm:$0xff]   ;;  %732 = vmatprep.mubr.bf16.mxu0 %v1341_v33  ;;  %v1348_v38 = vld [vmem:[%s1532_s6 + $0x34] ss:$20 sps:$4 sm:$0xff]   ;;  %v1351_v41 = vld [vmem:[%s1532_s6 + $0x30] ss:$20 sps:$4 sm:$0xff]  }
  0x14   : > { %797 = vmatprep.mubr.bf16.mxu1 %v1344_v35  ;;  %v1346_v37 = vld [vmem:[%s1532_s6 + $0x2c] ss:$20 sps:$4 sm:$0xff]   ;;  %v1350_v40 = vld [vmem:[%s1532_s6 + $0x28] ss:$20 sps:$4 sm:$0xff]   ;;  %v1359_v44 = vld [vmem:[%s1589_s1 + $0x110] sm:$0xff]  }
  0x15   : > { %1177 = vmatpush3.bf16.msra.mxu0 %v1321_v14  ;;  %v1353_v42 = vld [vmem:[%s1532_s6 + $0x54] ss:$20 sps:$4 sm:$0xff]   ;;  %v1355_v43 = vld [vmem:[%s1532_s6 + $0x5c] ss:$20 sps:$4 sm:$0xff]   ;;  %v1358_v47 = vld [vmem:[%s1532_s6 + $0x58] ss:$20 sps:$4 sm:$0xff]  }
  0x16   : > { %1217 = vmatpush3.bf16.msra.mxu1 %v1322_v15  ;;  %1178 = vmatprep.subr.bf16.mxu0 %v1323_v16  ;;  %v1366_v45 = vld [vmem:[%s1589_s1 + $0x118] sm:$0xff]   ;;  %v1357_v46 = vld [vmem:[%s1532_s6 + $0x50] ss:$20 sps:$4 sm:$0xff]   ;;  %v1365_v51 = vld [vmem:[%s1532_s6 + $0x80] ss:$20 sps:$4 sm:$0xff]  }
  0x17   : > { %1218 = vmatprep.subr.bf16.mxu1 %v1324_v17  ;;  %v1360_v48 = vld [vmem:[%s1532_s6 + $0x7c] ss:$20 sps:$4 sm:$0xff]   ;;  %v1362_v49 = vld [vmem:[%s1532_s6 + $0x84] ss:$20 sps:$4 sm:$0xff]   ;;  %v1368_v53 = vld [vmem:[%s1532_s6 + $0x60] ss:$20 sps:$4 sm:$0xff]  }
  0x18   : > { %v1364_v50 = vld [vmem:[%s1532_s6 + $0x78] ss:$20 sps:$4 sm:$0xff]   ;;  %v1367_v52 = vld [vmem:[%s1532_s6 + $0x10] ss:$20 sps:$4 sm:$0xff]   ;;  %v1370_v55 = vld [vmem:[%s1532_s6 + $0x88] ss:$20 sps:$4 sm:$0xff]  }
  0x19   : > { %1179 = vmatpush3.bf16.msra.mxu0 %v1325_v18  ;;  %v1369_v54 = vld [vmem:[%s1532_s6 + $0x38] ss:$20 sps:$4 sm:$0xff]  }
  0x1a   : > { %1219 = vmatpush3.bf16.msra.mxu1 %v1326_v19  ;;  %1180 = vmatprep.subr.bf16.mxu0 %v1327_v20 }
  0x1b   : > { %1220 = vmatprep.subr.bf16.mxu1 %v1328_v21 }
  0x1d   : > { %1181 = vmatpush3.bf16.msra.mxu0 %v1329_v22 }
  0x1e   : > { %1221 = vmatpush3.bf16.msra.mxu1 %v1330_v23  ;;  %1182 = vmatprep.subr.bf16.mxu0 %v1331_v24 }
  0x1f   : > { %1222 = vmatprep.subr.bf16.mxu1 %v1332_v25 }
  0x21   : > { %1183 = vmatpush3.bf16.msra.mxu0 %v1333_v26 }
  0x22   : > { %1223 = vmatpush3.bf16.msra.mxu1 %v1334_v27  ;;  %1184 = vmatprep.subr.bf16.mxu0 %v1335_v28 }
  0x23   : > { %1224 = vmatprep.subr.bf16.mxu1 %v1336_v29 }
  0x25   : > { %1185 = vmatpush3.bf16.msra.mxu0 %v1337_v30 }
  0x26   : > { %1225 = vmatpush3.bf16.msra.mxu1 %v1338_v31  ;;  %1258 = vmatprep.subr.bf16.mxu0 %v1345_v36 }
  0x27   : > { %1274 = vmatprep.subr.bf16.mxu1 %v1345_v36 }
  0x28   : > { %733 = vmatmul.mubr.bf16.vlgmr.msra.gmra.mrb[0].mxu0 %v1339_v32 }
  0x29   : > { %798 = vmatmul.mubr.bf16.vlgmr.msra.gmra.mrb[0].mxu1 %v1342_v34  ;;  %1259 = vmatpush3.bf16.msra.mxu0 %v1345_v36 }
  0x2a   : > { %1278 = vmatpush3.bf16.msra.mxu1 %v1345_v36  ;;  %740 = vmatprep.mubr.bf16.mxu0 %v1346_v37 }
  0x2b   : > { %805 = vmatprep.mubr.bf16.mxu1 %v1348_v38  ;;  %1260 = vmatprep.subr.bf16.mxu0 %v1352_v39 }
  0x2c   : > { %1275 = vmatprep.subr.bf16.mxu1 %v1352_v39 }
  0x2d   : > { %1261 = vmatpush3.bf16.msra.mxu0 %v1352_v39 }
  0x2e   : > { %1279 = vmatpush3.bf16.msra.mxu1 %v1352_v39  ;;  %1262 = vmatprep.subr.bf16.mxu0 %v1359_v44 }
  0x2f   : > { %1276 = vmatprep.subr.bf16.mxu1 %v1359_v44 }
  0x30   : > { %741 = vmatmul.mubr.bf16.gmra.mrb[4].mxu0 %v1350_v40 }
  0x31   : > { %806 = vmatmul.mubr.bf16.gmra.mrb[4].mxu1 %v1351_v41  ;;  %748 = vmatprep.mubr.bf16.mxu0 %v1353_v42 }
  0x32   : > { %813 = vmatprep.mubr.bf16.mxu1 %v1355_v43  ;;  %1263 = vmatpush3.bf16.msra.mxu0 %v1359_v44 }
  0x33   : > { %1280 = vmatpush3.bf16.msra.mxu1 %v1359_v44  ;;  %1264 = vmatprep.subr.bf16.mxu0 %v1366_v45 }
  0x34   : > { %1277 = vmatprep.subr.bf16.mxu1 %v1366_v45 }
  0x36   : > { %1265 = vmatpush3.bf16.msra.mxu0 %v1366_v45 }
  0x37   : > { %1281 = vmatpush3.bf16.msra.mxu1 %v1366_v45 }
  0x38   : > { %749 = vmatmul.mubr.bf16.gmra.mrb[8].mxu0 %v1357_v46 }
  0x39   : > { %814 = vmatmul.mubr.bf16.gmra.mrb[8].mxu1 %v1358_v47  ;;  %756 = vmatprep.mubr.bf16.mxu0 %v1360_v48 }
  0x3a   : > { %821 = vmatprep.mubr.bf16.mxu1 %v1362_v49 }
  0x40   : > { %757 = vmatmul.mubr.bf16.gmra.mrb[12].mxu0 %v1364_v50 }
  0x41   : > { %822 = vmatmul.mubr.bf16.gmra.mrb[12].mxu1 %v1365_v51  ;;  %1266 = vmatprep.mubr.msk.bf16.mxu0 %vm687_vm0, %v1367_v52 }
  0x42   : > { %1270 = vmatprep.mubr.msk.bf16.mxu1 %vm687_vm0, %v1368_v53 }
  0x48   : > { %1267 = vmatmul.mubr.msk.bf16.vlgmr.msra.gmra.mrb[16].mxu0 %vm687_vm0, %v1369_v54 }
  0x49   : > { %1271 = vmatmul.mubr.msk.bf16.vlgmr.msra.gmra.mrb[16].mxu1 %vm687_vm0, %v1370_v55 }
  0xfb   : > { %v1186_v56 = vpop.f32.mrb[0].mxu0 }
  0xfc   : > { %v1226_v57 = vpop.f32.mrb[0].mxu1  ;;  %v1187_v59 = vpop.f32.mrb[1].mxu0 }
  0xfd   : > { %v1188_v60 = vadd.f32 %v1187_v59, %v1186_v56  ;;  %v1227_v61 = vpop.f32.mrb[1].mxu1  ;;  %v1189_v62 = vpop.f32.mrb[2].mxu0 }
  0xfe   : > { %v1228_v63 = vadd.f32 %v1227_v61, %v1226_v57  ;;  %v1229_v0 = vpop.f32.mrb[2].mxu1  ;;  %v1190_v1 = vpop.f32.mrb[3].mxu0 }
  0xff   : > { %v735_v2 = vadd.f32 %v1188_v60, %v1068_v58  ;;  %v1191_v3 = vadd.f32 %v1190_v1, %v1189_v62  ;;  %v1230_v4 = vpop.f32.mrb[3].mxu1 }
 0x100   : > { %v1231_v5 = vadd.f32 %v1230_v4, %v1229_v0 }
 0x101   : > { %v738_v6 = vadd.f32 %v1191_v3, %v1068_v58  ;;  %v800_v7 = vadd.f32 %v1228_v63, %v735_v2 }
 0x103   : > { %v1192_v8 = vpop.f32.mrb[4].mxu0  ;;  %v803_v9 = vadd.f32 %v1231_v5, %v738_v6 }
 0x104   : > { %v1232_v10 = vpop.f32.mrb[4].mxu1  ;;  %v1193_v11 = vpop.f32.mrb[5].mxu0 }
 0x105   : > { %v1194_v12 = vadd.f32 %v1193_v11, %v1192_v8  ;;  %v1233_v13 = vpop.f32.mrb[5].mxu1  ;;  %v1195_v14 = vpop.f32.mrb[6].mxu0 }
 0x106   : > { %v1234_v15 = vadd.f32 %v1233_v13, %v1232_v10  ;;  %v1235_v16 = vpop.f32.mrb[6].mxu1  ;;  %v1196_v17 = vpop.f32.mrb[7].mxu0 }
 0x107   : > { %v743_v18 = vadd.f32 %v1194_v12, %v1068_v58  ;;  %v1197_v19 = vadd.f32 %v1196_v17, %v1195_v14  ;;  %v1236_v20 = vpop.f32.mrb[7].mxu1 }
 0x108   : > { %v1237_v21 = vadd.f32 %v1236_v20, %v1235_v16 }
 0x109   : > { %v746_v22 = vadd.f32 %v1197_v19, %v1068_v58  ;;  %v808_v23 = vadd.f32 %v1234_v15, %v743_v18 }
 0x10b   : > { %v1198_v24 = vpop.f32.mrb[8].mxu0  ;;  %v811_v25 = vadd.f32 %v1237_v21, %v746_v22 }
 0x10c   : > { %v1238_v26 = vpop.f32.mrb[8].mxu1  ;;  %v1199_v27 = vpop.f32.mrb[9].mxu0 }
 0x10d   : > { %v1200_v28 = vadd.f32 %v1199_v27, %v1198_v24  ;;  %v1239_v29 = vpop.f32.mrb[9].mxu1  ;;  %v1201_v30 = vpop.f32.mrb[10].mxu0 }
 0x10e   : > { %v1240_v31 = vadd.f32 %v1239_v29, %v1238_v26  ;;  %v1241_v32 = vpop.f32.mrb[10].mxu1  ;;  %v1202_v33 = vpop.f32.mrb[11].mxu0 }
 0x10f   : > { %v751_v34 = vadd.f32 %v1200_v28, %v1068_v58  ;;  %v1203_v35 = vadd.f32 %v1202_v33, %v1201_v30  ;;  %v1242_v36 = vpop.f32.mrb[11].mxu1 }
 0x110   : > { %v1243_v37 = vadd.f32 %v1242_v36, %v1241_v32 }
 0x111   : > { %v754_v38 = vadd.f32 %v1203_v35, %v1068_v58  ;;  %v816_v39 = vadd.f32 %v1240_v31, %v751_v34 }
 0x113   : > { %v1204_v40 = vpop.f32.mrb[12].mxu0  ;;  %v819_v41 = vadd.f32 %v1243_v37, %v754_v38 }
 0x114   : > { %v1244_v42 = vpop.f32.mrb[12].mxu1  ;;  %v1205_v43 = vpop.f32.mrb[13].mxu0 }
 0x115   : > { %v1206_v44 = vadd.f32 %v1205_v43, %v1204_v40  ;;  %v1245_v45 = vpop.f32.mrb[13].mxu1  ;;  %v1207_v46 = vpop.f32.mrb[14].mxu0 }
 0x116   : > { %v1246_v47 = vadd.f32 %v1245_v45, %v1244_v42  ;;  %v1247_v48 = vpop.f32.mrb[14].mxu1  ;;  %v1208_v49 = vpop.f32.mrb[15].mxu0 }
 0x117   : > { %v759_v50 = vadd.f32 %v1206_v44, %v1068_v58  ;;  %v1209_v51 = vadd.f32 %v1208_v49, %v1207_v46  ;;  %v1248_v52 = vpop.f32.mrb[15].mxu1 }
 0x118   : > { %v1249_v53 = vadd.f32 %v1248_v52, %v1247_v48 }
 0x119   : > { %v762_v54 = vadd.f32 %v1209_v51, %v1068_v58  ;;  %v824_v55 = vadd.f32 %v1246_v47, %v759_v50 }
 0x11b   : > { %v1268_v56 = vpop.f32.mrb[16].mxu0  ;;  %v827_v57 = vadd.f32 %v1249_v53, %v762_v54 }
 0x11c   : > { %v873_v59 = vadd.f32 %v1268_v56, %v808_v23  ;;  %v1272_v60 = vpop.f32.mrb[16].mxu1  ;;  %v864_v61 = vpop.f32.mrb[17].mxu0 }
 0x11d   : > { %v889_v62 = vadd.f32 %v1272_v60, %v824_v55  ;;  %v865_v63 = vadd.f32 %v864_v61, %v800_v7  ;;  %v880_v0 = vpop.f32.mrb[17].mxu1  ;;  %v1269_v1 = vpop.f32.mrb[18].mxu0 }
 0x11e   : > { %v881_v2 = vadd.f32 %v880_v0, %v816_v39  ;;  %v876_v3 = vadd.f32 %v1269_v1, %v811_v25  ;;  %v1273_v4 = vpop.f32.mrb[18].mxu1  ;;  %v867_v5 = vpop.f32.mrb[19].mxu0  ;;  %v897_v11 = vmax.f32 %v873_v59, 0.0 }
 0x11f   : > { %v892_v6 = vadd.f32 %v1273_v4, %v827_v57  ;;  %v868_v8 = vadd.f32 %v867_v5, %v803_v9  ;;  %v883_v10 = vpop.f32.mrb[19].mxu1  ;;  %v901_v13 = vmax.f32 %v889_v62, 0.0  ;;  %v895_v14 = vmax.f32 %v865_v63, 0.0 }
 0x120   : > { %v898_v58 = vmax.f32 %v876_v3, 0.0  ;;  %v884_v12 = vadd.f32 %v883_v10, %v819_v41  ;;  %v899_v16 = vmax.f32 %v881_v2, 0.0 }
 0x121   : > { %v902_v7 = vmax.f32 %v892_v6, 0.0  ;;  %v896_v15 = vmax.f32 %v868_v8, 0.0 }
 0x122   : > { %v1155_v17 = vpack.c.bf16 %v898_v58, %v897_v11  ;;  %v900_v18 = vmax.f32 %v884_v12, 0.0 }
 0x123   : > { %v1165_v19 = vpack.c.bf16 %v902_v7, %v901_v13  ;;  %v1150_v20 = vpack.c.bf16 %v896_v15, %v895_v14 }
 0x124   : > { %1167 = vst [vmem:[%s265_s29 + $0x8] sm:$0xff] %v1155_v17   ;;  %v1160_v21 = vpack.c.bf16 %v900_v18, %v899_v16 }
 0x125   : > { %1169 = vst [vmem:[%s265_s29 + $0x18] sm:$0xff] %v1165_v19   ;;  %1151 = vst [vmem:[%s265_s29] sm:$0xff] %v1150_v20  }
 0x126   : > { %1168 = vst [vmem:[%s265_s29 + $0x10] sm:$0xff] %v1160_v21  }
 0x127 PF: > { %s13_s14 = sadd.s32 1, %s1393_s14   ;;  %s1592_s12 = smov %s1389_s13 }
 0x128   : > { %p10_p5 = scmp.ge.s32.totalorder %s13_s14, 4   ;;  %s1593_s13 = smov %s1595_s15 }
 0x12a   :  { %12 = sbr.rel (!%p10_p5) target bundleno = 2 (0x2), region = 68 }

// kernel: my_resnet_forward.29
= control target key start
LH: loop header
LB: loop body
LE: loop exit
PB: predicated region body
PF: predicated region fallthrough
CT: control target
= control target key end

     0   :  { %s729_s12 = smov 0   ;;  %s731_s13 = smov 0   ;;  %s788_s0 = inlined_call_operand.vmem [shape: bf16[128,64], index: 0, kind: input, shape index: {}]   ;;  %s789_s1 = inlined_call_operand.vmem [shape: bf16[64,128], index: 1, kind: input, shape index: {}]   ;;  %s790_s2 = inlined_call_operand.vmem [shape: f32[1,128], index: 2, kind: input, shape index: {}]   ;;  %s791_s3 = inlined_call_operand.vmem [shape: bf16[128,128], index: 3, kind: output, shape index: {}]  }
   0x1   :  { %s733_s14 = smov 0  }
   0x2 LB: > { %s32_s15 = sadd.s32 1, %s703_s13  ;;  %p562_p0 = scmp.ge.s32.totalorder %s707_s14, 1  ;;  %s707_s14 = sphi %s733_s14, %s13_s14   ;;  %s703_s13 = sphi %s731_s13, %s793_s13   ;;  %s699_s12 = sphi %s729_s12, %s792_s12  }
   0x3   : > { %p34_p1 = scmp.ge.s32.totalorder %s32_s15, 2  ;;  %p188_p2 = scmp.lt.s32.totalorder %s707_s14, 3 }
   0x5   : > { %s795_s15 = smov (%p34_p1, %s32_s15), 0  ;;  %p189_p3 = pnand %p562_p0, %p188_p2 }
   0x6   : > { %v677_v0 = vld [vmem:[%s789_s1] sm:$0xff] (!%p189_p3)   ;;  %s563_s18 = sshll.u32 (!%p189_p3), %s699_s12, 3  ;;  %v678_v1 = vld [vmem:[%s789_s1 + $0x8] sm:$0xff] (!%p189_p3)   ;;  %v679_v2 = vld [vmem:[%s789_s1 + $0x10] sm:$0xff] (!%p189_p3)   ;;  %vm327_vm0 = vcmask (!%p189_p3), 523264  }
   0x7   : > { %192 = sbr.rel (%p189_p3) target bundleno = 243 (0xf3), region = 32  ;;  %p230_p4 = scmp.lt.s32.totalorder (!%p189_p3), %s563_s18, 15  ;;  %629 = vmatprep.subr.bf16.mxu0 (!%p189_p3), %v677_v0  ;;  %645 = vmatprep.subr.bf16.mxu1 (!%p189_p3), %v677_v0  ;;  %v680_v3 = vld [vmem:[%s789_s1 + $0x18] sm:$0xff] (!%p189_p3)   ;;  %v567_v9 = vld [vmem:[%s790_s2] ss:$0 sm:$0xff] (!%p189_p3) }
   0x8   : > { %630 = vmatpush3.bf16.msra.mxu0 (!%p189_p3), %v677_v0  ;;  %649 = vmatpush3.bf16.msra.mxu1 (!%p189_p3), %v677_v0 }
   0x9   : > { %631 = vmatprep.subr.bf16.mxu0 (!%p189_p3), %v678_v1  ;;  %646 = vmatprep.subr.bf16.mxu1 (!%p189_p3), %v678_v1 }
   0xc   : > { %632 = vmatpush3.bf16.msra.mxu0 (!%p189_p3), %v678_v1  ;;  %650 = vmatpush3.bf16.msra.mxu1 (!%p189_p3), %v678_v1 }
   0xd   : > { %633 = vmatprep.subr.bf16.mxu0 (!%p189_p3), %v679_v2  ;;  %647 = vmatprep.subr.bf16.mxu1 (!%p189_p3), %v679_v2 }
   0xe   : > { %s797_s18 = smov (!%p230_p4, %s563_s18), 15 }
   0xf   : > { %s564_s23 = sshll.u32 %s797_s18, 2 }
  0x10   : > { %s236_s28 = scalar_lea.vmem %s788_s0, %s564_s23  ;;  %634 = vmatpush3.bf16.msra.mxu0 %v679_v2  ;;  %651 = vmatpush3.bf16.msra.mxu1 %v679_v2  ;;  %s257_s6 = scalar_lea.vmem %s791_s3, %s564_s23 }
  0x11   : > { %v681_v4 = vld [vmem:[%s236_s28] sm:$0xff]   ;;  %v682_v5 = vld [vmem:[%s236_s28 + $0x10] sm:$0xff]   ;;  %635 = vmatprep.subr.bf16.mxu0 %v680_v3  ;;  %648 = vmatprep.subr.bf16.mxu1 %v680_v3  ;;  %v683_v6 = vld [vmem:[%s236_s28 + $0x8] sm:$0xff]  }
  0x12   : > { %637 = vmatprep.mubr.msk.bf16.mxu0 %vm327_vm0, %v681_v4  ;;  %641 = vmatprep.mubr.msk.bf16.mxu1 %vm327_vm0, %v682_v5  ;;  %v684_v7 = vld [vmem:[%s236_s28 + $0x18] sm:$0xff]  }
  0x14   : > { %636 = vmatpush3.bf16.msra.mxu0 %v680_v3  ;;  %652 = vmatpush3.bf16.msra.mxu1 %v680_v3 }
  0x17   : > { %638 = vmatmul.mubr.msk.bf16.vlgmr.msra.gmra.mrb[0].mxu0 %vm327_vm0, %v683_v6  ;;  %642 = vmatmul.mubr.msk.bf16.vlgmr.msra.gmra.mrb[0].mxu1 %vm327_vm0, %v684_v7 }
  0xea   : > { %v639_v8 = vpop.f32.mrb[0].mxu0  ;;  %v643_v10 = vpop.f32.mrb[0].mxu1 }
  0xeb   : > { %v374_v11 = vpop.f32.mrb[1].mxu0  ;;  %v390_v12 = vpop.f32.mrb[1].mxu1  ;;  %v383_v15 = vadd.f32 %v639_v8, %v567_v9  ;;  %v399_v16 = vadd.f32 %v643_v10, %v567_v9 }
  0xec   : > { %v640_v13 = vpop.f32.mrb[2].mxu0  ;;  %v644_v14 = vpop.f32.mrb[2].mxu1  ;;  %v375_v21 = vadd.f32 %v567_v9, %v374_v11  ;;  %v391_v22 = vadd.f32 %v567_v9, %v390_v12 }
  0xed   : > { %v386_v17 = vadd.f32 %v640_v13, %v567_v9  ;;  %v402_v18 = vadd.f32 %v644_v14, %v567_v9  ;;  %v377_v19 = vpop.f32.mrb[3].mxu0  ;;  %v393_v20 = vpop.f32.mrb[3].mxu1 }
  0xee   : > { %v378_v23 = vadd.f32 %v567_v9, %v377_v19  ;;  %v394_v24 = vadd.f32 %v567_v9, %v393_v20 }
  0xef   : > { %v606_v25 = vpack.c.bf16 %v386_v17, %v383_v15  ;;  %v616_v26 = vpack.c.bf16 %v402_v18, %v399_v16 }
  0xf0   : > { %v601_v27 = vpack.c.bf16 %v378_v23, %v375_v21  ;;  %v611_v28 = vpack.c.bf16 %v394_v24, %v391_v22 }
  0xf1   : > { %618 = vst [vmem:[%s257_s6 + $0x8] sm:$0xff] %v606_v25   ;;  %620 = vst [vmem:[%s257_s6 + $0x18] sm:$0xff] %v616_v26  }
  0xf2   : > { %602 = vst [vmem:[%s257_s6] sm:$0xff] %v601_v27   ;;  %619 = vst [vmem:[%s257_s6 + $0x10] sm:$0xff] %v611_v28  }
  0xf3 PF: > { %s13_s14 = sadd.s32 1, %s707_s14   ;;  %s792_s12 = smov %s703_s13 }
  0xf4   : > { %p10_p5 = scmp.ge.s32.totalorder %s13_s14, 4   ;;  %s793_s13 = smov %s795_s15 }
  0xf6   :  { %12 = sbr.rel (!%p10_p5) target bundleno = 2 (0x2), region = 68 }

// kernel: my_resnet_forward.30
= control target key start
LH: loop header
LB: loop body
LE: loop exit
PB: predicated region body
PF: predicated region fallthrough
CT: control target
= control target key end

     0   :  { %s1433_s15 = smov 0   ;;  %s1435_s16 = smov 0   ;;  %s1603_s0 = inlined_call_operand.vmem [shape: bf16[128,1152], index: 0, kind: input, shape index: {}]   ;;  %s1604_s1 = inlined_call_operand.vmem [shape: bf16[1152,128], index: 1, kind: input, shape index: {}]   ;;  %s1605_s2 = inlined_call_operand.vmem [shape: f32[1,128], index: 2, kind: input, shape index: {}]   ;;  %s1606_s3 = inlined_call_operand.vmem [shape: bf16[128,128], index: 3, kind: input, shape index: {}]   ;;  %s1607_s4 = inlined_call_operand.vmem [shape: bf16[128,128], index: 4, kind: output, shape index: {}]  }
   0x1   :  { %s1437_s17 = smov 0   ;;  %s1439_s18 = smov 0  }
   0x2   :  { %s1441_s19 = smov 0   ;;  %s1443_s20 = smov 0  }
   0x3   :  { %s1445_s21 = smov 0  }
   0x4 LB: > { %s26_s22 = sadd.s32 1, %s1397_s19  ;;  %s33_s23 = sadd.s32 1, %s1401_s20  ;;  %s1405_s21 = sphi %s1445_s21, %s14_s21   ;;  %s1401_s20 = sphi %s1443_s20, %s1613_s20   ;;  %s1397_s19 = sphi %s1441_s19, %s1612_s19   ;;  %s1393_s18 = sphi %s1439_s18, %s1611_s18   ;;  %s1389_s17 = sphi %s1437_s17, %s1610_s17   ;;  %s1385_s16 = sphi %s1435_s16, %s1609_s16   ;;  %s1381_s15 = sphi %s1433_s15, %s1608_s15  }
   0x5   : > { %p27_p0 = scmp.ge.s32.totalorder %s26_s22, 3  ;;  %p49_p1 = scmp.ne.s32.totalorder %s1385_s16, %s1381_s15 }
   0x6   : > { %p50_p2 = scmp.eq.s32.totalorder %s1405_s21, 0  ;;  %s42_s27 = sadd.s32 1, %s1385_s16 }
   0x7   : > { %s1615_s22 = smov (%p27_p0, %s26_s22), 0  ;;  %s1617_s23 = smov (!%p27_p0, %s33_s23), %s1401_s20 }
   0x8   : > { %p51_p3 = por %p50_p2, %p49_p1  ;;  %p35_p4 = scmp.ge.s32.totalorder %s1617_s23, 2 }
   0x9   : > { %s38_s24 = ssub.s32 %s1397_s19, %s1615_s22  ;;  %p1050_p6 = scmp.ge.s32.totalorder %s1405_s21, 6 }
   0xa   : > { %s1619_s23 = smov (%p35_p4, %s1617_s23), 0 }
   0xb   : > { %s37_s25 = ssub.s32 %s1401_s20, %s1619_s23  ;;  %191 = sbr.rel (%p1050_p6) target bundleno = 36 (0x24), region = 20 }
   0xc   : > { %s39_s26 = sor.u32 %s38_s24, %s37_s25 }
   0xd   : > { %p40_p5 = scmp.eq.s32.totalorder %s39_s26, 0 }
   0xf   : > { %s1484_s28 = scalar_select %p40_p5, %s1385_s16, %s42_s27  }
  0x12   : > { %194 = sbr.rel (!%p51_p3) target bundleno = 36 (0x24), region = 24  ;;  %s196_s29 = sand.u32 (%p51_p3), 1, %s1385_s16  }
  0x13   : > { %s200_s30 = smul.u32 (%p51_p3), 3, %s1397_s19 }
  0x14   : > { %s1251_s5 = smul.u32 (%p51_p3), 96, %s196_s29 }
  0x15   : > { %s1252_s6 = smul.u32 (%p51_p3), 72, %s1401_s20 }
  0x16   : > { %s198_s12 = scalar_lea.vmem (%p51_p3), [#allocation3], %s1251_s5 }
  0x17   : > { %s202_s7 = sadd.s32 (%p51_p3), %s1252_s6, %s200_s30 }
  0x18   : > { %s1053_s8 = sshll.u32 (%p51_p3), %s202_s7, 2 }
  0x19   : > { %s1493_s11 = scalar_lea.vmem %s1603_s0, %s1053_s8 }
  0x1a   : > { %v219_v0 = vld [vmem:[%s1493_s11] sm:$0xff]  ;;  %v223_v2 = vld [vmem:[%s1493_s11 + $0x48] sm:$0xff]  ;;  %v227_v4 = vld [vmem:[%s1493_s11 + $0x90] sm:$0xff] }
  0x1b   : > { %v221_v1 = vld [vmem:[%s1493_s11 + $0x24] sm:$0xff]  ;;  %220 = vst [vmem:[%s198_s12] sm:$0xff] %v219_v0  ;;  %224 = vst [vmem:[%s198_s12 + $0x18] sm:$0xff] %v223_v2  ;;  %v225_v3 = vld [vmem:[%s1493_s11 + $0x6c] sm:$0xff] }
  0x1c   : > { %222 = vst [vmem:[%s198_s12 + $0xc] sm:$0xff] %v221_v1  ;;  %v229_v5 = vld [vmem:[%s1493_s11 + $0xb4] sm:$0xff]  ;;  %226 = vst [vmem:[%s198_s12 + $0x24] sm:$0xff] %v225_v3  ;;  %v233_v7 = vld [vmem:[%s1493_s11 + $0xfc] sm:$0xff] }
  0x1d   : > { %228 = vst [vmem:[%s198_s12 + $0x30] sm:$0xff] %v227_v4  ;;  %230 = vst [vmem:[%s198_s12 + $0x3c] sm:$0xff] %v229_v5  ;;  %v231_v6 = vld [vmem:[%s1493_s11 + $0xd8] sm:$0xff]  ;;  %v1054_v8 = vld [vmem:[%s1493_s11 + $0x8] sm:$0xf] }
  0x1e   : > { %232 = vst [vmem:[%s198_s12 + $0x48] sm:$0xff] %v231_v6  ;;  %234 = vst [vmem:[%s198_s12 + $0x54] sm:$0xff] %v233_v7  ;;  %v1056_v9 = vld [vmem:[%s1493_s11 + $0x2c] sm:$0xf]  ;;  %v1058_v10 = vld [vmem:[%s1493_s11 + $0x50] sm:$0xf] }
  0x1f   : > { %1055 = vst [vmem:[%s198_s12 + $0x8] sm:$0xf] %v1054_v8  ;;  %v1060_v11 = vld [vmem:[%s1493_s11 + $0x74] sm:$0xf]  ;;  %1057 = vst [vmem:[%s198_s12 + $0x14] sm:$0xf] %v1056_v9 }
  0x20   : > { %1059 = vst [vmem:[%s198_s12 + $0x20] sm:$0xf] %v1058_v10  ;;  %1061 = vst [vmem:[%s198_s12 + $0x2c] sm:$0xf] %v1060_v11  ;;  %v1062_v12 = vld [vmem:[%s1493_s11 + $0x98] sm:$0xf] }
  0x21   : > { %v1064_v13 = vld [vmem:[%s1493_s11 + $0xbc] sm:$0xf]  ;;  %v1066_v14 = vld [vmem:[%s1493_s11 + $0xe0] sm:$0xf]  ;;  %1063 = vst [vmem:[%s198_s12 + $0x38] sm:$0xf] %v1062_v12 }
  0x22   : > { %1065 = vst [vmem:[%s198_s12 + $0x44] sm:$0xf] %v1064_v13  ;;  %1067 = vst [vmem:[%s198_s12 + $0x50] sm:$0xf] %v1066_v14  ;;  %v1068_v15 = vld [vmem:[%s1493_s11 + $0x104] sm:$0xf] }
  0x23   : > { %1069 = vst [vmem:[%s198_s12 + $0x5c] sm:$0xf] %v1068_v15 }
  0x24 PF: > { %p1070_p7 = scmp.ge.s32.totalorder %s1405_s21, 1  ;;  %p286_p8 = scmp.lt.s32.totalorder %s1405_s21, 7 }
  0x26   : > { %p287_p9 = pnand %p1070_p7, %p286_p8 }
  0x27   : > { %s293_s13 = sand.u32 (!%p287_p9), 1, %s1381_s15   ;;  %s342_s14 = smul.u32 (!%p287_p9), 48, %s1389_s17 }
  0x28   : > { %290 = sbr.rel (%p287_p9) target bundleno = 352 (0x160), region = 58  ;;  %s1072_s25 = sshll.u32 (!%p287_p9), %s1393_s18, 3 }
  0x29   : > { %s1253_s24 = smul.u32 (!%p287_p9), 96, %s293_s13  ;;  %p343_p10 = scmp.lt.s32.totalorder (!%p287_p9), %s342_s14, 143 }
  0x2a   : > { %p355_p11 = scmp.lt.s32.totalorder (!%p287_p9), %s1072_s25, 15  ;;  %p1076_p12 = scmp.ne.s32.totalorder (!%p287_p9), %s1389_s17, 0 }
  0x2b   : > { %s1531_s10 = scalar_lea.vmem (!%p287_p9), [#allocation3], %s1253_s24 }
  0x2f   : > { %s1621_s14 = smov (!%p343_p10, %s342_s14), 143  ;;  %s1623_s25 = smov (!%p355_p11, %s1072_s25), 15 }
  0x30   : > { %s1071_s26 = sshll.u32 %s1621_s14, 2  ;;  %s1073_s5 = sshll.u32 %s1623_s25, 2  ;;  %v1407_v16 = vmov (!%p1076_p12), 0.0  }
  0x31   : > { %s1519_s30 = scalar_lea.vmem %s1604_s1, %s1071_s26  ;;  %s1524_s8 = scalar_lea.vmem %s1606_s3, %s1073_s5  ;;  %377 = vst [vmem:[#allocation2] sm:$0xff] (!%p1076_p12), %v1407_v16  ;;  %378 = vst [vmem:[#allocation2 + $0x8] sm:$0xff] (!%p1076_p12), %v1407_v16 }
  0x32   : > { %s1529_s18 = scalar_lea.vmem %s1607_s4, %s1073_s5  ;;  %376 = sbr.rel (%p1076_p12) target bundleno = 57 (0x39), region = 66  ;;  %379 = vst [vmem:[#allocation2 + $0x10] sm:$0xff] (!%p1076_p12), %v1407_v16  ;;  %380 = vst [vmem:[#allocation2 + $0x18] sm:$0xff] (!%p1076_p12), %v1407_v16 }
  0x33   : > { %381 = vst [vmem:[#allocation2 + $0x20] sm:$0xff] (!%p1076_p12), %v1407_v16  ;;  %382 = vst [vmem:[#allocation2 + $0x28] sm:$0xff] (!%p1076_p12), %v1407_v16 }
  0x34   : > { %383 = vst [vmem:[#allocation2 + $0x30] sm:$0xff] (!%p1076_p12), %v1407_v16  ;;  %384 = vst [vmem:[#allocation2 + $0x38] sm:$0xff] (!%p1076_p12), %v1407_v16 }
  0x39 PF: > { %v1311_v17 = vld [vmem:[%s1519_s30 + $0x40] sm:$0xff]   ;;  %v1314_v20 = vld [vmem:[%s1519_s30 + $0x48] sm:$0xff]   ;;  %v1317_v23 = vld [vmem:[%s1519_s30 + $0x50] sm:$0xff]   ;;  %p1113_p13 = scmp.ne.s32.totalorder %s1389_s17, 2 }
  0x3a   : > { %v1312_v18 = vld [vmem:[%s1519_s30] sm:$0xff]   ;;  %1175 = vmatprep.subr.bf16.mxu0 %v1311_v17  ;;  %v1315_v21 = vld [vmem:[%s1519_s30 + $0x8] sm:$0xff]   ;;  %v1318_v24 = vld [vmem:[%s1519_s30 + $0x10] sm:$0xff]  }
  0x3b   : > { %v1313_v19 = vld [vmem:[%s1519_s30 + $0x80] sm:$0xff]   ;;  %1176 = vmatpush3.bf16.msra.mxu0 %v1312_v18  ;;  %v1316_v22 = vld [vmem:[%s1519_s30 + $0x88] sm:$0xff]   ;;  %v1319_v25 = vld [vmem:[%s1519_s30 + $0x90] sm:$0xff]  }
  0x3c   : > { %1227 = vmatprep.subr.bf16.mxu1 %v1313_v19  ;;  %1177 = vmatprep.subr.bf16.mxu0 %v1314_v20  ;;  %v1320_v26 = vld [vmem:[%s1519_s30 + $0x58] sm:$0xff]   ;;  %v1323_v29 = vld [vmem:[%s1519_s30 + $0x60] sm:$0xff]   ;;  %v1326_v32 = vld [vmem:[%s1519_s30 + $0x68] sm:$0xff]  }
  0x3d   : > { %1228 = vmatpush3.bf16.msra.mxu1 %v1313_v19  ;;  %v1321_v27 = vld [vmem:[%s1519_s30 + $0x18] sm:$0xff]   ;;  %v1325_v30 = vld [vmem:[%s1519_s30 + $0xa0] sm:$0xff]   ;;  %v1328_v33 = vld [vmem:[%s1519_s30 + $0xa8] sm:$0xff]  }
  0x3e   : > { %1229 = vmatprep.subr.bf16.mxu1 %v1316_v22  ;;  %v1322_v28 = vld [vmem:[%s1519_s30 + $0x98] sm:$0xff]   ;;  %v1324_v31 = vld [vmem:[%s1519_s30 + $0x20] sm:$0xff]   ;;  %v1327_v34 = vld [vmem:[%s1519_s30 + $0x28] sm:$0xff]  }
  0x3f   : > { %1178 = vmatpush3.bf16.msra.mxu0 %v1315_v21  ;;  %v1329_v35 = vld [vmem:[%s1519_s30 + $0x70] sm:$0xff]   ;;  %v1332_v38 = vld [vmem:[%s1519_s30 + $0x78] sm:$0xff]   ;;  %v1335_v43 = vld [vmem:[%s1531_s10] ss:$12 sps:$4 sm:$0xff]  }
  0x40   : > { %1179 = vmatprep.subr.bf16.mxu0 %v1317_v23  ;;  %v1330_v36 = vld [vmem:[%s1519_s30 + $0x30] sm:$0xff]   ;;  %v1334_v39 = vld [vmem:[%s1519_s30 + $0xb8] sm:$0xff]   ;;  %v1339_v45 = vld [vmem:[%s1531_s10 + $0x20] ss:$12 sps:$4 sm:$0xff]  }
  0x41   : > { %1230 = vmatpush3.bf16.msra.mxu1 %v1316_v22  ;;  %v1331_v37 = vld [vmem:[%s1519_s30 + $0xb0] sm:$0xff]   ;;  %v1333_v42 = vld [vmem:[%s1519_s30 + $0x38] sm:$0xff]   ;;  %v385_v59 = vld [vmem:[#allocation2] sm:$0xff] }
  0x42   : > { %1231 = vmatprep.subr.bf16.mxu1 %v1319_v25  ;;  %v1337_v40 = vld [vmem:[%s1531_s10 + $0x4] ss:$12 sps:$4 sm:$0xff]   ;;  %v1338_v41 = vld [vmem:[%s1531_s10 + $0x8] ss:$12 sps:$4 sm:$0xff]   ;;  %v1348_v51 = vld [vmem:[%s1531_s10 + $0x4c] ss:$12 sps:$4 sm:$0xff]  }
  0x43   : > { %1180 = vmatpush3.bf16.msra.mxu0 %v1318_v24  ;;  %697 = vmatprep.mubr.bf16.mxu0 %v1337_v40  ;;  %v1340_v44 = vld [vmem:[%s1531_s10 + $0x1c] ss:$12 sps:$4 sm:$0xff]   ;;  %v1346_v46 = vld [vmem:[%s1531_s10 + $0x38] ss:$12 sps:$4 sm:$0xff]   ;;  %v1343_v48 = vld [vmem:[%s1531_s10 + $0x34] ss:$12 sps:$4 sm:$0xff]  }
  0x44   : > { %1181 = vmatprep.subr.bf16.mxu0 %v1320_v26  ;;  %1243 = vmatprep.mubr.bf16.mxu1 %v1338_v41  ;;  %v1342_v47 = vld [vmem:[%s1531_s10 + $0x18] ss:$12 sps:$4 sm:$0xff]   ;;  %v1347_v49 = vld [vmem:[%s1531_s10 + $0x50] ss:$12 sps:$4 sm:$0xff]   ;;  %v1350_v52 = vld [vmem:[%s1531_s10 + $0x48] ss:$12 sps:$4 sm:$0xff]  }
  0x45   : > { %1232 = vmatpush3.bf16.msra.mxu1 %v1319_v25  ;;  %v1345_v50 = vld [vmem:[%s1531_s10 + $0x30] ss:$12 sps:$4 sm:$0xff]   ;;  %v386_v0 = vld [vmem:[#allocation2 + $0x8] sm:$0xff]  ;;  %v389_v26 = vld [vmem:[#allocation2 + $0x20] sm:$0xff] }
  0x46   : > { %1233 = vmatprep.subr.bf16.mxu1 %v1322_v28  ;;  %v387_v10 = vld [vmem:[#allocation2 + $0x10] sm:$0xff]  ;;  %v388_v16 = vld [vmem:[#allocation2 + $0x18] sm:$0xff] }
  0x47   : > { %1182 = vmatpush3.bf16.msra.mxu0 %v1321_v27  ;;  %v392_v41 = vld [vmem:[#allocation2 + $0x38] sm:$0xff] }
  0x48   : > { %1183 = vmatprep.subr.bf16.mxu0 %v1323_v29  ;;  %v390_v29 = vld [vmem:[#allocation2 + $0x28] sm:$0xff] }
  0x49   : > { %1234 = vmatpush3.bf16.msra.mxu1 %v1322_v28 }
  0x4a   : > { %1235 = vmatprep.subr.bf16.mxu1 %v1325_v30 }
  0x4b   : > { %1184 = vmatpush3.bf16.msra.mxu0 %v1324_v31 }
  0x4c   : > { %1185 = vmatprep.subr.bf16.mxu0 %v1326_v32 }
  0x4d   : > { %1236 = vmatpush3.bf16.msra.mxu1 %v1325_v30 }
  0x4e   : > { %1237 = vmatprep.subr.bf16.mxu1 %v1328_v33 }
  0x4f   : > { %1186 = vmatpush3.bf16.msra.mxu0 %v1327_v34 }
  0x50   : > { %1187 = vmatprep.subr.bf16.mxu0 %v1329_v35 }
  0x51   : > { %1238 = vmatpush3.bf16.msra.mxu1 %v1328_v33 }
  0x52   : > { %1239 = vmatprep.subr.bf16.mxu1 %v1331_v37 }
  0x53   : > { %1188 = vmatpush3.bf16.msra.mxu0 %v1330_v36 }
  0x54   : > { %1189 = vmatprep.subr.bf16.mxu0 %v1332_v38 }
  0x55   : > { %1240 = vmatpush3.bf16.msra.mxu1 %v1331_v37  ;;  %v391_v37 = vld [vmem:[#allocation2 + $0x30] sm:$0xff] }
  0x56   : > { %1241 = vmatprep.subr.bf16.mxu1 %v1334_v39 }
  0x57   : > { %1190 = vmatpush3.bf16.msra.mxu0 %v1333_v42 }
  0x59   : > { %1242 = vmatpush3.bf16.msra.mxu1 %v1334_v39 }
  0x5a   : > { %698 = vmatmul.mubr.bf16.vlgmr.msra.gmra.mrb[0].mxu0 %v1335_v43 }
  0x5b   : > { %705 = vmatprep.mubr.bf16.mxu0 %v1340_v44 }
  0x5c   : > { %1244 = vmatmul.mubr.bf16.vlgmr.msra.gmra.mrb[0].mxu1 %v1339_v45 }
  0x5d   : > { %1247 = vmatprep.mubr.bf16.mxu1 %v1346_v46 }
  0x62   : > { %706 = vmatmul.mubr.bf16.gmra.mrb[4].mxu0 %v1342_v47  ;;  %v1114_v47 = vld [vmem:[%s1605_s2] ss:$0 sm:$0xff] (!%p1113_p13) }
  0x63   : > { %713 = vmatprep.mubr.bf16.mxu0 %v1343_v48 }
  0x64   : > { %1248 = vmatmul.mubr.bf16.gmra.mrb[4].mxu1 %v1347_v49 }
  0x6a   : > { %714 = vmatmul.mubr.bf16.gmra.mrb[8].mxu0 %v1345_v50  ;;  %v1134_v50 = vld [vmem:[%s1524_s8] sm:$0xff] (!%p1113_p13)  }
  0x6b   : > { %721 = vmatprep.mubr.bf16.mxu0 %v1348_v51 }
  0x72   : > { %722 = vmatmul.mubr.bf16.gmra.mrb[12].mxu0 %v1350_v52 }
 0x12d   : > { %v1191_v53 = vpop.f32.mrb[0].mxu0 }
 0x12e   : > { %v1192_v54 = vpop.f32.mrb[1].mxu0 }
 0x12f   : > { %v1193_v55 = vadd.f32 %v1192_v54, %v1191_v53  ;;  %v1194_v56 = vpop.f32.mrb[2].mxu0  ;;  %v1245_v57 = vpop.f32.mrb[0].mxu1  ;;  %v1135_v53 = vunpack.c.l.bf16 (!%p1113_p13), %v1134_v50  ;;  %v1136_v54 = vunpack.c.h.bf16 (!%p1113_p13), %v1134_v50 }
 0x130   : > { %v1195_v58 = vpop.f32.mrb[3].mxu0  ;;  %v764_v60 = vpop.f32.mrb[1].mxu1 }
 0x131   : > { %v1196_v61 = vadd.f32 %v1195_v58, %v1194_v56  ;;  %v765_v62 = vadd.f32 %v1193_v55, %v764_v60  ;;  %v1246_v63 = vpop.f32.mrb[2].mxu1 }
 0x132   : > { %v767_v1 = vpop.f32.mrb[3].mxu1 }
 0x133   : > { %v795_v2 = vadd.f32 %v765_v62, %v385_v59  ;;  %v768_v3 = vadd.f32 %v1196_v61, %v767_v1 }
 0x135   : > { %803 = vst [vmem:[#allocation2] sm:$0xff] %v795_v2  ;;  %v796_v4 = vadd.f32 %v768_v3, %v386_v0  ;;  %v1197_v5 = vpop.f32.mrb[4].mxu0  ;;  %v1170_v0 = vld [vmem:[%s1524_s8 + $0x10] sm:$0xff] (!%p1113_p13)  }
 0x136   : > { %v1198_v6 = vpop.f32.mrb[5].mxu0 }
 0x137   : > { %804 = vst [vmem:[#allocation2 + $0x8] sm:$0xff] %v796_v4  ;;  %v1199_v7 = vadd.f32 %v1198_v6, %v1197_v5  ;;  %v1200_v8 = vpop.f32.mrb[6].mxu0  ;;  %v1249_v9 = vpop.f32.mrb[4].mxu1  ;;  %v1143_v5 = vunpack.c.l.bf16 (!%p1113_p13), %v1170_v0  ;;  %v1144_v6 = vunpack.c.h.bf16 (!%p1113_p13), %v1170_v0 }
 0x138   : > { %v1201_v11 = vpop.f32.mrb[7].mxu0  ;;  %v780_v12 = vpop.f32.mrb[5].mxu1 }
 0x139   : > { %v773_v13 = vadd.f32 %v1245_v57, %v1199_v7  ;;  %v1202_v14 = vadd.f32 %v1201_v11, %v1200_v8  ;;  %v1250_v15 = vpop.f32.mrb[6].mxu1  ;;  %v1169_v57 = vld [vmem:[%s1524_s8 + $0x8] sm:$0xff] (!%p1113_p13)   ;;  %v1171_v7 = vld [vmem:[%s1524_s8 + $0x18] sm:$0xff] (!%p1113_p13)  }
 0x13a   : > { %v783_v17 = vpop.f32.mrb[7].mxu1  ;;  %v1139_v60 = vunpack.c.l.bf16 (!%p1113_p13), %v1169_v57  ;;  %v1140_v61 = vunpack.c.h.bf16 (!%p1113_p13), %v1169_v57 }
 0x13b   : > { %v797_v18 = vadd.f32 %v773_v13, %v387_v10  ;;  %v776_v19 = vadd.f32 %v1246_v63, %v1202_v14 }
 0x13c   : > { %v815_v45 = vld [vmem:[#allocation2] sm:$0xff] (!%p1113_p13) }
 0x13d   : > { %805 = vst [vmem:[#allocation2 + $0x10] sm:$0xff] %v797_v18  ;;  %v798_v20 = vadd.f32 %v776_v19, %v388_v16  ;;  %v1203_v21 = vpop.f32.mrb[8].mxu0  ;;  %v830_v48 = vadd.f32 (!%p1113_p13), %v1114_v47, %v815_v45  ;;  %v1147_v18 = vunpack.c.l.bf16 (!%p1113_p13), %v1171_v7  ;;  %v1148_v19 = vunpack.c.h.bf16 (!%p1113_p13), %v1171_v7 }
 0x13e   : > { %v1204_v22 = vpop.f32.mrb[9].mxu0  ;;  %v816_v46 = vld [vmem:[#allocation2 + $0x8] sm:$0xff] (!%p1113_p13) }
 0x13f   : > { %806 = vst [vmem:[#allocation2 + $0x18] sm:$0xff] %v798_v20  ;;  %v1205_v23 = vadd.f32 %v1204_v22, %v1203_v21  ;;  %v1206_v24 = vpop.f32.mrb[10].mxu0  ;;  %v831_v49 = vadd.f32 (!%p1113_p13), %v1114_v47, %v816_v46  ;;  %v854_v3 = vadd.f32 (!%p1113_p13), %v1135_v53, %v830_v48 }
 0x140   : > { %v1207_v25 = vpop.f32.mrb[11].mxu0 }
 0x141   : > { %v1208_v27 = vadd.f32 %v1207_v25, %v1206_v24  ;;  %v781_v28 = vadd.f32 %v1205_v23, %v780_v12  ;;  %v855_v4 = vadd.f32 (!%p1113_p13), %v1136_v54, %v831_v49  ;;  %v862_v12 = vmax.f32 (!%p1113_p13), %v854_v3, 0.0 }
 0x143   : > { %v799_v30 = vadd.f32 %v781_v28, %v389_v26  ;;  %v784_v31 = vadd.f32 %v1208_v27, %v783_v17  ;;  %v863_v13 = vmax.f32 (!%p1113_p13), %v855_v4, 0.0 }
 0x144   : > { %v817_v51 = vld [vmem:[#allocation2 + $0x10] sm:$0xff] (!%p1113_p13) }
 0x145   : > { %807 = vst [vmem:[#allocation2 + $0x20] sm:$0xff] %v799_v30  ;;  %v800_v32 = vadd.f32 %v784_v31, %v390_v29  ;;  %v1209_v33 = vpop.f32.mrb[12].mxu0  ;;  %v832_v55 = vadd.f32 (!%p1113_p13), %v1114_v47, %v817_v51  ;;  %v1152_v20 = vpack.c.bf16 (!%p1113_p13), %v863_v13, %v862_v12 }
 0x146   : > { %v1210_v34 = vpop.f32.mrb[13].mxu0  ;;  %v818_v52 = vld [vmem:[#allocation2 + $0x18] sm:$0xff] (!%p1113_p13) }
 0x147   : > { %808 = vst [vmem:[#allocation2 + $0x28] sm:$0xff] %v800_v32  ;;  %v1211_v35 = vadd.f32 %v1210_v34, %v1209_v33  ;;  %v1212_v36 = vpop.f32.mrb[14].mxu0  ;;  %v833_v56 = vadd.f32 (!%p1113_p13), %v1114_v47, %v818_v52  ;;  %v856_v8 = vadd.f32 (!%p1113_p13), %v1139_v60, %v832_v55  ;;  %1153 = vst [vmem:[%s1529_s18] sm:$0xff] (!%p1113_p13), %v1152_v20  }
 0x148   : > { %v1213_v38 = vpop.f32.mrb[15].mxu0 }
 0x149   : > { %v789_v39 = vadd.f32 %v1249_v9, %v1211_v35  ;;  %v1214_v40 = vadd.f32 %v1213_v38, %v1212_v36  ;;  %814 = sbr.rel (%p1113_p13) target bundleno = 352 (0x160), region = 70  ;;  %v857_v9 = vadd.f32 (!%p1113_p13), %v1140_v61, %v833_v56  ;;  %v864_v16 = vmax.f32 (!%p1113_p13), %v856_v8, 0.0 }
 0x14b   : > { %v801_v42 = vadd.f32 %v789_v39, %v391_v37  ;;  %v792_v43 = vadd.f32 %v1250_v15, %v1214_v40  ;;  %v865_v17 = vmax.f32 (!%p1113_p13), %v857_v9, 0.0 }
 0x14c   : > { %v819_v58 = vld [vmem:[#allocation2 + $0x20] sm:$0xff] (!%p1113_p13) }
 0x14d   : > { %809 = vst [vmem:[#allocation2 + $0x30] sm:$0xff] %v801_v42  ;;  %v802_v44 = vadd.f32 %v792_v43, %v392_v41  ;;  %v834_v62 = vadd.f32 (!%p1113_p13), %v1114_v47, %v819_v58  ;;  %v1157_v23 = vpack.c.bf16 (!%p1113_p13), %v865_v17, %v864_v16 }
 0x14e   : > { %v820_v59 = vld [vmem:[#allocation2 + $0x28] sm:$0xff] (!%p1113_p13) }
 0x14f   : > { %810 = vst [vmem:[#allocation2 + $0x38] sm:$0xff] %v802_v44  ;;  %v835_v63 = vadd.f32 (!%p1113_p13), %v1114_v47, %v820_v59  ;;  %v858_v14 = vadd.f32 (!%p1113_p13), %v1143_v5, %v834_v62  ;;  %1172 = vst [vmem:[%s1529_s18 + $0x8] sm:$0xff] (!%p1113_p13), %v1157_v23  }
 0x151   : > { %v859_v15 = vadd.f32 %v1144_v6, %v835_v63  ;;  %v866_v21 = vmax.f32 %v858_v14, 0.0 }
 0x153   : > { %v867_v22 = vmax.f32 %v859_v15, 0.0 }
 0x154   : > { %v821_v1 = vld [vmem:[#allocation2 + $0x30] sm:$0xff] }
 0x155   : > { %v836_v10 = vadd.f32 %v1114_v47, %v821_v1  ;;  %v1162_v26 = vpack.c.bf16 %v867_v22, %v866_v21 }
 0x156   : > { %v822_v2 = vld [vmem:[#allocation2 + $0x38] sm:$0xff] }
 0x157   : > { %v837_v11 = vadd.f32 %v1114_v47, %v822_v2  ;;  %v860_v24 = vadd.f32 %v1147_v18, %v836_v10  ;;  %1173 = vst [vmem:[%s1529_s18 + $0x10] sm:$0xff] %v1162_v26  }
 0x159   : > { %v861_v25 = vadd.f32 %v1148_v19, %v837_v11  ;;  %v868_v27 = vmax.f32 %v860_v24, 0.0 }
 0x15b   : > { %v869_v28 = vmax.f32 %v861_v25, 0.0 }
 0x15d   : > { %v1167_v29 = vpack.c.bf16 %v869_v28, %v868_v27 }
 0x15f   : > { %1174 = vst [vmem:[%s1529_s18 + $0x18] sm:$0xff] %v1167_v29  }
 0x160 PF: > { %s14_s21 = sadd.s32 1, %s1405_s21   ;;  %s1608_s15 = smov %s1385_s16 }
 0x161   : > { %p11_p0 = scmp.ge.s32.totalorder %s14_s21, 8   ;;  %s1609_s16 = smov %s1484_s28 }
 0x162   : > { %s1610_s17 = smov %s1397_s19  ;;  %s1611_s18 = smov %s1401_s20 }
 0x163   : > { %s1612_s19 = smov %s1615_s22  ;;  %s1613_s20 = smov %s1619_s23 }
 0x164   :  { %13 = sbr.rel (!%p11_p0) target bundleno = 4 (0x4), region = 120 }

// kernel: my_resnet_forward.31
= control target key start
LH: loop header
LB: loop body
LE: loop exit
PB: predicated region body
PF: predicated region fallthrough
CT: control target
= control target key end

     0   :  { %s1308_s12 = smov 0   ;;  %s1310_s13 = smov 0   ;;  %s1469_s0 = inlined_call_operand.vmem [shape: bf16[128,1152], index: 0, kind: input, shape index: {}]   ;;  %s1470_s1 = inlined_call_operand.vmem [shape: bf16[1152,128], index: 1, kind: input, shape index: {}]   ;;  %s1471_s2 = inlined_call_operand.vmem [shape: f32[1,128], index: 2, kind: input, shape index: {}]   ;;  %s1472_s3 = inlined_call_operand.vmem [shape: bf16[128,128], index: 3, kind: output, shape index: {}]  }
   0x1   :  { %s1312_s14 = smov 0   ;;  %s1314_s15 = smov 0  }
   0x2   :  { %s1316_s16 = smov 0   ;;  %s1318_s17 = smov 0  }
   0x3   :  { %s1320_s18 = smov 0  }
   0x4 LB: > { %s25_s19 = sadd.s32 1, %s1277_s16  ;;  %s32_s20 = sadd.s32 1, %s1281_s17  ;;  %s1285_s18 = sphi %s1320_s18, %s13_s18   ;;  %s1281_s17 = sphi %s1318_s17, %s1478_s17   ;;  %s1277_s16 = sphi %s1316_s16, %s1477_s16   ;;  %s1273_s15 = sphi %s1314_s15, %s1476_s15   ;;  %s1269_s14 = sphi %s1312_s14, %s1475_s14   ;;  %s1265_s13 = sphi %s1310_s13, %s1474_s13   ;;  %s1261_s12 = sphi %s1308_s12, %s1473_s12  }
   0x5   : > { %p26_p0 = scmp.ge.s32.totalorder %s25_s19, 3  ;;  %p48_p1 = scmp.ne.s32.totalorder %s1265_s13, %s1261_s12 }
   0x6   : > { %p49_p2 = scmp.eq.s32.totalorder %s1285_s18, 0  ;;  %s41_s24 = sadd.s32 1, %s1265_s13 }
   0x7   : > { %s1480_s19 = smov (%p26_p0, %s25_s19), 0  ;;  %s1482_s20 = smov (!%p26_p0, %s32_s20), %s1281_s17 }
   0x8   : > { %p50_p3 = por %p49_p2, %p48_p1  ;;  %p34_p4 = scmp.ge.s32.totalorder %s1482_s20, 2 }
   0x9   : > { %s37_s21 = ssub.s32 %s1277_s16, %s1480_s19  ;;  %p951_p6 = scmp.ge.s32.totalorder %s1285_s18, 6 }
   0xa   : > { %s1484_s20 = smov (%p34_p4, %s1482_s20), 0 }
   0xb   : > { %s36_s22 = ssub.s32 %s1281_s17, %s1484_s20  ;;  %162 = sbr.rel (%p951_p6) target bundleno = 36 (0x24), region = 20 }
   0xc   : > { %s38_s23 = sor.u32 %s37_s21, %s36_s22 }
   0xd   : > { %p39_p5 = scmp.eq.s32.totalorder %s38_s23, 0 }
   0xf   : > { %s1359_s25 = scalar_select %p39_p5, %s1265_s13, %s41_s24  }
  0x12   : > { %165 = sbr.rel (!%p50_p3) target bundleno = 36 (0x24), region = 24  ;;  %s167_s26 = sand.u32 (%p50_p3), 1, %s1265_s13  }
  0x13   : > { %s171_s27 = smul.u32 (%p50_p3), 3, %s1277_s16 }
  0x14   : > { %s1131_s28 = smul.u32 (%p50_p3), 96, %s167_s26 }
  0x15   : > { %s1132_s29 = smul.u32 (%p50_p3), 72, %s1281_s17 }
  0x16   : > { %s169_s8 = scalar_lea.vmem (%p50_p3), [#allocation3], %s1131_s28 }
  0x17   : > { %s173_s30 = sadd.s32 (%p50_p3), %s1132_s29, %s171_s27 }
  0x18   : > { %s954_s4 = sshll.u32 (%p50_p3), %s173_s30, 2 }
  0x19   : > { %s1368_s7 = scalar_lea.vmem %s1469_s0, %s954_s4 }
  0x1a   : > { %v190_v0 = vld [vmem:[%s1368_s7] sm:$0xff]  ;;  %v194_v2 = vld [vmem:[%s1368_s7 + $0x48] sm:$0xff]  ;;  %v198_v4 = vld [vmem:[%s1368_s7 + $0x90] sm:$0xff] }
  0x1b   : > { %v192_v1 = vld [vmem:[%s1368_s7 + $0x24] sm:$0xff]  ;;  %191 = vst [vmem:[%s169_s8] sm:$0xff] %v190_v0  ;;  %195 = vst [vmem:[%s169_s8 + $0x18] sm:$0xff] %v194_v2  ;;  %v196_v3 = vld [vmem:[%s1368_s7 + $0x6c] sm:$0xff] }
  0x1c   : > { %193 = vst [vmem:[%s169_s8 + $0xc] sm:$0xff] %v192_v1  ;;  %v200_v5 = vld [vmem:[%s1368_s7 + $0xb4] sm:$0xff]  ;;  %197 = vst [vmem:[%s169_s8 + $0x24] sm:$0xff] %v196_v3  ;;  %v204_v7 = vld [vmem:[%s1368_s7 + $0xfc] sm:$0xff] }
  0x1d   : > { %199 = vst [vmem:[%s169_s8 + $0x30] sm:$0xff] %v198_v4  ;;  %201 = vst [vmem:[%s169_s8 + $0x3c] sm:$0xff] %v200_v5  ;;  %v202_v6 = vld [vmem:[%s1368_s7 + $0xd8] sm:$0xff]  ;;  %v955_v8 = vld [vmem:[%s1368_s7 + $0x8] sm:$0xf] }
  0x1e   : > { %203 = vst [vmem:[%s169_s8 + $0x48] sm:$0xff] %v202_v6  ;;  %205 = vst [vmem:[%s169_s8 + $0x54] sm:$0xff] %v204_v7  ;;  %v957_v9 = vld [vmem:[%s1368_s7 + $0x2c] sm:$0xf]  ;;  %v959_v10 = vld [vmem:[%s1368_s7 + $0x50] sm:$0xf] }
  0x1f   : > { %956 = vst [vmem:[%s169_s8 + $0x8] sm:$0xf] %v955_v8  ;;  %v961_v11 = vld [vmem:[%s1368_s7 + $0x74] sm:$0xf]  ;;  %958 = vst [vmem:[%s169_s8 + $0x14] sm:$0xf] %v957_v9 }
  0x20   : > { %960 = vst [vmem:[%s169_s8 + $0x20] sm:$0xf] %v959_v10  ;;  %962 = vst [vmem:[%s169_s8 + $0x2c] sm:$0xf] %v961_v11  ;;  %v963_v12 = vld [vmem:[%s1368_s7 + $0x98] sm:$0xf] }
  0x21   : > { %v965_v13 = vld [vmem:[%s1368_s7 + $0xbc] sm:$0xf]  ;;  %v967_v14 = vld [vmem:[%s1368_s7 + $0xe0] sm:$0xf]  ;;  %964 = vst [vmem:[%s169_s8 + $0x38] sm:$0xf] %v963_v12 }
  0x22   : > { %966 = vst [vmem:[%s169_s8 + $0x44] sm:$0xf] %v965_v13  ;;  %968 = vst [vmem:[%s169_s8 + $0x50] sm:$0xf] %v967_v14  ;;  %v969_v15 = vld [vmem:[%s1368_s7 + $0x104] sm:$0xf] }
  0x23   : > { %970 = vst [vmem:[%s169_s8 + $0x5c] sm:$0xf] %v969_v15 }
  0x24 PF: > { %p971_p7 = scmp.ge.s32.totalorder %s1285_s18, 1  ;;  %p245_p8 = scmp.lt.s32.totalorder %s1285_s18, 7 }
  0x26   : > { %p246_p9 = pnand %p971_p7, %p245_p8 }
  0x27   : > { %s252_s9 = sand.u32 (!%p246_p9), 1, %s1261_s12   ;;  %s291_s10 = smul.u32 (!%p246_p9), 48, %s1269_s14 }
  0x28   : > { %249 = sbr.rel (%p246_p9) target bundleno = 350 (0x15e), region = 54  ;;  %s973_s21 = sshll.u32 (!%p246_p9), %s1273_s15, 3 }
  0x29   : > { %s1133_s11 = smul.u32 (!%p246_p9), 96, %s252_s9  ;;  %p292_p10 = scmp.lt.s32.totalorder (!%p246_p9), %s291_s10, 143 }
  0x2a   : > { %p304_p11 = scmp.lt.s32.totalorder (!%p246_p9), %s973_s21, 15  ;;  %p975_p12 = scmp.ne.s32.totalorder (!%p246_p9), %s1269_s14, 0 }
  0x2b   : > { %s1401_s12 = scalar_lea.vmem (!%p246_p9), [#allocation3], %s1133_s11 }
  0x2f   : > { %s1486_s10 = smov (!%p292_p10, %s291_s10), 143  ;;  %s1488_s21 = smov (!%p304_p11, %s973_s21), 15 }
  0x30   : > { %s972_s22 = sshll.u32 %s1486_s10, 2  ;;  %s974_s27 = sshll.u32 %s1488_s21, 2  ;;  %v1287_v16 = vmov (!%p975_p12), 0.0  }
  0x31   : > { %s1394_s26 = scalar_lea.vmem %s1470_s1, %s972_s22  ;;  %s1399_s30 = scalar_lea.vmem %s1472_s3, %s974_s27  ;;  %317 = vst [vmem:[#allocation2] sm:$0xff] (!%p975_p12), %v1287_v16  ;;  %318 = vst [vmem:[#allocation2 + $0x8] sm:$0xff] (!%p975_p12), %v1287_v16 }
  0x32   : > { %316 = sbr.rel (%p975_p12) target bundleno = 57 (0x39), region = 62  ;;  %319 = vst [vmem:[#allocation2 + $0x10] sm:$0xff] (!%p975_p12), %v1287_v16  ;;  %320 = vst [vmem:[#allocation2 + $0x18] sm:$0xff] (!%p975_p12), %v1287_v16 }
  0x33   : > { %321 = vst [vmem:[#allocation2 + $0x20] sm:$0xff] (!%p975_p12), %v1287_v16  ;;  %322 = vst [vmem:[#allocation2 + $0x28] sm:$0xff] (!%p975_p12), %v1287_v16 }
  0x34   : > { %323 = vst [vmem:[#allocation2 + $0x30] sm:$0xff] (!%p975_p12), %v1287_v16  ;;  %324 = vst [vmem:[#allocation2 + $0x38] sm:$0xff] (!%p975_p12), %v1287_v16 }
  0x39 PF: > { %v1191_v17 = vld [vmem:[%s1394_s26 + $0x40] sm:$0xff]   ;;  %v1194_v20 = vld [vmem:[%s1394_s26 + $0x48] sm:$0xff]   ;;  %v1197_v23 = vld [vmem:[%s1394_s26 + $0x50] sm:$0xff]   ;;  %p1012_p13 = scmp.ne.s32.totalorder %s1269_s14, 2 }
  0x3a   : > { %v1192_v18 = vld [vmem:[%s1394_s26] sm:$0xff]   ;;  %1055 = vmatprep.subr.bf16.mxu0 %v1191_v17  ;;  %v1195_v21 = vld [vmem:[%s1394_s26 + $0x8] sm:$0xff]   ;;  %v1198_v24 = vld [vmem:[%s1394_s26 + $0x10] sm:$0xff]  }
  0x3b   : > { %v1193_v19 = vld [vmem:[%s1394_s26 + $0x80] sm:$0xff]   ;;  %1056 = vmatpush3.bf16.msra.mxu0 %v1192_v18  ;;  %v1196_v22 = vld [vmem:[%s1394_s26 + $0x88] sm:$0xff]   ;;  %v1199_v25 = vld [vmem:[%s1394_s26 + $0x90] sm:$0xff]  }
  0x3c   : > { %1107 = vmatprep.subr.bf16.mxu1 %v1193_v19  ;;  %1057 = vmatprep.subr.bf16.mxu0 %v1194_v20  ;;  %v1200_v26 = vld [vmem:[%s1394_s26 + $0x58] sm:$0xff]   ;;  %v1203_v29 = vld [vmem:[%s1394_s26 + $0x60] sm:$0xff]   ;;  %v1206_v32 = vld [vmem:[%s1394_s26 + $0x68] sm:$0xff]  }
  0x3d   : > { %1108 = vmatpush3.bf16.msra.mxu1 %v1193_v19  ;;  %v1201_v27 = vld [vmem:[%s1394_s26 + $0x18] sm:$0xff]   ;;  %v1205_v30 = vld [vmem:[%s1394_s26 + $0xa0] sm:$0xff]   ;;  %v1208_v33 = vld [vmem:[%s1394_s26 + $0xa8] sm:$0xff]  }
  0x3e   : > { %1109 = vmatprep.subr.bf16.mxu1 %v1196_v22  ;;  %v1202_v28 = vld [vmem:[%s1394_s26 + $0x98] sm:$0xff]   ;;  %v1204_v31 = vld [vmem:[%s1394_s26 + $0x20] sm:$0xff]   ;;  %v1207_v34 = vld [vmem:[%s1394_s26 + $0x28] sm:$0xff]  }
  0x3f   : > { %1058 = vmatpush3.bf16.msra.mxu0 %v1195_v21  ;;  %v1209_v35 = vld [vmem:[%s1394_s26 + $0x70] sm:$0xff]   ;;  %v1212_v38 = vld [vmem:[%s1394_s26 + $0x78] sm:$0xff]   ;;  %v1215_v43 = vld [vmem:[%s1401_s12] ss:$12 sps:$4 sm:$0xff]  }
  0x40   : > { %1059 = vmatprep.subr.bf16.mxu0 %v1197_v23  ;;  %v1210_v36 = vld [vmem:[%s1394_s26 + $0x30] sm:$0xff]   ;;  %v1214_v39 = vld [vmem:[%s1394_s26 + $0xb8] sm:$0xff]   ;;  %v1219_v45 = vld [vmem:[%s1401_s12 + $0x20] ss:$12 sps:$4 sm:$0xff]  }
  0x41   : > { %1110 = vmatpush3.bf16.msra.mxu1 %v1196_v22  ;;  %v1211_v37 = vld [vmem:[%s1394_s26 + $0xb0] sm:$0xff]   ;;  %v1213_v42 = vld [vmem:[%s1394_s26 + $0x38] sm:$0xff]   ;;  %v325_v59 = vld [vmem:[#allocation2] sm:$0xff] }
  0x42   : > { %1111 = vmatprep.subr.bf16.mxu1 %v1199_v25  ;;  %v1217_v40 = vld [vmem:[%s1401_s12 + $0x4] ss:$12 sps:$4 sm:$0xff]   ;;  %v1218_v41 = vld [vmem:[%s1401_s12 + $0x8] ss:$12 sps:$4 sm:$0xff]   ;;  %v1228_v51 = vld [vmem:[%s1401_s12 + $0x4c] ss:$12 sps:$4 sm:$0xff]  }
  0x43   : > { %1060 = vmatpush3.bf16.msra.mxu0 %v1198_v24  ;;  %637 = vmatprep.mubr.bf16.mxu0 %v1217_v40  ;;  %v1220_v44 = vld [vmem:[%s1401_s12 + $0x1c] ss:$12 sps:$4 sm:$0xff]   ;;  %v1226_v46 = vld [vmem:[%s1401_s12 + $0x38] ss:$12 sps:$4 sm:$0xff]   ;;  %v1223_v48 = vld [vmem:[%s1401_s12 + $0x34] ss:$12 sps:$4 sm:$0xff]  }
  0x44   : > { %1061 = vmatprep.subr.bf16.mxu0 %v1200_v26  ;;  %1123 = vmatprep.mubr.bf16.mxu1 %v1218_v41  ;;  %v1222_v47 = vld [vmem:[%s1401_s12 + $0x18] ss:$12 sps:$4 sm:$0xff]   ;;  %v1227_v49 = vld [vmem:[%s1401_s12 + $0x50] ss:$12 sps:$4 sm:$0xff]   ;;  %v1230_v52 = vld [vmem:[%s1401_s12 + $0x48] ss:$12 sps:$4 sm:$0xff]  }
  0x45   : > { %1112 = vmatpush3.bf16.msra.mxu1 %v1199_v25  ;;  %v1225_v50 = vld [vmem:[%s1401_s12 + $0x30] ss:$12 sps:$4 sm:$0xff]   ;;  %v326_v0 = vld [vmem:[#allocation2 + $0x8] sm:$0xff]  ;;  %v329_v26 = vld [vmem:[#allocation2 + $0x20] sm:$0xff] }
  0x46   : > { %1113 = vmatprep.subr.bf16.mxu1 %v1202_v28  ;;  %v327_v10 = vld [vmem:[#allocation2 + $0x10] sm:$0xff]  ;;  %v328_v16 = vld [vmem:[#allocation2 + $0x18] sm:$0xff] }
  0x47   : > { %1062 = vmatpush3.bf16.msra.mxu0 %v1201_v27  ;;  %v332_v41 = vld [vmem:[#allocation2 + $0x38] sm:$0xff] }
  0x48   : > { %1063 = vmatprep.subr.bf16.mxu0 %v1203_v29  ;;  %v330_v29 = vld [vmem:[#allocation2 + $0x28] sm:$0xff] }
  0x49   : > { %1114 = vmatpush3.bf16.msra.mxu1 %v1202_v28 }
  0x4a   : > { %1115 = vmatprep.subr.bf16.mxu1 %v1205_v30 }
  0x4b   : > { %1064 = vmatpush3.bf16.msra.mxu0 %v1204_v31 }
  0x4c   : > { %1065 = vmatprep.subr.bf16.mxu0 %v1206_v32 }
  0x4d   : > { %1116 = vmatpush3.bf16.msra.mxu1 %v1205_v30 }
  0x4e   : > { %1117 = vmatprep.subr.bf16.mxu1 %v1208_v33 }
  0x4f   : > { %1066 = vmatpush3.bf16.msra.mxu0 %v1207_v34 }
  0x50   : > { %1067 = vmatprep.subr.bf16.mxu0 %v1209_v35 }
  0x51   : > { %1118 = vmatpush3.bf16.msra.mxu1 %v1208_v33 }
  0x52   : > { %1119 = vmatprep.subr.bf16.mxu1 %v1211_v37 }
  0x53   : > { %1068 = vmatpush3.bf16.msra.mxu0 %v1210_v36 }
  0x54   : > { %1069 = vmatprep.subr.bf16.mxu0 %v1212_v38 }
  0x55   : > { %1120 = vmatpush3.bf16.msra.mxu1 %v1211_v37  ;;  %v331_v37 = vld [vmem:[#allocation2 + $0x30] sm:$0xff] }
  0x56   : > { %1121 = vmatprep.subr.bf16.mxu1 %v1214_v39 }
  0x57   : > { %1070 = vmatpush3.bf16.msra.mxu0 %v1213_v42 }
  0x59   : > { %1122 = vmatpush3.bf16.msra.mxu1 %v1214_v39 }
  0x5a   : > { %638 = vmatmul.mubr.bf16.vlgmr.msra.gmra.mrb[0].mxu0 %v1215_v43 }
  0x5b   : > { %645 = vmatprep.mubr.bf16.mxu0 %v1220_v44 }
  0x5c   : > { %1124 = vmatmul.mubr.bf16.vlgmr.msra.gmra.mrb[0].mxu1 %v1219_v45 }
  0x5d   : > { %1127 = vmatprep.mubr.bf16.mxu1 %v1226_v46 }
  0x62   : > { %646 = vmatmul.mubr.bf16.gmra.mrb[4].mxu0 %v1222_v47  ;;  %v1013_v47 = vld [vmem:[%s1471_s2] ss:$0 sm:$0xff] (!%p1012_p13) }
  0x63   : > { %653 = vmatprep.mubr.bf16.mxu0 %v1223_v48 }
  0x64   : > { %1128 = vmatmul.mubr.bf16.gmra.mrb[4].mxu1 %v1227_v49 }
  0x6a   : > { %654 = vmatmul.mubr.bf16.gmra.mrb[8].mxu0 %v1225_v50 }
  0x6b   : > { %661 = vmatprep.mubr.bf16.mxu0 %v1228_v51 }
  0x72   : > { %662 = vmatmul.mubr.bf16.gmra.mrb[12].mxu0 %v1230_v52 }
 0x12d   : > { %v1071_v53 = vpop.f32.mrb[0].mxu0 }
 0x12e   : > { %v1072_v54 = vpop.f32.mrb[1].mxu0 }
 0x12f   : > { %v1073_v55 = vadd.f32 %v1072_v54, %v1071_v53  ;;  %v1074_v56 = vpop.f32.mrb[2].mxu0  ;;  %v1125_v57 = vpop.f32.mrb[0].mxu1 }
 0x130   : > { %v1075_v58 = vpop.f32.mrb[3].mxu0  ;;  %v704_v60 = vpop.f32.mrb[1].mxu1 }
 0x131   : > { %v1076_v61 = vadd.f32 %v1075_v58, %v1074_v56  ;;  %v705_v62 = vadd.f32 %v1073_v55, %v704_v60  ;;  %v1126_v63 = vpop.f32.mrb[2].mxu1 }
 0x132   : > { %v707_v1 = vpop.f32.mrb[3].mxu1 }
 0x133   : > { %v735_v2 = vadd.f32 %v705_v62, %v325_v59  ;;  %v708_v3 = vadd.f32 %v1076_v61, %v707_v1 }
 0x135   : > { %743 = vst [vmem:[#allocation2] sm:$0xff] %v735_v2  ;;  %v736_v4 = vadd.f32 %v708_v3, %v326_v0  ;;  %v1077_v5 = vpop.f32.mrb[4].mxu0 }
 0x136   : > { %v1078_v6 = vpop.f32.mrb[5].mxu0 }
 0x137   : > { %744 = vst [vmem:[#allocation2 + $0x8] sm:$0xff] %v736_v4  ;;  %v1079_v7 = vadd.f32 %v1078_v6, %v1077_v5  ;;  %v1080_v8 = vpop.f32.mrb[6].mxu0  ;;  %v1129_v9 = vpop.f32.mrb[4].mxu1 }
 0x138   : > { %v1081_v11 = vpop.f32.mrb[7].mxu0  ;;  %v720_v12 = vpop.f32.mrb[5].mxu1 }
 0x139   : > { %v713_v13 = vadd.f32 %v1125_v57, %v1079_v7  ;;  %v1082_v14 = vadd.f32 %v1081_v11, %v1080_v8  ;;  %v1130_v15 = vpop.f32.mrb[6].mxu1 }
 0x13a   : > { %v723_v17 = vpop.f32.mrb[7].mxu1 }
 0x13b   : > { %v737_v18 = vadd.f32 %v713_v13, %v327_v10  ;;  %v716_v19 = vadd.f32 %v1126_v63, %v1082_v14 }
 0x13c   : > { %v755_v45 = vld [vmem:[#allocation2] sm:$0xff] (!%p1012_p13) }
 0x13d   : > { %745 = vst [vmem:[#allocation2 + $0x10] sm:$0xff] %v737_v18  ;;  %v738_v20 = vadd.f32 %v716_v19, %v328_v16  ;;  %v1083_v21 = vpop.f32.mrb[8].mxu0  ;;  %v770_v48 = vadd.f32 (!%p1012_p13), %v1013_v47, %v755_v45 }
 0x13e   : > { %v1084_v22 = vpop.f32.mrb[9].mxu0  ;;  %v756_v46 = vld [vmem:[#allocation2 + $0x8] sm:$0xff] (!%p1012_p13) }
 0x13f   : > { %746 = vst [vmem:[#allocation2 + $0x18] sm:$0xff] %v738_v20  ;;  %v1085_v23 = vadd.f32 %v1084_v22, %v1083_v21  ;;  %v1086_v24 = vpop.f32.mrb[10].mxu0  ;;  %v771_v49 = vadd.f32 (!%p1012_p13), %v1013_v47, %v756_v46  ;;  %v778_v59 = vmax.f32 (!%p1012_p13), %v770_v48, 0.0 }
 0x140   : > { %v1087_v25 = vpop.f32.mrb[11].mxu0 }
 0x141   : > { %v1088_v27 = vadd.f32 %v1087_v25, %v1086_v24  ;;  %v721_v28 = vadd.f32 %v1085_v23, %v720_v12  ;;  %v779_v60 = vmax.f32 (!%p1012_p13), %v771_v49, 0.0 }
 0x143   : > { %v739_v30 = vadd.f32 %v721_v28, %v329_v26  ;;  %v724_v31 = vadd.f32 %v1088_v27, %v723_v17  ;;  %v1035_v3 = vpack.c.bf16 (!%p1012_p13), %v779_v60, %v778_v59 }
 0x144   : > { %v757_v50 = vld [vmem:[#allocation2 + $0x10] sm:$0xff] (!%p1012_p13) }
 0x145   : > { %747 = vst [vmem:[#allocation2 + $0x20] sm:$0xff] %v739_v30  ;;  %v740_v32 = vadd.f32 %v724_v31, %v330_v29  ;;  %v1089_v33 = vpop.f32.mrb[12].mxu0  ;;  %v772_v53 = vadd.f32 (!%p1012_p13), %v1013_v47, %v757_v50  ;;  %1036 = vst [vmem:[%s1399_s30] sm:$0xff] (!%p1012_p13), %v1035_v3  }
 0x146   : > { %v1090_v34 = vpop.f32.mrb[13].mxu0  ;;  %v758_v51 = vld [vmem:[#allocation2 + $0x18] sm:$0xff] (!%p1012_p13) }
 0x147   : > { %748 = vst [vmem:[#allocation2 + $0x28] sm:$0xff] %v740_v32  ;;  %v1091_v35 = vadd.f32 %v1090_v34, %v1089_v33  ;;  %v1092_v36 = vpop.f32.mrb[14].mxu0  ;;  %v773_v54 = vadd.f32 (!%p1012_p13), %v1013_v47, %v758_v51  ;;  %v780_v63 = vmax.f32 (!%p1012_p13), %v772_v53, 0.0 }
 0x148   : > { %v1093_v38 = vpop.f32.mrb[15].mxu0 }
 0x149   : > { %v729_v39 = vadd.f32 %v1129_v9, %v1091_v35  ;;  %v1094_v40 = vadd.f32 %v1093_v38, %v1092_v36  ;;  %754 = sbr.rel (%p1012_p13) target bundleno = 350 (0x15e), region = 66  ;;  %v781_v0 = vmax.f32 (!%p1012_p13), %v773_v54, 0.0 }
 0x14b   : > { %v741_v42 = vadd.f32 %v729_v39, %v331_v37  ;;  %v732_v43 = vadd.f32 %v1130_v15, %v1094_v40  ;;  %v1040_v6 = vpack.c.bf16 (!%p1012_p13), %v781_v0, %v780_v63 }
 0x14c   : > { %v759_v52 = vld [vmem:[#allocation2 + $0x20] sm:$0xff] (!%p1012_p13) }
 0x14d   : > { %749 = vst [vmem:[#allocation2 + $0x30] sm:$0xff] %v741_v42  ;;  %v742_v44 = vadd.f32 %v732_v43, %v332_v41  ;;  %v774_v56 = vadd.f32 (!%p1012_p13), %v1013_v47, %v759_v52  ;;  %1052 = vst [vmem:[%s1399_s30 + $0x8] sm:$0xff] (!%p1012_p13), %v1040_v6  }
 0x14e   : > { %v760_v55 = vld [vmem:[#allocation2 + $0x28] sm:$0xff] (!%p1012_p13) }
 0x14f   : > { %750 = vst [vmem:[#allocation2 + $0x38] sm:$0xff] %v742_v44  ;;  %v775_v61 = vadd.f32 (!%p1012_p13), %v1013_v47, %v760_v55  ;;  %v782_v1 = vmax.f32 (!%p1012_p13), %v774_v56, 0.0 }
 0x151   : > { %v783_v4 = vmax.f32 %v775_v61, 0.0 }
 0x153   : > { %v1045_v8 = vpack.c.bf16 %v783_v4, %v782_v1 }
 0x154   : > { %v761_v57 = vld [vmem:[#allocation2 + $0x30] sm:$0xff] }
 0x155   : > { %v776_v62 = vadd.f32 %v1013_v47, %v761_v57  ;;  %1053 = vst [vmem:[%s1399_s30 + $0x10] sm:$0xff] %v1045_v8  }
 0x156   : > { %v762_v58 = vld [vmem:[#allocation2 + $0x38] sm:$0xff] }
 0x157   : > { %v777_v2 = vadd.f32 %v1013_v47, %v762_v58  ;;  %v784_v5 = vmax.f32 %v776_v62, 0.0 }
 0x159   : > { %v785_v7 = vmax.f32 %v777_v2, 0.0 }
 0x15b   : > { %v1050_v9 = vpack.c.bf16 %v785_v7, %v784_v5 }
 0x15d   : > { %1054 = vst [vmem:[%s1399_s30 + $0x18] sm:$0xff] %v1050_v9  }
 0x15e PF: > { %s13_s18 = sadd.s32 1, %s1285_s18   ;;  %s1473_s12 = smov %s1265_s13 }
 0x15f   : > { %p10_p0 = scmp.ge.s32.totalorder %s13_s18, 8   ;;  %s1474_s13 = smov %s1359_s25 }
 0x160   : > { %s1475_s14 = smov %s1277_s16  ;;  %s1476_s15 = smov %s1281_s17 }
 0x161   : > { %s1477_s16 = smov %s1480_s19  ;;  %s1478_s17 = smov %s1484_s20 }
 0x162   :  { %12 = sbr.rel (!%p10_p0) target bundleno = 4 (0x4), region = 113 }

// kernel: my_resnet_forward.33
= control target key start
LH: loop header
LB: loop body
LE: loop exit
PB: predicated region body
PF: predicated region fallthrough
CT: control target
= control target key end

     0   :  { %s1754_s0 = inlined_call_operand.vmem [shape: bf16[32,1152], index: 0, kind: input, shape index: {}]   ;;  %s1755_s1 = inlined_call_operand.vmem [shape: bf16[1152,256], index: 1, kind: input, shape index: {}]   ;;  %s1756_s2 = inlined_call_operand.vmem [shape: f32[1,256], index: 2, kind: input, shape index: {}]   ;;  %s1757_s3 = inlined_call_operand.vmem [shape: bf16[32,256], index: 3, kind: output, shape index: {}]  }
   0x1   :  { %1759 = sst [smem:[#allocation7_spill]] %s1754_s0 }
   0x2   :  { %1760 = sst [smem:[#allocation8_spill]] %s1755_s1 }
   0x3   :  { %s1439_s12 = smov 0   ;;  %s1441_s13 = smov 0  }
   0x4   :  { %s1443_s14 = smov 0   ;;  %s1445_s15 = smov 0  }
   0x5   :  { %s1447_s16 = smov 0   ;;  %s1449_s17 = smov 0  }
   0x6   :  { %s1451_s18 = smov 0   ;;  %s1453_s19 = smov 0  }
   0x7   :  { %s1455_s20 = smov 0   ;;  %s1457_s21 = smov 0  }
   0x8   :  { %s1459_s22 = smov 0  }
   0x9 LB: > { %s1072_s23 = sadd.s32 4294967295, %s1416_s22   ;;  %s25_s24 = sadd.s32 1, %s1408_s20  ;;  %s1416_s22 = sphi %s1459_s22, %s13_s22   ;;  %s1412_s21 = sphi %s1457_s21, %s1777_s21   ;;  %s1408_s20 = sphi %s1455_s20, %s1776_s20   ;;  %s1404_s19 = sphi %s1453_s19, %s1775_s19   ;;  %s1400_s18 = sphi %s1451_s18, %s1774_s18   ;;  %s1396_s17 = sphi %s1449_s17, %s1773_s17   ;;  %s1392_s16 = sphi %s1447_s16, %s1772_s16   ;;  %s1388_s15 = sphi %s1445_s15, %s1771_s15   ;;  %s1384_s14 = sphi %s1443_s14, %s1770_s14   ;;  %s1380_s13 = sphi %s1441_s13, %s1769_s13   ;;  %s1376_s12 = sphi %s1439_s12, %s1768_s12  }
   0xa   : > { %p26_p0 = scmp.ge.s32.totalorder %s25_s24, 3  ;;  %s28_s25 = sadd.s32 1, %s1412_s21 }
   0xb   : > { %s41_s26 = sadd.s32 1, %s1396_s17  ;;  %p48_p1 = scmp.ne.s32.totalorder %s1396_s17, %s1392_s16 }
   0xc   : > { %s1779_s24 = smov (%p26_p0, %s25_s24), 0  ;;  %s1781_s25 = smov (!%p26_p0, %s28_s25), %s1412_s21 }
   0xd   : > { %s37_s27 = ssub.s32 %s1408_s20, %s1779_s24  ;;  %p49_p2 = scmp.eq.s32.totalorder %s1416_s22, 0 }
   0xe   : > { %p30_p3 = scmp.ge.s32.totalorder %s1781_s25, 2  ;;  %p39_p4 = scmp.eq.s32.totalorder %s37_s27, 0 }
   0xf   : > { %p1506_p5 = por %p49_p2, %p48_p1  ;;  %s69_s29 = sadd.s32 1, %s1388_s15 }
  0x10   : > { %s1783_s25 = smov (%p30_p3, %s1781_s25), 0  ;;  %p76_p6 = scmp.ne.s32.totalorder %s1388_s15, %s1384_s14 }
  0x11   : > { %1762 = sst [smem:[#allocation6_spill]] %s1783_s25  ;;  %s65_s4 = ssub.s32 %s1412_s21, %s1783_s25 }
  0x12   : > { %s1514_s30 = scalar_select %p39_p4, %s1396_s17, %s41_s26  }
  0x13   : > { %s66_s5 = sor.u32 %s65_s4, %s37_s27  ;;  %p121_p7 = scmp.eq.s32.totalorder %s65_s4, 0 }
  0x14   : > { %p67_p8 = scmp.eq.s32.totalorder %s66_s5, 0  ;;  %p1520_p9 = por %p76_p6, %p49_p2 }
  0x15   : > { %s123_s7 = sadd.s32 1, %s1380_s13  ;;  %p133_p10 = scmp.ne.s32.totalorder %s1380_s13, %s1376_s12 }
  0x16   : > { %s1528_s8 = scalar_select %p67_p8, %s1388_s15, %s69_s29  }
  0x17   : > { %s1531_s9 = scalar_select %p121_p7, %s1380_s13, %s123_s7  }
  0x18   : > { %p134_p11 = scmp.eq.s32.totalorder %s1072_s23, 5  ;;  %p1075_p13 = scmp.ge.s32.totalorder %s1416_s22, 6 }
  0x1a   : > { %p1533_p12 = por %p134_p11, %p133_p10  ;;  %156 = sbr.rel (%p1075_p13) target bundleno = 87 (0x57), region = 16 }
  0x21   : > { %159 = sbr.rel (!%p1506_p5) target bundleno = 46 (0x2e), region = 20  ;;  %s161_s11 = sand.u32 (%p1506_p5), 1, %s1396_s17  }
  0x22   : > { %s1130_s26 = smul.u32 (%p1506_p5), 12, %s1408_s20  ;;  %s1765_s0 = sld [smem:[#allocation7_spill]] (%p1506_p5) }
  0x23   : > { %s1205_s27 = smul.u32 (%p1506_p5), 48, %s161_s11 }
  0x25   : > { %s163_s23 = scalar_lea.vmem (%p1506_p5), [#allocation3], %s1205_s27 }
  0x28   : > { %s169_s5 = scalar_lea.vmem %s1765_s0, %s1130_s26 }
  0x29   : > { %v184_v0 = vld [vmem:[%s169_s5] sm:$0xff]  ;;  %v188_v2 = vld [vmem:[%s169_s5 + $0x48] sm:$0xff]  ;;  %v1081_v6 = vld [vmem:[%s169_s5 + $0x50] sm:$0xf] }
  0x2a   : > { %v186_v1 = vld [vmem:[%s169_s5 + $0x24] sm:$0xff]  ;;  %185 = vst [vmem:[%s163_s23] sm:$0xff] %v184_v0  ;;  %189 = vst [vmem:[%s163_s23 + $0x18] sm:$0xff] %v188_v2  ;;  %v190_v3 = vld [vmem:[%s169_s5 + $0x6c] sm:$0xff] }
  0x2b   : > { %187 = vst [vmem:[%s163_s23 + $0xc] sm:$0xff] %v186_v1  ;;  %v1077_v4 = vld [vmem:[%s169_s5 + $0x8] sm:$0xf]  ;;  %v1079_v5 = vld [vmem:[%s169_s5 + $0x2c] sm:$0xf]  ;;  %191 = vst [vmem:[%s163_s23 + $0x24] sm:$0xff] %v190_v3 }
  0x2c   : > { %1078 = vst [vmem:[%s163_s23 + $0x8] sm:$0xf] %v1077_v4  ;;  %1080 = vst [vmem:[%s163_s23 + $0x14] sm:$0xf] %v1079_v5  ;;  %v1083_v7 = vld [vmem:[%s169_s5 + $0x74] sm:$0xf] }
  0x2d   : > { %1082 = vst [vmem:[%s163_s23 + $0x20] sm:$0xf] %v1081_v6  ;;  %1084 = vst [vmem:[%s163_s23 + $0x2c] sm:$0xf] %v1083_v7 }
  0x2e PF: > { %212 = sbr.rel (!%p1520_p9) target bundleno = 87 (0x57), region = 46  ;;  %s214_s28 = sand.u32 (%p1520_p9), 1, %s1388_s15  }
  0x2f   : > { %s1131_s7 = smul.u32 (%p1520_p9), 96, %s1408_s20  ;;  %s1766_s1 = sld [smem:[#allocation8_spill]] (%p1520_p9) }
  0x30   : > { %s1206_s11 = smul.u32 (%p1520_p9), 192, %s214_s28 }
  0x31   : > { %s219_s26 = sadd.s32 (%p1520_p9), %s1412_s21, %s1131_s7 }
  0x32   : > { %s1086_s27 = sshll.u32 (%p1520_p9), %s219_s26, 2  ;;  %s1558_s6 = scalar_lea.vmem (%p1520_p9), [#allocation4], %s1206_s11 }
  0x35   : > { %s1553_s0 = scalar_lea.vmem %s1766_s1, %s1086_s27 }
  0x36   : > { %v237_v8 = vld [vmem:[%s1553_s0] sm:$0xf]  ;;  %v239_v9 = vld [vmem:[%s1553_s0 + $0x8] sm:$0xf]  ;;  %v241_v10 = vld [vmem:[%s1553_s0 + $0x10] sm:$0xf] }
  0x37   : > { %238 = vst [vmem:[%s1558_s6] sm:$0xf] %v237_v8  ;;  %240 = vst [vmem:[%s1558_s6 + $0x4] sm:$0xf] %v239_v9  ;;  %v243_v11 = vld [vmem:[%s1553_s0 + $0x18] sm:$0xf] }
  0x38   : > { %242 = vst [vmem:[%s1558_s6 + $0x8] sm:$0xf] %v241_v10  ;;  %v245_v12 = vld [vmem:[%s1553_s0 + $0x20] sm:$0xf]  ;;  %v247_v13 = vld [vmem:[%s1553_s0 + $0x28] sm:$0xf] }
  0x39   : > { %244 = vst [vmem:[%s1558_s6 + $0xc] sm:$0xf] %v243_v11  ;;  %246 = vst [vmem:[%s1558_s6 + $0x10] sm:$0xf] %v245_v12  ;;  %v249_v14 = vld [vmem:[%s1553_s0 + $0x30] sm:$0xf] }
  0x3a   : > { %248 = vst [vmem:[%s1558_s6 + $0x14] sm:$0xf] %v247_v13  ;;  %v251_v15 = vld [vmem:[%s1553_s0 + $0x38] sm:$0xf]  ;;  %v253_v16 = vld [vmem:[%s1553_s0 + $0x40] sm:$0xf] }
  0x3b   : > { %250 = vst [vmem:[%s1558_s6 + $0x18] sm:$0xf] %v249_v14  ;;  %252 = vst [vmem:[%s1558_s6 + $0x1c] sm:$0xf] %v251_v15  ;;  %v255_v17 = vld [vmem:[%s1553_s0 + $0x48] sm:$0xf] }
  0x3c   : > { %254 = vst [vmem:[%s1558_s6 + $0x20] sm:$0xf] %v253_v16  ;;  %v257_v18 = vld [vmem:[%s1553_s0 + $0x50] sm:$0xf]  ;;  %v259_v19 = vld [vmem:[%s1553_s0 + $0x58] sm:$0xf] }
  0x3d   : > { %256 = vst [vmem:[%s1558_s6 + $0x24] sm:$0xf] %v255_v17  ;;  %258 = vst [vmem:[%s1558_s6 + $0x28] sm:$0xf] %v257_v18  ;;  %v261_v20 = vld [vmem:[%s1553_s0 + $0x60] sm:$0xf] }
  0x3e   : > { %260 = vst [vmem:[%s1558_s6 + $0x2c] sm:$0xf] %v259_v19  ;;  %v263_v21 = vld [vmem:[%s1553_s0 + $0x68] sm:$0xf]  ;;  %v265_v22 = vld [vmem:[%s1553_s0 + $0x70] sm:$0xf] }
  0x3f   : > { %262 = vst [vmem:[%s1558_s6 + $0x30] sm:$0xf] %v261_v20  ;;  %264 = vst [vmem:[%s1558_s6 + $0x34] sm:$0xf] %v263_v21  ;;  %v267_v23 = vld [vmem:[%s1553_s0 + $0x78] sm:$0xf] }
  0x40   : > { %266 = vst [vmem:[%s1558_s6 + $0x38] sm:$0xf] %v265_v22  ;;  %v269_v24 = vld [vmem:[%s1553_s0 + $0x80] sm:$0xf]  ;;  %v271_v25 = vld [vmem:[%s1553_s0 + $0x88] sm:$0xf] }
  0x41   : > { %268 = vst [vmem:[%s1558_s6 + $0x3c] sm:$0xf] %v267_v23  ;;  %270 = vst [vmem:[%s1558_s6 + $0x40] sm:$0xf] %v269_v24  ;;  %v273_v26 = vld [vmem:[%s1553_s0 + $0x90] sm:$0xf] }
  0x42   : > { %272 = vst [vmem:[%s1558_s6 + $0x44] sm:$0xf] %v271_v25  ;;  %v275_v27 = vld [vmem:[%s1553_s0 + $0x98] sm:$0xf]  ;;  %v277_v28 = vld [vmem:[%s1553_s0 + $0xa0] sm:$0xf] }
  0x43   : > { %274 = vst [vmem:[%s1558_s6 + $0x48] sm:$0xf] %v273_v26  ;;  %276 = vst [vmem:[%s1558_s6 + $0x4c] sm:$0xf] %v275_v27  ;;  %v279_v29 = vld [vmem:[%s1553_s0 + $0xa8] sm:$0xf] }
  0x44   : > { %278 = vst [vmem:[%s1558_s6 + $0x50] sm:$0xf] %v277_v28  ;;  %v281_v30 = vld [vmem:[%s1553_s0 + $0xb0] sm:$0xf]  ;;  %v283_v31 = vld [vmem:[%s1553_s0 + $0xb8] sm:$0xf] }
  0x45   : > { %280 = vst [vmem:[%s1558_s6 + $0x54] sm:$0xf] %v279_v29  ;;  %282 = vst [vmem:[%s1558_s6 + $0x58] sm:$0xf] %v281_v30  ;;  %v285_v32 = vld [vmem:[%s1553_s0 + $0xc0] sm:$0xf] }
  0x46   : > { %284 = vst [vmem:[%s1558_s6 + $0x5c] sm:$0xf] %v283_v31  ;;  %v287_v33 = vld [vmem:[%s1553_s0 + $0xc8] sm:$0xf]  ;;  %v289_v34 = vld [vmem:[%s1553_s0 + $0xd0] sm:$0xf] }
  0x47   : > { %286 = vst [vmem:[%s1558_s6 + $0x60] sm:$0xf] %v285_v32  ;;  %288 = vst [vmem:[%s1558_s6 + $0x64] sm:$0xf] %v287_v33  ;;  %v291_v35 = vld [vmem:[%s1553_s0 + $0xd8] sm:$0xf] }
  0x48   : > { %290 = vst [vmem:[%s1558_s6 + $0x68] sm:$0xf] %v289_v34  ;;  %v293_v36 = vld [vmem:[%s1553_s0 + $0xe0] sm:$0xf]  ;;  %v295_v37 = vld [vmem:[%s1553_s0 + $0xe8] sm:$0xf] }
  0x49   : > { %292 = vst [vmem:[%s1558_s6 + $0x6c] sm:$0xf] %v291_v35  ;;  %294 = vst [vmem:[%s1558_s6 + $0x70] sm:$0xf] %v293_v36  ;;  %v297_v38 = vld [vmem:[%s1553_s0 + $0xf0] sm:$0xf] }
  0x4a   : > { %296 = vst [vmem:[%s1558_s6 + $0x74] sm:$0xf] %v295_v37  ;;  %v299_v39 = vld [vmem:[%s1553_s0 + $0xf8] sm:$0xf]  ;;  %v301_v40 = vld [vmem:[%s1553_s0 + $0x100] sm:$0xf] }
  0x4b   : > { %298 = vst [vmem:[%s1558_s6 + $0x78] sm:$0xf] %v297_v38  ;;  %300 = vst [vmem:[%s1558_s6 + $0x7c] sm:$0xf] %v299_v39  ;;  %v303_v41 = vld [vmem:[%s1553_s0 + $0x108] sm:$0xf] }
  0x4c   : > { %302 = vst [vmem:[%s1558_s6 + $0x80] sm:$0xf] %v301_v40  ;;  %v305_v42 = vld [vmem:[%s1553_s0 + $0x110] sm:$0xf]  ;;  %v307_v43 = vld [vmem:[%s1553_s0 + $0x118] sm:$0xf] }
  0x4d   : > { %304 = vst [vmem:[%s1558_s6 + $0x84] sm:$0xf] %v303_v41  ;;  %306 = vst [vmem:[%s1558_s6 + $0x88] sm:$0xf] %v305_v42  ;;  %v309_v44 = vld [vmem:[%s1553_s0 + $0x120] sm:$0xf] }
  0x4e   : > { %308 = vst [vmem:[%s1558_s6 + $0x8c] sm:$0xf] %v307_v43  ;;  %v311_v45 = vld [vmem:[%s1553_s0 + $0x128] sm:$0xf]  ;;  %v313_v46 = vld [vmem:[%s1553_s0 + $0x130] sm:$0xf] }
  0x4f   : > { %310 = vst [vmem:[%s1558_s6 + $0x90] sm:$0xf] %v309_v44  ;;  %312 = vst [vmem:[%s1558_s6 + $0x94] sm:$0xf] %v311_v45  ;;  %v315_v47 = vld [vmem:[%s1553_s0 + $0x138] sm:$0xf] }
  0x50   : > { %314 = vst [vmem:[%s1558_s6 + $0x98] sm:$0xf] %v313_v46  ;;  %v317_v48 = vld [vmem:[%s1553_s0 + $0x140] sm:$0xf]  ;;  %v319_v49 = vld [vmem:[%s1553_s0 + $0x148] sm:$0xf] }
  0x51   : > { %316 = vst [vmem:[%s1558_s6 + $0x9c] sm:$0xf] %v315_v47  ;;  %318 = vst [vmem:[%s1558_s6 + $0xa0] sm:$0xf] %v317_v48  ;;  %v321_v50 = vld [vmem:[%s1553_s0 + $0x150] sm:$0xf] }
  0x52   : > { %320 = vst [vmem:[%s1558_s6 + $0xa4] sm:$0xf] %v319_v49  ;;  %v323_v51 = vld [vmem:[%s1553_s0 + $0x158] sm:$0xf]  ;;  %v325_v52 = vld [vmem:[%s1553_s0 + $0x160] sm:$0xf] }
  0x53   : > { %322 = vst [vmem:[%s1558_s6 + $0xa8] sm:$0xf] %v321_v50  ;;  %324 = vst [vmem:[%s1558_s6 + $0xac] sm:$0xf] %v323_v51  ;;  %v327_v53 = vld [vmem:[%s1553_s0 + $0x168] sm:$0xf] }
  0x54   : > { %326 = vst [vmem:[%s1558_s6 + $0xb0] sm:$0xf] %v325_v52  ;;  %v329_v54 = vld [vmem:[%s1553_s0 + $0x170] sm:$0xf]  ;;  %v331_v55 = vld [vmem:[%s1553_s0 + $0x178] sm:$0xf] }
  0x55   : > { %328 = vst [vmem:[%s1558_s6 + $0xb4] sm:$0xf] %v327_v53  ;;  %330 = vst [vmem:[%s1558_s6 + $0xb8] sm:$0xf] %v329_v54 }
  0x56   : > { %332 = vst [vmem:[%s1558_s6 + $0xbc] sm:$0xf] %v331_v55 }
  0x57 PF: > { %p1087_p0 = scmp.ge.s32.totalorder %s1416_s22, 1  ;;  %p456_p1 = scmp.lt.s32.totalorder %s1416_s22, 7 }
  0x59   : > { %p457_p2 = pnand %p1087_p0, %p456_p1 }
  0x5a   : > { %s463_s5 = sand.u32 (!%p457_p2), 1, %s1392_s16   ;;  %s470_s23 = sand.u32 (!%p457_p2), 1, %s1384_s14  }
  0x5b   : > { %460 = sbr.rel (%p457_p2) target bundleno = 391 (0x187), region = 91  ;;  %s496_s0 = sand.u32 (!%p457_p2), 1, %s1376_s12  }
  0x5c   : > { %s1207_s28 = smul.u32 (!%p457_p2), 48, %s463_s5  ;;  %s1088_s11 = sshll.u32 (!%p457_p2), %s496_s0, 4 }
  0x5d   : > { %s1208_s7 = smul.u32 (!%p457_p2), 192, %s470_s23  ;;  %p502_p3 = scmp.lt.s32.totalorder (!%p457_p2), %s1404_s19, 1 }
  0x5e   : > { %s1666_s6 = scalar_lea.vmem (!%p457_p2), [#allocation3], %s1207_s28  ;;  %s1670_s25 = scalar_lea.vmem (!%p457_p2), [#allocation5], %s1088_s11 }
  0x5f   : > { %s1668_s1 = scalar_lea.vmem (!%p457_p2), [#allocation4], %s1208_s7  ;;  %p1089_p4 = scmp.ne.s32.totalorder (!%p457_p2), %s1400_s18, 0 }
  0x62   : > { %s1660_s26 = scalar_select %p502_p3, %s1404_s19, 1 }
  0x63   : > { %510 = sbr.rel (%p1089_p4) target bundleno = 106 (0x6a), region = 103  ;;  %v1418_v56 = vmov (!%p1089_p4), 0.0  }
  0x64   : > { %s504_s4 = scalar_lea.vmem %s1756_s2, %s1660_s26  ;;  %511 = vst [vmem:[#allocation2] sm:$0xff] (!%p1089_p4), %v1418_v56  ;;  %512 = vst [vmem:[#allocation2 + $0x8] sm:$0xff] (!%p1089_p4), %v1418_v56 }
  0x65   : > { %513 = vst [vmem:[#allocation2 + $0x10] sm:$0xff] (!%p1089_p4), %v1418_v56  ;;  %514 = vst [vmem:[#allocation2 + $0x18] sm:$0xff] (!%p1089_p4), %v1418_v56 }
  0x6a PF: > { %v1298_v57 = vld [vmem:[%s1668_s1 + $0x40] sm:$0xff]   ;;  %v1301_v60 = vld [vmem:[%s1668_s1 + $0x48] sm:$0xff]   ;;  %v1304_v63 = vld [vmem:[%s1668_s1 + $0x50] sm:$0xff]   ;;  %p1120_p5 = scmp.ne.s32.totalorder %s1400_s18, 2 }
  0x6b   : > { %v1299_v58 = vld [vmem:[%s1668_s1] sm:$0xff]   ;;  %1147 = vmatprep.subr.bf16.mxu0 %v1298_v57  ;;  %v1302_v61 = vld [vmem:[%s1668_s1 + $0x8] sm:$0xff]   ;;  %v1305_v0 = vld [vmem:[%s1668_s1 + $0x10] sm:$0xff]  }
  0x6c   : > { %v1300_v59 = vld [vmem:[%s1668_s1 + $0x80] sm:$0xff]   ;;  %1148 = vmatpush3.bf16.msra.mxu0 %v1299_v58  ;;  %v1303_v62 = vld [vmem:[%s1668_s1 + $0x88] sm:$0xff]   ;;  %v1306_v1 = vld [vmem:[%s1668_s1 + $0x90] sm:$0xff]  }
  0x6d   : > { %1185 = vmatprep.subr.bf16.mxu1 %v1300_v59  ;;  %1149 = vmatprep.subr.bf16.mxu0 %v1301_v60  ;;  %v1307_v2 = vld [vmem:[%s1668_s1 + $0x58] sm:$0xff]   ;;  %v1310_v5 = vld [vmem:[%s1668_s1 + $0x60] sm:$0xff]   ;;  %v1313_v8 = vld [vmem:[%s1668_s1 + $0x68] sm:$0xff]  }
  0x6e   : > { %1186 = vmatpush3.bf16.msra.mxu1 %v1300_v59  ;;  %v1308_v3 = vld [vmem:[%s1668_s1 + $0x18] sm:$0xff]   ;;  %v1312_v6 = vld [vmem:[%s1668_s1 + $0xa0] sm:$0xff]   ;;  %v1315_v9 = vld [vmem:[%s1668_s1 + $0xa8] sm:$0xff]  }
  0x6f   : > { %1187 = vmatprep.subr.bf16.mxu1 %v1303_v62  ;;  %v1309_v4 = vld [vmem:[%s1668_s1 + $0x98] sm:$0xff]   ;;  %v1311_v7 = vld [vmem:[%s1668_s1 + $0x20] sm:$0xff]   ;;  %v1314_v10 = vld [vmem:[%s1668_s1 + $0x28] sm:$0xff]  }
  0x70   : > { %1150 = vmatpush3.bf16.msra.mxu0 %v1302_v61  ;;  %v1316_v11 = vld [vmem:[%s1668_s1 + $0x70] sm:$0xff]   ;;  %v1319_v14 = vld [vmem:[%s1668_s1 + $0x78] sm:$0xff]   ;;  %v515_v29 = vld [vmem:[#allocation2] sm:$0xff] }
  0x71   : > { %1151 = vmatprep.subr.bf16.mxu0 %v1304_v63  ;;  %v1317_v12 = vld [vmem:[%s1668_s1 + $0x30] sm:$0xff]   ;;  %v1321_v15 = vld [vmem:[%s1668_s1 + $0xb8] sm:$0xff]   ;;  %v516_v34 = vld [vmem:[#allocation2 + $0x8] sm:$0xff] }
  0x72   : > { %1188 = vmatpush3.bf16.msra.mxu1 %v1303_v62  ;;  %v1318_v13 = vld [vmem:[%s1668_s1 + $0xb0] sm:$0xff]   ;;  %v1320_v18 = vld [vmem:[%s1668_s1 + $0x38] sm:$0xff]   ;;  %v1121_v53 = vld [vmem:[%s504_s4] ss:$0 sm:$0xff] (!%p1120_p5) }
  0x73   : > { %1189 = vmatprep.subr.bf16.mxu1 %v1306_v1  ;;  %v1324_v16 = vld [vmem:[%s1666_s6 + $0x4] ss:$12 sps:$4 sm:$0xff]   ;;  %v1325_v17 = vld [vmem:[%s1666_s6 + $0x8] ss:$12 sps:$4 sm:$0xff]   ;;  %v1322_v19 = vld [vmem:[%s1666_s6] ss:$12 sps:$4 sm:$0xff]  }
  0x74   : > { %1152 = vmatpush3.bf16.msra.mxu0 %v1305_v0  ;;  %783 = vmatprep.mubr.bf16.mxu0 %v1324_v16  ;;  %v1327_v20 = vld [vmem:[%s1666_s6 + $0x1c] ss:$12 sps:$4 sm:$0xff]   ;;  %v1326_v21 = vld [vmem:[%s1666_s6 + $0x20] ss:$12 sps:$4 sm:$0xff]   ;;  %v1329_v22 = vld [vmem:[%s1666_s6 + $0x18] ss:$12 sps:$4 sm:$0xff]  }
  0x75   : > { %1153 = vmatprep.subr.bf16.mxu0 %v1307_v2  ;;  %1201 = vmatprep.mubr.bf16.mxu1 %v1325_v17  ;;  %v517_v43 = vld [vmem:[#allocation2 + $0x10] sm:$0xff]  ;;  %v518_v47 = vld [vmem:[#allocation2 + $0x18] sm:$0xff] }
  0x76   : > { %1190 = vmatpush3.bf16.msra.mxu1 %v1306_v1 }
  0x77   : > { %1191 = vmatprep.subr.bf16.mxu1 %v1309_v4 }
  0x78   : > { %1154 = vmatpush3.bf16.msra.mxu0 %v1308_v3 }
  0x79   : > { %1155 = vmatprep.subr.bf16.mxu0 %v1310_v5 }
  0x7a   : > { %1192 = vmatpush3.bf16.msra.mxu1 %v1309_v4 }
  0x7b   : > { %1193 = vmatprep.subr.bf16.mxu1 %v1312_v6 }
  0x7c   : > { %1156 = vmatpush3.bf16.msra.mxu0 %v1311_v7 }
  0x7d   : > { %1157 = vmatprep.subr.bf16.mxu0 %v1313_v8 }
  0x7e   : > { %1194 = vmatpush3.bf16.msra.mxu1 %v1312_v6 }
  0x7f   : > { %1195 = vmatprep.subr.bf16.mxu1 %v1315_v9 }
  0x80   : > { %1158 = vmatpush3.bf16.msra.mxu0 %v1314_v10 }
  0x81   : > { %1159 = vmatprep.subr.bf16.mxu0 %v1316_v11 }
  0x82   : > { %1196 = vmatpush3.bf16.msra.mxu1 %v1315_v9 }
  0x83   : > { %1197 = vmatprep.subr.bf16.mxu1 %v1318_v13 }
  0x84   : > { %1160 = vmatpush3.bf16.msra.mxu0 %v1317_v12 }
  0x85   : > { %1161 = vmatprep.subr.bf16.mxu0 %v1319_v14 }
  0x86   : > { %1198 = vmatpush3.bf16.msra.mxu1 %v1318_v13 }
  0x87   : > { %1199 = vmatprep.subr.bf16.mxu1 %v1321_v15 }
  0x88   : > { %1162 = vmatpush3.bf16.msra.mxu0 %v1320_v18 }
  0x8a   : > { %1200 = vmatpush3.bf16.msra.mxu1 %v1321_v15 }
  0x8b   : > { %784 = vmatmul.mubr.bf16.vlgmr.msra.gmra.mrb[0].mxu0 %v1322_v19 }
  0x8c   : > { %791 = vmatprep.mubr.bf16.mxu0 %v1327_v20 }
  0x8d   : > { %1202 = vmatmul.mubr.bf16.vlgmr.msra.gmra.mrb[0].mxu1 %v1326_v21 }
  0x93   : > { %792 = vmatmul.mubr.bf16.gmra.mrb[4].mxu0 %v1329_v22 }
 0x15e   : > { %v1163_v23 = vpop.f32.mrb[0].mxu0 }
 0x15f   : > { %v1164_v24 = vpop.f32.mrb[1].mxu0 }
 0x160   : > { %v1165_v25 = vadd.f32 %v1164_v24, %v1163_v23  ;;  %v1166_v26 = vpop.f32.mrb[2].mxu0  ;;  %v1203_v27 = vpop.f32.mrb[0].mxu1 }
 0x161   : > { %v1167_v28 = vpop.f32.mrb[3].mxu0  ;;  %v834_v30 = vpop.f32.mrb[1].mxu1 }
 0x162   : > { %v1168_v31 = vadd.f32 %v1167_v28, %v1166_v26  ;;  %v835_v32 = vadd.f32 %v1165_v25, %v834_v30  ;;  %v1204_v33 = vpop.f32.mrb[2].mxu1 }
 0x163   : > { %v837_v35 = vpop.f32.mrb[3].mxu1 }
 0x164   : > { %v849_v36 = vadd.f32 %v835_v32, %v515_v29  ;;  %v838_v37 = vadd.f32 %v1168_v31, %v837_v35 }
 0x166   : > { %853 = vst [vmem:[#allocation2] sm:$0xff] %v849_v36  ;;  %v850_v38 = vadd.f32 %v838_v37, %v516_v34  ;;  %v1169_v39 = vpop.f32.mrb[4].mxu0 }
 0x167   : > { %v1170_v40 = vpop.f32.mrb[5].mxu0 }
 0x168   : > { %854 = vst [vmem:[#allocation2 + $0x8] sm:$0xff] %v850_v38  ;;  %v1171_v41 = vadd.f32 %v1170_v40, %v1169_v39  ;;  %v1172_v42 = vpop.f32.mrb[6].mxu0 }
 0x169   : > { %v1173_v44 = vpop.f32.mrb[7].mxu0 }
 0x16a   : > { %v843_v45 = vadd.f32 %v1203_v27, %v1171_v41  ;;  %v1174_v46 = vadd.f32 %v1173_v44, %v1172_v42  ;;  %860 = sbr.rel (%p1120_p5) target bundleno = 383 (0x17f), region = 107 }
 0x16c   : > { %v851_v48 = vadd.f32 %v843_v45, %v517_v43  ;;  %v846_v49 = vadd.f32 %v1204_v33, %v1174_v46 }
 0x16d   : > { %v861_v51 = vld [vmem:[#allocation2] sm:$0xff] (!%p1120_p5) }
 0x16e   : > { %855 = vst [vmem:[#allocation2 + $0x10] sm:$0xff] %v851_v48  ;;  %v852_v50 = vadd.f32 %v846_v49, %v518_v47  ;;  %v872_v54 = vadd.f32 (!%p1120_p5), %v1121_v53, %v861_v51 }
 0x16f   : > { %v862_v52 = vld [vmem:[#allocation2 + $0x8] sm:$0xff] (!%p1120_p5) }
 0x170   : > { %856 = vst [vmem:[#allocation2 + $0x18] sm:$0xff] %v852_v50  ;;  %v873_v55 = vadd.f32 (!%p1120_p5), %v1121_v53, %v862_v52  ;;  %v876_v60 = vmax.f32 (!%p1120_p5), %v872_v54, 0.0 }
 0x172   : > { %v877_v61 = vmax.f32 %v873_v55, 0.0 }
 0x174   : > { %v1139_v0 = vpack.c.bf16 %v877_v61, %v876_v60 }
 0x175   : > { %v863_v56 = vld [vmem:[#allocation2 + $0x10] sm:$0xff] }
 0x176   : > { %v874_v58 = vadd.f32 %v1121_v53, %v863_v56  ;;  %1140 = vst [vmem:[%s1670_s25] sm:$0xff] %v1139_v0  }
 0x177   : > { %v864_v57 = vld [vmem:[#allocation2 + $0x18] sm:$0xff] }
 0x178   : > { %v875_v59 = vadd.f32 %v1121_v53, %v864_v57  ;;  %v878_v62 = vmax.f32 %v874_v58, 0.0 }
 0x17a   : > { %v879_v63 = vmax.f32 %v875_v59, 0.0 }
 0x17c   : > { %v1144_v1 = vpack.c.bf16 %v879_v63, %v878_v62 }
 0x17e   : > { %1146 = vst [vmem:[%s1670_s25 + $0x8] sm:$0xff] %v1144_v1  }
 0x17f PF: > { %906 = sbr.rel (!%p1533_p12) target bundleno = 391 (0x187), region = 111  ;;  %s1127_s14 = sshll.u32 (%p1533_p12), %s1404_s19, 2  ;;  %v927_v2 = vld [vmem:[%s1670_s25] sm:$0xf] (%p1533_p12)  ;;  %v929_v3 = vld [vmem:[%s1670_s25 + $0x4] sm:$0xf] (%p1533_p12) }
 0x180   : > { %s911_s5 = scalar_lea.vmem (%p1533_p12), %s1757_s3, %s1127_s14 }
 0x181   : > { %928 = vst [vmem:[%s911_s5] sm:$0xf] (%p1533_p12), %v927_v2  ;;  %930 = vst [vmem:[%s911_s5 + $0x8] sm:$0xf] (%p1533_p12), %v929_v3 }
 0x185   : > { %v931_v4 = vld [vmem:[%s1670_s25 + $0x8] sm:$0xf] (%p1533_p12)  ;;  %v933_v5 = vld [vmem:[%s1670_s25 + $0xc] sm:$0xf] (%p1533_p12) }
 0x186   : > { %932 = vst [vmem:[%s911_s5 + $0x10] sm:$0xf] %v931_v4  ;;  %934 = vst [vmem:[%s911_s5 + $0x18] sm:$0xf] %v933_v5 }
 0x187 PF: > { %s13_s22 = sadd.s32 1, %s1416_s22   ;;  %s1767_s10 = sld [smem:[#allocation6_spill]] }
 0x188   : > { %p10_p6 = scmp.ge.s32.totalorder %s13_s22, 8   ;;  %s1768_s12 = smov %s1380_s13 }
 0x189   : > { %s1769_s13 = smov %s1531_s9  ;;  %s1770_s14 = smov %s1388_s15 }
 0x18a   : > { %s1771_s15 = smov %s1528_s8  ;;  %s1772_s16 = smov %s1396_s17 }
 0x18b   : > { %s1773_s17 = smov %s1514_s30  ;;  %s1774_s18 = smov %s1408_s20 }
 0x18c   : > { %s1775_s19 = smov %s1412_s21  ;;  %s1776_s20 = smov %s1779_s24 }
 0x18d   : > { %s1777_s21 = smov %s1767_s10  ;;  %12 = sbr.rel (!%p10_p6) target bundleno = 9 (0x9), region = 200 }

// kernel: my_resnet_forward.34
= control target key start
LH: loop header
LB: loop body
LE: loop exit
PB: predicated region body
PF: predicated region fallthrough
CT: control target
= control target key end

     0   :  { %s844_s12 = smov 0   ;;  %s846_s13 = smov 0   ;;  %s949_s0 = inlined_call_operand.vmem [shape: bf16[32,128], index: 0, kind: input, shape index: {}]   ;;  %s950_s1 = inlined_call_operand.vmem [shape: bf16[128,256], index: 1, kind: input, shape index: {}]   ;;  %s951_s2 = inlined_call_operand.vmem [shape: f32[1,256], index: 2, kind: input, shape index: {}]   ;;  %s952_s3 = inlined_call_operand.vmem [shape: bf16[32,256], index: 3, kind: output, shape index: {}]  }
   0x1   :  { %s848_s14 = smov 0   ;;  %s850_s15 = smov 0  }
   0x2   :  { %s852_s16 = smov 0  }
   0x3 LB: > { %s28_s17 = sadd.s32 1, %s818_s15  ;;  %s660_s18 = sadd.s32 4294967295, %s822_s16   ;;  %s822_s16 = sphi %s852_s16, %s13_s16   ;;  %s818_s15 = sphi %s850_s15, %s957_s15   ;;  %s814_s14 = sphi %s848_s14, %s956_s14   ;;  %s810_s13 = sphi %s846_s13, %s955_s13   ;;  %s806_s12 = sphi %s844_s12, %s954_s12  }
   0x4   : > { %p30_p0 = scmp.ge.s32.totalorder %s28_s17, 2  ;;  %p76_p1 = scmp.ne.s32.totalorder %s810_s13, %s806_s12 }
   0x5   : > { %p77_p2 = scmp.eq.s32.totalorder %s822_s16, 0  ;;  %p134_p4 = scmp.eq.s32.totalorder %s660_s18, 1 }
   0x6   : > { %s959_s17 = smov (%p30_p0, %s28_s17), 0  ;;  %s69_s20 = sadd.s32 1, %s810_s13 }
   0x7   : > { %p78_p3 = por %p77_p2, %p76_p1  ;;  %s65_s19 = ssub.s32 %s818_s15, %s959_s17 }
   0x8   : > { %p67_p5 = scmp.eq.s32.totalorder %s65_s19, 0  ;;  %p879_p6 = por %p134_p4, %p76_p1 }
   0x9   : > { %p664_p7 = scmp.ge.s32.totalorder %s822_s16, 2 }
   0xa   : > { %s884_s22 = scalar_select %p67_p5, %s810_s13, %s69_s20  }
   0xb   : > { %168 = sbr.rel (%p664_p7) target bundleno = 32 (0x20), region = 20 }
  0x12   : > { %171 = sbr.rel (!%p78_p3) target bundleno = 32 (0x20), region = 24  ;;  %s173_s23 = sand.u32 (%p78_p3), 1, %s810_s13  }
  0x13   : > { %s666_s24 = sshll.u32 (%p78_p3), %s818_s15, 2  ;;  %s665_s25 = sshll.u32 (%p78_p3), %s173_s23, 6 }
  0x14   : > { %s892_s28 = scalar_lea.vmem (%p78_p3), %s950_s1, %s666_s24  ;;  %s175_s29 = scalar_lea.vmem (%p78_p3), [#allocation2], %s665_s25 }
  0x15   : > { %v196_v0 = vld [vmem:[%s892_s28] sm:$0xf] (%p78_p3)  ;;  %v198_v1 = vld [vmem:[%s892_s28 + $0x8] sm:$0xf] (%p78_p3)  ;;  %v200_v2 = vld [vmem:[%s892_s28 + $0x10] sm:$0xf] (%p78_p3) }
  0x16   : > { %197 = vst [vmem:[%s175_s29] sm:$0xf] (%p78_p3), %v196_v0  ;;  %199 = vst [vmem:[%s175_s29 + $0x4] sm:$0xf] (%p78_p3), %v198_v1  ;;  %v202_v3 = vld [vmem:[%s892_s28 + $0x18] sm:$0xf] (%p78_p3) }
  0x17   : > { %v204_v4 = vld [vmem:[%s892_s28 + $0x20] sm:$0xf] (%p78_p3)  ;;  %201 = vst [vmem:[%s175_s29 + $0x8] sm:$0xf] (%p78_p3), %v200_v2  ;;  %203 = vst [vmem:[%s175_s29 + $0xc] sm:$0xf] (%p78_p3), %v202_v3 }
  0x18   : > { %205 = vst [vmem:[%s175_s29 + $0x10] sm:$0xf] (%p78_p3), %v204_v4  ;;  %v206_v5 = vld [vmem:[%s892_s28 + $0x28] sm:$0xf] (%p78_p3)  ;;  %v208_v6 = vld [vmem:[%s892_s28 + $0x30] sm:$0xf] (%p78_p3) }
  0x19   : > { %v210_v7 = vld [vmem:[%s892_s28 + $0x38] sm:$0xf]  ;;  %207 = vst [vmem:[%s175_s29 + $0x14] sm:$0xf] %v206_v5  ;;  %209 = vst [vmem:[%s175_s29 + $0x18] sm:$0xf] %v208_v6 }
  0x1a   : > { %211 = vst [vmem:[%s175_s29 + $0x1c] sm:$0xf] %v210_v7  ;;  %v212_v8 = vld [vmem:[%s892_s28 + $0x40] sm:$0xf]  ;;  %v214_v9 = vld [vmem:[%s892_s28 + $0x48] sm:$0xf] }
  0x1b   : > { %v216_v10 = vld [vmem:[%s892_s28 + $0x50] sm:$0xf]  ;;  %213 = vst [vmem:[%s175_s29 + $0x20] sm:$0xf] %v212_v8  ;;  %215 = vst [vmem:[%s175_s29 + $0x24] sm:$0xf] %v214_v9 }
  0x1c   : > { %217 = vst [vmem:[%s175_s29 + $0x28] sm:$0xf] %v216_v10  ;;  %v218_v11 = vld [vmem:[%s892_s28 + $0x58] sm:$0xf]  ;;  %v220_v12 = vld [vmem:[%s892_s28 + $0x60] sm:$0xf] }
  0x1d   : > { %v222_v13 = vld [vmem:[%s892_s28 + $0x68] sm:$0xf]  ;;  %219 = vst [vmem:[%s175_s29 + $0x2c] sm:$0xf] %v218_v11  ;;  %221 = vst [vmem:[%s175_s29 + $0x30] sm:$0xf] %v220_v12 }
  0x1e   : > { %223 = vst [vmem:[%s175_s29 + $0x34] sm:$0xf] %v222_v13  ;;  %v224_v14 = vld [vmem:[%s892_s28 + $0x70] sm:$0xf]  ;;  %v226_v15 = vld [vmem:[%s892_s28 + $0x78] sm:$0xf] }
  0x1f   : > { %225 = vst [vmem:[%s175_s29 + $0x38] sm:$0xf] %v224_v14  ;;  %227 = vst [vmem:[%s175_s29 + $0x3c] sm:$0xf] %v226_v15 }
  0x20 PF: > { %p667_p8 = scmp.ge.s32.totalorder %s822_s16, 1  ;;  %p287_p9 = scmp.lt.s32.totalorder %s822_s16, 3 }
  0x22   : > { %p288_p10 = pnand %p667_p8, %p287_p9 }
  0x23   : > { %s294_s30 = sand.u32 (!%p288_p10), 1, %s806_s12   ;;  %v782_v16 = vld [vmem:[%s949_s0] sm:$0xff] (!%p288_p10)   ;;  %v783_v25 = vld [vmem:[%s949_s0 + $0x8] sm:$0xff] (!%p288_p10)   ;;  %p337_p11 = scmp.lt.s32.totalorder (!%p288_p10), %s814_s14, 1 }
  0x24   : > { %291 = sbr.rel (%p288_p10) target bundleno = 300 (0x12c), region = 69  ;;  %s668_s6 = sshll.u32 (!%p288_p10), %s294_s30, 6  ;;  %730 = vmatprep.mubr.bf16.mxu0 (!%p288_p10), %v782_v16 }
  0x25   : > { %s296_s7 = scalar_lea.vmem (!%p288_p10), [#allocation2], %s668_s6  ;;  %s669_s20 = sshll.u32 (!%p288_p10), %s294_s30, 4 }
  0x26   : > { %v774_v17 = vld [vmem:[%s296_s7] sm:$0xff] (!%p288_p10)   ;;  %v775_v18 = vld [vmem:[%s296_s7 + $0x8] sm:$0xff] (!%p288_p10)   ;;  %v776_v19 = vld [vmem:[%s296_s7 + $0x10] sm:$0xff] (!%p288_p10)   ;;  %s326_s23 = scalar_lea.vmem (!%p288_p10), [#allocation3], %s669_s20 }
  0x27   : > { %714 = vmatprep.subr.bf16.mxu0 (!%p288_p10), %v774_v17  ;;  %v777_v20 = vld [vmem:[%s296_s7 + $0x18] sm:$0xff] (!%p288_p10)   ;;  %v778_v21 = vld [vmem:[%s296_s7 + $0x20] sm:$0xff] (!%p288_p10)   ;;  %v779_v22 = vld [vmem:[%s296_s7 + $0x28] sm:$0xff] (!%p288_p10)  }
  0x28   : > { %715 = vmatpush3.bf16.msra.mxu0 (!%p288_p10), %v774_v17  ;;  %v780_v23 = vld [vmem:[%s296_s7 + $0x30] sm:$0xff] (!%p288_p10)   ;;  %v781_v24 = vld [vmem:[%s296_s7 + $0x38] sm:$0xff] (!%p288_p10)  }
  0x29   : > { %716 = vmatprep.subr.bf16.mxu0 (!%p288_p10), %v775_v18 }
  0x2b   : > { %s338_s10 = scalar_select %p337_p11, %s814_s14, 1 }
  0x2c   : > { %717 = vmatpush3.bf16.msra.mxu0 %v775_v18  ;;  %s686_s24 = sshll.u32 (%p879_p6), %s814_s14, 2 }
  0x2d   : > { %718 = vmatprep.subr.bf16.mxu0 %v776_v19  ;;  %s339_s19 = scalar_lea.vmem %s951_s2, %s338_s10  ;;  %s509_s26 = scalar_lea.vmem (%p879_p6), %s952_s3, %s686_s24 }
  0x2e   : > { %v670_v27 = vld [vmem:[%s339_s19] ss:$0 sm:$0xff] }
  0x30   : > { %719 = vmatpush3.bf16.msra.mxu0 %v776_v19 }
  0x31   : > { %720 = vmatprep.subr.bf16.mxu0 %v777_v20 }
  0x34   : > { %721 = vmatpush3.bf16.msra.mxu0 %v777_v20 }
  0x35   : > { %722 = vmatprep.subr.bf16.mxu0 %v778_v21 }
  0x38   : > { %723 = vmatpush3.bf16.msra.mxu0 %v778_v21 }
  0x39   : > { %724 = vmatprep.subr.bf16.mxu0 %v779_v22 }
  0x3c   : > { %725 = vmatpush3.bf16.msra.mxu0 %v779_v22 }
  0x3d   : > { %726 = vmatprep.subr.bf16.mxu0 %v780_v23 }
  0x40   : > { %727 = vmatpush3.bf16.msra.mxu0 %v780_v23 }
  0x41   : > { %728 = vmatprep.subr.bf16.mxu0 %v781_v24 }
  0x44   : > { %729 = vmatpush3.bf16.msra.mxu0 %v781_v24 }
  0x47   : > { %731 = vmatmul.mubr.bf16.vlgmr.msra.gmra.mrb[0].mxu0 %v783_v25 }
 0x11a   : > { %v732_v26 = vpop.f32.mrb[0].mxu0 }
 0x11b   : > { %v463_v28 = vpop.f32.mrb[1].mxu0  ;;  %v472_v30 = vadd.f32 %v732_v26, %v670_v27 }
 0x11c   : > { %v733_v29 = vpop.f32.mrb[2].mxu0  ;;  %v464_v33 = vadd.f32 %v670_v27, %v463_v28  ;;  %504 = sbr.rel (!%p879_p6) target bundleno = 300 (0x12c), region = 77 }
 0x11d   : > { %v475_v31 = vadd.f32 %v733_v29, %v670_v27  ;;  %v466_v32 = vpop.f32.mrb[3].mxu0 }
 0x11e   : > { %v467_v34 = vadd.f32 %v670_v27, %v466_v32 }
 0x11f   : > { %v701_v35 = vpack.c.bf16 %v475_v31, %v472_v30 }
 0x120   : > { %v696_v36 = vpack.c.bf16 %v467_v34, %v464_v33 }
 0x121   : > { %703 = vst [vmem:[%s326_s23 + $0x8] sm:$0xff] %v701_v35  }
 0x122   : > { %697 = vst [vmem:[%s326_s23] sm:$0xff] %v696_v36  }
 0x128   : > { %v529_v39 = vld [vmem:[%s326_s23 + $0x8] sm:$0xf]  ;;  %v531_v40 = vld [vmem:[%s326_s23 + $0xc] sm:$0xf] }
 0x129   : > { %v525_v37 = vld [vmem:[%s326_s23] sm:$0xf]  ;;  %v527_v38 = vld [vmem:[%s326_s23 + $0x4] sm:$0xf]  ;;  %530 = vst [vmem:[%s509_s26 + $0x10] sm:$0xf] %v529_v39 }
 0x12a   : > { %526 = vst [vmem:[%s509_s26] sm:$0xf] %v525_v37  ;;  %528 = vst [vmem:[%s509_s26 + $0x8] sm:$0xf] %v527_v38 }
 0x12b   : > { %532 = vst [vmem:[%s509_s26 + $0x18] sm:$0xf] %v531_v40 }
 0x12c PF: > { %s13_s16 = sadd.s32 1, %s822_s16   ;;  %s954_s12 = smov %s810_s13 }
 0x12d   : > { %p10_p12 = scmp.ge.s32.totalorder %s13_s16, 4   ;;  %s955_s13 = smov %s884_s22 }
 0x12e   : > { %s956_s14 = smov %s818_s15  ;;  %s957_s15 = smov %s959_s17 }
 0x12f   :  { %12 = sbr.rel (!%p10_p12) target bundleno = 3 (0x3), region = 155 }

// kernel: my_resnet_forward.35
= control target key start
LH: loop header
LB: loop body
LE: loop exit
PB: predicated region body
PF: predicated region fallthrough
CT: control target
= control target key end

     0   :  { %s1934_s0 = inlined_call_operand.vmem [shape: bf16[32,2304], index: 0, kind: input, shape index: {}]   ;;  %s1935_s1 = inlined_call_operand.vmem [shape: bf16[2304,256], index: 1, kind: input, shape index: {}]   ;;  %s1936_s2 = inlined_call_operand.vmem [shape: f32[1,256], index: 2, kind: input, shape index: {}]   ;;  %s1937_s3 = inlined_call_operand.vmem [shape: bf16[32,256], index: 3, kind: input, shape index: {}]   ;;  %s1938_s4 = inlined_call_operand.vmem [shape: bf16[32,256], index: 4, kind: output, shape index: {}]  }
   0x1   :  { %1941 = sst [smem:[#allocation9_spill]] %s1934_s0 }
   0x2   :  { %s1594_s15 = smov 0   ;;  %s1596_s16 = smov 0  }
   0x3   :  { %s1598_s17 = smov 0   ;;  %s1600_s18 = smov 0  }
   0x4   :  { %s1602_s19 = smov 0   ;;  %s1604_s20 = smov 0  }
   0x5   :  { %s1606_s21 = smov 0   ;;  %s1608_s22 = smov 0  }
   0x6   :  { %s1610_s23 = smov 0   ;;  %s1612_s24 = smov 0  }
   0x7   :  { %s1614_s25 = smov 0  }
   0x8 LB: > { %s1210_s26 = sadd.s32 4294967295, %s1566_s25   ;;  %s26_s27 = sadd.s32 1, %s1558_s23  ;;  %s1566_s25 = sphi %s1614_s25, %s14_s25   ;;  %s1562_s24 = sphi %s1612_s24, %s1960_s24   ;;  %s1558_s23 = sphi %s1610_s23, %s1959_s23   ;;  %s1554_s22 = sphi %s1608_s22, %s1958_s22   ;;  %s1550_s21 = sphi %s1606_s21, %s1957_s21   ;;  %s1546_s20 = sphi %s1604_s20, %s1956_s20   ;;  %s1542_s19 = sphi %s1602_s19, %s1955_s19   ;;  %s1538_s18 = sphi %s1600_s18, %s1954_s18   ;;  %s1534_s17 = sphi %s1598_s17, %s1953_s17   ;;  %s1530_s16 = sphi %s1596_s16, %s1952_s16   ;;  %s1526_s15 = sphi %s1594_s15, %s1951_s15  }
   0x9   : > { %p27_p0 = scmp.ge.s32.totalorder %s26_s27, 6  ;;  %s29_s28 = sadd.s32 1, %s1562_s24 }
   0xa   : > { %s42_s29 = sadd.s32 1, %s1546_s20  ;;  %p49_p1 = scmp.ne.s32.totalorder %s1546_s20, %s1542_s19 }
   0xb   : > { %s1962_s27 = smov (%p27_p0, %s26_s27), 0  ;;  %s1964_s28 = smov (!%p27_p0, %s29_s28), %s1562_s24 }
   0xc   : > { %1942 = sst [smem:[#allocation7_spill]] %s1962_s27  ;;  %s38_s30 = ssub.s32 %s1558_s23, %s1962_s27 }
   0xd   : > { %p50_p2 = scmp.eq.s32.totalorder %s1566_s25, 0  ;;  %p31_p3 = scmp.ge.s32.totalorder %s1964_s28, 2 }
   0xe   : > { %p40_p4 = scmp.eq.s32.totalorder %s38_s30, 0  ;;  %s70_s6 = sadd.s32 1, %s1538_s18 }
   0xf   : > { %p1663_p5 = por %p50_p2, %p49_p1  ;;  %s1966_s28 = smov (%p31_p3, %s1964_s28), 0 }
  0x10   : > { %1944 = sst [smem:[#allocation8_spill]] %s1966_s28  ;;  %s66_s8 = ssub.s32 %s1562_s24, %s1966_s28 }
  0x11   : > { %s1671_s7 = scalar_select %p40_p4, %s1546_s20, %s42_s29  }
  0x12   : > { %p77_p6 = scmp.ne.s32.totalorder %s1538_s18, %s1534_s17  ;;  %s67_s9 = sor.u32 %s66_s8, %s38_s30 }
  0x13   : > { %p122_p7 = scmp.eq.s32.totalorder %s66_s8, 0  ;;  %p68_p8 = scmp.eq.s32.totalorder %s67_s9, 0 }
  0x14   : > { %p1679_p9 = por %p77_p6, %p50_p2  ;;  %s124_s11 = sadd.s32 1, %s1530_s16 }
  0x15   : > { %p131_p10 = scmp.ne.s32.totalorder %s1530_s16, %s1526_s15  ;;  %p163_p12 = scmp.eq.s32.totalorder %s1210_s26, 11 }
  0x16   : > { %s1687_s12 = scalar_select %p68_p8, %s1538_s18, %s70_s6  }
  0x17   : > { %s1690_s13 = scalar_select %p122_p7, %s1530_s16, %s124_s11  }
  0x18   : > { %p1694_p11 = por %p131_p10, %p50_p2  ;;  %p1698_p13 = por %p163_p12, %p131_p10 }
  0x19   : > { %p1213_p0 = scmp.ge.s32.totalorder %s1566_s25, 12 }
  0x1b   : > { %185 = sbr.rel (%p1213_p0) target bundleno = 93 (0x5d), region = 16 }
  0x22   : > { %188 = sbr.rel (!%p1663_p5) target bundleno = 47 (0x2f), region = 20  ;;  %s190_s30 = sand.u32 (%p1663_p5), 1, %s1546_s20  }
  0x23   : > { %s1271_s6 = smul.u32 (%p1663_p5), 12, %s1558_s23  ;;  %s1948_s0 = sld [smem:[#allocation9_spill]] (%p1663_p5) }
  0x24   : > { %s1355_s8 = smul.u32 (%p1663_p5), 48, %s190_s30 }
  0x26   : > { %s192_s26 = scalar_lea.vmem (%p1663_p5), [#allocation3], %s1355_s8 }
  0x29   : > { %s198_s28 = scalar_lea.vmem %s1948_s0, %s1271_s6 }
  0x2a   : > { %v213_v0 = vld [vmem:[%s198_s28] sm:$0xff]  ;;  %v215_v1 = vld [vmem:[%s198_s28 + $0x48] sm:$0xff]  ;;  %v217_v2 = vld [vmem:[%s198_s28 + $0x90] sm:$0xff] }
  0x2b   : > { %214 = vst [vmem:[%s192_s26] sm:$0xff] %v213_v0  ;;  %216 = vst [vmem:[%s192_s26 + $0xc] sm:$0xff] %v215_v1  ;;  %v219_v3 = vld [vmem:[%s198_s28 + $0xd8] sm:$0xff]  ;;  %v1215_v4 = vld [vmem:[%s198_s28 + $0x8] sm:$0xf] }
  0x2c   : > { %218 = vst [vmem:[%s192_s26 + $0x18] sm:$0xff] %v217_v2  ;;  %v1217_v5 = vld [vmem:[%s198_s28 + $0x50] sm:$0xf]  ;;  %220 = vst [vmem:[%s192_s26 + $0x24] sm:$0xff] %v219_v3  ;;  %v1219_v6 = vld [vmem:[%s198_s28 + $0x98] sm:$0xf] }
  0x2d   : > { %1216 = vst [vmem:[%s192_s26 + $0x8] sm:$0xf] %v1215_v4  ;;  %1218 = vst [vmem:[%s192_s26 + $0x14] sm:$0xf] %v1217_v5  ;;  %v1221_v7 = vld [vmem:[%s198_s28 + $0xe0] sm:$0xf] }
  0x2e   : > { %1220 = vst [vmem:[%s192_s26 + $0x20] sm:$0xf] %v1219_v6  ;;  %1222 = vst [vmem:[%s192_s26 + $0x2c] sm:$0xf] %v1221_v7 }
  0x2f PF: > { %241 = sbr.rel (!%p1679_p9) target bundleno = 86 (0x56), region = 46  ;;  %s243_s5 = sand.u32 (%p1679_p9), 1, %s1538_s18  }
  0x30   : > { %s1272_s30 = smul.u32 (%p1679_p9), 96, %s1558_s23 }
  0x31   : > { %s1356_s6 = smul.u32 (%p1679_p9), 192, %s243_s5 }
  0x32   : > { %s248_s8 = sadd.s32 (%p1679_p9), %s1562_s24, %s1272_s30 }
  0x33   : > { %s1224_s9 = sshll.u32 (%p1679_p9), %s248_s8, 2  ;;  %s1723_s28 = scalar_lea.vmem (%p1679_p9), [#allocation4], %s1356_s6 }
  0x34   : > { %s1718_s27 = scalar_lea.vmem (%p1679_p9), %s1935_s1, %s1224_s9 }
  0x35   : > { %v266_v8 = vld [vmem:[%s1718_s27] sm:$0xf] (%p1679_p9)  ;;  %v268_v9 = vld [vmem:[%s1718_s27 + $0x8] sm:$0xf] (%p1679_p9)  ;;  %v270_v10 = vld [vmem:[%s1718_s27 + $0x10] sm:$0xf] (%p1679_p9) }
  0x36   : > { %267 = vst [vmem:[%s1723_s28] sm:$0xf] %v266_v8  ;;  %269 = vst [vmem:[%s1723_s28 + $0x4] sm:$0xf] %v268_v9  ;;  %v272_v11 = vld [vmem:[%s1718_s27 + $0x18] sm:$0xf] }
  0x37   : > { %271 = vst [vmem:[%s1723_s28 + $0x8] sm:$0xf] %v270_v10  ;;  %v274_v12 = vld [vmem:[%s1718_s27 + $0x20] sm:$0xf]  ;;  %v276_v13 = vld [vmem:[%s1718_s27 + $0x28] sm:$0xf] }
  0x38   : > { %273 = vst [vmem:[%s1723_s28 + $0xc] sm:$0xf] %v272_v11  ;;  %275 = vst [vmem:[%s1723_s28 + $0x10] sm:$0xf] %v274_v12  ;;  %v278_v14 = vld [vmem:[%s1718_s27 + $0x30] sm:$0xf] }
  0x39   : > { %277 = vst [vmem:[%s1723_s28 + $0x14] sm:$0xf] %v276_v13  ;;  %v280_v15 = vld [vmem:[%s1718_s27 + $0x38] sm:$0xf]  ;;  %v282_v16 = vld [vmem:[%s1718_s27 + $0x40] sm:$0xf] }
  0x3a   : > { %279 = vst [vmem:[%s1723_s28 + $0x18] sm:$0xf] %v278_v14  ;;  %281 = vst [vmem:[%s1723_s28 + $0x1c] sm:$0xf] %v280_v15  ;;  %v284_v17 = vld [vmem:[%s1718_s27 + $0x48] sm:$0xf] }
  0x3b   : > { %283 = vst [vmem:[%s1723_s28 + $0x20] sm:$0xf] %v282_v16  ;;  %v286_v18 = vld [vmem:[%s1718_s27 + $0x50] sm:$0xf]  ;;  %v288_v19 = vld [vmem:[%s1718_s27 + $0x58] sm:$0xf] }
  0x3c   : > { %285 = vst [vmem:[%s1723_s28 + $0x24] sm:$0xf] %v284_v17  ;;  %287 = vst [vmem:[%s1723_s28 + $0x28] sm:$0xf] %v286_v18  ;;  %v290_v20 = vld [vmem:[%s1718_s27 + $0x60] sm:$0xf] }
  0x3d   : > { %289 = vst [vmem:[%s1723_s28 + $0x2c] sm:$0xf] %v288_v19  ;;  %v292_v21 = vld [vmem:[%s1718_s27 + $0x68] sm:$0xf]  ;;  %v294_v22 = vld [vmem:[%s1718_s27 + $0x70] sm:$0xf] }
  0x3e   : > { %291 = vst [vmem:[%s1723_s28 + $0x30] sm:$0xf] %v290_v20  ;;  %293 = vst [vmem:[%s1723_s28 + $0x34] sm:$0xf] %v292_v21  ;;  %v296_v23 = vld [vmem:[%s1718_s27 + $0x78] sm:$0xf] }
  0x3f   : > { %295 = vst [vmem:[%s1723_s28 + $0x38] sm:$0xf] %v294_v22  ;;  %v298_v24 = vld [vmem:[%s1718_s27 + $0x80] sm:$0xf]  ;;  %v300_v25 = vld [vmem:[%s1718_s27 + $0x88] sm:$0xf] }
  0x40   : > { %297 = vst [vmem:[%s1723_s28 + $0x3c] sm:$0xf] %v296_v23  ;;  %299 = vst [vmem:[%s1723_s28 + $0x40] sm:$0xf] %v298_v24  ;;  %v302_v26 = vld [vmem:[%s1718_s27 + $0x90] sm:$0xf] }
  0x41   : > { %301 = vst [vmem:[%s1723_s28 + $0x44] sm:$0xf] %v300_v25  ;;  %v304_v27 = vld [vmem:[%s1718_s27 + $0x98] sm:$0xf]  ;;  %v306_v28 = vld [vmem:[%s1718_s27 + $0xa0] sm:$0xf] }
  0x42   : > { %303 = vst [vmem:[%s1723_s28 + $0x48] sm:$0xf] %v302_v26  ;;  %305 = vst [vmem:[%s1723_s28 + $0x4c] sm:$0xf] %v304_v27  ;;  %v308_v29 = vld [vmem:[%s1718_s27 + $0xa8] sm:$0xf] }
  0x43   : > { %307 = vst [vmem:[%s1723_s28 + $0x50] sm:$0xf] %v306_v28  ;;  %v310_v30 = vld [vmem:[%s1718_s27 + $0xb0] sm:$0xf]  ;;  %v312_v31 = vld [vmem:[%s1718_s27 + $0xb8] sm:$0xf] }
  0x44   : > { %309 = vst [vmem:[%s1723_s28 + $0x54] sm:$0xf] %v308_v29  ;;  %311 = vst [vmem:[%s1723_s28 + $0x58] sm:$0xf] %v310_v30  ;;  %v314_v32 = vld [vmem:[%s1718_s27 + $0xc0] sm:$0xf] }
  0x45   : > { %313 = vst [vmem:[%s1723_s28 + $0x5c] sm:$0xf] %v312_v31  ;;  %v316_v33 = vld [vmem:[%s1718_s27 + $0xc8] sm:$0xf]  ;;  %v318_v34 = vld [vmem:[%s1718_s27 + $0xd0] sm:$0xf] }
  0x46   : > { %315 = vst [vmem:[%s1723_s28 + $0x60] sm:$0xf] %v314_v32  ;;  %317 = vst [vmem:[%s1723_s28 + $0x64] sm:$0xf] %v316_v33  ;;  %v320_v35 = vld [vmem:[%s1718_s27 + $0xd8] sm:$0xf] }
  0x47   : > { %319 = vst [vmem:[%s1723_s28 + $0x68] sm:$0xf] %v318_v34  ;;  %v322_v36 = vld [vmem:[%s1718_s27 + $0xe0] sm:$0xf]  ;;  %v324_v37 = vld [vmem:[%s1718_s27 + $0xe8] sm:$0xf] }
  0x48   : > { %321 = vst [vmem:[%s1723_s28 + $0x6c] sm:$0xf] %v320_v35  ;;  %323 = vst [vmem:[%s1723_s28 + $0x70] sm:$0xf] %v322_v36  ;;  %v326_v38 = vld [vmem:[%s1718_s27 + $0xf0] sm:$0xf] }
  0x49   : > { %325 = vst [vmem:[%s1723_s28 + $0x74] sm:$0xf] %v324_v37  ;;  %v328_v39 = vld [vmem:[%s1718_s27 + $0xf8] sm:$0xf]  ;;  %v330_v40 = vld [vmem:[%s1718_s27 + $0x100] sm:$0xf] }
  0x4a   : > { %327 = vst [vmem:[%s1723_s28 + $0x78] sm:$0xf] %v326_v38  ;;  %329 = vst [vmem:[%s1723_s28 + $0x7c] sm:$0xf] %v328_v39  ;;  %v332_v41 = vld [vmem:[%s1718_s27 + $0x108] sm:$0xf] }
  0x4b   : > { %331 = vst [vmem:[%s1723_s28 + $0x80] sm:$0xf] %v330_v40  ;;  %v334_v42 = vld [vmem:[%s1718_s27 + $0x110] sm:$0xf]  ;;  %v336_v43 = vld [vmem:[%s1718_s27 + $0x118] sm:$0xf] }
  0x4c   : > { %333 = vst [vmem:[%s1723_s28 + $0x84] sm:$0xf] %v332_v41  ;;  %335 = vst [vmem:[%s1723_s28 + $0x88] sm:$0xf] %v334_v42  ;;  %v338_v44 = vld [vmem:[%s1718_s27 + $0x120] sm:$0xf] }
  0x4d   : > { %337 = vst [vmem:[%s1723_s28 + $0x8c] sm:$0xf] %v336_v43  ;;  %v340_v45 = vld [vmem:[%s1718_s27 + $0x128] sm:$0xf]  ;;  %v342_v46 = vld [vmem:[%s1718_s27 + $0x130] sm:$0xf] }
  0x4e   : > { %339 = vst [vmem:[%s1723_s28 + $0x90] sm:$0xf] %v338_v44  ;;  %341 = vst [vmem:[%s1723_s28 + $0x94] sm:$0xf] %v340_v45  ;;  %v344_v47 = vld [vmem:[%s1718_s27 + $0x138] sm:$0xf] }
  0x4f   : > { %343 = vst [vmem:[%s1723_s28 + $0x98] sm:$0xf] %v342_v46  ;;  %v346_v48 = vld [vmem:[%s1718_s27 + $0x140] sm:$0xf]  ;;  %v348_v49 = vld [vmem:[%s1718_s27 + $0x148] sm:$0xf] }
  0x50   : > { %345 = vst [vmem:[%s1723_s28 + $0x9c] sm:$0xf] %v344_v47  ;;  %347 = vst [vmem:[%s1723_s28 + $0xa0] sm:$0xf] %v346_v48  ;;  %v350_v50 = vld [vmem:[%s1718_s27 + $0x150] sm:$0xf] }
  0x51   : > { %349 = vst [vmem:[%s1723_s28 + $0xa4] sm:$0xf] %v348_v49  ;;  %v352_v51 = vld [vmem:[%s1718_s27 + $0x158] sm:$0xf]  ;;  %v354_v52 = vld [vmem:[%s1718_s27 + $0x160] sm:$0xf] }
  0x52   : > { %351 = vst [vmem:[%s1723_s28 + $0xa8] sm:$0xf] %v350_v50  ;;  %353 = vst [vmem:[%s1723_s28 + $0xac] sm:$0xf] %v352_v51  ;;  %v356_v53 = vld [vmem:[%s1718_s27 + $0x168] sm:$0xf] }
  0x53   : > { %355 = vst [vmem:[%s1723_s28 + $0xb0] sm:$0xf] %v354_v52  ;;  %v358_v54 = vld [vmem:[%s1718_s27 + $0x170] sm:$0xf]  ;;  %v360_v55 = vld [vmem:[%s1718_s27 + $0x178] sm:$0xf] }
  0x54   : > { %357 = vst [vmem:[%s1723_s28 + $0xb4] sm:$0xf] %v356_v53  ;;  %359 = vst [vmem:[%s1723_s28 + $0xb8] sm:$0xf] %v358_v54 }
  0x55   : > { %361 = vst [vmem:[%s1723_s28 + $0xbc] sm:$0xf] %v360_v55 }
  0x56 PF: > { %486 = sbr.rel (!%p1694_p11) target bundleno = 93 (0x5d), region = 91  ;;  %s488_s0 = sand.u32 (%p1694_p11), 1, %s1530_s16  }
  0x57   : > { %s1226_s10 = sshll.u32 (%p1694_p11), %s1562_s24, 2  ;;  %s1225_s26 = sshll.u32 (%p1694_p11), %s488_s0, 4 }
  0x58   : > { %s495_s6 = scalar_lea.vmem (%p1694_p11), %s1937_s3, %s1226_s10  ;;  %s490_s8 = scalar_lea.vmem (%p1694_p11), [#allocation5], %s1225_s26 }
  0x59   : > { %v511_v56 = vld [vmem:[%s495_s6] sm:$0xf] (%p1694_p11)  ;;  %v513_v57 = vld [vmem:[%s495_s6 + $0x8] sm:$0xf] (%p1694_p11)  ;;  %v515_v58 = vld [vmem:[%s495_s6 + $0x10] sm:$0xf] (%p1694_p11) }
  0x5a   : > { %512 = vst [vmem:[%s490_s8] sm:$0xf] (%p1694_p11), %v511_v56  ;;  %514 = vst [vmem:[%s490_s8 + $0x4] sm:$0xf] (%p1694_p11), %v513_v57  ;;  %v517_v59 = vld [vmem:[%s495_s6 + $0x18] sm:$0xf] (%p1694_p11) }
  0x5b   : > { %516 = vst [vmem:[%s490_s8 + $0x8] sm:$0xf] (%p1694_p11), %v515_v58  ;;  %518 = vst [vmem:[%s490_s8 + $0xc] sm:$0xf] (%p1694_p11), %v517_v59 }
  0x5d PF: > { %p1227_p1 = scmp.ge.s32.totalorder %s1566_s25, 1  ;;  %p548_p2 = scmp.lt.s32.totalorder %s1566_s25, 13 }
  0x5f   : > { %p549_p3 = pnand %p1227_p1, %p548_p2 }
  0x60   : > { %s555_s27 = sand.u32 (!%p549_p3), 1, %s1542_s19   ;;  %s562_s14 = sand.u32 (!%p549_p3), 1, %s1534_s17  }
  0x61   : > { %552 = sbr.rel (%p549_p3) target bundleno = 399 (0x18f), region = 132  ;;  %s569_s11 = sand.u32 (!%p549_p3), 1, %s1526_s15  }
  0x62   : > { %s1357_s9 = smul.u32 (!%p549_p3), 48, %s555_s27  ;;  %s1830_s0 = sshll.u32 (!%p549_p3), %s569_s11, 4 }
  0x63   : > { %s1358_s28 = smul.u32 (!%p549_p3), 192, %s562_s14  ;;  %p607_p4 = scmp.lt.s32.totalorder (!%p549_p3), %s1554_s22, 1 }
  0x64   : > { %s1840_s6 = scalar_lea.vmem (!%p549_p3), [#allocation3], %s1357_s9  ;;  %s571_s17 = scalar_lea.vmem (!%p549_p3), [#allocation5], %s1830_s0 }
  0x65   : > { %s1842_s8 = scalar_lea.vmem (!%p549_p3), [#allocation4], %s1358_s28  ;;  %s1846_s19 = scalar_lea.vmem (!%p549_p3), [#allocation6], %s1830_s0 }
  0x66   : > { %p1230_p5 = scmp.ne.s32.totalorder (!%p549_p3), %s1550_s21, 0 }
  0x68   : > { %s1834_s10 = scalar_select %p607_p4, %s1554_s22, 1 }
  0x69   : > { %616 = sbr.rel (%p1230_p5) target bundleno = 112 (0x70), region = 148  ;;  %v1568_v60 = vmov (!%p1230_p5), 0.0  }
  0x6a   : > { %s609_s30 = scalar_lea.vmem %s1936_s2, %s1834_s10  ;;  %617 = vst [vmem:[#allocation2] sm:$0xff] (!%p1230_p5), %v1568_v60  ;;  %618 = vst [vmem:[#allocation2 + $0x8] sm:$0xff] (!%p1230_p5), %v1568_v60 }
  0x6b   : > { %619 = vst [vmem:[#allocation2 + $0x10] sm:$0xff] (!%p1230_p5), %v1568_v60  ;;  %620 = vst [vmem:[#allocation2 + $0x18] sm:$0xff] (!%p1230_p5), %v1568_v60 }
  0x70 PF: > { %v1448_v61 = vld [vmem:[%s1842_s8 + $0x40] sm:$0xff]   ;;  %v1451_v0 = vld [vmem:[%s1842_s8 + $0x48] sm:$0xff]   ;;  %v1454_v3 = vld [vmem:[%s1842_s8 + $0x50] sm:$0xff]   ;;  %p1261_p6 = scmp.ne.s32.totalorder %s1550_s21, 5 }
  0x71   : > { %v1449_v62 = vld [vmem:[%s1842_s8] sm:$0xff]   ;;  %1297 = vmatprep.subr.bf16.mxu0 %v1448_v61  ;;  %v1452_v1 = vld [vmem:[%s1842_s8 + $0x8] sm:$0xff]   ;;  %v1455_v4 = vld [vmem:[%s1842_s8 + $0x10] sm:$0xff]  }
  0x72   : > { %v1450_v63 = vld [vmem:[%s1842_s8 + $0x80] sm:$0xff]   ;;  %1298 = vmatpush3.bf16.msra.mxu0 %v1449_v62  ;;  %v1453_v2 = vld [vmem:[%s1842_s8 + $0x88] sm:$0xff]   ;;  %v1456_v5 = vld [vmem:[%s1842_s8 + $0x90] sm:$0xff]  }
  0x73   : > { %1335 = vmatprep.subr.bf16.mxu1 %v1450_v63  ;;  %1299 = vmatprep.subr.bf16.mxu0 %v1451_v0  ;;  %v1457_v6 = vld [vmem:[%s1842_s8 + $0x58] sm:$0xff]   ;;  %v1460_v9 = vld [vmem:[%s1842_s8 + $0x60] sm:$0xff]   ;;  %v1463_v12 = vld [vmem:[%s1842_s8 + $0x68] sm:$0xff]  }
  0x74   : > { %1336 = vmatpush3.bf16.msra.mxu1 %v1450_v63  ;;  %v1458_v7 = vld [vmem:[%s1842_s8 + $0x18] sm:$0xff]   ;;  %v1462_v10 = vld [vmem:[%s1842_s8 + $0xa0] sm:$0xff]   ;;  %v1465_v13 = vld [vmem:[%s1842_s8 + $0xa8] sm:$0xff]  }
  0x75   : > { %1337 = vmatprep.subr.bf16.mxu1 %v1453_v2  ;;  %v1459_v8 = vld [vmem:[%s1842_s8 + $0x98] sm:$0xff]   ;;  %v1461_v11 = vld [vmem:[%s1842_s8 + $0x20] sm:$0xff]   ;;  %v1464_v14 = vld [vmem:[%s1842_s8 + $0x28] sm:$0xff]  }
  0x76   : > { %1300 = vmatpush3.bf16.msra.mxu0 %v1452_v1  ;;  %v1466_v15 = vld [vmem:[%s1842_s8 + $0x70] sm:$0xff]   ;;  %v1469_v18 = vld [vmem:[%s1842_s8 + $0x78] sm:$0xff]   ;;  %v621_v33 = vld [vmem:[#allocation2] sm:$0xff] }
  0x77   : > { %1301 = vmatprep.subr.bf16.mxu0 %v1454_v3  ;;  %v1467_v16 = vld [vmem:[%s1842_s8 + $0x30] sm:$0xff]   ;;  %v1471_v19 = vld [vmem:[%s1842_s8 + $0xb8] sm:$0xff]   ;;  %v622_v38 = vld [vmem:[#allocation2 + $0x8] sm:$0xff] }
  0x78   : > { %1338 = vmatpush3.bf16.msra.mxu1 %v1453_v2  ;;  %v1468_v17 = vld [vmem:[%s1842_s8 + $0xb0] sm:$0xff]   ;;  %v1470_v22 = vld [vmem:[%s1842_s8 + $0x38] sm:$0xff]   ;;  %v1262_v57 = vld [vmem:[%s609_s30] ss:$0 sm:$0xff] (!%p1261_p6) }
  0x79   : > { %1339 = vmatprep.subr.bf16.mxu1 %v1456_v5  ;;  %v1474_v20 = vld [vmem:[%s1840_s6 + $0x4] ss:$12 sps:$4 sm:$0xff]   ;;  %v1475_v21 = vld [vmem:[%s1840_s6 + $0x8] ss:$12 sps:$4 sm:$0xff]   ;;  %v1472_v23 = vld [vmem:[%s1840_s6] ss:$12 sps:$4 sm:$0xff]  }
  0x7a   : > { %1302 = vmatpush3.bf16.msra.mxu0 %v1455_v4  ;;  %889 = vmatprep.mubr.bf16.mxu0 %v1474_v20  ;;  %v1477_v24 = vld [vmem:[%s1840_s6 + $0x1c] ss:$12 sps:$4 sm:$0xff]   ;;  %v1476_v25 = vld [vmem:[%s1840_s6 + $0x20] ss:$12 sps:$4 sm:$0xff]   ;;  %v1479_v26 = vld [vmem:[%s1840_s6 + $0x18] ss:$12 sps:$4 sm:$0xff]  }
  0x7b   : > { %1303 = vmatprep.subr.bf16.mxu0 %v1457_v6  ;;  %1351 = vmatprep.mubr.bf16.mxu1 %v1475_v21  ;;  %v623_v47 = vld [vmem:[#allocation2 + $0x10] sm:$0xff]  ;;  %v624_v51 = vld [vmem:[#allocation2 + $0x18] sm:$0xff] }
  0x7c   : > { %1340 = vmatpush3.bf16.msra.mxu1 %v1456_v5  ;;  %v1278_v60 = vld [vmem:[%s571_s17] sm:$0xff] (!%p1261_p6)   ;;  %v1295_v3 = vld [vmem:[%s571_s17 + $0x8] sm:$0xff] (!%p1261_p6)  }
  0x7d   : > { %1341 = vmatprep.subr.bf16.mxu1 %v1459_v8  ;;  %v1279_v63 = vunpack.c.l.bf16 (!%p1261_p6), %v1278_v60  ;;  %v1280_v0 = vunpack.c.h.bf16 (!%p1261_p6), %v1278_v60  ;;  %v1283_v4 = vunpack.c.l.bf16 (!%p1261_p6), %v1295_v3  ;;  %v1284_v5 = vunpack.c.h.bf16 (!%p1261_p6), %v1295_v3 }
  0x7e   : > { %1304 = vmatpush3.bf16.msra.mxu0 %v1458_v7 }
  0x7f   : > { %1305 = vmatprep.subr.bf16.mxu0 %v1460_v9 }
  0x80   : > { %1342 = vmatpush3.bf16.msra.mxu1 %v1459_v8 }
  0x81   : > { %1343 = vmatprep.subr.bf16.mxu1 %v1462_v10 }
  0x82   : > { %1306 = vmatpush3.bf16.msra.mxu0 %v1461_v11 }
  0x83   : > { %1307 = vmatprep.subr.bf16.mxu0 %v1463_v12 }
  0x84   : > { %1344 = vmatpush3.bf16.msra.mxu1 %v1462_v10 }
  0x85   : > { %1345 = vmatprep.subr.bf16.mxu1 %v1465_v13 }
  0x86   : > { %1308 = vmatpush3.bf16.msra.mxu0 %v1464_v14 }
  0x87   : > { %1309 = vmatprep.subr.bf16.mxu0 %v1466_v15 }
  0x88   : > { %1346 = vmatpush3.bf16.msra.mxu1 %v1465_v13 }
  0x89   : > { %1347 = vmatprep.subr.bf16.mxu1 %v1468_v17 }
  0x8a   : > { %1310 = vmatpush3.bf16.msra.mxu0 %v1467_v16 }
  0x8b   : > { %1311 = vmatprep.subr.bf16.mxu0 %v1469_v18 }
  0x8c   : > { %1348 = vmatpush3.bf16.msra.mxu1 %v1468_v17 }
  0x8d   : > { %1349 = vmatprep.subr.bf16.mxu1 %v1471_v19 }
  0x8e   : > { %1312 = vmatpush3.bf16.msra.mxu0 %v1470_v22 }
  0x90   : > { %1350 = vmatpush3.bf16.msra.mxu1 %v1471_v19 }
  0x91   : > { %890 = vmatmul.mubr.bf16.vlgmr.msra.gmra.mrb[0].mxu0 %v1472_v23 }
  0x92   : > { %897 = vmatprep.mubr.bf16.mxu0 %v1477_v24 }
  0x93   : > { %1352 = vmatmul.mubr.bf16.vlgmr.msra.gmra.mrb[0].mxu1 %v1476_v25 }
  0x99   : > { %898 = vmatmul.mubr.bf16.gmra.mrb[4].mxu0 %v1479_v26 }
 0x164   : > { %v1313_v27 = vpop.f32.mrb[0].mxu0 }
 0x165   : > { %v1314_v28 = vpop.f32.mrb[1].mxu0 }
 0x166   : > { %v1315_v29 = vadd.f32 %v1314_v28, %v1313_v27  ;;  %v1316_v30 = vpop.f32.mrb[2].mxu0  ;;  %v1353_v31 = vpop.f32.mrb[0].mxu1 }
 0x167   : > { %v1317_v32 = vpop.f32.mrb[3].mxu0  ;;  %v940_v34 = vpop.f32.mrb[1].mxu1 }
 0x168   : > { %v1318_v35 = vadd.f32 %v1317_v32, %v1316_v30  ;;  %v941_v36 = vadd.f32 %v1315_v29, %v940_v34  ;;  %v1354_v37 = vpop.f32.mrb[2].mxu1 }
 0x169   : > { %v943_v39 = vpop.f32.mrb[3].mxu1 }
 0x16a   : > { %v955_v40 = vadd.f32 %v941_v36, %v621_v33  ;;  %v944_v41 = vadd.f32 %v1318_v35, %v943_v39 }
 0x16c   : > { %959 = vst [vmem:[#allocation2] sm:$0xff] %v955_v40  ;;  %v956_v42 = vadd.f32 %v944_v41, %v622_v38  ;;  %v1319_v43 = vpop.f32.mrb[4].mxu0 }
 0x16d   : > { %v1320_v44 = vpop.f32.mrb[5].mxu0 }
 0x16e   : > { %960 = vst [vmem:[#allocation2 + $0x8] sm:$0xff] %v956_v42  ;;  %v1321_v45 = vadd.f32 %v1320_v44, %v1319_v43  ;;  %v1322_v46 = vpop.f32.mrb[6].mxu0 }
 0x16f   : > { %v1323_v48 = vpop.f32.mrb[7].mxu0 }
 0x170   : > { %v949_v49 = vadd.f32 %v1353_v31, %v1321_v45  ;;  %v1324_v50 = vadd.f32 %v1323_v48, %v1322_v46  ;;  %966 = sbr.rel (%p1261_p6) target bundleno = 391 (0x187), region = 152 }
 0x172   : > { %v957_v52 = vadd.f32 %v949_v49, %v623_v47  ;;  %v952_v53 = vadd.f32 %v1354_v37, %v1324_v50 }
 0x173   : > { %v967_v55 = vld [vmem:[#allocation2] sm:$0xff] (!%p1261_p6) }
 0x174   : > { %961 = vst [vmem:[#allocation2 + $0x10] sm:$0xff] %v957_v52  ;;  %v958_v54 = vadd.f32 %v952_v53, %v624_v51  ;;  %v978_v58 = vadd.f32 (!%p1261_p6), %v1262_v57, %v967_v55 }
 0x175   : > { %v968_v56 = vld [vmem:[#allocation2 + $0x8] sm:$0xff] (!%p1261_p6) }
 0x176   : > { %962 = vst [vmem:[#allocation2 + $0x18] sm:$0xff] %v958_v54  ;;  %v979_v59 = vadd.f32 (!%p1261_p6), %v1262_v57, %v968_v56  ;;  %v990_v6 = vadd.f32 (!%p1261_p6), %v1279_v63, %v978_v58 }
 0x178   : > { %v991_v7 = vadd.f32 %v1280_v0, %v979_v59  ;;  %v994_v10 = vmax.f32 %v990_v6, 0.0 }
 0x17a   : > { %v995_v11 = vmax.f32 %v991_v7, 0.0 }
 0x17b   : > { %v969_v61 = vld [vmem:[#allocation2 + $0x10] sm:$0xff] }
 0x17c   : > { %v980_v1 = vadd.f32 %v1262_v57, %v969_v61  ;;  %v1288_v14 = vpack.c.bf16 %v995_v11, %v994_v10 }
 0x17d   : > { %v970_v62 = vld [vmem:[#allocation2 + $0x18] sm:$0xff] }
 0x17e   : > { %v981_v2 = vadd.f32 %v1262_v57, %v970_v62  ;;  %v992_v8 = vadd.f32 %v1283_v4, %v980_v1  ;;  %1289 = vst [vmem:[%s1846_s19] sm:$0xff] %v1288_v14  }
 0x180   : > { %v993_v9 = vadd.f32 %v1284_v5, %v981_v2  ;;  %v996_v12 = vmax.f32 %v992_v8, 0.0 }
 0x182   : > { %v997_v13 = vmax.f32 %v993_v9, 0.0 }
 0x184   : > { %v1293_v15 = vpack.c.bf16 %v997_v13, %v996_v12 }
 0x186   : > { %1296 = vst [vmem:[%s1846_s19 + $0x8] sm:$0xff] %v1293_v15  }
 0x187 PF: > { %1024 = sbr.rel (!%p1698_p13) target bundleno = 399 (0x18f), region = 156  ;;  %s1268_s21 = sshll.u32 (%p1698_p13), %s1554_s22, 2  ;;  %v1045_v16 = vld [vmem:[%s1846_s19] sm:$0xf] (%p1698_p13)  ;;  %v1047_v17 = vld [vmem:[%s1846_s19 + $0x4] sm:$0xf] (%p1698_p13) }
 0x188   : > { %s1029_s11 = scalar_lea.vmem (%p1698_p13), %s1938_s4, %s1268_s21 }
 0x189   : > { %1046 = vst [vmem:[%s1029_s11] sm:$0xf] (%p1698_p13), %v1045_v16  ;;  %1048 = vst [vmem:[%s1029_s11 + $0x8] sm:$0xf] (%p1698_p13), %v1047_v17 }
 0x18d   : > { %v1049_v18 = vld [vmem:[%s1846_s19 + $0x8] sm:$0xf] (%p1698_p13)  ;;  %v1051_v19 = vld [vmem:[%s1846_s19 + $0xc] sm:$0xf] (%p1698_p13) }
 0x18e   : > { %1050 = vst [vmem:[%s1029_s11 + $0x10] sm:$0xf] %v1049_v18  ;;  %1052 = vst [vmem:[%s1029_s11 + $0x18] sm:$0xf] %v1051_v19 }
 0x18f PF: > { %s14_s25 = sadd.s32 1, %s1566_s25   ;;  %s1949_s29 = sld [smem:[#allocation7_spill]] }
 0x190   : > { %p11_p7 = scmp.ge.s32.totalorder %s14_s25, 14   ;;  %s1950_s28 = sld [smem:[#allocation8_spill]] }
 0x191   : > { %s1951_s15 = smov %s1530_s16  ;;  %s1952_s16 = smov %s1690_s13 }
 0x192   : > { %s1953_s17 = smov %s1538_s18  ;;  %s1954_s18 = smov %s1687_s12 }
 0x193   : > { %s1955_s19 = smov %s1546_s20  ;;  %s1956_s20 = smov %s1671_s7 }
 0x194   : > { %s1957_s21 = smov %s1558_s23  ;;  %s1958_s22 = smov %s1562_s24 }
 0x195   : > { %s1959_s23 = smov %s1949_s29  ;;  %13 = sbr.rel (!%p11_p7) target bundleno = 8 (0x8), region = 253 }
 0x196   : > { %s1960_s24 = smov %s1950_s28 }

// kernel: my_resnet_forward.36
= control target key start
LH: loop header
LB: loop body
LE: loop exit
PB: predicated region body
PF: predicated region fallthrough
CT: control target
= control target key end

     0   :  { %s1754_s0 = inlined_call_operand.vmem [shape: bf16[32,2304], index: 0, kind: input, shape index: {}]   ;;  %s1755_s1 = inlined_call_operand.vmem [shape: bf16[2304,256], index: 1, kind: input, shape index: {}]   ;;  %s1756_s2 = inlined_call_operand.vmem [shape: f32[1,256], index: 2, kind: input, shape index: {}]   ;;  %s1757_s3 = inlined_call_operand.vmem [shape: bf16[32,256], index: 3, kind: output, shape index: {}]  }
   0x1   :  { %1759 = sst [smem:[#allocation7_spill]] %s1754_s0 }
   0x2   :  { %1760 = sst [smem:[#allocation8_spill]] %s1755_s1 }
   0x3   :  { %s1439_s12 = smov 0   ;;  %s1441_s13 = smov 0  }
   0x4   :  { %s1443_s14 = smov 0   ;;  %s1445_s15 = smov 0  }
   0x5   :  { %s1447_s16 = smov 0   ;;  %s1449_s17 = smov 0  }
   0x6   :  { %s1451_s18 = smov 0   ;;  %s1453_s19 = smov 0  }
   0x7   :  { %s1455_s20 = smov 0   ;;  %s1457_s21 = smov 0  }
   0x8   :  { %s1459_s22 = smov 0  }
   0x9 LB: > { %s1072_s23 = sadd.s32 4294967295, %s1416_s22   ;;  %s25_s24 = sadd.s32 1, %s1408_s20  ;;  %s1416_s22 = sphi %s1459_s22, %s13_s22   ;;  %s1412_s21 = sphi %s1457_s21, %s1777_s21   ;;  %s1408_s20 = sphi %s1455_s20, %s1776_s20   ;;  %s1404_s19 = sphi %s1453_s19, %s1775_s19   ;;  %s1400_s18 = sphi %s1451_s18, %s1774_s18   ;;  %s1396_s17 = sphi %s1449_s17, %s1773_s17   ;;  %s1392_s16 = sphi %s1447_s16, %s1772_s16   ;;  %s1388_s15 = sphi %s1445_s15, %s1771_s15   ;;  %s1384_s14 = sphi %s1443_s14, %s1770_s14   ;;  %s1380_s13 = sphi %s1441_s13, %s1769_s13   ;;  %s1376_s12 = sphi %s1439_s12, %s1768_s12  }
   0xa   : > { %p26_p0 = scmp.ge.s32.totalorder %s25_s24, 6  ;;  %s28_s25 = sadd.s32 1, %s1412_s21 }
   0xb   : > { %s41_s26 = sadd.s32 1, %s1396_s17  ;;  %p48_p1 = scmp.ne.s32.totalorder %s1396_s17, %s1392_s16 }
   0xc   : > { %s1779_s24 = smov (%p26_p0, %s25_s24), 0  ;;  %s1781_s25 = smov (!%p26_p0, %s28_s25), %s1412_s21 }
   0xd   : > { %s37_s27 = ssub.s32 %s1408_s20, %s1779_s24  ;;  %p49_p2 = scmp.eq.s32.totalorder %s1416_s22, 0 }
   0xe   : > { %p30_p3 = scmp.ge.s32.totalorder %s1781_s25, 2  ;;  %p39_p4 = scmp.eq.s32.totalorder %s37_s27, 0 }
   0xf   : > { %p1506_p5 = por %p49_p2, %p48_p1  ;;  %s69_s29 = sadd.s32 1, %s1388_s15 }
  0x10   : > { %s1783_s25 = smov (%p30_p3, %s1781_s25), 0  ;;  %p76_p6 = scmp.ne.s32.totalorder %s1388_s15, %s1384_s14 }
  0x11   : > { %1762 = sst [smem:[#allocation6_spill]] %s1783_s25  ;;  %s65_s4 = ssub.s32 %s1412_s21, %s1783_s25 }
  0x12   : > { %s1514_s30 = scalar_select %p39_p4, %s1396_s17, %s41_s26  }
  0x13   : > { %s66_s5 = sor.u32 %s65_s4, %s37_s27  ;;  %p121_p7 = scmp.eq.s32.totalorder %s65_s4, 0 }
  0x14   : > { %p67_p8 = scmp.eq.s32.totalorder %s66_s5, 0  ;;  %p1520_p9 = por %p76_p6, %p49_p2 }
  0x15   : > { %s123_s7 = sadd.s32 1, %s1380_s13  ;;  %p133_p10 = scmp.ne.s32.totalorder %s1380_s13, %s1376_s12 }
  0x16   : > { %s1528_s8 = scalar_select %p67_p8, %s1388_s15, %s69_s29  }
  0x17   : > { %s1531_s9 = scalar_select %p121_p7, %s1380_s13, %s123_s7  }
  0x18   : > { %p134_p11 = scmp.eq.s32.totalorder %s1072_s23, 11  ;;  %p1075_p13 = scmp.ge.s32.totalorder %s1416_s22, 12 }
  0x1a   : > { %p1533_p12 = por %p134_p11, %p133_p10  ;;  %156 = sbr.rel (%p1075_p13) target bundleno = 87 (0x57), region = 16 }
  0x21   : > { %159 = sbr.rel (!%p1506_p5) target bundleno = 46 (0x2e), region = 20  ;;  %s161_s11 = sand.u32 (%p1506_p5), 1, %s1396_s17  }
  0x22   : > { %s1130_s26 = smul.u32 (%p1506_p5), 12, %s1408_s20  ;;  %s1765_s0 = sld [smem:[#allocation7_spill]] (%p1506_p5) }
  0x23   : > { %s1205_s27 = smul.u32 (%p1506_p5), 48, %s161_s11 }
  0x25   : > { %s163_s23 = scalar_lea.vmem (%p1506_p5), [#allocation3], %s1205_s27 }
  0x28   : > { %s169_s5 = scalar_lea.vmem %s1765_s0, %s1130_s26 }
  0x29   : > { %v184_v0 = vld [vmem:[%s169_s5] sm:$0xff]  ;;  %v186_v1 = vld [vmem:[%s169_s5 + $0x48] sm:$0xff]  ;;  %v188_v2 = vld [vmem:[%s169_s5 + $0x90] sm:$0xff] }
  0x2a   : > { %185 = vst [vmem:[%s163_s23] sm:$0xff] %v184_v0  ;;  %187 = vst [vmem:[%s163_s23 + $0xc] sm:$0xff] %v186_v1  ;;  %v190_v3 = vld [vmem:[%s169_s5 + $0xd8] sm:$0xff]  ;;  %v1077_v4 = vld [vmem:[%s169_s5 + $0x8] sm:$0xf] }
  0x2b   : > { %189 = vst [vmem:[%s163_s23 + $0x18] sm:$0xff] %v188_v2  ;;  %v1079_v5 = vld [vmem:[%s169_s5 + $0x50] sm:$0xf]  ;;  %191 = vst [vmem:[%s163_s23 + $0x24] sm:$0xff] %v190_v3  ;;  %v1081_v6 = vld [vmem:[%s169_s5 + $0x98] sm:$0xf] }
  0x2c   : > { %1078 = vst [vmem:[%s163_s23 + $0x8] sm:$0xf] %v1077_v4  ;;  %1080 = vst [vmem:[%s163_s23 + $0x14] sm:$0xf] %v1079_v5  ;;  %v1083_v7 = vld [vmem:[%s169_s5 + $0xe0] sm:$0xf] }
  0x2d   : > { %1082 = vst [vmem:[%s163_s23 + $0x20] sm:$0xf] %v1081_v6  ;;  %1084 = vst [vmem:[%s163_s23 + $0x2c] sm:$0xf] %v1083_v7 }
  0x2e PF: > { %212 = sbr.rel (!%p1520_p9) target bundleno = 87 (0x57), region = 46  ;;  %s214_s28 = sand.u32 (%p1520_p9), 1, %s1388_s15  }
  0x2f   : > { %s1131_s7 = smul.u32 (%p1520_p9), 96, %s1408_s20  ;;  %s1766_s1 = sld [smem:[#allocation8_spill]] (%p1520_p9) }
  0x30   : > { %s1206_s11 = smul.u32 (%p1520_p9), 192, %s214_s28 }
  0x31   : > { %s219_s26 = sadd.s32 (%p1520_p9), %s1412_s21, %s1131_s7 }
  0x32   : > { %s1086_s27 = sshll.u32 (%p1520_p9), %s219_s26, 2  ;;  %s1558_s6 = scalar_lea.vmem (%p1520_p9), [#allocation4], %s1206_s11 }
  0x35   : > { %s1553_s0 = scalar_lea.vmem %s1766_s1, %s1086_s27 }
  0x36   : > { %v237_v8 = vld [vmem:[%s1553_s0] sm:$0xf]  ;;  %v239_v9 = vld [vmem:[%s1553_s0 + $0x8] sm:$0xf]  ;;  %v241_v10 = vld [vmem:[%s1553_s0 + $0x10] sm:$0xf] }
  0x37   : > { %238 = vst [vmem:[%s1558_s6] sm:$0xf] %v237_v8  ;;  %240 = vst [vmem:[%s1558_s6 + $0x4] sm:$0xf] %v239_v9  ;;  %v243_v11 = vld [vmem:[%s1553_s0 + $0x18] sm:$0xf] }
  0x38   : > { %242 = vst [vmem:[%s1558_s6 + $0x8] sm:$0xf] %v241_v10  ;;  %v245_v12 = vld [vmem:[%s1553_s0 + $0x20] sm:$0xf]  ;;  %v247_v13 = vld [vmem:[%s1553_s0 + $0x28] sm:$0xf] }
  0x39   : > { %244 = vst [vmem:[%s1558_s6 + $0xc] sm:$0xf] %v243_v11  ;;  %246 = vst [vmem:[%s1558_s6 + $0x10] sm:$0xf] %v245_v12  ;;  %v249_v14 = vld [vmem:[%s1553_s0 + $0x30] sm:$0xf] }
  0x3a   : > { %248 = vst [vmem:[%s1558_s6 + $0x14] sm:$0xf] %v247_v13  ;;  %v251_v15 = vld [vmem:[%s1553_s0 + $0x38] sm:$0xf]  ;;  %v253_v16 = vld [vmem:[%s1553_s0 + $0x40] sm:$0xf] }
  0x3b   : > { %250 = vst [vmem:[%s1558_s6 + $0x18] sm:$0xf] %v249_v14  ;;  %252 = vst [vmem:[%s1558_s6 + $0x1c] sm:$0xf] %v251_v15  ;;  %v255_v17 = vld [vmem:[%s1553_s0 + $0x48] sm:$0xf] }
  0x3c   : > { %254 = vst [vmem:[%s1558_s6 + $0x20] sm:$0xf] %v253_v16  ;;  %v257_v18 = vld [vmem:[%s1553_s0 + $0x50] sm:$0xf]  ;;  %v259_v19 = vld [vmem:[%s1553_s0 + $0x58] sm:$0xf] }
  0x3d   : > { %256 = vst [vmem:[%s1558_s6 + $0x24] sm:$0xf] %v255_v17  ;;  %258 = vst [vmem:[%s1558_s6 + $0x28] sm:$0xf] %v257_v18  ;;  %v261_v20 = vld [vmem:[%s1553_s0 + $0x60] sm:$0xf] }
  0x3e   : > { %260 = vst [vmem:[%s1558_s6 + $0x2c] sm:$0xf] %v259_v19  ;;  %v263_v21 = vld [vmem:[%s1553_s0 + $0x68] sm:$0xf]  ;;  %v265_v22 = vld [vmem:[%s1553_s0 + $0x70] sm:$0xf] }
  0x3f   : > { %262 = vst [vmem:[%s1558_s6 + $0x30] sm:$0xf] %v261_v20  ;;  %264 = vst [vmem:[%s1558_s6 + $0x34] sm:$0xf] %v263_v21  ;;  %v267_v23 = vld [vmem:[%s1553_s0 + $0x78] sm:$0xf] }
  0x40   : > { %266 = vst [vmem:[%s1558_s6 + $0x38] sm:$0xf] %v265_v22  ;;  %v269_v24 = vld [vmem:[%s1553_s0 + $0x80] sm:$0xf]  ;;  %v271_v25 = vld [vmem:[%s1553_s0 + $0x88] sm:$0xf] }
  0x41   : > { %268 = vst [vmem:[%s1558_s6 + $0x3c] sm:$0xf] %v267_v23  ;;  %270 = vst [vmem:[%s1558_s6 + $0x40] sm:$0xf] %v269_v24  ;;  %v273_v26 = vld [vmem:[%s1553_s0 + $0x90] sm:$0xf] }
  0x42   : > { %272 = vst [vmem:[%s1558_s6 + $0x44] sm:$0xf] %v271_v25  ;;  %v275_v27 = vld [vmem:[%s1553_s0 + $0x98] sm:$0xf]  ;;  %v277_v28 = vld [vmem:[%s1553_s0 + $0xa0] sm:$0xf] }
  0x43   : > { %274 = vst [vmem:[%s1558_s6 + $0x48] sm:$0xf] %v273_v26  ;;  %276 = vst [vmem:[%s1558_s6 + $0x4c] sm:$0xf] %v275_v27  ;;  %v279_v29 = vld [vmem:[%s1553_s0 + $0xa8] sm:$0xf] }
  0x44   : > { %278 = vst [vmem:[%s1558_s6 + $0x50] sm:$0xf] %v277_v28  ;;  %v281_v30 = vld [vmem:[%s1553_s0 + $0xb0] sm:$0xf]  ;;  %v283_v31 = vld [vmem:[%s1553_s0 + $0xb8] sm:$0xf] }
  0x45   : > { %280 = vst [vmem:[%s1558_s6 + $0x54] sm:$0xf] %v279_v29  ;;  %282 = vst [vmem:[%s1558_s6 + $0x58] sm:$0xf] %v281_v30  ;;  %v285_v32 = vld [vmem:[%s1553_s0 + $0xc0] sm:$0xf] }
  0x46   : > { %284 = vst [vmem:[%s1558_s6 + $0x5c] sm:$0xf] %v283_v31  ;;  %v287_v33 = vld [vmem:[%s1553_s0 + $0xc8] sm:$0xf]  ;;  %v289_v34 = vld [vmem:[%s1553_s0 + $0xd0] sm:$0xf] }
  0x47   : > { %286 = vst [vmem:[%s1558_s6 + $0x60] sm:$0xf] %v285_v32  ;;  %288 = vst [vmem:[%s1558_s6 + $0x64] sm:$0xf] %v287_v33  ;;  %v291_v35 = vld [vmem:[%s1553_s0 + $0xd8] sm:$0xf] }
  0x48   : > { %290 = vst [vmem:[%s1558_s6 + $0x68] sm:$0xf] %v289_v34  ;;  %v293_v36 = vld [vmem:[%s1553_s0 + $0xe0] sm:$0xf]  ;;  %v295_v37 = vld [vmem:[%s1553_s0 + $0xe8] sm:$0xf] }
  0x49   : > { %292 = vst [vmem:[%s1558_s6 + $0x6c] sm:$0xf] %v291_v35  ;;  %294 = vst [vmem:[%s1558_s6 + $0x70] sm:$0xf] %v293_v36  ;;  %v297_v38 = vld [vmem:[%s1553_s0 + $0xf0] sm:$0xf] }
  0x4a   : > { %296 = vst [vmem:[%s1558_s6 + $0x74] sm:$0xf] %v295_v37  ;;  %v299_v39 = vld [vmem:[%s1553_s0 + $0xf8] sm:$0xf]  ;;  %v301_v40 = vld [vmem:[%s1553_s0 + $0x100] sm:$0xf] }
  0x4b   : > { %298 = vst [vmem:[%s1558_s6 + $0x78] sm:$0xf] %v297_v38  ;;  %300 = vst [vmem:[%s1558_s6 + $0x7c] sm:$0xf] %v299_v39  ;;  %v303_v41 = vld [vmem:[%s1553_s0 + $0x108] sm:$0xf] }
  0x4c   : > { %302 = vst [vmem:[%s1558_s6 + $0x80] sm:$0xf] %v301_v40  ;;  %v305_v42 = vld [vmem:[%s1553_s0 + $0x110] sm:$0xf]  ;;  %v307_v43 = vld [vmem:[%s1553_s0 + $0x118] sm:$0xf] }
  0x4d   : > { %304 = vst [vmem:[%s1558_s6 + $0x84] sm:$0xf] %v303_v41  ;;  %306 = vst [vmem:[%s1558_s6 + $0x88] sm:$0xf] %v305_v42  ;;  %v309_v44 = vld [vmem:[%s1553_s0 + $0x120] sm:$0xf] }
  0x4e   : > { %308 = vst [vmem:[%s1558_s6 + $0x8c] sm:$0xf] %v307_v43  ;;  %v311_v45 = vld [vmem:[%s1553_s0 + $0x128] sm:$0xf]  ;;  %v313_v46 = vld [vmem:[%s1553_s0 + $0x130] sm:$0xf] }
  0x4f   : > { %310 = vst [vmem:[%s1558_s6 + $0x90] sm:$0xf] %v309_v44  ;;  %312 = vst [vmem:[%s1558_s6 + $0x94] sm:$0xf] %v311_v45  ;;  %v315_v47 = vld [vmem:[%s1553_s0 + $0x138] sm:$0xf] }
  0x50   : > { %314 = vst [vmem:[%s1558_s6 + $0x98] sm:$0xf] %v313_v46  ;;  %v317_v48 = vld [vmem:[%s1553_s0 + $0x140] sm:$0xf]  ;;  %v319_v49 = vld [vmem:[%s1553_s0 + $0x148] sm:$0xf] }
  0x51   : > { %316 = vst [vmem:[%s1558_s6 + $0x9c] sm:$0xf] %v315_v47  ;;  %318 = vst [vmem:[%s1558_s6 + $0xa0] sm:$0xf] %v317_v48  ;;  %v321_v50 = vld [vmem:[%s1553_s0 + $0x150] sm:$0xf] }
  0x52   : > { %320 = vst [vmem:[%s1558_s6 + $0xa4] sm:$0xf] %v319_v49  ;;  %v323_v51 = vld [vmem:[%s1553_s0 + $0x158] sm:$0xf]  ;;  %v325_v52 = vld [vmem:[%s1553_s0 + $0x160] sm:$0xf] }
  0x53   : > { %322 = vst [vmem:[%s1558_s6 + $0xa8] sm:$0xf] %v321_v50  ;;  %324 = vst [vmem:[%s1558_s6 + $0xac] sm:$0xf] %v323_v51  ;;  %v327_v53 = vld [vmem:[%s1553_s0 + $0x168] sm:$0xf] }
  0x54   : > { %326 = vst [vmem:[%s1558_s6 + $0xb0] sm:$0xf] %v325_v52  ;;  %v329_v54 = vld [vmem:[%s1553_s0 + $0x170] sm:$0xf]  ;;  %v331_v55 = vld [vmem:[%s1553_s0 + $0x178] sm:$0xf] }
  0x55   : > { %328 = vst [vmem:[%s1558_s6 + $0xb4] sm:$0xf] %v327_v53  ;;  %330 = vst [vmem:[%s1558_s6 + $0xb8] sm:$0xf] %v329_v54 }
  0x56   : > { %332 = vst [vmem:[%s1558_s6 + $0xbc] sm:$0xf] %v331_v55 }
  0x57 PF: > { %p1087_p0 = scmp.ge.s32.totalorder %s1416_s22, 1  ;;  %p456_p1 = scmp.lt.s32.totalorder %s1416_s22, 13 }
  0x59   : > { %p457_p2 = pnand %p1087_p0, %p456_p1 }
  0x5a   : > { %s463_s5 = sand.u32 (!%p457_p2), 1, %s1392_s16   ;;  %s470_s23 = sand.u32 (!%p457_p2), 1, %s1384_s14  }
  0x5b   : > { %460 = sbr.rel (%p457_p2) target bundleno = 391 (0x187), region = 91  ;;  %s496_s0 = sand.u32 (!%p457_p2), 1, %s1376_s12  }
  0x5c   : > { %s1207_s28 = smul.u32 (!%p457_p2), 48, %s463_s5  ;;  %s1088_s11 = sshll.u32 (!%p457_p2), %s496_s0, 4 }
  0x5d   : > { %s1208_s7 = smul.u32 (!%p457_p2), 192, %s470_s23  ;;  %p502_p3 = scmp.lt.s32.totalorder (!%p457_p2), %s1404_s19, 1 }
  0x5e   : > { %s1666_s6 = scalar_lea.vmem (!%p457_p2), [#allocation3], %s1207_s28  ;;  %s1670_s25 = scalar_lea.vmem (!%p457_p2), [#allocation5], %s1088_s11 }
  0x5f   : > { %s1668_s1 = scalar_lea.vmem (!%p457_p2), [#allocation4], %s1208_s7  ;;  %p1089_p4 = scmp.ne.s32.totalorder (!%p457_p2), %s1400_s18, 0 }
  0x62   : > { %s1660_s26 = scalar_select %p502_p3, %s1404_s19, 1 }
  0x63   : > { %510 = sbr.rel (%p1089_p4) target bundleno = 106 (0x6a), region = 103  ;;  %v1418_v56 = vmov (!%p1089_p4), 0.0  }
  0x64   : > { %s504_s4 = scalar_lea.vmem %s1756_s2, %s1660_s26  ;;  %511 = vst [vmem:[#allocation2] sm:$0xff] (!%p1089_p4), %v1418_v56  ;;  %512 = vst [vmem:[#allocation2 + $0x8] sm:$0xff] (!%p1089_p4), %v1418_v56 }
  0x65   : > { %513 = vst [vmem:[#allocation2 + $0x10] sm:$0xff] (!%p1089_p4), %v1418_v56  ;;  %514 = vst [vmem:[#allocation2 + $0x18] sm:$0xff] (!%p1089_p4), %v1418_v56 }
  0x6a PF: > { %v1298_v57 = vld [vmem:[%s1668_s1 + $0x40] sm:$0xff]   ;;  %v1301_v60 = vld [vmem:[%s1668_s1 + $0x48] sm:$0xff]   ;;  %v1304_v63 = vld [vmem:[%s1668_s1 + $0x50] sm:$0xff]   ;;  %p1120_p5 = scmp.ne.s32.totalorder %s1400_s18, 5 }
  0x6b   : > { %v1299_v58 = vld [vmem:[%s1668_s1] sm:$0xff]   ;;  %1147 = vmatprep.subr.bf16.mxu0 %v1298_v57  ;;  %v1302_v61 = vld [vmem:[%s1668_s1 + $0x8] sm:$0xff]   ;;  %v1305_v0 = vld [vmem:[%s1668_s1 + $0x10] sm:$0xff]  }
  0x6c   : > { %v1300_v59 = vld [vmem:[%s1668_s1 + $0x80] sm:$0xff]   ;;  %1148 = vmatpush3.bf16.msra.mxu0 %v1299_v58  ;;  %v1303_v62 = vld [vmem:[%s1668_s1 + $0x88] sm:$0xff]   ;;  %v1306_v1 = vld [vmem:[%s1668_s1 + $0x90] sm:$0xff]  }
  0x6d   : > { %1185 = vmatprep.subr.bf16.mxu1 %v1300_v59  ;;  %1149 = vmatprep.subr.bf16.mxu0 %v1301_v60  ;;  %v1307_v2 = vld [vmem:[%s1668_s1 + $0x58] sm:$0xff]   ;;  %v1310_v5 = vld [vmem:[%s1668_s1 + $0x60] sm:$0xff]   ;;  %v1313_v8 = vld [vmem:[%s1668_s1 + $0x68] sm:$0xff]  }
  0x6e   : > { %1186 = vmatpush3.bf16.msra.mxu1 %v1300_v59  ;;  %v1308_v3 = vld [vmem:[%s1668_s1 + $0x18] sm:$0xff]   ;;  %v1312_v6 = vld [vmem:[%s1668_s1 + $0xa0] sm:$0xff]   ;;  %v1315_v9 = vld [vmem:[%s1668_s1 + $0xa8] sm:$0xff]  }
  0x6f   : > { %1187 = vmatprep.subr.bf16.mxu1 %v1303_v62  ;;  %v1309_v4 = vld [vmem:[%s1668_s1 + $0x98] sm:$0xff]   ;;  %v1311_v7 = vld [vmem:[%s1668_s1 + $0x20] sm:$0xff]   ;;  %v1314_v10 = vld [vmem:[%s1668_s1 + $0x28] sm:$0xff]  }
  0x70   : > { %1150 = vmatpush3.bf16.msra.mxu0 %v1302_v61  ;;  %v1316_v11 = vld [vmem:[%s1668_s1 + $0x70] sm:$0xff]   ;;  %v1319_v14 = vld [vmem:[%s1668_s1 + $0x78] sm:$0xff]   ;;  %v515_v29 = vld [vmem:[#allocation2] sm:$0xff] }
  0x71   : > { %1151 = vmatprep.subr.bf16.mxu0 %v1304_v63  ;;  %v1317_v12 = vld [vmem:[%s1668_s1 + $0x30] sm:$0xff]   ;;  %v1321_v15 = vld [vmem:[%s1668_s1 + $0xb8] sm:$0xff]   ;;  %v516_v34 = vld [vmem:[#allocation2 + $0x8] sm:$0xff] }
  0x72   : > { %1188 = vmatpush3.bf16.msra.mxu1 %v1303_v62  ;;  %v1318_v13 = vld [vmem:[%s1668_s1 + $0xb0] sm:$0xff]   ;;  %v1320_v18 = vld [vmem:[%s1668_s1 + $0x38] sm:$0xff]   ;;  %v1121_v53 = vld [vmem:[%s504_s4] ss:$0 sm:$0xff] (!%p1120_p5) }
  0x73   : > { %1189 = vmatprep.subr.bf16.mxu1 %v1306_v1  ;;  %v1324_v16 = vld [vmem:[%s1666_s6 + $0x4] ss:$12 sps:$4 sm:$0xff]   ;;  %v1325_v17 = vld [vmem:[%s1666_s6 + $0x8] ss:$12 sps:$4 sm:$0xff]   ;;  %v1322_v19 = vld [vmem:[%s1666_s6] ss:$12 sps:$4 sm:$0xff]  }
  0x74   : > { %1152 = vmatpush3.bf16.msra.mxu0 %v1305_v0  ;;  %783 = vmatprep.mubr.bf16.mxu0 %v1324_v16  ;;  %v1327_v20 = vld [vmem:[%s1666_s6 + $0x1c] ss:$12 sps:$4 sm:$0xff]   ;;  %v1326_v21 = vld [vmem:[%s1666_s6 + $0x20] ss:$12 sps:$4 sm:$0xff]   ;;  %v1329_v22 = vld [vmem:[%s1666_s6 + $0x18] ss:$12 sps:$4 sm:$0xff]  }
  0x75   : > { %1153 = vmatprep.subr.bf16.mxu0 %v1307_v2  ;;  %1201 = vmatprep.mubr.bf16.mxu1 %v1325_v17  ;;  %v517_v43 = vld [vmem:[#allocation2 + $0x10] sm:$0xff]  ;;  %v518_v47 = vld [vmem:[#allocation2 + $0x18] sm:$0xff] }
  0x76   : > { %1190 = vmatpush3.bf16.msra.mxu1 %v1306_v1 }
  0x77   : > { %1191 = vmatprep.subr.bf16.mxu1 %v1309_v4 }
  0x78   : > { %1154 = vmatpush3.bf16.msra.mxu0 %v1308_v3 }
  0x79   : > { %1155 = vmatprep.subr.bf16.mxu0 %v1310_v5 }
  0x7a   : > { %1192 = vmatpush3.bf16.msra.mxu1 %v1309_v4 }
  0x7b   : > { %1193 = vmatprep.subr.bf16.mxu1 %v1312_v6 }
  0x7c   : > { %1156 = vmatpush3.bf16.msra.mxu0 %v1311_v7 }
  0x7d   : > { %1157 = vmatprep.subr.bf16.mxu0 %v1313_v8 }
  0x7e   : > { %1194 = vmatpush3.bf16.msra.mxu1 %v1312_v6 }
  0x7f   : > { %1195 = vmatprep.subr.bf16.mxu1 %v1315_v9 }
  0x80   : > { %1158 = vmatpush3.bf16.msra.mxu0 %v1314_v10 }
  0x81   : > { %1159 = vmatprep.subr.bf16.mxu0 %v1316_v11 }
  0x82   : > { %1196 = vmatpush3.bf16.msra.mxu1 %v1315_v9 }
  0x83   : > { %1197 = vmatprep.subr.bf16.mxu1 %v1318_v13 }
  0x84   : > { %1160 = vmatpush3.bf16.msra.mxu0 %v1317_v12 }
  0x85   : > { %1161 = vmatprep.subr.bf16.mxu0 %v1319_v14 }
  0x86   : > { %1198 = vmatpush3.bf16.msra.mxu1 %v1318_v13 }
  0x87   : > { %1199 = vmatprep.subr.bf16.mxu1 %v1321_v15 }
  0x88   : > { %1162 = vmatpush3.bf16.msra.mxu0 %v1320_v18 }
  0x8a   : > { %1200 = vmatpush3.bf16.msra.mxu1 %v1321_v15 }
  0x8b   : > { %784 = vmatmul.mubr.bf16.vlgmr.msra.gmra.mrb[0].mxu0 %v1322_v19 }
  0x8c   : > { %791 = vmatprep.mubr.bf16.mxu0 %v1327_v20 }
  0x8d   : > { %1202 = vmatmul.mubr.bf16.vlgmr.msra.gmra.mrb[0].mxu1 %v1326_v21 }
  0x93   : > { %792 = vmatmul.mubr.bf16.gmra.mrb[4].mxu0 %v1329_v22 }
 0x15e   : > { %v1163_v23 = vpop.f32.mrb[0].mxu0 }
 0x15f   : > { %v1164_v24 = vpop.f32.mrb[1].mxu0 }
 0x160   : > { %v1165_v25 = vadd.f32 %v1164_v24, %v1163_v23  ;;  %v1166_v26 = vpop.f32.mrb[2].mxu0  ;;  %v1203_v27 = vpop.f32.mrb[0].mxu1 }
 0x161   : > { %v1167_v28 = vpop.f32.mrb[3].mxu0  ;;  %v834_v30 = vpop.f32.mrb[1].mxu1 }
 0x162   : > { %v1168_v31 = vadd.f32 %v1167_v28, %v1166_v26  ;;  %v835_v32 = vadd.f32 %v1165_v25, %v834_v30  ;;  %v1204_v33 = vpop.f32.mrb[2].mxu1 }
 0x163   : > { %v837_v35 = vpop.f32.mrb[3].mxu1 }
 0x164   : > { %v849_v36 = vadd.f32 %v835_v32, %v515_v29  ;;  %v838_v37 = vadd.f32 %v1168_v31, %v837_v35 }
 0x166   : > { %853 = vst [vmem:[#allocation2] sm:$0xff] %v849_v36  ;;  %v850_v38 = vadd.f32 %v838_v37, %v516_v34  ;;  %v1169_v39 = vpop.f32.mrb[4].mxu0 }
 0x167   : > { %v1170_v40 = vpop.f32.mrb[5].mxu0 }
 0x168   : > { %854 = vst [vmem:[#allocation2 + $0x8] sm:$0xff] %v850_v38  ;;  %v1171_v41 = vadd.f32 %v1170_v40, %v1169_v39  ;;  %v1172_v42 = vpop.f32.mrb[6].mxu0 }
 0x169   : > { %v1173_v44 = vpop.f32.mrb[7].mxu0 }
 0x16a   : > { %v843_v45 = vadd.f32 %v1203_v27, %v1171_v41  ;;  %v1174_v46 = vadd.f32 %v1173_v44, %v1172_v42  ;;  %860 = sbr.rel (%p1120_p5) target bundleno = 383 (0x17f), region = 107 }
 0x16c   : > { %v851_v48 = vadd.f32 %v843_v45, %v517_v43  ;;  %v846_v49 = vadd.f32 %v1204_v33, %v1174_v46 }
 0x16d   : > { %v861_v51 = vld [vmem:[#allocation2] sm:$0xff] (!%p1120_p5) }
 0x16e   : > { %855 = vst [vmem:[#allocation2 + $0x10] sm:$0xff] %v851_v48  ;;  %v852_v50 = vadd.f32 %v846_v49, %v518_v47  ;;  %v872_v54 = vadd.f32 (!%p1120_p5), %v1121_v53, %v861_v51 }
 0x16f   : > { %v862_v52 = vld [vmem:[#allocation2 + $0x8] sm:$0xff] (!%p1120_p5) }
 0x170   : > { %856 = vst [vmem:[#allocation2 + $0x18] sm:$0xff] %v852_v50  ;;  %v873_v55 = vadd.f32 (!%p1120_p5), %v1121_v53, %v862_v52  ;;  %v876_v60 = vmax.f32 (!%p1120_p5), %v872_v54, 0.0 }
 0x172   : > { %v877_v61 = vmax.f32 %v873_v55, 0.0 }
 0x174   : > { %v1139_v0 = vpack.c.bf16 %v877_v61, %v876_v60 }
 0x175   : > { %v863_v56 = vld [vmem:[#allocation2 + $0x10] sm:$0xff] }
 0x176   : > { %v874_v58 = vadd.f32 %v1121_v53, %v863_v56  ;;  %1140 = vst [vmem:[%s1670_s25] sm:$0xff] %v1139_v0  }
 0x177   : > { %v864_v57 = vld [vmem:[#allocation2 + $0x18] sm:$0xff] }
 0x178   : > { %v875_v59 = vadd.f32 %v1121_v53, %v864_v57  ;;  %v878_v62 = vmax.f32 %v874_v58, 0.0 }
 0x17a   : > { %v879_v63 = vmax.f32 %v875_v59, 0.0 }
 0x17c   : > { %v1144_v1 = vpack.c.bf16 %v879_v63, %v878_v62 }
 0x17e   : > { %1146 = vst [vmem:[%s1670_s25 + $0x8] sm:$0xff] %v1144_v1  }
 0x17f PF: > { %906 = sbr.rel (!%p1533_p12) target bundleno = 391 (0x187), region = 111  ;;  %s1127_s14 = sshll.u32 (%p1533_p12), %s1404_s19, 2  ;;  %v927_v2 = vld [vmem:[%s1670_s25] sm:$0xf] (%p1533_p12)  ;;  %v929_v3 = vld [vmem:[%s1670_s25 + $0x4] sm:$0xf] (%p1533_p12) }
 0x180   : > { %s911_s5 = scalar_lea.vmem (%p1533_p12), %s1757_s3, %s1127_s14 }
 0x181   : > { %928 = vst [vmem:[%s911_s5] sm:$0xf] (%p1533_p12), %v927_v2  ;;  %930 = vst [vmem:[%s911_s5 + $0x8] sm:$0xf] (%p1533_p12), %v929_v3 }
 0x185   : > { %v931_v4 = vld [vmem:[%s1670_s25 + $0x8] sm:$0xf] (%p1533_p12)  ;;  %v933_v5 = vld [vmem:[%s1670_s25 + $0xc] sm:$0xf] (%p1533_p12) }
 0x186   : > { %932 = vst [vmem:[%s911_s5 + $0x10] sm:$0xf] %v931_v4  ;;  %934 = vst [vmem:[%s911_s5 + $0x18] sm:$0xf] %v933_v5 }
 0x187 PF: > { %s13_s22 = sadd.s32 1, %s1416_s22   ;;  %s1767_s10 = sld [smem:[#allocation6_spill]] }
 0x188   : > { %p10_p6 = scmp.ge.s32.totalorder %s13_s22, 14   ;;  %s1768_s12 = smov %s1380_s13 }
 0x189   : > { %s1769_s13 = smov %s1531_s9  ;;  %s1770_s14 = smov %s1388_s15 }
 0x18a   : > { %s1771_s15 = smov %s1528_s8  ;;  %s1772_s16 = smov %s1396_s17 }
 0x18b   : > { %s1773_s17 = smov %s1514_s30  ;;  %s1774_s18 = smov %s1408_s20 }
 0x18c   : > { %s1775_s19 = smov %s1412_s21  ;;  %s1776_s20 = smov %s1779_s24 }
 0x18d   : > { %s1777_s21 = smov %s1767_s10  ;;  %12 = sbr.rel (!%p10_p6) target bundleno = 9 (0x9), region = 200 }

// kernel: my_resnet_forward.38
= control target key start
LH: loop header
LB: loop body
LE: loop exit
PB: predicated region body
PF: predicated region fallthrough
CT: control target
= control target key end

     0   :  { %s1171_s12 = smov 0   ;;  %s1173_s13 = smov 0   ;;  %s1411_s0 = inlined_call_operand.vmem [shape: bf16[8,2304], index: 0, kind: input, shape index: {}]   ;;  %s1412_s1 = inlined_call_operand.vmem [shape: bf16[2304,512], index: 1, kind: input, shape index: {}]   ;;  %s1413_s2 = inlined_call_operand.vmem [shape: f32[1,512], index: 2, kind: input, shape index: {}]   ;;  %s1414_s3 = inlined_call_operand.vmem [shape: bf16[8,512], index: 3, kind: output, shape index: {}]  }
   0x1   :  { %s1175_s14 = smov 0   ;;  %s1177_s15 = smov 0  }
   0x2   :  { %s1179_s16 = smov 0   ;;  %s1181_s17 = smov 0  }
   0x3   :  { %s1183_s18 = smov 0  }
   0x4 LB: > { %s25_s19 = sadd.s32 1, %s1138_s16  ;;  %s28_s20 = sadd.s32 1, %s1142_s17  ;;  %s1146_s18 = sphi %s1183_s18, %s13_s18   ;;  %s1142_s17 = sphi %s1181_s17, %s1420_s17   ;;  %s1138_s16 = sphi %s1179_s16, %s1419_s16   ;;  %s1134_s15 = sphi %s1177_s15, %s1418_s15   ;;  %s1130_s14 = sphi %s1175_s14, %s1417_s14   ;;  %s1126_s13 = sphi %s1173_s13, %s1416_s13   ;;  %s1122_s12 = sphi %s1171_s12, %s1415_s12  }
   0x5   : > { %p26_p0 = scmp.ge.s32.totalorder %s25_s19, 6  ;;  %p76_p1 = scmp.ne.s32.totalorder %s1126_s13, %s1122_s12 }
   0x6   : > { %p77_p2 = scmp.eq.s32.totalorder %s1146_s18, 0  ;;  %s69_s24 = sadd.s32 1, %s1126_s13 }
   0x7   : > { %s1422_s19 = smov (%p26_p0, %s25_s19), 0  ;;  %s1424_s20 = smov (!%p26_p0, %s28_s20), %s1142_s17 }
   0x8   : > { %p78_p3 = por %p77_p2, %p76_p1  ;;  %p30_p4 = scmp.ge.s32.totalorder %s1424_s20, 4 }
   0x9   : > { %s64_s21 = ssub.s32 %s1138_s16, %s1422_s19  ;;  %p914_p6 = scmp.ge.s32.totalorder %s1146_s18, 24 }
   0xa   : > { %s1426_s20 = smov (%p30_p4, %s1424_s20), 0 }
   0xb   : > { %s65_s22 = ssub.s32 %s1142_s17, %s1426_s20  ;;  %156 = sbr.rel (%p914_p6) target bundleno = 57 (0x39), region = 16 }
   0xc   : > { %s66_s23 = sor.u32 %s65_s22, %s64_s21 }
   0xd   : > { %p67_p5 = scmp.eq.s32.totalorder %s66_s23, 0 }
   0xf   : > { %s1222_s25 = scalar_select %p67_p5, %s1126_s13, %s69_s24  }
  0x12   : > { %172 = sbr.rel (!%p78_p3) target bundleno = 57 (0x39), region = 24  ;;  %s174_s26 = sand.u32 (%p78_p3), 1, %s1126_s13  }
  0x13   : > { %s952_s27 = smul.u32 (%p78_p3), 192, %s1138_s16 }
  0x14   : > { %s1004_s28 = smul.u32 (%p78_p3), 192, %s174_s26 }
  0x15   : > { %s179_s29 = sadd.s32 (%p78_p3), %s1142_s17, %s952_s27 }
  0x16   : > { %s916_s30 = sshll.u32 (%p78_p3), %s179_s29, 2  ;;  %s1236_s7 = scalar_lea.vmem (%p78_p3), [#allocation3], %s1004_s28 }
  0x17   : > { %s1231_s6 = scalar_lea.vmem (%p78_p3), %s1412_s1, %s916_s30 }
  0x18   : > { %v197_v0 = vld [vmem:[%s1231_s6] sm:$0xf] (%p78_p3)  ;;  %v199_v1 = vld [vmem:[%s1231_s6 + $0x10] sm:$0xf] (%p78_p3) }
  0x19   : > { %v201_v2 = vld [vmem:[%s1231_s6 + $0x20] sm:$0xf]  ;;  %198 = vst [vmem:[%s1236_s7] sm:$0xf] %v197_v0  ;;  %200 = vst [vmem:[%s1236_s7 + $0x4] sm:$0xf] %v199_v1 }
  0x1a   : > { %202 = vst [vmem:[%s1236_s7 + $0x8] sm:$0xf] %v201_v2  ;;  %v203_v3 = vld [vmem:[%s1231_s6 + $0x30] sm:$0xf]  ;;  %v205_v4 = vld [vmem:[%s1231_s6 + $0x40] sm:$0xf] }
  0x1b   : > { %v207_v5 = vld [vmem:[%s1231_s6 + $0x50] sm:$0xf]  ;;  %204 = vst [vmem:[%s1236_s7 + $0xc] sm:$0xf] %v203_v3  ;;  %206 = vst [vmem:[%s1236_s7 + $0x10] sm:$0xf] %v205_v4 }
  0x1c   : > { %208 = vst [vmem:[%s1236_s7 + $0x14] sm:$0xf] %v207_v5  ;;  %v209_v6 = vld [vmem:[%s1231_s6 + $0x60] sm:$0xf]  ;;  %v211_v7 = vld [vmem:[%s1231_s6 + $0x70] sm:$0xf] }
  0x1d   : > { %v213_v8 = vld [vmem:[%s1231_s6 + $0x80] sm:$0xf]  ;;  %210 = vst [vmem:[%s1236_s7 + $0x18] sm:$0xf] %v209_v6  ;;  %212 = vst [vmem:[%s1236_s7 + $0x1c] sm:$0xf] %v211_v7 }
  0x1e   : > { %214 = vst [vmem:[%s1236_s7 + $0x20] sm:$0xf] %v213_v8  ;;  %v215_v9 = vld [vmem:[%s1231_s6 + $0x90] sm:$0xf]  ;;  %v217_v10 = vld [vmem:[%s1231_s6 + $0xa0] sm:$0xf] }
  0x1f   : > { %v219_v11 = vld [vmem:[%s1231_s6 + $0xb0] sm:$0xf]  ;;  %216 = vst [vmem:[%s1236_s7 + $0x24] sm:$0xf] %v215_v9  ;;  %218 = vst [vmem:[%s1236_s7 + $0x28] sm:$0xf] %v217_v10 }
  0x20   : > { %220 = vst [vmem:[%s1236_s7 + $0x2c] sm:$0xf] %v219_v11  ;;  %v221_v12 = vld [vmem:[%s1231_s6 + $0xc0] sm:$0xf]  ;;  %v223_v13 = vld [vmem:[%s1231_s6 + $0xd0] sm:$0xf] }
  0x21   : > { %v225_v14 = vld [vmem:[%s1231_s6 + $0xe0] sm:$0xf]  ;;  %222 = vst [vmem:[%s1236_s7 + $0x30] sm:$0xf] %v221_v12  ;;  %224 = vst [vmem:[%s1236_s7 + $0x34] sm:$0xf] %v223_v13 }
  0x22   : > { %226 = vst [vmem:[%s1236_s7 + $0x38] sm:$0xf] %v225_v14  ;;  %v227_v15 = vld [vmem:[%s1231_s6 + $0xf0] sm:$0xf]  ;;  %v229_v16 = vld [vmem:[%s1231_s6 + $0x100] sm:$0xf] }
  0x23   : > { %v231_v17 = vld [vmem:[%s1231_s6 + $0x110] sm:$0xf]  ;;  %228 = vst [vmem:[%s1236_s7 + $0x3c] sm:$0xf] %v227_v15  ;;  %230 = vst [vmem:[%s1236_s7 + $0x40] sm:$0xf] %v229_v16 }
  0x24   : > { %232 = vst [vmem:[%s1236_s7 + $0x44] sm:$0xf] %v231_v17  ;;  %v233_v18 = vld [vmem:[%s1231_s6 + $0x120] sm:$0xf]  ;;  %v235_v19 = vld [vmem:[%s1231_s6 + $0x130] sm:$0xf] }
  0x25   : > { %v237_v20 = vld [vmem:[%s1231_s6 + $0x140] sm:$0xf]  ;;  %234 = vst [vmem:[%s1236_s7 + $0x48] sm:$0xf] %v233_v18  ;;  %236 = vst [vmem:[%s1236_s7 + $0x4c] sm:$0xf] %v235_v19 }
  0x26   : > { %238 = vst [vmem:[%s1236_s7 + $0x50] sm:$0xf] %v237_v20  ;;  %v239_v21 = vld [vmem:[%s1231_s6 + $0x150] sm:$0xf]  ;;  %v241_v22 = vld [vmem:[%s1231_s6 + $0x160] sm:$0xf] }
  0x27   : > { %v243_v23 = vld [vmem:[%s1231_s6 + $0x170] sm:$0xf]  ;;  %240 = vst [vmem:[%s1236_s7 + $0x54] sm:$0xf] %v239_v21  ;;  %242 = vst [vmem:[%s1236_s7 + $0x58] sm:$0xf] %v241_v22 }
  0x28   : > { %244 = vst [vmem:[%s1236_s7 + $0x5c] sm:$0xf] %v243_v23  ;;  %v245_v24 = vld [vmem:[%s1231_s6 + $0x180] sm:$0xf]  ;;  %v247_v25 = vld [vmem:[%s1231_s6 + $0x190] sm:$0xf] }
  0x29   : > { %v249_v26 = vld [vmem:[%s1231_s6 + $0x1a0] sm:$0xf]  ;;  %246 = vst [vmem:[%s1236_s7 + $0x60] sm:$0xf] %v245_v24  ;;  %248 = vst [vmem:[%s1236_s7 + $0x64] sm:$0xf] %v247_v25 }
  0x2a   : > { %250 = vst [vmem:[%s1236_s7 + $0x68] sm:$0xf] %v249_v26  ;;  %v251_v27 = vld [vmem:[%s1231_s6 + $0x1b0] sm:$0xf]  ;;  %v253_v28 = vld [vmem:[%s1231_s6 + $0x1c0] sm:$0xf] }
  0x2b   : > { %v255_v29 = vld [vmem:[%s1231_s6 + $0x1d0] sm:$0xf]  ;;  %252 = vst [vmem:[%s1236_s7 + $0x6c] sm:$0xf] %v251_v27  ;;  %254 = vst [vmem:[%s1236_s7 + $0x70] sm:$0xf] %v253_v28 }
  0x2c   : > { %256 = vst [vmem:[%s1236_s7 + $0x74] sm:$0xf] %v255_v29  ;;  %v257_v30 = vld [vmem:[%s1231_s6 + $0x1e0] sm:$0xf]  ;;  %v259_v31 = vld [vmem:[%s1231_s6 + $0x1f0] sm:$0xf] }
  0x2d   : > { %v261_v32 = vld [vmem:[%s1231_s6 + $0x200] sm:$0xf]  ;;  %258 = vst [vmem:[%s1236_s7 + $0x78] sm:$0xf] %v257_v30  ;;  %260 = vst [vmem:[%s1236_s7 + $0x7c] sm:$0xf] %v259_v31 }
  0x2e   : > { %262 = vst [vmem:[%s1236_s7 + $0x80] sm:$0xf] %v261_v32  ;;  %v263_v33 = vld [vmem:[%s1231_s6 + $0x210] sm:$0xf]  ;;  %v265_v34 = vld [vmem:[%s1231_s6 + $0x220] sm:$0xf] }
  0x2f   : > { %v267_v35 = vld [vmem:[%s1231_s6 + $0x230] sm:$0xf]  ;;  %264 = vst [vmem:[%s1236_s7 + $0x84] sm:$0xf] %v263_v33  ;;  %266 = vst [vmem:[%s1236_s7 + $0x88] sm:$0xf] %v265_v34 }
  0x30   : > { %268 = vst [vmem:[%s1236_s7 + $0x8c] sm:$0xf] %v267_v35  ;;  %v269_v36 = vld [vmem:[%s1231_s6 + $0x240] sm:$0xf]  ;;  %v271_v37 = vld [vmem:[%s1231_s6 + $0x250] sm:$0xf] }
  0x31   : > { %v273_v38 = vld [vmem:[%s1231_s6 + $0x260] sm:$0xf]  ;;  %270 = vst [vmem:[%s1236_s7 + $0x90] sm:$0xf] %v269_v36  ;;  %272 = vst [vmem:[%s1236_s7 + $0x94] sm:$0xf] %v271_v37 }
  0x32   : > { %274 = vst [vmem:[%s1236_s7 + $0x98] sm:$0xf] %v273_v38  ;;  %v275_v39 = vld [vmem:[%s1231_s6 + $0x270] sm:$0xf]  ;;  %v277_v40 = vld [vmem:[%s1231_s6 + $0x280] sm:$0xf] }
  0x33   : > { %v279_v41 = vld [vmem:[%s1231_s6 + $0x290] sm:$0xf]  ;;  %276 = vst [vmem:[%s1236_s7 + $0x9c] sm:$0xf] %v275_v39  ;;  %278 = vst [vmem:[%s1236_s7 + $0xa0] sm:$0xf] %v277_v40 }
  0x34   : > { %280 = vst [vmem:[%s1236_s7 + $0xa4] sm:$0xf] %v279_v41  ;;  %v281_v42 = vld [vmem:[%s1231_s6 + $0x2a0] sm:$0xf]  ;;  %v283_v43 = vld [vmem:[%s1231_s6 + $0x2b0] sm:$0xf] }
  0x35   : > { %v285_v44 = vld [vmem:[%s1231_s6 + $0x2c0] sm:$0xf]  ;;  %282 = vst [vmem:[%s1236_s7 + $0xa8] sm:$0xf] %v281_v42  ;;  %284 = vst [vmem:[%s1236_s7 + $0xac] sm:$0xf] %v283_v43 }
  0x36   : > { %286 = vst [vmem:[%s1236_s7 + $0xb0] sm:$0xf] %v285_v44  ;;  %v287_v45 = vld [vmem:[%s1231_s6 + $0x2d0] sm:$0xf]  ;;  %v289_v46 = vld [vmem:[%s1231_s6 + $0x2e0] sm:$0xf] }
  0x37   : > { %v291_v47 = vld [vmem:[%s1231_s6 + $0x2f0] sm:$0xf]  ;;  %288 = vst [vmem:[%s1236_s7 + $0xb4] sm:$0xf] %v287_v45  ;;  %290 = vst [vmem:[%s1236_s7 + $0xb8] sm:$0xf] %v289_v46 }
  0x38   : > { %292 = vst [vmem:[%s1236_s7 + $0xbc] sm:$0xf] %v291_v47 }
  0x39 PF: > { %p917_p7 = scmp.ge.s32.totalorder %s1146_s18, 1  ;;  %p416_p8 = scmp.lt.s32.totalorder %s1146_s18, 25 }
  0x3b   : > { %p417_p9 = pnand %p917_p7, %p416_p8 }
  0x3c   : > { %s423_s8 = sand.u32 (!%p417_p9), 1, %s1122_s12   ;;  %s461_s9 = smul.u32 (!%p417_p9), 3, %s1130_s14 }
  0x3d   : > { %420 = sbr.rel (%p417_p9) target bundleno = 345 (0x159), region = 69  ;;  %p472_p10 = scmp.lt.s32.totalorder (!%p417_p9), %s1134_s15, 3 }
  0x3e   : > { %s1005_s10 = smul.u32 (!%p417_p9), 192, %s423_s8  ;;  %p464_p11 = scmp.lt.s32.totalorder (!%p417_p9), %s461_s9, 17 }
  0x3f   : > { %p920_p12 = scmp.ne.s32.totalorder (!%p417_p9), %s1130_s14, 0 }
  0x40   : > { %s1354_s4 = scalar_lea.vmem (!%p417_p9), [#allocation3], %s1005_s10 }
  0x44   : > { %s1428_s9 = smov (!%p464_p11, %s461_s9), 17  ;;  %s1430_s15 = smov (!%p472_p10, %s1134_s15), 3 }
  0x45   : > { %s918_s11 = sshll.u32 %s1428_s9, 2  ;;  %s474_s27 = scalar_lea.vmem %s1413_s2, %s1430_s15  ;;  %v1148_v48 = vmov (!%p920_p12), 0.0  }
  0x46   : > { %s1342_s23 = scalar_lea.vmem %s1411_s0, %s918_s11  ;;  %s919_s12 = sshll.u32 %s1430_s15, 2  ;;  %488 = vst [vmem:[#allocation2] sm:$0xff] (!%p920_p12), %v1148_v48 }
  0x47   : > { %s1352_s30 = scalar_lea.vmem %s1414_s3, %s919_s12  ;;  %487 = sbr.rel (%p920_p12) target bundleno = 78 (0x4e), region = 77 }
  0x4e PF: > { %v1065_v49 = vld [vmem:[%s1354_s4 + $0x40] sm:$0xff]   ;;  %v1149_v50 = vmov 0.0   ;;  %vm1150_vm0 = vmmov 0   ;;  %v1068_v53 = vld [vmem:[%s1354_s4 + $0x48] sm:$0xff]   ;;  %v1071_v56 = vld [vmem:[%s1354_s4 + $0x50] sm:$0xff]   ;;  %p948_p13 = scmp.ne.s32.totalorder %s1130_s14, 5 }
  0x4f   : > { %984 = vmatprep.subr.bf16.mxu1 %v1149_v50  ;;  %v1066_v51 = vld [vmem:[%s1354_s4] sm:$0xff]   ;;  %953 = vmatprep.subr.bf16.mxu0 %v1065_v49  ;;  %v1069_v54 = vld [vmem:[%s1354_s4 + $0x8] sm:$0xff]   ;;  %v1072_v57 = vld [vmem:[%s1354_s4 + $0x10] sm:$0xff]  }
  0x50   : > { %v1067_v52 = vld [vmem:[%s1354_s4 + $0x80] sm:$0xff]   ;;  %1000 = vmatprep.mubr.msk.bf16.mxu1 %vm1150_vm0, %v1149_v50  ;;  %954 = vmatpush3.bf16.msra.mxu0 %v1066_v51  ;;  %v1070_v55 = vld [vmem:[%s1354_s4 + $0x88] sm:$0xff]   ;;  %v1073_v58 = vld [vmem:[%s1354_s4 + $0x90] sm:$0xff]  }
  0x51   : > { %985 = vmatpush3.bf16.msra.mxu1 %v1067_v52  ;;  %955 = vmatprep.subr.bf16.mxu0 %v1068_v53  ;;  %v1074_v59 = vld [vmem:[%s1354_s4 + $0x58] sm:$0xff]   ;;  %v1077_v62 = vld [vmem:[%s1354_s4 + $0x60] sm:$0xff]   ;;  %v1080_v1 = vld [vmem:[%s1354_s4 + $0x68] sm:$0xff]  }
  0x52   : > { %986 = vmatprep.subr.bf16.mxu1 %v1149_v50  ;;  %v1075_v60 = vld [vmem:[%s1354_s4 + $0x18] sm:$0xff]   ;;  %v1078_v63 = vld [vmem:[%s1354_s4 + $0x20] sm:$0xff]   ;;  %v1081_v2 = vld [vmem:[%s1354_s4 + $0x28] sm:$0xff]  }
  0x53   : > { %v1076_v61 = vld [vmem:[%s1354_s4 + $0x98] sm:$0xff]   ;;  %v1079_v0 = vld [vmem:[%s1354_s4 + $0xa0] sm:$0xff]   ;;  %v1082_v3 = vld [vmem:[%s1354_s4 + $0xa8] sm:$0xff]  }
  0x54   : > { %956 = vmatpush3.bf16.msra.mxu0 %v1069_v54  ;;  %v1083_v4 = vld [vmem:[%s1354_s4 + $0x70] sm:$0xff]   ;;  %v1086_v7 = vld [vmem:[%s1354_s4 + $0x78] sm:$0xff]   ;;  %v1091_v13 = vld [vmem:[%s1342_s23 + $0x8] ss:$0 sps:$4 sm:$0xff]  }
  0x55   : > { %987 = vmatpush3.bf16.msra.mxu1 %v1070_v55  ;;  %957 = vmatprep.subr.bf16.mxu0 %v1071_v56  ;;  %v1084_v5 = vld [vmem:[%s1354_s4 + $0x30] sm:$0xff]   ;;  %v490_v8 = vld [vmem:[%s1342_s23] sm:$0xff] }
  0x56   : > { %988 = vmatprep.subr.bf16.mxu1 %v1149_v50  ;;  %v1085_v6 = vld [vmem:[%s1354_s4 + $0xb0] sm:$0xff]   ;;  %v922_v9 = vcombine.high %v490_v8, %v490_v8  ;;  %v1087_v10 = vld [vmem:[%s1354_s4 + $0x38] sm:$0xff]   ;;  %v921_v12 = vcombine.low %v490_v8, %v490_v8 }
  0x57   : > { %v1088_v11 = vld [vmem:[%s1354_s4 + $0xb8] sm:$0xff]  }
  0x58   : > { %958 = vmatpush3.bf16.msra.mxu0 %v1072_v57  ;;  %727 = vmatprep.mubr.bf16.mxu0 %v922_v9  ;;  %v489_v20 = vld [vmem:[#allocation2] sm:$0xff] }
  0x59   : > { %989 = vmatpush3.bf16.msra.mxu1 %v1073_v58  ;;  %959 = vmatprep.subr.bf16.mxu0 %v1074_v59  ;;  %v949_v27 = vld [vmem:[%s474_s27] ss:$0 sm:$0xff] (!%p948_p13) }
  0x5a   : > { %990 = vmatprep.subr.bf16.mxu1 %v1149_v50 }
  0x5c   : > { %960 = vmatpush3.bf16.msra.mxu0 %v1075_v60 }
  0x5d   : > { %991 = vmatpush3.bf16.msra.mxu1 %v1076_v61  ;;  %961 = vmatprep.subr.bf16.mxu0 %v1077_v62 }
  0x5e   : > { %992 = vmatprep.subr.bf16.mxu1 %v1149_v50 }
  0x60   : > { %962 = vmatpush3.bf16.msra.mxu0 %v1078_v63 }
  0x61   : > { %993 = vmatpush3.bf16.msra.mxu1 %v1079_v0  ;;  %963 = vmatprep.subr.bf16.mxu0 %v1080_v1 }
  0x62   : > { %994 = vmatprep.subr.bf16.mxu1 %v1149_v50 }
  0x64   : > { %964 = vmatpush3.bf16.msra.mxu0 %v1081_v2 }
  0x65   : > { %995 = vmatpush3.bf16.msra.mxu1 %v1082_v3  ;;  %965 = vmatprep.subr.bf16.mxu0 %v1083_v4 }
  0x66   : > { %996 = vmatprep.subr.bf16.mxu1 %v1149_v50 }
  0x68   : > { %966 = vmatpush3.bf16.msra.mxu0 %v1084_v5 }
  0x69   : > { %997 = vmatpush3.bf16.msra.mxu1 %v1085_v6  ;;  %967 = vmatprep.subr.bf16.mxu0 %v1086_v7 }
  0x6a   : > { %998 = vmatprep.subr.bf16.mxu1 %v1149_v50 }
  0x6c   : > { %968 = vmatpush3.bf16.msra.mxu0 %v1087_v10 }
  0x6d   : > { %999 = vmatpush3.bf16.msra.mxu1 %v1088_v11 }
  0x6f   : > { %728 = vmatmul.mubr.bf16.vlgmr.msra.gmra.mrb[0].mxu0 %v921_v12 }
  0x70   : > { %1001 = vmatmul.mubr.bf16.vlgmr.msra.gmra.mrb[0].mxu1 %v1091_v13 }
 0x142   : > { %v969_v14 = vpop.f32.mrb[0].mxu0 }
 0x143   : > { %v769_v15 = vpop.f32.mrb[0].mxu1  ;;  %v970_v16 = vpop.f32.mrb[1].mxu0 }
 0x144   : > { %v971_v17 = vadd.f32 %v970_v16, %v969_v14  ;;  %v1002_v18 = vpop.f32.mrb[1].mxu1  ;;  %v972_v19 = vpop.f32.mrb[2].mxu0  ;;  %780 = sbr.rel (%p948_p13) target bundleno = 345 (0x159), region = 81 }
 0x145   : > { %v772_v21 = vpop.f32.mrb[2].mxu1  ;;  %v973_v22 = vpop.f32.mrb[3].mxu0 }
 0x146   : > { %v770_v23 = vadd.f32 %v971_v17, %v769_v15  ;;  %v1003_v24 = vpop.f32.mrb[3].mxu1 }
 0x148   : > { %v775_v25 = vadd.f32 %v770_v23, %v489_v20 }
 0x14a   : > { %776 = vst [vmem:[#allocation2] sm:$0xff] %v775_v25 }
 0x151   : > { %v781_v26 = vld [vmem:[#allocation2] sm:$0xff] }
 0x152   : > { %v789_v28 = vadd.f32 %v949_v27, %v781_v26 }
 0x154   : > { %v790_v29 = vmax.f32 %v789_v28, 0.0 }
 0x156   : > { %v791_v30 = vpack.c.bf16 %v790_v29, %v790_v29 }
 0x158   : > { %792 = vst [vmem:[%s1352_s30] sm:$0xf] %v791_v30 }
 0x159 PF: > { %s13_s18 = sadd.s32 1, %s1146_s18   ;;  %s1415_s12 = smov %s1126_s13 }
 0x15a   : > { %p10_p0 = scmp.ge.s32.totalorder %s13_s18, 26   ;;  %s1416_s13 = smov %s1222_s25 }
 0x15b   : > { %s1417_s14 = smov %s1138_s16  ;;  %s1418_s15 = smov %s1142_s17 }
 0x15c   : > { %s1419_s16 = smov %s1422_s19  ;;  %s1420_s17 = smov %s1426_s20 }
 0x15d   :  { %12 = sbr.rel (!%p10_p0) target bundleno = 4 (0x4), region = 122 }

// kernel: my_resnet_forward.39
= control target key start
LH: loop header
LB: loop body
LE: loop exit
PB: predicated region body
PF: predicated region fallthrough
CT: control target
= control target key end

     0   :  { %s895_s12 = smov 0   ;;  %s897_s13 = smov 0   ;;  %s1053_s0 = inlined_call_operand.vmem [shape: bf16[8,256], index: 0, kind: input, shape index: {}]   ;;  %s1054_s1 = inlined_call_operand.vmem [shape: bf16[256,512], index: 1, kind: input, shape index: {}]   ;;  %s1055_s2 = inlined_call_operand.vmem [shape: f32[1,512], index: 2, kind: input, shape index: {}]   ;;  %s1056_s3 = inlined_call_operand.vmem [shape: bf16[8,512], index: 3, kind: output, shape index: {}]  }
   0x1   :  { %s899_s14 = smov 0   ;;  %s901_s15 = smov 0  }
   0x2   :  { %s903_s16 = smov 0  }
   0x3 LB: > { %s28_s17 = sadd.s32 1, %s869_s15  ;;  %p76_p1 = scmp.ne.s32.totalorder %s861_s13, %s857_s12  ;;  %s873_s16 = sphi %s903_s16, %s13_s16   ;;  %s869_s15 = sphi %s901_s15, %s1060_s15   ;;  %s865_s14 = sphi %s899_s14, %s1059_s14   ;;  %s861_s13 = sphi %s897_s13, %s1058_s13   ;;  %s857_s12 = sphi %s895_s12, %s1057_s12  }
   0x4   : > { %p30_p0 = scmp.ge.s32.totalorder %s28_s17, 4  ;;  %p77_p2 = scmp.eq.s32.totalorder %s873_s16, 0 }
   0x5   : > { %s69_s19 = sadd.s32 1, %s861_s13  ;;  %p728_p5 = scmp.ge.s32.totalorder %s873_s16, 4 }
   0x6   : > { %s1062_s17 = smov (%p30_p0, %s28_s17), 0  ;;  %p78_p3 = por %p77_p2, %p76_p1 }
   0x7   : > { %s65_s18 = ssub.s32 %s869_s15, %s1062_s17  ;;  %169 = sbr.rel (%p728_p5) target bundleno = 39 (0x27), region = 20 }
   0x8   : > { %p67_p4 = scmp.eq.s32.totalorder %s65_s18, 0 }
   0xa   : > { %s930_s20 = scalar_select %p67_p4, %s861_s13, %s69_s19  }
   0xe   : > { %172 = sbr.rel (!%p78_p3) target bundleno = 39 (0x27), region = 24  ;;  %s174_s21 = sand.u32 (%p78_p3), 1, %s861_s13  }
   0xf   : > { %s730_s22 = sshll.u32 (%p78_p3), %s869_s15, 2  ;;  %s729_s23 = sshll.u32 (%p78_p3), %s174_s21, 7 }
  0x10   : > { %s938_s26 = scalar_lea.vmem (%p78_p3), %s1054_s1, %s730_s22  ;;  %s942_s27 = scalar_lea.vmem (%p78_p3), [#allocation2], %s729_s23 }
  0x11   : > { %v197_v0 = vld [vmem:[%s938_s26] sm:$0xf] (%p78_p3)  ;;  %v199_v1 = vld [vmem:[%s938_s26 + $0x10] sm:$0xf] (%p78_p3) }
  0x12   : > { %198 = vst [vmem:[%s942_s27] sm:$0xf] (%p78_p3), %v197_v0  ;;  %200 = vst [vmem:[%s942_s27 + $0x4] sm:$0xf] (%p78_p3), %v199_v1  ;;  %v201_v2 = vld [vmem:[%s938_s26 + $0x20] sm:$0xf] (%p78_p3) }
  0x13   : > { %v203_v3 = vld [vmem:[%s938_s26 + $0x30] sm:$0xf] (%p78_p3)  ;;  %v205_v4 = vld [vmem:[%s938_s26 + $0x40] sm:$0xf] (%p78_p3)  ;;  %202 = vst [vmem:[%s942_s27 + $0x8] sm:$0xf] (%p78_p3), %v201_v2 }
  0x14   : > { %204 = vst [vmem:[%s942_s27 + $0xc] sm:$0xf] (%p78_p3), %v203_v3  ;;  %206 = vst [vmem:[%s942_s27 + $0x10] sm:$0xf] (%p78_p3), %v205_v4  ;;  %v207_v5 = vld [vmem:[%s938_s26 + $0x50] sm:$0xf] (%p78_p3) }
  0x15   : > { %v209_v6 = vld [vmem:[%s938_s26 + $0x60] sm:$0xf]  ;;  %v211_v7 = vld [vmem:[%s938_s26 + $0x70] sm:$0xf]  ;;  %208 = vst [vmem:[%s942_s27 + $0x14] sm:$0xf] %v207_v5 }
  0x16   : > { %210 = vst [vmem:[%s942_s27 + $0x18] sm:$0xf] %v209_v6  ;;  %212 = vst [vmem:[%s942_s27 + $0x1c] sm:$0xf] %v211_v7  ;;  %v213_v8 = vld [vmem:[%s938_s26 + $0x80] sm:$0xf] }
  0x17   : > { %v215_v9 = vld [vmem:[%s938_s26 + $0x90] sm:$0xf]  ;;  %v217_v10 = vld [vmem:[%s938_s26 + $0xa0] sm:$0xf]  ;;  %214 = vst [vmem:[%s942_s27 + $0x20] sm:$0xf] %v213_v8 }
  0x18   : > { %216 = vst [vmem:[%s942_s27 + $0x24] sm:$0xf] %v215_v9  ;;  %218 = vst [vmem:[%s942_s27 + $0x28] sm:$0xf] %v217_v10  ;;  %v219_v11 = vld [vmem:[%s938_s26 + $0xb0] sm:$0xf] }
  0x19   : > { %v221_v12 = vld [vmem:[%s938_s26 + $0xc0] sm:$0xf]  ;;  %v223_v13 = vld [vmem:[%s938_s26 + $0xd0] sm:$0xf]  ;;  %220 = vst [vmem:[%s942_s27 + $0x2c] sm:$0xf] %v219_v11 }
  0x1a   : > { %222 = vst [vmem:[%s942_s27 + $0x30] sm:$0xf] %v221_v12  ;;  %224 = vst [vmem:[%s942_s27 + $0x34] sm:$0xf] %v223_v13  ;;  %v225_v14 = vld [vmem:[%s938_s26 + $0xe0] sm:$0xf] }
  0x1b   : > { %v227_v15 = vld [vmem:[%s938_s26 + $0xf0] sm:$0xf]  ;;  %v229_v16 = vld [vmem:[%s938_s26 + $0x100] sm:$0xf]  ;;  %226 = vst [vmem:[%s942_s27 + $0x38] sm:$0xf] %v225_v14 }
  0x1c   : > { %228 = vst [vmem:[%s942_s27 + $0x3c] sm:$0xf] %v227_v15  ;;  %230 = vst [vmem:[%s942_s27 + $0x40] sm:$0xf] %v229_v16  ;;  %v231_v17 = vld [vmem:[%s938_s26 + $0x110] sm:$0xf] }
  0x1d   : > { %v233_v18 = vld [vmem:[%s938_s26 + $0x120] sm:$0xf]  ;;  %v235_v19 = vld [vmem:[%s938_s26 + $0x130] sm:$0xf]  ;;  %232 = vst [vmem:[%s942_s27 + $0x44] sm:$0xf] %v231_v17 }
  0x1e   : > { %234 = vst [vmem:[%s942_s27 + $0x48] sm:$0xf] %v233_v18  ;;  %236 = vst [vmem:[%s942_s27 + $0x4c] sm:$0xf] %v235_v19  ;;  %v237_v20 = vld [vmem:[%s938_s26 + $0x140] sm:$0xf] }
  0x1f   : > { %v239_v21 = vld [vmem:[%s938_s26 + $0x150] sm:$0xf]  ;;  %v241_v22 = vld [vmem:[%s938_s26 + $0x160] sm:$0xf]  ;;  %238 = vst [vmem:[%s942_s27 + $0x50] sm:$0xf] %v237_v20 }
  0x20   : > { %240 = vst [vmem:[%s942_s27 + $0x54] sm:$0xf] %v239_v21  ;;  %242 = vst [vmem:[%s942_s27 + $0x58] sm:$0xf] %v241_v22  ;;  %v243_v23 = vld [vmem:[%s938_s26 + $0x170] sm:$0xf] }
  0x21   : > { %v245_v24 = vld [vmem:[%s938_s26 + $0x180] sm:$0xf]  ;;  %v247_v25 = vld [vmem:[%s938_s26 + $0x190] sm:$0xf]  ;;  %244 = vst [vmem:[%s942_s27 + $0x5c] sm:$0xf] %v243_v23 }
  0x22   : > { %246 = vst [vmem:[%s942_s27 + $0x60] sm:$0xf] %v245_v24  ;;  %248 = vst [vmem:[%s942_s27 + $0x64] sm:$0xf] %v247_v25  ;;  %v249_v26 = vld [vmem:[%s938_s26 + $0x1a0] sm:$0xf] }
  0x23   : > { %v251_v27 = vld [vmem:[%s938_s26 + $0x1b0] sm:$0xf]  ;;  %v253_v28 = vld [vmem:[%s938_s26 + $0x1c0] sm:$0xf]  ;;  %250 = vst [vmem:[%s942_s27 + $0x68] sm:$0xf] %v249_v26 }
  0x24   : > { %252 = vst [vmem:[%s942_s27 + $0x6c] sm:$0xf] %v251_v27  ;;  %254 = vst [vmem:[%s942_s27 + $0x70] sm:$0xf] %v253_v28  ;;  %v255_v29 = vld [vmem:[%s938_s26 + $0x1d0] sm:$0xf] }
  0x25   : > { %v257_v30 = vld [vmem:[%s938_s26 + $0x1e0] sm:$0xf]  ;;  %v259_v31 = vld [vmem:[%s938_s26 + $0x1f0] sm:$0xf]  ;;  %256 = vst [vmem:[%s942_s27 + $0x74] sm:$0xf] %v255_v29 }
  0x26   : > { %258 = vst [vmem:[%s942_s27 + $0x78] sm:$0xf] %v257_v30  ;;  %260 = vst [vmem:[%s942_s27 + $0x7c] sm:$0xf] %v259_v31 }
  0x27 PF: > { %p731_p6 = scmp.ge.s32.totalorder %s873_s16, 1  ;;  %p352_p7 = scmp.lt.s32.totalorder %s873_s16, 5 }
  0x29   : > { %p353_p8 = pnand %p731_p6, %p352_p7 }
  0x2a   : > { %s359_s28 = sand.u32 (!%p353_p8), 1, %s857_s12   ;;  %v420_v32 = vld [vmem:[%s1053_s0] sm:$0xff] (!%p353_p8)  ;;  %p408_p9 = scmp.lt.s32.totalorder (!%p353_p8), %s865_s14, 3 }
  0x2b   : > { %356 = sbr.rel (%p353_p8) target bundleno = 298 (0x12a), region = 69  ;;  %s732_s4 = sshll.u32 (!%p353_p8), %s359_s28, 7  ;;  %v736_v33 = vcombine.high (!%p353_p8), %v420_v32, %v420_v32  ;;  %v735_v50 = vcombine.low (!%p353_p8), %v420_v32, %v420_v32 }
  0x2c   : > { %s1012_s5 = scalar_lea.vmem (!%p353_p8), [#allocation2], %s732_s4 }
  0x2d   : > { %v817_v34 = vld [vmem:[%s1012_s5 + $0x40] sm:$0xff] (!%p353_p8)   ;;  %595 = vmatprep.mubr.bf16.mxu0 (!%p353_p8), %v736_v33  ;;  %v819_v36 = vld [vmem:[%s1012_s5 + $0x48] sm:$0xff] (!%p353_p8)   ;;  %v821_v38 = vld [vmem:[%s1012_s5 + $0x50] sm:$0xff] (!%p353_p8)  }
  0x2e   : > { %v818_v35 = vld [vmem:[%s1012_s5] sm:$0xff] (!%p353_p8)   ;;  %755 = vmatprep.subr.bf16.mxu0 (!%p353_p8), %v817_v34  ;;  %v820_v37 = vld [vmem:[%s1012_s5 + $0x8] sm:$0xff] (!%p353_p8)   ;;  %v822_v39 = vld [vmem:[%s1012_s5 + $0x10] sm:$0xff] (!%p353_p8)  }
  0x2f   : > { %756 = vmatpush3.bf16.msra.mxu0 (!%p353_p8), %v818_v35  ;;  %v823_v40 = vld [vmem:[%s1012_s5 + $0x58] sm:$0xff] (!%p353_p8)   ;;  %v825_v42 = vld [vmem:[%s1012_s5 + $0x60] sm:$0xff] (!%p353_p8)   ;;  %v827_v44 = vld [vmem:[%s1012_s5 + $0x68] sm:$0xff] (!%p353_p8)  }
  0x30   : > { %757 = vmatprep.subr.bf16.mxu0 (!%p353_p8), %v819_v36  ;;  %v824_v41 = vld [vmem:[%s1012_s5 + $0x18] sm:$0xff] (!%p353_p8)   ;;  %v826_v43 = vld [vmem:[%s1012_s5 + $0x20] sm:$0xff] (!%p353_p8)   ;;  %v828_v45 = vld [vmem:[%s1012_s5 + $0x28] sm:$0xff] (!%p353_p8)  }
  0x31   : > { %v829_v46 = vld [vmem:[%s1012_s5 + $0x70] sm:$0xff] (!%p353_p8)   ;;  %v831_v48 = vld [vmem:[%s1012_s5 + $0x78] sm:$0xff] (!%p353_p8)  }
  0x32   : > { %v830_v47 = vld [vmem:[%s1012_s5 + $0x30] sm:$0xff]   ;;  %v832_v49 = vld [vmem:[%s1012_s5 + $0x38] sm:$0xff]   ;;  %s1064_s14 = smov (!%p408_p9, %s865_s14), 3 }
  0x33   : > { %758 = vmatpush3.bf16.msra.mxu0 %v820_v37  ;;  %s410_s8 = scalar_lea.vmem %s1055_s2, %s1064_s14  ;;  %s733_s9 = sshll.u32 %s1064_s14, 2 }
  0x34   : > { %759 = vmatprep.subr.bf16.mxu0 %v821_v38  ;;  %v734_v52 = vld [vmem:[%s410_s8] ss:$0 sm:$0xff]  ;;  %s418_s12 = scalar_lea.vmem %s1056_s3, %s733_s9 }
  0x37   : > { %760 = vmatpush3.bf16.msra.mxu0 %v822_v39 }
  0x38   : > { %761 = vmatprep.subr.bf16.mxu0 %v823_v40 }
  0x3b   : > { %762 = vmatpush3.bf16.msra.mxu0 %v824_v41 }
  0x3c   : > { %763 = vmatprep.subr.bf16.mxu0 %v825_v42 }
  0x3f   : > { %764 = vmatpush3.bf16.msra.mxu0 %v826_v43 }
  0x40   : > { %765 = vmatprep.subr.bf16.mxu0 %v827_v44 }
  0x43   : > { %766 = vmatpush3.bf16.msra.mxu0 %v828_v45 }
  0x44   : > { %767 = vmatprep.subr.bf16.mxu0 %v829_v46 }
  0x47   : > { %768 = vmatpush3.bf16.msra.mxu0 %v830_v47 }
  0x48   : > { %769 = vmatprep.subr.bf16.mxu0 %v831_v48 }
  0x4b   : > { %770 = vmatpush3.bf16.msra.mxu0 %v832_v49 }
  0x4e   : > { %596 = vmatmul.mubr.bf16.vlgmr.msra.gmra.mrb[0].mxu0 %v735_v50 }
 0x121   : > { %v771_v51 = vpop.f32.mrb[0].mxu0 }
 0x122   : > { %v772_v53 = vpop.f32.mrb[1].mxu0 }
 0x123   : > { %v773_v54 = vadd.f32 %v772_v53, %v771_v51  ;;  %v774_v55 = vpop.f32.mrb[2].mxu0 }
 0x124   : > { %v775_v56 = vpop.f32.mrb[3].mxu0 }
 0x125   : > { %v598_v57 = vadd.f32 %v773_v54, %v734_v52 }
 0x127   : > { %v603_v58 = vpack.c.bf16 %v598_v57, %v598_v57 }
 0x129   : > { %604 = vst [vmem:[%s418_s12] sm:$0xf] %v603_v58 }
 0x12a PF: > { %s13_s16 = sadd.s32 1, %s873_s16   ;;  %s1057_s12 = smov %s861_s13 }
 0x12b   : > { %p10_p10 = scmp.ge.s32.totalorder %s13_s16, 6   ;;  %s1058_s13 = smov %s930_s20 }
 0x12c   : > { %s1059_s14 = smov %s869_s15  ;;  %s1060_s15 = smov %s1062_s17 }
 0x12d   :  { %12 = sbr.rel (!%p10_p10) target bundleno = 3 (0x3), region = 114 }

// kernel: my_resnet_forward.40
= control target key start
LH: loop header
LB: loop body
LE: loop exit
PB: predicated region body
PF: predicated region fallthrough
CT: control target
= control target key end

     0   :  { %s1396_s15 = smov 0   ;;  %s1398_s16 = smov 0   ;;  %s1682_s0 = inlined_call_operand.vmem [shape: bf16[8,4608], index: 0, kind: input, shape index: {}]   ;;  %s1683_s1 = inlined_call_operand.vmem [shape: bf16[4608,512], index: 1, kind: input, shape index: {}]   ;;  %s1684_s2 = inlined_call_operand.vmem [shape: f32[1,512], index: 2, kind: input, shape index: {}]   ;;  %s1685_s3 = inlined_call_operand.vmem [shape: bf16[8,512], index: 3, kind: input, shape index: {}]   ;;  %s1686_s4 = inlined_call_operand.vmem [shape: bf16[8,512], index: 4, kind: output, shape index: {}]  }
   0x1   :  { %s1400_s17 = smov 0   ;;  %s1402_s18 = smov 0  }
   0x2   :  { %s1404_s19 = smov 0   ;;  %s1406_s20 = smov 0  }
   0x3   :  { %s1408_s21 = smov 0  }
   0x4 LB: > { %s26_s22 = sadd.s32 1, %s1360_s19  ;;  %s29_s23 = sadd.s32 1, %s1364_s20  ;;  %s1368_s21 = sphi %s1408_s21, %s14_s21   ;;  %s1364_s20 = sphi %s1406_s20, %s1692_s20   ;;  %s1360_s19 = sphi %s1404_s19, %s1691_s19   ;;  %s1356_s18 = sphi %s1402_s18, %s1690_s18   ;;  %s1352_s17 = sphi %s1400_s17, %s1689_s17   ;;  %s1348_s16 = sphi %s1398_s16, %s1688_s16   ;;  %s1344_s15 = sphi %s1396_s15, %s1687_s15  }
   0x5   : > { %p27_p0 = scmp.ge.s32.totalorder %s26_s22, 9  ;;  %p77_p1 = scmp.ne.s32.totalorder %s1348_s16, %s1344_s15 }
   0x6   : > { %p78_p2 = scmp.eq.s32.totalorder %s1368_s21, 0  ;;  %s70_s27 = sadd.s32 1, %s1348_s16 }
   0x7   : > { %s1694_s22 = smov (%p27_p0, %s26_s22), 0  ;;  %s1696_s23 = smov (!%p27_p0, %s29_s23), %s1364_s20 }
   0x8   : > { %p79_p3 = por %p78_p2, %p77_p1  ;;  %p31_p4 = scmp.ge.s32.totalorder %s1696_s23, 4 }
   0x9   : > { %s65_s24 = ssub.s32 %s1360_s19, %s1694_s22  ;;  %p1124_p6 = scmp.ge.s32.totalorder %s1368_s21, 36 }
   0xa   : > { %s1698_s23 = smov (%p31_p4, %s1696_s23), 0 }
   0xb   : > { %s66_s25 = ssub.s32 %s1364_s20, %s1698_s23  ;;  %185 = sbr.rel (%p1124_p6) target bundleno = 67 (0x43), region = 16 }
   0xc   : > { %s67_s26 = sor.u32 %s66_s25, %s65_s24 }
   0xd   : > { %p68_p5 = scmp.eq.s32.totalorder %s67_s26, 0 }
   0xf   : > { %s1447_s28 = scalar_select %p68_p5, %s1348_s16, %s70_s27  }
  0x12   : > { %201 = sbr.rel (!%p79_p3) target bundleno = 67 (0x43), region = 24  ;;  %s203_s29 = sand.u32 (%p79_p3), 1, %s1348_s16  }
  0x13   : > { %s1176_s30 = sshll.u32 (%p79_p3), %s1360_s19, 8  ;;  %s1125_s5 = sshll.u32 (%p79_p3), %s203_s29, 8 }
  0x14   : > { %s208_s6 = sadd.s32 (%p79_p3), %s1364_s20, %s1176_s30  ;;  %s1461_s11 = scalar_lea.vmem (%p79_p3), [#allocation3], %s1125_s5 }
  0x15   : > { %s1128_s7 = sshll.u32 (%p79_p3), %s208_s6, 2 }
  0x16   : > { %s1456_s10 = scalar_lea.vmem (%p79_p3), %s1683_s1, %s1128_s7 }
  0x17   : > { %v226_v0 = vld [vmem:[%s1456_s10] sm:$0xf] (%p79_p3)  ;;  %v228_v1 = vld [vmem:[%s1456_s10 + $0x10] sm:$0xf] (%p79_p3) }
  0x18   : > { %v230_v2 = vld [vmem:[%s1456_s10 + $0x20] sm:$0xf] (%p79_p3)  ;;  %227 = vst [vmem:[%s1461_s11] sm:$0xf] (%p79_p3), %v226_v0  ;;  %229 = vst [vmem:[%s1461_s11 + $0x4] sm:$0xf] (%p79_p3), %v228_v1 }
  0x19   : > { %231 = vst [vmem:[%s1461_s11 + $0x8] sm:$0xf] %v230_v2  ;;  %v232_v3 = vld [vmem:[%s1456_s10 + $0x30] sm:$0xf]  ;;  %v234_v4 = vld [vmem:[%s1456_s10 + $0x40] sm:$0xf] }
  0x1a   : > { %v236_v5 = vld [vmem:[%s1456_s10 + $0x50] sm:$0xf]  ;;  %233 = vst [vmem:[%s1461_s11 + $0xc] sm:$0xf] %v232_v3  ;;  %235 = vst [vmem:[%s1461_s11 + $0x10] sm:$0xf] %v234_v4 }
  0x1b   : > { %237 = vst [vmem:[%s1461_s11 + $0x14] sm:$0xf] %v236_v5  ;;  %v238_v6 = vld [vmem:[%s1456_s10 + $0x60] sm:$0xf]  ;;  %v240_v7 = vld [vmem:[%s1456_s10 + $0x70] sm:$0xf] }
  0x1c   : > { %v242_v8 = vld [vmem:[%s1456_s10 + $0x80] sm:$0xf]  ;;  %239 = vst [vmem:[%s1461_s11 + $0x18] sm:$0xf] %v238_v6  ;;  %241 = vst [vmem:[%s1461_s11 + $0x1c] sm:$0xf] %v240_v7 }
  0x1d   : > { %243 = vst [vmem:[%s1461_s11 + $0x20] sm:$0xf] %v242_v8  ;;  %v244_v9 = vld [vmem:[%s1456_s10 + $0x90] sm:$0xf]  ;;  %v246_v10 = vld [vmem:[%s1456_s10 + $0xa0] sm:$0xf] }
  0x1e   : > { %v248_v11 = vld [vmem:[%s1456_s10 + $0xb0] sm:$0xf]  ;;  %245 = vst [vmem:[%s1461_s11 + $0x24] sm:$0xf] %v244_v9  ;;  %247 = vst [vmem:[%s1461_s11 + $0x28] sm:$0xf] %v246_v10 }
  0x1f   : > { %249 = vst [vmem:[%s1461_s11 + $0x2c] sm:$0xf] %v248_v11  ;;  %v250_v12 = vld [vmem:[%s1456_s10 + $0xc0] sm:$0xf]  ;;  %v252_v13 = vld [vmem:[%s1456_s10 + $0xd0] sm:$0xf] }
  0x20   : > { %v254_v14 = vld [vmem:[%s1456_s10 + $0xe0] sm:$0xf]  ;;  %251 = vst [vmem:[%s1461_s11 + $0x30] sm:$0xf] %v250_v12  ;;  %253 = vst [vmem:[%s1461_s11 + $0x34] sm:$0xf] %v252_v13 }
  0x21   : > { %255 = vst [vmem:[%s1461_s11 + $0x38] sm:$0xf] %v254_v14  ;;  %v256_v15 = vld [vmem:[%s1456_s10 + $0xf0] sm:$0xf]  ;;  %v258_v16 = vld [vmem:[%s1456_s10 + $0x100] sm:$0xf] }
  0x22   : > { %v260_v17 = vld [vmem:[%s1456_s10 + $0x110] sm:$0xf]  ;;  %257 = vst [vmem:[%s1461_s11 + $0x3c] sm:$0xf] %v256_v15  ;;  %259 = vst [vmem:[%s1461_s11 + $0x40] sm:$0xf] %v258_v16 }
  0x23   : > { %261 = vst [vmem:[%s1461_s11 + $0x44] sm:$0xf] %v260_v17  ;;  %v262_v18 = vld [vmem:[%s1456_s10 + $0x120] sm:$0xf]  ;;  %v264_v19 = vld [vmem:[%s1456_s10 + $0x130] sm:$0xf] }
  0x24   : > { %v266_v20 = vld [vmem:[%s1456_s10 + $0x140] sm:$0xf]  ;;  %263 = vst [vmem:[%s1461_s11 + $0x48] sm:$0xf] %v262_v18  ;;  %265 = vst [vmem:[%s1461_s11 + $0x4c] sm:$0xf] %v264_v19 }
  0x25   : > { %267 = vst [vmem:[%s1461_s11 + $0x50] sm:$0xf] %v266_v20  ;;  %v268_v21 = vld [vmem:[%s1456_s10 + $0x150] sm:$0xf]  ;;  %v270_v22 = vld [vmem:[%s1456_s10 + $0x160] sm:$0xf] }
  0x26   : > { %v272_v23 = vld [vmem:[%s1456_s10 + $0x170] sm:$0xf]  ;;  %269 = vst [vmem:[%s1461_s11 + $0x54] sm:$0xf] %v268_v21  ;;  %271 = vst [vmem:[%s1461_s11 + $0x58] sm:$0xf] %v270_v22 }
  0x27   : > { %273 = vst [vmem:[%s1461_s11 + $0x5c] sm:$0xf] %v272_v23  ;;  %v274_v24 = vld [vmem:[%s1456_s10 + $0x180] sm:$0xf]  ;;  %v276_v25 = vld [vmem:[%s1456_s10 + $0x190] sm:$0xf] }
  0x28   : > { %v278_v26 = vld [vmem:[%s1456_s10 + $0x1a0] sm:$0xf]  ;;  %275 = vst [vmem:[%s1461_s11 + $0x60] sm:$0xf] %v274_v24  ;;  %277 = vst [vmem:[%s1461_s11 + $0x64] sm:$0xf] %v276_v25 }
  0x29   : > { %279 = vst [vmem:[%s1461_s11 + $0x68] sm:$0xf] %v278_v26  ;;  %v280_v27 = vld [vmem:[%s1456_s10 + $0x1b0] sm:$0xf]  ;;  %v282_v28 = vld [vmem:[%s1456_s10 + $0x1c0] sm:$0xf] }
  0x2a   : > { %v284_v29 = vld [vmem:[%s1456_s10 + $0x1d0] sm:$0xf]  ;;  %281 = vst [vmem:[%s1461_s11 + $0x6c] sm:$0xf] %v280_v27  ;;  %283 = vst [vmem:[%s1461_s11 + $0x70] sm:$0xf] %v282_v28 }
  0x2b   : > { %285 = vst [vmem:[%s1461_s11 + $0x74] sm:$0xf] %v284_v29  ;;  %v286_v30 = vld [vmem:[%s1456_s10 + $0x1e0] sm:$0xf]  ;;  %v288_v31 = vld [vmem:[%s1456_s10 + $0x1f0] sm:$0xf] }
  0x2c   : > { %v290_v32 = vld [vmem:[%s1456_s10 + $0x200] sm:$0xf]  ;;  %287 = vst [vmem:[%s1461_s11 + $0x78] sm:$0xf] %v286_v30  ;;  %289 = vst [vmem:[%s1461_s11 + $0x7c] sm:$0xf] %v288_v31 }
  0x2d   : > { %291 = vst [vmem:[%s1461_s11 + $0x80] sm:$0xf] %v290_v32  ;;  %v292_v33 = vld [vmem:[%s1456_s10 + $0x210] sm:$0xf]  ;;  %v294_v34 = vld [vmem:[%s1456_s10 + $0x220] sm:$0xf] }
  0x2e   : > { %v296_v35 = vld [vmem:[%s1456_s10 + $0x230] sm:$0xf]  ;;  %293 = vst [vmem:[%s1461_s11 + $0x84] sm:$0xf] %v292_v33  ;;  %295 = vst [vmem:[%s1461_s11 + $0x88] sm:$0xf] %v294_v34 }
  0x2f   : > { %297 = vst [vmem:[%s1461_s11 + $0x8c] sm:$0xf] %v296_v35  ;;  %v298_v36 = vld [vmem:[%s1456_s10 + $0x240] sm:$0xf]  ;;  %v300_v37 = vld [vmem:[%s1456_s10 + $0x250] sm:$0xf] }
  0x30   : > { %v302_v38 = vld [vmem:[%s1456_s10 + $0x260] sm:$0xf]  ;;  %299 = vst [vmem:[%s1461_s11 + $0x90] sm:$0xf] %v298_v36  ;;  %301 = vst [vmem:[%s1461_s11 + $0x94] sm:$0xf] %v300_v37 }
  0x31   : > { %303 = vst [vmem:[%s1461_s11 + $0x98] sm:$0xf] %v302_v38  ;;  %v304_v39 = vld [vmem:[%s1456_s10 + $0x270] sm:$0xf]  ;;  %v306_v40 = vld [vmem:[%s1456_s10 + $0x280] sm:$0xf] }
  0x32   : > { %v308_v41 = vld [vmem:[%s1456_s10 + $0x290] sm:$0xf]  ;;  %305 = vst [vmem:[%s1461_s11 + $0x9c] sm:$0xf] %v304_v39  ;;  %307 = vst [vmem:[%s1461_s11 + $0xa0] sm:$0xf] %v306_v40 }
  0x33   : > { %309 = vst [vmem:[%s1461_s11 + $0xa4] sm:$0xf] %v308_v41  ;;  %v310_v42 = vld [vmem:[%s1456_s10 + $0x2a0] sm:$0xf]  ;;  %v312_v43 = vld [vmem:[%s1456_s10 + $0x2b0] sm:$0xf] }
  0x34   : > { %v314_v44 = vld [vmem:[%s1456_s10 + $0x2c0] sm:$0xf]  ;;  %311 = vst [vmem:[%s1461_s11 + $0xa8] sm:$0xf] %v310_v42  ;;  %313 = vst [vmem:[%s1461_s11 + $0xac] sm:$0xf] %v312_v43 }
  0x35   : > { %315 = vst [vmem:[%s1461_s11 + $0xb0] sm:$0xf] %v314_v44  ;;  %v316_v45 = vld [vmem:[%s1456_s10 + $0x2d0] sm:$0xf]  ;;  %v318_v46 = vld [vmem:[%s1456_s10 + $0x2e0] sm:$0xf] }
  0x36   : > { %v320_v47 = vld [vmem:[%s1456_s10 + $0x2f0] sm:$0xf]  ;;  %317 = vst [vmem:[%s1461_s11 + $0xb4] sm:$0xf] %v316_v45  ;;  %319 = vst [vmem:[%s1461_s11 + $0xb8] sm:$0xf] %v318_v46 }
  0x37   : > { %321 = vst [vmem:[%s1461_s11 + $0xbc] sm:$0xf] %v320_v47  ;;  %v322_v48 = vld [vmem:[%s1456_s10 + $0x300] sm:$0xf]  ;;  %v324_v49 = vld [vmem:[%s1456_s10 + $0x310] sm:$0xf] }
  0x38   : > { %v326_v50 = vld [vmem:[%s1456_s10 + $0x320] sm:$0xf]  ;;  %323 = vst [vmem:[%s1461_s11 + $0xc0] sm:$0xf] %v322_v48  ;;  %325 = vst [vmem:[%s1461_s11 + $0xc4] sm:$0xf] %v324_v49 }
  0x39   : > { %327 = vst [vmem:[%s1461_s11 + $0xc8] sm:$0xf] %v326_v50  ;;  %v328_v51 = vld [vmem:[%s1456_s10 + $0x330] sm:$0xf]  ;;  %v330_v52 = vld [vmem:[%s1456_s10 + $0x340] sm:$0xf] }
  0x3a   : > { %v332_v53 = vld [vmem:[%s1456_s10 + $0x350] sm:$0xf]  ;;  %329 = vst [vmem:[%s1461_s11 + $0xcc] sm:$0xf] %v328_v51  ;;  %331 = vst [vmem:[%s1461_s11 + $0xd0] sm:$0xf] %v330_v52 }
  0x3b   : > { %333 = vst [vmem:[%s1461_s11 + $0xd4] sm:$0xf] %v332_v53  ;;  %v334_v54 = vld [vmem:[%s1456_s10 + $0x360] sm:$0xf]  ;;  %v336_v55 = vld [vmem:[%s1456_s10 + $0x370] sm:$0xf] }
  0x3c   : > { %v338_v56 = vld [vmem:[%s1456_s10 + $0x380] sm:$0xf]  ;;  %335 = vst [vmem:[%s1461_s11 + $0xd8] sm:$0xf] %v334_v54  ;;  %337 = vst [vmem:[%s1461_s11 + $0xdc] sm:$0xf] %v336_v55 }
  0x3d   : > { %339 = vst [vmem:[%s1461_s11 + $0xe0] sm:$0xf] %v338_v56  ;;  %v340_v57 = vld [vmem:[%s1456_s10 + $0x390] sm:$0xf]  ;;  %v342_v58 = vld [vmem:[%s1456_s10 + $0x3a0] sm:$0xf] }
  0x3e   : > { %v344_v59 = vld [vmem:[%s1456_s10 + $0x3b0] sm:$0xf]  ;;  %341 = vst [vmem:[%s1461_s11 + $0xe4] sm:$0xf] %v340_v57  ;;  %343 = vst [vmem:[%s1461_s11 + $0xe8] sm:$0xf] %v342_v58 }
  0x3f   : > { %345 = vst [vmem:[%s1461_s11 + $0xec] sm:$0xf] %v344_v59  ;;  %v346_v60 = vld [vmem:[%s1456_s10 + $0x3c0] sm:$0xf]  ;;  %v348_v61 = vld [vmem:[%s1456_s10 + $0x3d0] sm:$0xf] }
  0x40   : > { %v350_v62 = vld [vmem:[%s1456_s10 + $0x3e0] sm:$0xf]  ;;  %347 = vst [vmem:[%s1461_s11 + $0xf0] sm:$0xf] %v346_v60  ;;  %349 = vst [vmem:[%s1461_s11 + $0xf4] sm:$0xf] %v348_v61 }
  0x41   : > { %351 = vst [vmem:[%s1461_s11 + $0xf8] sm:$0xf] %v350_v62  ;;  %v352_v63 = vld [vmem:[%s1456_s10 + $0x3f0] sm:$0xf] }
  0x42   : > { %353 = vst [vmem:[%s1461_s11 + $0xfc] sm:$0xf] %v352_v63 }
  0x43 PF: > { %p1129_p7 = scmp.ge.s32.totalorder %s1368_s21, 1  ;;  %p520_p8 = scmp.lt.s32.totalorder %s1368_s21, 37 }
  0x45   : > { %p521_p9 = pnand %p1129_p7, %p520_p8 }
  0x46   : > { %s527_s12 = sand.u32 (!%p521_p9), 1, %s1344_s15   ;;  %s1131_s13 = sshll.u32 (!%p521_p9), %s1352_s17, 2 }
  0x47   : > { %524 = sbr.rel (%p521_p9) target bundleno = 360 (0x168), region = 73  ;;  %s1130_s14 = sshll.u32 (!%p521_p9), %s527_s12, 8 }
  0x48   : > { %p578_p10 = scmp.lt.s32.totalorder (!%p521_p9), %s1131_s13, 35  ;;  %p586_p11 = scmp.lt.s32.totalorder (!%p521_p9), %s1356_s18, 3 }
  0x49   : > { %s1616_s12 = scalar_lea.vmem (!%p521_p9), [#allocation3], %s1130_s14  ;;  %p1135_p12 = scmp.ne.s32.totalorder (!%p521_p9), %s1352_s17, 0 }
  0x4e   : > { %s1700_s13 = smov (!%p578_p10, %s1131_s13), 35  ;;  %s1702_s18 = smov (!%p586_p11, %s1356_s18), 3 }
  0x4f   : > { %s1132_s24 = sshll.u32 %s1700_s13, 2  ;;  %s588_s5 = scalar_lea.vmem %s1684_s2, %s1702_s18  ;;  %v1370_v0 = vmov (!%p1135_p12), 0.0  }
  0x50   : > { %s1599_s27 = scalar_lea.vmem %s1682_s0, %s1132_s24  ;;  %s1133_s15 = sshll.u32 %s1702_s18, 2  ;;  %610 = vst [vmem:[#allocation2] sm:$0xff] (!%p1135_p12), %v1370_v0 }
  0x51   : > { %s1609_s8 = scalar_lea.vmem %s1685_s3, %s1133_s15  ;;  %s1614_s11 = scalar_lea.vmem %s1686_s4, %s1133_s15 }
  0x52   : > { %609 = sbr.rel (%p1135_p12) target bundleno = 89 (0x59), region = 81 }
  0x59 PF: > { %v1278_v1 = vld [vmem:[%s1616_s12 + $0x40] sm:$0xff]   ;;  %v1282_v5 = vld [vmem:[%s1616_s12 + $0x48] sm:$0xff]   ;;  %v1286_v9 = vld [vmem:[%s1616_s12 + $0x50] sm:$0xff]   ;;  %p1172_p13 = scmp.ne.s32.totalorder %s1352_s17, 8 }
  0x5a   : > { %v1279_v2 = vld [vmem:[%s1616_s12 + $0xc0] sm:$0xff]   ;;  %1177 = vmatprep.subr.bf16.mxu0 %v1278_v1  ;;  %v1283_v6 = vld [vmem:[%s1616_s12 + $0xc8] sm:$0xff]   ;;  %v1287_v10 = vld [vmem:[%s1616_s12 + $0xd0] sm:$0xff]  }
  0x5b   : > { %v1280_v3 = vld [vmem:[%s1616_s12] sm:$0xff]   ;;  %1199 = vmatprep.subr.bf16.mxu1 %v1279_v2  ;;  %v1284_v7 = vld [vmem:[%s1616_s12 + $0x8] sm:$0xff]   ;;  %v1288_v11 = vld [vmem:[%s1616_s12 + $0x10] sm:$0xff]  }
  0x5c   : > { %v1281_v4 = vld [vmem:[%s1616_s12 + $0x80] sm:$0xff]   ;;  %1178 = vmatpush3.bf16.msra.mxu0 %v1280_v3  ;;  %v1285_v8 = vld [vmem:[%s1616_s12 + $0x88] sm:$0xff]   ;;  %v1289_v12 = vld [vmem:[%s1616_s12 + $0x90] sm:$0xff]  }
  0x5d   : > { %1200 = vmatpush3.bf16.msra.mxu1 %v1281_v4  ;;  %1179 = vmatprep.subr.bf16.mxu0 %v1282_v5  ;;  %v1290_v13 = vld [vmem:[%s1616_s12 + $0x58] sm:$0xff]   ;;  %v1294_v17 = vld [vmem:[%s1616_s12 + $0x60] sm:$0xff]   ;;  %v1298_v21 = vld [vmem:[%s1616_s12 + $0x68] sm:$0xff]  }
  0x5e   : > { %1201 = vmatprep.subr.bf16.mxu1 %v1283_v6  ;;  %v1291_v14 = vld [vmem:[%s1616_s12 + $0xd8] sm:$0xff]   ;;  %v1295_v18 = vld [vmem:[%s1616_s12 + $0xe0] sm:$0xff]   ;;  %v1299_v22 = vld [vmem:[%s1616_s12 + $0xe8] sm:$0xff]  }
  0x5f   : > { %v1292_v15 = vld [vmem:[%s1616_s12 + $0x18] sm:$0xff]   ;;  %v1296_v19 = vld [vmem:[%s1616_s12 + $0x20] sm:$0xff]   ;;  %v1300_v23 = vld [vmem:[%s1616_s12 + $0x28] sm:$0xff]  }
  0x60   : > { %1180 = vmatpush3.bf16.msra.mxu0 %v1284_v7  ;;  %v1293_v16 = vld [vmem:[%s1616_s12 + $0x98] sm:$0xff]   ;;  %v1297_v20 = vld [vmem:[%s1616_s12 + $0xa0] sm:$0xff]   ;;  %v1301_v24 = vld [vmem:[%s1616_s12 + $0xa8] sm:$0xff]  }
  0x61   : > { %1202 = vmatpush3.bf16.msra.mxu1 %v1285_v8  ;;  %1181 = vmatprep.subr.bf16.mxu0 %v1286_v9  ;;  %v1302_v25 = vld [vmem:[%s1616_s12 + $0x70] sm:$0xff]   ;;  %v1306_v29 = vld [vmem:[%s1616_s12 + $0x78] sm:$0xff]   ;;  %v613_v34 = vld [vmem:[%s1599_s27 + $0x8] sm:$0xff] }
  0x62   : > { %1203 = vmatprep.subr.bf16.mxu1 %v1287_v10  ;;  %v1303_v26 = vld [vmem:[%s1616_s12 + $0xf0] sm:$0xff]   ;;  %v1307_v30 = vld [vmem:[%s1616_s12 + $0xf8] sm:$0xff]   ;;  %v1138_v37 = vcombine.low %v613_v34, %v613_v34  ;;  %v1139_v38 = vcombine.high %v613_v34, %v613_v34 }
  0x63   : > { %v1304_v27 = vld [vmem:[%s1616_s12 + $0x30] sm:$0xff]   ;;  %v1308_v31 = vld [vmem:[%s1616_s12 + $0x38] sm:$0xff]  }
  0x64   : > { %1182 = vmatpush3.bf16.msra.mxu0 %v1288_v11  ;;  %v1305_v28 = vld [vmem:[%s1616_s12 + $0xb0] sm:$0xff]   ;;  %v1309_v32 = vld [vmem:[%s1616_s12 + $0xb8] sm:$0xff]   ;;  %956 = vmatprep.mubr.bf16.mxu1 %v1139_v38 }
  0x65   : > { %1204 = vmatpush3.bf16.msra.mxu1 %v1289_v12  ;;  %1183 = vmatprep.subr.bf16.mxu0 %v1290_v13  ;;  %v612_v33 = vld [vmem:[%s1599_s27] sm:$0xff] }
  0x66   : > { %1205 = vmatprep.subr.bf16.mxu1 %v1291_v14  ;;  %v1136_v35 = vcombine.low %v612_v33, %v612_v33  ;;  %v1137_v36 = vcombine.high %v612_v33, %v612_v33  ;;  %v611_v47 = vld [vmem:[#allocation2] sm:$0xff] }
  0x67   : > { %v1173_v53 = vld [vmem:[%s588_s5] ss:$0 sm:$0xff] (!%p1172_p13) }
  0x68   : > { %1184 = vmatpush3.bf16.msra.mxu0 %v1292_v15  ;;  %916 = vmatprep.mubr.bf16.mxu0 %v1137_v36  ;;  %v979_v54 = vld [vmem:[%s1609_s8] sm:$0xf] (!%p1172_p13) }
  0x69   : > { %1206 = vmatpush3.bf16.msra.mxu1 %v1293_v16  ;;  %1185 = vmatprep.subr.bf16.mxu0 %v1294_v17  ;;  %v980_v56 = vunpack.c.l.bf16 (!%p1172_p13), %v979_v54 }
  0x6a   : > { %1207 = vmatprep.subr.bf16.mxu1 %v1295_v18 }
  0x6c   : > { %1186 = vmatpush3.bf16.msra.mxu0 %v1296_v19 }
  0x6d   : > { %1208 = vmatpush3.bf16.msra.mxu1 %v1297_v20  ;;  %1187 = vmatprep.subr.bf16.mxu0 %v1298_v21 }
  0x6e   : > { %1209 = vmatprep.subr.bf16.mxu1 %v1299_v22 }
  0x70   : > { %1188 = vmatpush3.bf16.msra.mxu0 %v1300_v23 }
  0x71   : > { %1210 = vmatpush3.bf16.msra.mxu1 %v1301_v24  ;;  %1189 = vmatprep.subr.bf16.mxu0 %v1302_v25 }
  0x72   : > { %1211 = vmatprep.subr.bf16.mxu1 %v1303_v26 }
  0x74   : > { %1190 = vmatpush3.bf16.msra.mxu0 %v1304_v27 }
  0x75   : > { %1212 = vmatpush3.bf16.msra.mxu1 %v1305_v28  ;;  %1191 = vmatprep.subr.bf16.mxu0 %v1306_v29 }
  0x76   : > { %1213 = vmatprep.subr.bf16.mxu1 %v1307_v30 }
  0x78   : > { %1192 = vmatpush3.bf16.msra.mxu0 %v1308_v31 }
  0x79   : > { %1214 = vmatpush3.bf16.msra.mxu1 %v1309_v32 }
  0x7b   : > { %917 = vmatmul.mubr.bf16.vlgmr.msra.gmra.mrb[0].mxu0 %v1136_v35 }
  0x7c   : > { %957 = vmatmul.mubr.bf16.vlgmr.msra.gmra.mrb[0].mxu1 %v1138_v37 }
 0x14e   : > { %v1193_v39 = vpop.f32.mrb[0].mxu0 }
 0x14f   : > { %v1215_v40 = vpop.f32.mrb[0].mxu1  ;;  %v1194_v41 = vpop.f32.mrb[1].mxu0 }
 0x150   : > { %v1216_v42 = vpop.f32.mrb[1].mxu1  ;;  %v1195_v43 = vadd.f32 %v1194_v41, %v1193_v39  ;;  %v1196_v45 = vpop.f32.mrb[2].mxu0 }
 0x151   : > { %v1217_v44 = vadd.f32 %v1216_v42, %v1215_v40  ;;  %v1218_v46 = vpop.f32.mrb[2].mxu1  ;;  %v1197_v48 = vpop.f32.mrb[3].mxu0  ;;  %969 = sbr.rel (%p1172_p13) target bundleno = 360 (0x168), region = 85 }
 0x152   : > { %v1219_v49 = vpop.f32.mrb[3].mxu1 }
 0x153   : > { %v959_v50 = vadd.f32 %v1217_v44, %v1195_v43 }
 0x155   : > { %v964_v51 = vadd.f32 %v959_v50, %v611_v47 }
 0x157   : > { %965 = vst [vmem:[#allocation2] sm:$0xff] %v964_v51 }
 0x15e   : > { %v970_v52 = vld [vmem:[#allocation2] sm:$0xff] }
 0x15f   : > { %v978_v55 = vadd.f32 %v1173_v53, %v970_v52 }
 0x161   : > { %v981_v57 = vadd.f32 %v980_v56, %v978_v55 }
 0x163   : > { %v982_v58 = vmax.f32 %v981_v57, 0.0 }
 0x165   : > { %v983_v59 = vpack.c.bf16 %v982_v58, %v982_v58 }
 0x167   : > { %984 = vst [vmem:[%s1614_s11] sm:$0xf] %v983_v59 }
 0x168 PF: > { %s14_s21 = sadd.s32 1, %s1368_s21   ;;  %s1687_s15 = smov %s1348_s16 }
 0x169   : > { %p11_p0 = scmp.ge.s32.totalorder %s14_s21, 38   ;;  %s1688_s16 = smov %s1447_s28 }
 0x16a   : > { %s1689_s17 = smov %s1360_s19  ;;  %s1690_s18 = smov %s1364_s20 }
 0x16b   : > { %s1691_s19 = smov %s1694_s22  ;;  %s1692_s20 = smov %s1698_s23 }
 0x16c   :  { %13 = sbr.rel (!%p11_p0) target bundleno = 4 (0x4), region = 129 }

// kernel: my_resnet_forward.41
= control target key start
LH: loop header
LB: loop body
LE: loop exit
PB: predicated region body
PF: predicated region fallthrough
CT: control target
= control target key end

     0   :  { %s1311_s12 = smov 0   ;;  %s1313_s13 = smov 0   ;;  %s1591_s0 = inlined_call_operand.vmem [shape: bf16[8,4608], index: 0, kind: input, shape index: {}]   ;;  %s1592_s1 = inlined_call_operand.vmem [shape: bf16[4608,512], index: 1, kind: input, shape index: {}]   ;;  %s1593_s2 = inlined_call_operand.vmem [shape: f32[1,512], index: 2, kind: input, shape index: {}]   ;;  %s1594_s3 = inlined_call_operand.vmem [shape: bf16[8,512], index: 3, kind: output, shape index: {}]  }
   0x1   :  { %s1315_s14 = smov 0   ;;  %s1317_s15 = smov 0  }
   0x2   :  { %s1319_s16 = smov 0   ;;  %s1321_s17 = smov 0  }
   0x3   :  { %s1323_s18 = smov 0  }
   0x4 LB: > { %s25_s19 = sadd.s32 1, %s1280_s16  ;;  %s28_s20 = sadd.s32 1, %s1284_s17  ;;  %s1288_s18 = sphi %s1323_s18, %s13_s18   ;;  %s1284_s17 = sphi %s1321_s17, %s1600_s17   ;;  %s1280_s16 = sphi %s1319_s16, %s1599_s16   ;;  %s1276_s15 = sphi %s1317_s15, %s1598_s15   ;;  %s1272_s14 = sphi %s1315_s14, %s1597_s14   ;;  %s1268_s13 = sphi %s1313_s13, %s1596_s13   ;;  %s1264_s12 = sphi %s1311_s12, %s1595_s12  }
   0x5   : > { %p26_p0 = scmp.ge.s32.totalorder %s25_s19, 9  ;;  %p76_p1 = scmp.ne.s32.totalorder %s1268_s13, %s1264_s12 }
   0x6   : > { %p77_p2 = scmp.eq.s32.totalorder %s1288_s18, 0  ;;  %s69_s24 = sadd.s32 1, %s1268_s13 }
   0x7   : > { %s1602_s19 = smov (%p26_p0, %s25_s19), 0  ;;  %s1604_s20 = smov (!%p26_p0, %s28_s20), %s1284_s17 }
   0x8   : > { %p78_p3 = por %p77_p2, %p76_p1  ;;  %p30_p4 = scmp.ge.s32.totalorder %s1604_s20, 4 }
   0x9   : > { %s64_s21 = ssub.s32 %s1280_s16, %s1602_s19  ;;  %p1045_p6 = scmp.ge.s32.totalorder %s1288_s18, 36 }
   0xa   : > { %s1606_s20 = smov (%p30_p4, %s1604_s20), 0 }
   0xb   : > { %s65_s22 = ssub.s32 %s1284_s17, %s1606_s20  ;;  %156 = sbr.rel (%p1045_p6) target bundleno = 67 (0x43), region = 16 }
   0xc   : > { %s66_s23 = sor.u32 %s65_s22, %s64_s21 }
   0xd   : > { %p67_p5 = scmp.eq.s32.totalorder %s66_s23, 0 }
   0xf   : > { %s1362_s25 = scalar_select %p67_p5, %s1268_s13, %s69_s24  }
  0x12   : > { %172 = sbr.rel (!%p78_p3) target bundleno = 67 (0x43), region = 24  ;;  %s174_s26 = sand.u32 (%p78_p3), 1, %s1268_s13  }
  0x13   : > { %s1096_s27 = sshll.u32 (%p78_p3), %s1280_s16, 8  ;;  %s1046_s28 = sshll.u32 (%p78_p3), %s174_s26, 8 }
  0x14   : > { %s179_s29 = sadd.s32 (%p78_p3), %s1284_s17, %s1096_s27  ;;  %s1376_s7 = scalar_lea.vmem (%p78_p3), [#allocation3], %s1046_s28 }
  0x15   : > { %s1049_s30 = sshll.u32 (%p78_p3), %s179_s29, 2 }
  0x16   : > { %s1371_s6 = scalar_lea.vmem (%p78_p3), %s1592_s1, %s1049_s30 }
  0x17   : > { %v197_v0 = vld [vmem:[%s1371_s6] sm:$0xf] (%p78_p3)  ;;  %v199_v1 = vld [vmem:[%s1371_s6 + $0x10] sm:$0xf] (%p78_p3) }
  0x18   : > { %v201_v2 = vld [vmem:[%s1371_s6 + $0x20] sm:$0xf] (%p78_p3)  ;;  %198 = vst [vmem:[%s1376_s7] sm:$0xf] (%p78_p3), %v197_v0  ;;  %200 = vst [vmem:[%s1376_s7 + $0x4] sm:$0xf] (%p78_p3), %v199_v1 }
  0x19   : > { %202 = vst [vmem:[%s1376_s7 + $0x8] sm:$0xf] %v201_v2  ;;  %v203_v3 = vld [vmem:[%s1371_s6 + $0x30] sm:$0xf]  ;;  %v205_v4 = vld [vmem:[%s1371_s6 + $0x40] sm:$0xf] }
  0x1a   : > { %v207_v5 = vld [vmem:[%s1371_s6 + $0x50] sm:$0xf]  ;;  %204 = vst [vmem:[%s1376_s7 + $0xc] sm:$0xf] %v203_v3  ;;  %206 = vst [vmem:[%s1376_s7 + $0x10] sm:$0xf] %v205_v4 }
  0x1b   : > { %208 = vst [vmem:[%s1376_s7 + $0x14] sm:$0xf] %v207_v5  ;;  %v209_v6 = vld [vmem:[%s1371_s6 + $0x60] sm:$0xf]  ;;  %v211_v7 = vld [vmem:[%s1371_s6 + $0x70] sm:$0xf] }
  0x1c   : > { %v213_v8 = vld [vmem:[%s1371_s6 + $0x80] sm:$0xf]  ;;  %210 = vst [vmem:[%s1376_s7 + $0x18] sm:$0xf] %v209_v6  ;;  %212 = vst [vmem:[%s1376_s7 + $0x1c] sm:$0xf] %v211_v7 }
  0x1d   : > { %214 = vst [vmem:[%s1376_s7 + $0x20] sm:$0xf] %v213_v8  ;;  %v215_v9 = vld [vmem:[%s1371_s6 + $0x90] sm:$0xf]  ;;  %v217_v10 = vld [vmem:[%s1371_s6 + $0xa0] sm:$0xf] }
  0x1e   : > { %v219_v11 = vld [vmem:[%s1371_s6 + $0xb0] sm:$0xf]  ;;  %216 = vst [vmem:[%s1376_s7 + $0x24] sm:$0xf] %v215_v9  ;;  %218 = vst [vmem:[%s1376_s7 + $0x28] sm:$0xf] %v217_v10 }
  0x1f   : > { %220 = vst [vmem:[%s1376_s7 + $0x2c] sm:$0xf] %v219_v11  ;;  %v221_v12 = vld [vmem:[%s1371_s6 + $0xc0] sm:$0xf]  ;;  %v223_v13 = vld [vmem:[%s1371_s6 + $0xd0] sm:$0xf] }
  0x20   : > { %v225_v14 = vld [vmem:[%s1371_s6 + $0xe0] sm:$0xf]  ;;  %222 = vst [vmem:[%s1376_s7 + $0x30] sm:$0xf] %v221_v12  ;;  %224 = vst [vmem:[%s1376_s7 + $0x34] sm:$0xf] %v223_v13 }
  0x21   : > { %226 = vst [vmem:[%s1376_s7 + $0x38] sm:$0xf] %v225_v14  ;;  %v227_v15 = vld [vmem:[%s1371_s6 + $0xf0] sm:$0xf]  ;;  %v229_v16 = vld [vmem:[%s1371_s6 + $0x100] sm:$0xf] }
  0x22   : > { %v231_v17 = vld [vmem:[%s1371_s6 + $0x110] sm:$0xf]  ;;  %228 = vst [vmem:[%s1376_s7 + $0x3c] sm:$0xf] %v227_v15  ;;  %230 = vst [vmem:[%s1376_s7 + $0x40] sm:$0xf] %v229_v16 }
  0x23   : > { %232 = vst [vmem:[%s1376_s7 + $0x44] sm:$0xf] %v231_v17  ;;  %v233_v18 = vld [vmem:[%s1371_s6 + $0x120] sm:$0xf]  ;;  %v235_v19 = vld [vmem:[%s1371_s6 + $0x130] sm:$0xf] }
  0x24   : > { %v237_v20 = vld [vmem:[%s1371_s6 + $0x140] sm:$0xf]  ;;  %234 = vst [vmem:[%s1376_s7 + $0x48] sm:$0xf] %v233_v18  ;;  %236 = vst [vmem:[%s1376_s7 + $0x4c] sm:$0xf] %v235_v19 }
  0x25   : > { %238 = vst [vmem:[%s1376_s7 + $0x50] sm:$0xf] %v237_v20  ;;  %v239_v21 = vld [vmem:[%s1371_s6 + $0x150] sm:$0xf]  ;;  %v241_v22 = vld [vmem:[%s1371_s6 + $0x160] sm:$0xf] }
  0x26   : > { %v243_v23 = vld [vmem:[%s1371_s6 + $0x170] sm:$0xf]  ;;  %240 = vst [vmem:[%s1376_s7 + $0x54] sm:$0xf] %v239_v21  ;;  %242 = vst [vmem:[%s1376_s7 + $0x58] sm:$0xf] %v241_v22 }
  0x27   : > { %244 = vst [vmem:[%s1376_s7 + $0x5c] sm:$0xf] %v243_v23  ;;  %v245_v24 = vld [vmem:[%s1371_s6 + $0x180] sm:$0xf]  ;;  %v247_v25 = vld [vmem:[%s1371_s6 + $0x190] sm:$0xf] }
  0x28   : > { %v249_v26 = vld [vmem:[%s1371_s6 + $0x1a0] sm:$0xf]  ;;  %246 = vst [vmem:[%s1376_s7 + $0x60] sm:$0xf] %v245_v24  ;;  %248 = vst [vmem:[%s1376_s7 + $0x64] sm:$0xf] %v247_v25 }
  0x29   : > { %250 = vst [vmem:[%s1376_s7 + $0x68] sm:$0xf] %v249_v26  ;;  %v251_v27 = vld [vmem:[%s1371_s6 + $0x1b0] sm:$0xf]  ;;  %v253_v28 = vld [vmem:[%s1371_s6 + $0x1c0] sm:$0xf] }
  0x2a   : > { %v255_v29 = vld [vmem:[%s1371_s6 + $0x1d0] sm:$0xf]  ;;  %252 = vst [vmem:[%s1376_s7 + $0x6c] sm:$0xf] %v251_v27  ;;  %254 = vst [vmem:[%s1376_s7 + $0x70] sm:$0xf] %v253_v28 }
  0x2b   : > { %256 = vst [vmem:[%s1376_s7 + $0x74] sm:$0xf] %v255_v29  ;;  %v257_v30 = vld [vmem:[%s1371_s6 + $0x1e0] sm:$0xf]  ;;  %v259_v31 = vld [vmem:[%s1371_s6 + $0x1f0] sm:$0xf] }
  0x2c   : > { %v261_v32 = vld [vmem:[%s1371_s6 + $0x200] sm:$0xf]  ;;  %258 = vst [vmem:[%s1376_s7 + $0x78] sm:$0xf] %v257_v30  ;;  %260 = vst [vmem:[%s1376_s7 + $0x7c] sm:$0xf] %v259_v31 }
  0x2d   : > { %262 = vst [vmem:[%s1376_s7 + $0x80] sm:$0xf] %v261_v32  ;;  %v263_v33 = vld [vmem:[%s1371_s6 + $0x210] sm:$0xf]  ;;  %v265_v34 = vld [vmem:[%s1371_s6 + $0x220] sm:$0xf] }
  0x2e   : > { %v267_v35 = vld [vmem:[%s1371_s6 + $0x230] sm:$0xf]  ;;  %264 = vst [vmem:[%s1376_s7 + $0x84] sm:$0xf] %v263_v33  ;;  %266 = vst [vmem:[%s1376_s7 + $0x88] sm:$0xf] %v265_v34 }
  0x2f   : > { %268 = vst [vmem:[%s1376_s7 + $0x8c] sm:$0xf] %v267_v35  ;;  %v269_v36 = vld [vmem:[%s1371_s6 + $0x240] sm:$0xf]  ;;  %v271_v37 = vld [vmem:[%s1371_s6 + $0x250] sm:$0xf] }
  0x30   : > { %v273_v38 = vld [vmem:[%s1371_s6 + $0x260] sm:$0xf]  ;;  %270 = vst [vmem:[%s1376_s7 + $0x90] sm:$0xf] %v269_v36  ;;  %272 = vst [vmem:[%s1376_s7 + $0x94] sm:$0xf] %v271_v37 }
  0x31   : > { %274 = vst [vmem:[%s1376_s7 + $0x98] sm:$0xf] %v273_v38  ;;  %v275_v39 = vld [vmem:[%s1371_s6 + $0x270] sm:$0xf]  ;;  %v277_v40 = vld [vmem:[%s1371_s6 + $0x280] sm:$0xf] }
  0x32   : > { %v279_v41 = vld [vmem:[%s1371_s6 + $0x290] sm:$0xf]  ;;  %276 = vst [vmem:[%s1376_s7 + $0x9c] sm:$0xf] %v275_v39  ;;  %278 = vst [vmem:[%s1376_s7 + $0xa0] sm:$0xf] %v277_v40 }
  0x33   : > { %280 = vst [vmem:[%s1376_s7 + $0xa4] sm:$0xf] %v279_v41  ;;  %v281_v42 = vld [vmem:[%s1371_s6 + $0x2a0] sm:$0xf]  ;;  %v283_v43 = vld [vmem:[%s1371_s6 + $0x2b0] sm:$0xf] }
  0x34   : > { %v285_v44 = vld [vmem:[%s1371_s6 + $0x2c0] sm:$0xf]  ;;  %282 = vst [vmem:[%s1376_s7 + $0xa8] sm:$0xf] %v281_v42  ;;  %284 = vst [vmem:[%s1376_s7 + $0xac] sm:$0xf] %v283_v43 }
  0x35   : > { %286 = vst [vmem:[%s1376_s7 + $0xb0] sm:$0xf] %v285_v44  ;;  %v287_v45 = vld [vmem:[%s1371_s6 + $0x2d0] sm:$0xf]  ;;  %v289_v46 = vld [vmem:[%s1371_s6 + $0x2e0] sm:$0xf] }
  0x36   : > { %v291_v47 = vld [vmem:[%s1371_s6 + $0x2f0] sm:$0xf]  ;;  %288 = vst [vmem:[%s1376_s7 + $0xb4] sm:$0xf] %v287_v45  ;;  %290 = vst [vmem:[%s1376_s7 + $0xb8] sm:$0xf] %v289_v46 }
  0x37   : > { %292 = vst [vmem:[%s1376_s7 + $0xbc] sm:$0xf] %v291_v47  ;;  %v293_v48 = vld [vmem:[%s1371_s6 + $0x300] sm:$0xf]  ;;  %v295_v49 = vld [vmem:[%s1371_s6 + $0x310] sm:$0xf] }
  0x38   : > { %v297_v50 = vld [vmem:[%s1371_s6 + $0x320] sm:$0xf]  ;;  %294 = vst [vmem:[%s1376_s7 + $0xc0] sm:$0xf] %v293_v48  ;;  %296 = vst [vmem:[%s1376_s7 + $0xc4] sm:$0xf] %v295_v49 }
  0x39   : > { %298 = vst [vmem:[%s1376_s7 + $0xc8] sm:$0xf] %v297_v50  ;;  %v299_v51 = vld [vmem:[%s1371_s6 + $0x330] sm:$0xf]  ;;  %v301_v52 = vld [vmem:[%s1371_s6 + $0x340] sm:$0xf] }
  0x3a   : > { %v303_v53 = vld [vmem:[%s1371_s6 + $0x350] sm:$0xf]  ;;  %300 = vst [vmem:[%s1376_s7 + $0xcc] sm:$0xf] %v299_v51  ;;  %302 = vst [vmem:[%s1376_s7 + $0xd0] sm:$0xf] %v301_v52 }
  0x3b   : > { %304 = vst [vmem:[%s1376_s7 + $0xd4] sm:$0xf] %v303_v53  ;;  %v305_v54 = vld [vmem:[%s1371_s6 + $0x360] sm:$0xf]  ;;  %v307_v55 = vld [vmem:[%s1371_s6 + $0x370] sm:$0xf] }
  0x3c   : > { %v309_v56 = vld [vmem:[%s1371_s6 + $0x380] sm:$0xf]  ;;  %306 = vst [vmem:[%s1376_s7 + $0xd8] sm:$0xf] %v305_v54  ;;  %308 = vst [vmem:[%s1376_s7 + $0xdc] sm:$0xf] %v307_v55 }
  0x3d   : > { %310 = vst [vmem:[%s1376_s7 + $0xe0] sm:$0xf] %v309_v56  ;;  %v311_v57 = vld [vmem:[%s1371_s6 + $0x390] sm:$0xf]  ;;  %v313_v58 = vld [vmem:[%s1371_s6 + $0x3a0] sm:$0xf] }
  0x3e   : > { %v315_v59 = vld [vmem:[%s1371_s6 + $0x3b0] sm:$0xf]  ;;  %312 = vst [vmem:[%s1376_s7 + $0xe4] sm:$0xf] %v311_v57  ;;  %314 = vst [vmem:[%s1376_s7 + $0xe8] sm:$0xf] %v313_v58 }
  0x3f   : > { %316 = vst [vmem:[%s1376_s7 + $0xec] sm:$0xf] %v315_v59  ;;  %v317_v60 = vld [vmem:[%s1371_s6 + $0x3c0] sm:$0xf]  ;;  %v319_v61 = vld [vmem:[%s1371_s6 + $0x3d0] sm:$0xf] }
  0x40   : > { %v321_v62 = vld [vmem:[%s1371_s6 + $0x3e0] sm:$0xf]  ;;  %318 = vst [vmem:[%s1376_s7 + $0xf0] sm:$0xf] %v317_v60  ;;  %320 = vst [vmem:[%s1376_s7 + $0xf4] sm:$0xf] %v319_v61 }
  0x41   : > { %322 = vst [vmem:[%s1376_s7 + $0xf8] sm:$0xf] %v321_v62  ;;  %v323_v63 = vld [vmem:[%s1371_s6 + $0x3f0] sm:$0xf] }
  0x42   : > { %324 = vst [vmem:[%s1376_s7 + $0xfc] sm:$0xf] %v323_v63 }
  0x43 PF: > { %p1050_p7 = scmp.ge.s32.totalorder %s1288_s18, 1  ;;  %p480_p8 = scmp.lt.s32.totalorder %s1288_s18, 37 }
  0x45   : > { %p481_p9 = pnand %p1050_p7, %p480_p8 }
  0x46   : > { %s487_s8 = sand.u32 (!%p481_p9), 1, %s1264_s12   ;;  %s1052_s9 = sshll.u32 (!%p481_p9), %s1272_s14, 2 }
  0x47   : > { %484 = sbr.rel (%p481_p9) target bundleno = 357 (0x165), region = 69  ;;  %s1051_s10 = sshll.u32 (!%p481_p9), %s487_s8, 8 }
  0x48   : > { %p528_p10 = scmp.lt.s32.totalorder (!%p481_p9), %s1052_s9, 35  ;;  %p536_p11 = scmp.lt.s32.totalorder (!%p481_p9), %s1276_s15, 3 }
  0x49   : > { %s1526_s4 = scalar_lea.vmem (!%p481_p9), [#allocation3], %s1051_s10  ;;  %p1055_p12 = scmp.ne.s32.totalorder (!%p481_p9), %s1272_s14, 0 }
  0x4e   : > { %s1608_s9 = smov (!%p528_p10, %s1052_s9), 35  ;;  %s1610_s15 = smov (!%p536_p11, %s1276_s15), 3 }
  0x4f   : > { %s1053_s11 = sshll.u32 %s1608_s9, 2  ;;  %s538_s27 = scalar_lea.vmem %s1593_s2, %s1610_s15  ;;  %v1290_v0 = vmov (!%p1055_p12), 0.0  }
  0x50   : > { %s1514_s23 = scalar_lea.vmem %s1591_s0, %s1053_s11  ;;  %s1054_s12 = sshll.u32 %s1610_s15, 2  ;;  %552 = vst [vmem:[#allocation2] sm:$0xff] (!%p1055_p12), %v1290_v0 }
  0x51   : > { %s1524_s30 = scalar_lea.vmem %s1594_s3, %s1054_s12  ;;  %551 = sbr.rel (%p1055_p12) target bundleno = 88 (0x58), region = 77 }
  0x58 PF: > { %v1198_v1 = vld [vmem:[%s1526_s4 + $0x40] sm:$0xff]   ;;  %v1202_v5 = vld [vmem:[%s1526_s4 + $0x48] sm:$0xff]   ;;  %v1206_v9 = vld [vmem:[%s1526_s4 + $0x50] sm:$0xff]   ;;  %p1092_p13 = scmp.ne.s32.totalorder %s1272_s14, 8 }
  0x59   : > { %v1199_v2 = vld [vmem:[%s1526_s4 + $0xc0] sm:$0xff]   ;;  %1097 = vmatprep.subr.bf16.mxu0 %v1198_v1  ;;  %v1203_v6 = vld [vmem:[%s1526_s4 + $0xc8] sm:$0xff]   ;;  %v1207_v10 = vld [vmem:[%s1526_s4 + $0xd0] sm:$0xff]  }
  0x5a   : > { %v1200_v3 = vld [vmem:[%s1526_s4] sm:$0xff]   ;;  %1119 = vmatprep.subr.bf16.mxu1 %v1199_v2  ;;  %v1204_v7 = vld [vmem:[%s1526_s4 + $0x8] sm:$0xff]   ;;  %v1208_v11 = vld [vmem:[%s1526_s4 + $0x10] sm:$0xff]  }
  0x5b   : > { %v1201_v4 = vld [vmem:[%s1526_s4 + $0x80] sm:$0xff]   ;;  %1098 = vmatpush3.bf16.msra.mxu0 %v1200_v3  ;;  %v1205_v8 = vld [vmem:[%s1526_s4 + $0x88] sm:$0xff]   ;;  %v1209_v12 = vld [vmem:[%s1526_s4 + $0x90] sm:$0xff]  }
  0x5c   : > { %1120 = vmatpush3.bf16.msra.mxu1 %v1201_v4  ;;  %1099 = vmatprep.subr.bf16.mxu0 %v1202_v5  ;;  %v1210_v13 = vld [vmem:[%s1526_s4 + $0x58] sm:$0xff]   ;;  %v1214_v17 = vld [vmem:[%s1526_s4 + $0x60] sm:$0xff]   ;;  %v1218_v21 = vld [vmem:[%s1526_s4 + $0x68] sm:$0xff]  }
  0x5d   : > { %1121 = vmatprep.subr.bf16.mxu1 %v1203_v6  ;;  %v1211_v14 = vld [vmem:[%s1526_s4 + $0xd8] sm:$0xff]   ;;  %v1215_v18 = vld [vmem:[%s1526_s4 + $0xe0] sm:$0xff]   ;;  %v1219_v22 = vld [vmem:[%s1526_s4 + $0xe8] sm:$0xff]  }
  0x5e   : > { %v1212_v15 = vld [vmem:[%s1526_s4 + $0x18] sm:$0xff]   ;;  %v1216_v19 = vld [vmem:[%s1526_s4 + $0x20] sm:$0xff]   ;;  %v1220_v23 = vld [vmem:[%s1526_s4 + $0x28] sm:$0xff]  }
  0x5f   : > { %1100 = vmatpush3.bf16.msra.mxu0 %v1204_v7  ;;  %v1213_v16 = vld [vmem:[%s1526_s4 + $0x98] sm:$0xff]   ;;  %v1217_v20 = vld [vmem:[%s1526_s4 + $0xa0] sm:$0xff]   ;;  %v1221_v24 = vld [vmem:[%s1526_s4 + $0xa8] sm:$0xff]  }
  0x60   : > { %1122 = vmatpush3.bf16.msra.mxu1 %v1205_v8  ;;  %1101 = vmatprep.subr.bf16.mxu0 %v1206_v9  ;;  %v1222_v25 = vld [vmem:[%s1526_s4 + $0x70] sm:$0xff]   ;;  %v1226_v29 = vld [vmem:[%s1526_s4 + $0x78] sm:$0xff]   ;;  %v555_v34 = vld [vmem:[%s1514_s23 + $0x8] sm:$0xff] }
  0x61   : > { %1123 = vmatprep.subr.bf16.mxu1 %v1207_v10  ;;  %v1223_v26 = vld [vmem:[%s1526_s4 + $0xf0] sm:$0xff]   ;;  %v1227_v30 = vld [vmem:[%s1526_s4 + $0xf8] sm:$0xff]   ;;  %v1058_v37 = vcombine.low %v555_v34, %v555_v34  ;;  %v1059_v38 = vcombine.high %v555_v34, %v555_v34 }
  0x62   : > { %v1224_v27 = vld [vmem:[%s1526_s4 + $0x30] sm:$0xff]   ;;  %v1228_v31 = vld [vmem:[%s1526_s4 + $0x38] sm:$0xff]  }
  0x63   : > { %1102 = vmatpush3.bf16.msra.mxu0 %v1208_v11  ;;  %v1225_v28 = vld [vmem:[%s1526_s4 + $0xb0] sm:$0xff]   ;;  %v1229_v32 = vld [vmem:[%s1526_s4 + $0xb8] sm:$0xff]   ;;  %898 = vmatprep.mubr.bf16.mxu1 %v1059_v38 }
  0x64   : > { %1124 = vmatpush3.bf16.msra.mxu1 %v1209_v12  ;;  %1103 = vmatprep.subr.bf16.mxu0 %v1210_v13  ;;  %v554_v33 = vld [vmem:[%s1514_s23] sm:$0xff] }
  0x65   : > { %1125 = vmatprep.subr.bf16.mxu1 %v1211_v14  ;;  %v1056_v35 = vcombine.low %v554_v33, %v554_v33  ;;  %v1057_v36 = vcombine.high %v554_v33, %v554_v33  ;;  %v553_v47 = vld [vmem:[#allocation2] sm:$0xff] }
  0x66   : > { %v1093_v53 = vld [vmem:[%s538_s27] ss:$0 sm:$0xff] (!%p1092_p13) }
  0x67   : > { %1104 = vmatpush3.bf16.msra.mxu0 %v1212_v15  ;;  %858 = vmatprep.mubr.bf16.mxu0 %v1057_v36 }
  0x68   : > { %1126 = vmatpush3.bf16.msra.mxu1 %v1213_v16  ;;  %1105 = vmatprep.subr.bf16.mxu0 %v1214_v17 }
  0x69   : > { %1127 = vmatprep.subr.bf16.mxu1 %v1215_v18 }
  0x6b   : > { %1106 = vmatpush3.bf16.msra.mxu0 %v1216_v19 }
  0x6c   : > { %1128 = vmatpush3.bf16.msra.mxu1 %v1217_v20  ;;  %1107 = vmatprep.subr.bf16.mxu0 %v1218_v21 }
  0x6d   : > { %1129 = vmatprep.subr.bf16.mxu1 %v1219_v22 }
  0x6f   : > { %1108 = vmatpush3.bf16.msra.mxu0 %v1220_v23 }
  0x70   : > { %1130 = vmatpush3.bf16.msra.mxu1 %v1221_v24  ;;  %1109 = vmatprep.subr.bf16.mxu0 %v1222_v25 }
  0x71   : > { %1131 = vmatprep.subr.bf16.mxu1 %v1223_v26 }
  0x73   : > { %1110 = vmatpush3.bf16.msra.mxu0 %v1224_v27 }
  0x74   : > { %1132 = vmatpush3.bf16.msra.mxu1 %v1225_v28  ;;  %1111 = vmatprep.subr.bf16.mxu0 %v1226_v29 }
  0x75   : > { %1133 = vmatprep.subr.bf16.mxu1 %v1227_v30 }
  0x77   : > { %1112 = vmatpush3.bf16.msra.mxu0 %v1228_v31 }
  0x78   : > { %1134 = vmatpush3.bf16.msra.mxu1 %v1229_v32 }
  0x7a   : > { %859 = vmatmul.mubr.bf16.vlgmr.msra.gmra.mrb[0].mxu0 %v1056_v35 }
  0x7b   : > { %899 = vmatmul.mubr.bf16.vlgmr.msra.gmra.mrb[0].mxu1 %v1058_v37 }
 0x14d   : > { %v1113_v39 = vpop.f32.mrb[0].mxu0 }
 0x14e   : > { %v1135_v40 = vpop.f32.mrb[0].mxu1  ;;  %v1114_v41 = vpop.f32.mrb[1].mxu0 }
 0x14f   : > { %v1136_v42 = vpop.f32.mrb[1].mxu1  ;;  %v1115_v43 = vadd.f32 %v1114_v41, %v1113_v39  ;;  %v1116_v45 = vpop.f32.mrb[2].mxu0 }
 0x150   : > { %v1137_v44 = vadd.f32 %v1136_v42, %v1135_v40  ;;  %v1138_v46 = vpop.f32.mrb[2].mxu1  ;;  %v1117_v48 = vpop.f32.mrb[3].mxu0  ;;  %911 = sbr.rel (%p1092_p13) target bundleno = 357 (0x165), region = 81 }
 0x151   : > { %v1139_v49 = vpop.f32.mrb[3].mxu1 }
 0x152   : > { %v901_v50 = vadd.f32 %v1137_v44, %v1115_v43 }
 0x154   : > { %v906_v51 = vadd.f32 %v901_v50, %v553_v47 }
 0x156   : > { %907 = vst [vmem:[#allocation2] sm:$0xff] %v906_v51 }
 0x15d   : > { %v912_v52 = vld [vmem:[#allocation2] sm:$0xff] }
 0x15e   : > { %v920_v54 = vadd.f32 %v1093_v53, %v912_v52 }
 0x160   : > { %v921_v55 = vmax.f32 %v920_v54, 0.0 }
 0x162   : > { %v922_v56 = vpack.c.bf16 %v921_v55, %v921_v55 }
 0x164   : > { %923 = vst [vmem:[%s1524_s30] sm:$0xf] %v922_v56 }
 0x165 PF: > { %s13_s18 = sadd.s32 1, %s1288_s18   ;;  %s1595_s12 = smov %s1268_s13 }
 0x166   : > { %p10_p0 = scmp.ge.s32.totalorder %s13_s18, 38   ;;  %s1596_s13 = smov %s1362_s25 }
 0x167   : > { %s1597_s14 = smov %s1280_s16  ;;  %s1598_s15 = smov %s1284_s17 }
 0x168   : > { %s1599_s16 = smov %s1602_s19  ;;  %s1600_s17 = smov %s1606_s20 }
 0x169   :  { %12 = sbr.rel (!%p10_p0) target bundleno = 4 (0x4), region = 122 }

// kernel: my_resnet_forward.43
= control target key start
LH: loop header
LB: loop body
LE: loop exit
PB: predicated region body
PF: predicated region fallthrough
CT: control target
= control target key end

     0   :  { %vm40_vm0 = vcmask 1043456   ;;  %v797_v38 = vmov 0.0   ;;  %s995_s0 = inlined_call_operand.vmem [shape: bf16[2,4,512], index: 0, kind: input, shape index: {}]   ;;  %s996_s1 = inlined_call_operand.vmem [shape: bf16[512,128], index: 1, kind: input, shape index: {}]   ;;  %s997_s2 = inlined_call_operand.vmem [shape: f32[1,128], index: 2, kind: input, shape index: {}]   ;;  %s998_s3 = inlined_call_operand.vmem [shape: bf16[128,10], index: 3, kind: input, shape index: {}]   ;;  %s999_s4 = inlined_call_operand.vmem [shape: f32[1,10], index: 4, kind: input, shape index: {}]   ;;  %s1000_s5 = inlined_call_operand.hbm [shape: f32[2,10], index: 5, kind: output, shape index: {}]  }
   0x1   :  { %v733_v0 = vld [vmem:[%s996_s1 + $0x40] sm:$0xff]   ;;  %v737_v4 = vld [vmem:[%s996_s1 + $0x48] sm:$0xff]   ;;  %v741_v8 = vld [vmem:[%s996_s1 + $0x50] sm:$0xff]  }
   0x2   :  { %v734_v1 = vld [vmem:[%s996_s1 + $0xc0] sm:$0xff]   ;;  %657 = vmatprep.subr.bf16.mxu0 %v733_v0  ;;  %v738_v5 = vld [vmem:[%s996_s1 + $0xc8] sm:$0xff]   ;;  %v742_v9 = vld [vmem:[%s996_s1 + $0xd0] sm:$0xff]  }
   0x3   :  { %v735_v2 = vld [vmem:[%s996_s1] sm:$0xff]   ;;  %679 = vmatprep.subr.bf16.mxu1 %v734_v1  ;;  %v739_v6 = vld [vmem:[%s996_s1 + $0x8] sm:$0xff]   ;;  %v743_v10 = vld [vmem:[%s996_s1 + $0x10] sm:$0xff]  }
   0x4   :  { %v736_v3 = vld [vmem:[%s996_s1 + $0x80] sm:$0xff]   ;;  %658 = vmatpush3.bf16.msra.mxu0 %v735_v2  ;;  %v740_v7 = vld [vmem:[%s996_s1 + $0x88] sm:$0xff]   ;;  %v744_v11 = vld [vmem:[%s996_s1 + $0x90] sm:$0xff]  }
   0x5   :  { %680 = vmatpush3.bf16.msra.mxu1 %v736_v3  ;;  %659 = vmatprep.subr.bf16.mxu0 %v737_v4  ;;  %v745_v12 = vld [vmem:[%s996_s1 + $0x58] sm:$0xff]   ;;  %v749_v16 = vld [vmem:[%s996_s1 + $0x60] sm:$0xff]   ;;  %v753_v20 = vld [vmem:[%s996_s1 + $0x68] sm:$0xff]  }
   0x6   :  { %681 = vmatprep.subr.bf16.mxu1 %v738_v5  ;;  %v746_v13 = vld [vmem:[%s996_s1 + $0xd8] sm:$0xff]   ;;  %v750_v17 = vld [vmem:[%s996_s1 + $0xe0] sm:$0xff]   ;;  %v754_v21 = vld [vmem:[%s996_s1 + $0xe8] sm:$0xff]  }
   0x7   :  { %v747_v14 = vld [vmem:[%s996_s1 + $0x18] sm:$0xff]   ;;  %v751_v18 = vld [vmem:[%s996_s1 + $0x20] sm:$0xff]   ;;  %v755_v22 = vld [vmem:[%s996_s1 + $0x28] sm:$0xff]  }
   0x8   :  { %660 = vmatpush3.bf16.msra.mxu0 %v739_v6  ;;  %v748_v15 = vld [vmem:[%s996_s1 + $0x98] sm:$0xff]   ;;  %v752_v19 = vld [vmem:[%s996_s1 + $0xa0] sm:$0xff]   ;;  %v756_v23 = vld [vmem:[%s996_s1 + $0xa8] sm:$0xff]  }
   0x9   :  { %682 = vmatpush3.bf16.msra.mxu1 %v740_v7  ;;  %661 = vmatprep.subr.bf16.mxu0 %v741_v8  ;;  %v757_v24 = vld [vmem:[%s996_s1 + $0x70] sm:$0xff]   ;;  %v761_v28 = vld [vmem:[%s996_s1 + $0x78] sm:$0xff]   ;;  %v22_v32 = vld [vmem:[%s995_s0] sm:$0xff] }
   0xa   :  { %683 = vmatprep.subr.bf16.mxu1 %v742_v9  ;;  %v758_v25 = vld [vmem:[%s996_s1 + $0xf0] sm:$0xff]   ;;  %v762_v29 = vld [vmem:[%s996_s1 + $0xf8] sm:$0xff]   ;;  %v23_v33 = vld [vmem:[%s995_s0 + $0x8] sm:$0xff]  ;;  %v24_v34 = vunpack.c.l.bf16 %v22_v32  ;;  %v25_v36 = vunpack.c.h.bf16 %v22_v32 }
   0xb   :  { %v759_v26 = vld [vmem:[%s996_s1 + $0x30] sm:$0xff]   ;;  %v763_v30 = vld [vmem:[%s996_s1 + $0x38] sm:$0xff]   ;;  %v26_v35 = vunpack.c.l.bf16 %v23_v33  ;;  %v27_v37 = vunpack.c.h.bf16 %v23_v33 }
   0xc   :  { %662 = vmatpush3.bf16.msra.mxu0 %v743_v10  ;;  %v760_v27 = vld [vmem:[%s996_s1 + $0xb0] sm:$0xff]   ;;  %v764_v31 = vld [vmem:[%s996_s1 + $0xb8] sm:$0xff]   ;;  %v32_v39 = vcombine.high %v24_v34, %v24_v34  ;;  %v33_v41 = vcombine.high %v25_v36, %v25_v36  ;;  %v41_v43 = vsel %vm40_vm0, %v24_v34, 0.0  ;;  %v55_v45 = vsel %vm40_vm0, %v25_v36, 0.0 }
   0xd   :  { %684 = vmatpush3.bf16.msra.mxu1 %v744_v11  ;;  %663 = vmatprep.subr.bf16.mxu0 %v745_v12  ;;  %v34_v40 = vcombine.high %v26_v35, %v26_v35  ;;  %v35_v42 = vcombine.high %v27_v37, %v27_v37  ;;  %v69_v44 = vsel %vm40_vm0, %v26_v35, 0.0  ;;  %v83_v46 = vsel %vm40_vm0, %v27_v37, 0.0 }
   0xe   :  { %685 = vmatprep.subr.bf16.mxu1 %v746_v13  ;;  %v48_v47 = vsel %vm40_vm0, %v32_v39, 0.0  ;;  %v62_v49 = vsel %vm40_vm0, %v33_v41, 0.0  ;;  %v42_v55 = vrot.slane %v41_v43, 4  ;;  %v70_v56 = vrot.slane %v69_v44, 4 }
   0xf   :  { %v76_v48 = vsel %vm40_vm0, %v34_v40, 0.0  ;;  %v90_v50 = vsel %vm40_vm0, %v35_v42, 0.0  ;;  %v49_v51 = vrot.slane %v48_v47, 4  ;;  %v63_v53 = vrot.slane %v62_v49, 4 }
  0x10   :  { %664 = vmatpush3.bf16.msra.mxu0 %v747_v14  ;;  %v77_v52 = vrot.slane %v76_v48, 4  ;;  %v91_v54 = vrot.slane %v90_v50, 4  ;;  %v56_v57 = vrot.slane %v55_v45, 4  ;;  %v84_v58 = vrot.slane %v83_v46, 4 }
  0x11   :  { %686 = vmatpush3.bf16.msra.mxu1 %v748_v15  ;;  %665 = vmatprep.subr.bf16.mxu0 %v749_v16  ;;  %v50_v59 = vadd.f32 %v49_v51, %v48_v47  ;;  %v64_v61 = vadd.f32 %v63_v53, %v62_v49  ;;  %v43_v63 = vadd.f32 %v42_v55, %v41_v43 }
  0x12   :  { %687 = vmatprep.subr.bf16.mxu1 %v750_v17  ;;  %v78_v60 = vadd.f32 %v77_v52, %v76_v48  ;;  %v92_v62 = vadd.f32 %v91_v54, %v90_v50  ;;  %v71_v0 = vadd.f32 %v70_v56, %v69_v44  ;;  %v57_v1 = vadd.f32 %v56_v57, %v55_v45 }
  0x13   :  { %v85_v2 = vadd.f32 %v84_v58, %v83_v46  ;;  %v51_v3 = vrot.slane %v50_v59, 2  ;;  %v65_v5 = vrot.slane %v64_v61, 2 }
  0x14   :  { %666 = vmatpush3.bf16.msra.mxu0 %v751_v18  ;;  %v79_v4 = vrot.slane %v78_v60, 2  ;;  %v93_v6 = vrot.slane %v92_v62, 2 }
  0x15   :  { %688 = vmatpush3.bf16.msra.mxu1 %v752_v19  ;;  %667 = vmatprep.subr.bf16.mxu0 %v753_v20 }
  0x16   :  { %689 = vmatprep.subr.bf16.mxu1 %v754_v21 }
  0x18   :  { %668 = vmatpush3.bf16.msra.mxu0 %v755_v22 }
  0x19   :  { %690 = vmatpush3.bf16.msra.mxu1 %v756_v23  ;;  %669 = vmatprep.subr.bf16.mxu0 %v757_v24 }
  0x1a   :  { %691 = vmatprep.subr.bf16.mxu1 %v758_v25 }
  0x1c   :  { %670 = vmatpush3.bf16.msra.mxu0 %v759_v26 }
  0x1d   :  { %692 = vmatpush3.bf16.msra.mxu1 %v760_v27  ;;  %671 = vmatprep.subr.bf16.mxu0 %v761_v28 }
  0x1e   :  { %693 = vmatprep.subr.bf16.mxu1 %v762_v29 }
  0x20   :  { %672 = vmatpush3.bf16.msra.mxu0 %v763_v30 }
  0x21   :  { %694 = vmatpush3.bf16.msra.mxu1 %v764_v31  ;;  %710 = vmatprep.subr.bf16.mxu0 %v797_v38 }
  0x22   :  { %10 = vsyncpa [#allocation3], 0  ;;  %v44_v7 = vrot.slane %v43_v63, 2  ;;  %v72_v8 = vrot.slane %v71_v0, 2  ;;  %v58_v9 = vrot.slane %v57_v1, 2  ;;  %v86_v10 = vrot.slane %v85_v2, 2 }
  0x23   :  { %v52_v11 = vadd.f32 %v51_v3, %v50_v59  ;;  %v80_v12 = vadd.f32 %v79_v4, %v78_v60  ;;  %v66_v13 = vadd.f32 %v65_v5, %v64_v61  ;;  %v94_v14 = vadd.f32 %v93_v6, %v92_v62  ;;  %v766_v5 = vld [vmem:[%s998_s3 + $0x8] sm:$0xff]   ;;  %v767_v6 = vld [vmem:[%s998_s3 + $0x10] sm:$0xff]   ;;  %s799_s28 = smov [#allocation2]  }
  0x24   :  { %vm201_vm1 = vcmask 1041409   ;;  %v45_v15 = vadd.f32 %v44_v7, %v43_v63  ;;  %v73_v16 = vadd.f32 %v72_v8, %v71_v0  ;;  %v59_v17 = vadd.f32 %v58_v9, %v57_v1  ;;  %v768_v7 = vld [vmem:[%s998_s3 + $0x18] sm:$0xff]   ;;  %v769_v8 = vld [vmem:[%s998_s3 + $0x20] sm:$0xff]   ;;  %v770_v9 = vld [vmem:[%s998_s3 + $0x28] sm:$0xff]   ;;  %s607_s29 = sshll.u32 %s799_s28, 4  ;;  %s608_s29 = int_to_ptr.vmem [resolvable:$true] %s607_s29 }
  0x25   :  { %v87_v18 = vadd.f32 %v86_v10, %v85_v2  ;;  %v53_v19 = vrot.slane %v52_v11, 1  ;;  %v81_v20 = vrot.slane %v80_v12, 1  ;;  %v67_v21 = vrot.slane %v66_v13, 1  ;;  %v765_v2 = vld [vmem:[%s998_s3] sm:$0xff]   ;;  %v771_v10 = vld [vmem:[%s998_s3 + $0x30] sm:$0xff]   ;;  %p778_p1 = scmp.lt.s32.totalorder %s608_s29, %s608_s29 }
  0x26   :  { %v95_v22 = vrot.slane %v94_v14, 1  ;;  %v46_v23 = vrot.slane %v45_v15, 1  ;;  %v74_v24 = vrot.slane %v73_v16, 1  ;;  %v60_v25 = vrot.slane %v59_v17, 1 }
  0x27   :  { %v88_v26 = vrot.slane %v87_v18, 1  ;;  %v54_v27 = vadd.f32 %v53_v19, %v52_v11  ;;  %v82_v28 = vadd.f32 %v81_v20, %v80_v12  ;;  %v68_v29 = vadd.f32 %v67_v21, %v66_v13  ;;  %v772_v11 = vld [vmem:[%s998_s3 + $0x38] sm:$0xff]  }
  0x28   :  { %v96_v30 = vadd.f32 %v95_v22, %v94_v14  ;;  %v47_v31 = vadd.f32 %v46_v23, %v45_v15  ;;  %v75_v32 = vadd.f32 %v74_v24, %v73_v16  ;;  %v61_v33 = vadd.f32 %v60_v25, %v59_v17  ;;  %v615_v14 = vld [vmem:[%s997_s2] ss:$0 sm:$0xff]  ;;  %s773_s2 = scalar_lea.vmem %s608_s29, 32 }
  0x29   :  { %v89_v34 = vadd.f32 %v88_v26, %v87_v18  ;;  %v99_v35 = vmul.f32 0.25, %v54_v27  ;;  %v103_v36 = vmul.f32 0.25, %v82_v28  ;;  %v101_v37 = vmul.f32 0.25, %v68_v29  ;;  %p774_p0 = scmp.ne.s32.totalorder %s608_s29, %s773_s2  ;;  %p779_p2 = scmp.lt.s32.totalorder %s773_s2, %s773_s2 }
  0x2a   :  { %v105_v39 = vmul.f32 0.25, %v96_v30  ;;  %v98_v40 = vmul.f32 0.25, %v47_v31  ;;  %v102_v41 = vmul.f32 0.25, %v75_v32  ;;  %v100_v42 = vmul.f32 0.25, %v61_v33 }
  0x2b   :  { %v104_v43 = vmul.f32 0.25, %v89_v34  ;;  %v107_v44 = vpack.c.bf16 %v99_v35, %v99_v35  ;;  %v111_v45 = vpack.c.bf16 %v103_v36, %v103_v36  ;;  %v109_v46 = vpack.c.bf16 %v101_v37, %v101_v37  ;;  %p780_p3 = por %p779_p2, %p778_p1 }
  0x2c   :  { %v113_v47 = vpack.c.bf16 %v105_v39, %v105_v39  ;;  %v106_v48 = vpack.c.bf16 %v98_v40, %v98_v40  ;;  %v110_v49 = vpack.c.bf16 %v102_v41, %v102_v41  ;;  %v108_v50 = vpack.c.bf16 %v100_v42, %v100_v42 }
  0x2d   :  { %v112_v51 = vpack.c.bf16 %v104_v43, %v104_v43  ;;  %v194_v52 = vunpack.c.l.b16 %v107_v44  ;;  %v198_v53 = vunpack.c.l.b16 %v111_v45  ;;  %v196_v54 = vunpack.c.l.b16 %v109_v46  ;;  %p781_p4 = pnand %p780_p3, %p774_p0 }
  0x2e   :  { %v200_v55 = vunpack.c.l.b16 %v113_v47  ;;  %v193_v56 = vunpack.c.l.b16 %v106_v48  ;;  %v197_v57 = vunpack.c.l.b16 %v110_v49  ;;  %v195_v58 = vunpack.c.l.b16 %v108_v50 }
  0x2f   :  { %v199_v59 = vunpack.c.l.b16 %v112_v51  ;;  %v203_v60 = vsel %vm201_vm1, %v198_v53, %v194_v52  ;;  %vm798_vm2 = vmmov 0   ;;  %vm599_vm3 = vcmask 74752  }
  0x30   :  { %v205_v61 = vsel %vm201_vm1, %v200_v55, %v196_v54  ;;  %v207_v62 = vpack.c.b16 %v203_v60, %v203_v60  ;;  %v202_v0 = vsel %vm201_vm1, %v197_v57, %v193_v56 }
  0x31   :  { %v209_v63 = vpack.c.b16 %v205_v61, %v205_v61  ;;  %v204_v1 = vsel %vm201_vm1, %v199_v59, %v195_v58  ;;  %v206_v3 = vpack.c.b16 %v202_v0, %v202_v0 }
  0x32   :  { %v208_v4 = vpack.c.b16 %v204_v1, %v204_v1  ;;  %438 = vmatprep.mubr.bf16.mxu0 %v207_v62 }
  0x33   :  { %478 = vmatprep.mubr.bf16.mxu1 %v209_v63  ;;  %439 = vmatmul.mubr.bf16.vlgmr.msra.gmra.mrb[0].mxu0 %v206_v3 }
  0x34   :  { %479 = vmatmul.mubr.bf16.vlgmr.msra.gmra.mrb[0].mxu1 %v208_v4  ;;  %711 = vmatpush3.bf16.msra.mxu0 %v765_v2 }
  0x35   :  { %712 = vmatprep.subr.bf16.mxu0 %v797_v38  ;;  %726 = vmatprep.mubr.msk.bf16.mxu0 %vm798_vm2, %v797_v38 }
  0x38   :  { %713 = vmatpush3.bf16.msra.mxu0 %v766_v5 }
  0x39   :  { %714 = vmatprep.subr.bf16.mxu0 %v797_v38 }
  0x3c   :  { %715 = vmatpush3.bf16.msra.mxu0 %v767_v6 }
  0x3d   :  { %716 = vmatprep.subr.bf16.mxu0 %v797_v38 }
  0x40   :  { %717 = vmatpush3.bf16.msra.mxu0 %v768_v7 }
  0x41   :  { %718 = vmatprep.subr.bf16.mxu0 %v797_v38 }
  0x44   :  { %719 = vmatpush3.bf16.msra.mxu0 %v769_v8 }
  0x45   :  { %720 = vmatprep.subr.bf16.mxu0 %v797_v38 }
  0x48   :  { %721 = vmatpush3.bf16.msra.mxu0 %v770_v9 }
  0x49   :  { %722 = vmatprep.subr.bf16.mxu0 %v797_v38 }
  0x4c   :  { %723 = vmatpush3.bf16.msra.mxu0 %v771_v10 }
  0x4d   :  { %724 = vmatprep.subr.bf16.mxu0 %v797_v38  ;;  %v648_v38 = vld [vmem:[%s999_s4] ss:$0 sm:$0xff] }
  0x50   :  { %725 = vmatpush3.bf16.msra.mxu0 %v772_v11 }
 0x106   :  { %v673_v12 = vpop.f32.mrb[0].mxu0 }
 0x107   :  { %v695_v13 = vpop.f32.mrb[0].mxu1  ;;  %v674_v15 = vpop.f32.mrb[1].mxu0 }
 0x108   :  { %v696_v16 = vpop.f32.mrb[1].mxu1  ;;  %v675_v17 = vadd.f32 %v674_v15, %v673_v12  ;;  %v676_v19 = vpop.f32.mrb[2].mxu0 }
 0x109   :  { %v697_v18 = vadd.f32 %v696_v16, %v695_v13  ;;  %v698_v20 = vpop.f32.mrb[2].mxu1  ;;  %v677_v21 = vpop.f32.mrb[3].mxu0 }
 0x10a   :  { %v699_v22 = vpop.f32.mrb[3].mxu1  ;;  %v441_v23 = vadd.f32 %v675_v17, %v615_v14 }
 0x10c   :  { %v481_v24 = vadd.f32 %v697_v18, %v441_v23 }
 0x10e   :  { %v486_v25 = vmax.f32 %v481_v24, 0.0 }
 0x110   :  { %v487_v26 = vpack.c.bf16 %v486_v25, %v486_v25 }
 0x112   :  { %727 = vmatmul.mubr.bf16.vlgmr.msra.gmra.mrb[4].mxu0 %v487_v26 }
 0x1e5   :  { %v593_v27 = vpop.f32.mrb[4].mxu0 }
 0x1e6   :  { %v594_v28 = vadd.f32 %v648_v38, %v593_v27  ;;  %v728_v29 = vpop.f32.mrb[5].mxu0 }
 0x1e7   :  { %v596_v30 = vpop.f32.mrb[6].mxu0 }
 0x1e8   :  { %v729_v31 = vpop.f32.mrb[7].mxu0  ;;  %600 = vst.msk [vmem:[#allocation2] sm:$0x3] %vm599_vm3, %v594_v28 }
 0x1e9   :  { %784 = shalt.err (!%p781_p4)
}
 0x1ea   :  { %s785_s4 = scalar_lea.hbm %s1000_s5, 32 }
 0x1eb   :  { %p786_p5 = scmp.ne.s32.totalorder %s1000_s5, %s785_s4  ;;  %p789_p6 = scmp.lt.u32.totalorder %s785_s4, %s1000_s5 }
 0x1ed   :  { %p791_p7 = pnand %p789_p6, %p786_p5 }
 0x1ef   :  { %794 = shalt.err (!%p791_p7)
}
 0x1f0   :  { %610 = dma.vmem_to_hbm [thread:$0]  %s608_s29, 32, %s1000_s5, [#allocation3]  }
 0x1f1   :  { %795 = dma.done.wait [#allocation3], 32  }
 0x1f2   :  { %796 = vsyncadd [#allocation3], 4294967264 }
 0x1f3   :  { %614 = vsyncpa [#allocation3], 1 }

</bundles_post_ra>
